<compile_context>
chip_gen: v7x
topology: tpu7x:2x2x1
jax: 0.10.0
libtpu: 0.0.40
codegen_flags: <defaults>
</compile_context>

<pallas_src>
import math

import numpy as np
import jax
import jax.numpy as jnp
from jax.experimental import pallas as pl
from jax.experimental.pallas import tpu as pltpu


# ----------------------------------------------------------------------------
# In-kernel math helpers
# ----------------------------------------------------------------------------

def _erf(z):
    # Abramowitz & Stegun 7.1.26 (|err| < 1.5e-7); exact-GELU semantics in f32.
    a1, a2, a3, a4, a5 = (0.254829592, -0.284496736, 1.421413741,
                          -1.453152027, 1.061405429)
    p = 0.3275911
    sgn = jnp.where(z >= 0.0, 1.0, -1.0)
    za = jnp.abs(z)
    t = 1.0 / (1.0 + p * za)
    poly = t * (a1 + t * (a2 + t * (a3 + t * (a4 + t * a5))))
    return sgn * (1.0 - poly * jnp.exp(-za * za))


def _gelu(x):
    return 0.5 * x * (1.0 + _erf(x * (1.0 / math.sqrt(2.0))))


def _layernorm(x, eps=1e-5):
    mu = jnp.mean(x, axis=-1, keepdims=True)
    var = jnp.mean((x - mu) ** 2, axis=-1, keepdims=True)
    return (x - mu) * jax.lax.rsqrt(var + eps)


# ----------------------------------------------------------------------------
# The single fused kernel
# ----------------------------------------------------------------------------

_ARG_NAMES = (
    "rrep", "wct", "staps",
    "wcat1", "bc1", "wcat2", "bc2", "wcat3", "bc3",
    "wrtm", "eye_n", "lrows", "rcols", "pdata",
    "wpack", "wo", "w1", "b1", "w2", "b2",
    "pj0", "pj1", "dsum", "dexp",
    "rsel", "pzrow", "pblk",
    "lcr", "rcr",
    "hs", "md1", "bd1", "md2", "bd2",
    "prow", "pcol", "selph", "fcw", "fcb",
)


def _eegformer_kernel(
        xmat_ref, rrep_ref, wct_ref, staps_ref,
        wcat1_ref, bc1_ref, wcat2_ref, bc2_ref, wcat3_ref, bc3_ref,
        wrtm_ref, eye_ref, lrows_ref, rcols_ref, pdata_ref,
        wpack_ref, wo_ref, w1_ref, b1_ref, w2_ref, b2_ref,
        pj0_ref, pj1_ref, dsum_ref, dexp_ref,
        rsel_ref, pzrow_ref, pblk_ref,
        lcr_ref, rcr_ref,
        hs_ref, md1_ref, bd1_ref, md2_ref, bd2_ref,
        prow_ref, pcol_ref, selph_ref, fcw_ref, fcb_ref,
        out_ref):
    f32 = jnp.float32

    def dot(a, b):
        return jnp.dot(a, b, preferred_element_type=f32)

    n_sp = staps_ref.shape[1]            # B*H*W = 36 spatial rows
    t_len = xmat_ref.shape[1]            # T = 6

    # ---- wavelet: |CWT| as a precomputed linear operator --------------------
    # TODO(synk): pywt.cwt('morl') has no Pallas equivalent; it is linear in the
    # data, so it is applied here as a host-precomputed [rows, T] operator.
    xrep = dot(rrep_ref[...], xmat_ref[...])                            # [36, T]
    a0 = jnp.abs(dot(xrep * wct_ref[...], jnp.ones((t_len, 1), f32)))   # [36, 1]

    # ---- ODCM: 3x (3x3 conv, pad 1, ReLU); rows=(b,h,w), cols=channels -------
    def conv_sp(act, wcat_ref, bias_ref):
        cout = bias_ref.shape[1]
        aw = dot(act, wcat_ref[...])                 # [36, 9*cout] (all taps at once)
        acc = jnp.zeros((n_sp, cout), f32)
        for k in range(9):                           # spatial shift per tap
            acc = acc + dot(staps_ref[k], aw[:, k * cout:(k + 1) * cout])
        return jnp.maximum(acc + bias_ref[...], 0.0)

    h1 = conv_sp(a0, wcat1_ref, bc1_ref)             # [36, 32]
    h2 = conv_sp(h1, wcat2_ref, bc2_ref)             # [36, 64]
    h3 = conv_sp(h2, wcat3_ref, bc3_ref)             # [36, 128]

    # ---- RTM token reduction -> savespace [12, W] (rows = (b, i, j)) ---------
    # TODO(synk): reference draws torch.randn weights every forward; a fixed
    # deterministic parameter of the same shape is used instead.
    prod = h3 * wrtm_ref[...]                                           # [36, 128]
    rsum = dot(prod, jnp.ones((prod.shape[1], 1), f32))                 # [36, 1]
    sv_data = dot(dot(lrows_ref[...], rsum * eye_ref[...]), rcols_ref[...])  # [6, W]
    sv = dot(pdata_ref[...], sv_data)                                   # [12, W]

    # ---- transformer blocks; savespace never leaves the chip ----------------
    # Reference-forced structural sizes: B == 3, savespace dim1 == 2, H == 2,
    # num_heads == 2 (asserted host-side).
    w_emb = sv.shape[1]
    nh = dsum_ref.shape[1] // 3
    dh = w_emb // nh
    scale = 1.0 / math.sqrt(float(w_emb))
    nblocks = wpack_ref.shape[0]

    for t in range(nblocks):
        svn = _layernorm(sv)                                            # [12, W]
        qkv = dot(svn, wpack_ref[t])                                    # [12, 3*nh*dh]
        q = qkv[0:4, :]          # q/k/v from batch rows 0/1/2 (reference quirk)
        k = qkv[4:8, :]
        v = qkv[8:12, :]
        k0 = dot(pj0_ref[...], k)
        k1 = dot(pj1_ref[...], k)
        v0 = dot(pj0_ref[...], v)
        v1 = dot(pj1_ref[...], v)
        s0 = dot(q * k0, dsum_ref[...]) * scale                         # [4, 3*nh]
        s1 = dot(q * k1, dsum_ref[...]) * scale
        mx = jnp.maximum(s0, s1)
        e0 = jnp.exp(s0 - mx)
        e1 = jnp.exp(s1 - mx)
        inv = 1.0 / (e0 + e1)
        p0 = e0 * inv
        p1 = e1 * inv
        ctx = dot(p0, dexp_ref[...]) * v0 + dot(p1, dexp_ref[...]) * v1  # [4, 3*nh*dh]

        wo_t = wo_ref[t]
        w1_t = w1_ref[t]
        b1_t = b1_ref[t]
        w2_t = w2_ref[t]
        b2_t = b2_ref[t]

        sv_new = jnp.zeros((sv.shape[0], w_emb), f32)
        for a in range(3):
            sv_a = sv[a * 4:(a + 1) * 4, :]                             # [4, W]
            z_acc = jnp.zeros((4, w_emb), f32)
            for hd in range(nh):
                c0 = a * w_emb + hd * dh
                ctx_s = ctx[:, c0:c0 + dh]                              # [4, dh]
                # merge (i, d) with d fastest -> rows j, cols W
                blk = jnp.concatenate([ctx_s[0:2, :], ctx_s[2:4, :]], axis=-1)
                proj = dot(blk, wo_t)                                   # [2, W]
                res = dot(rsel_ref[hd], sv_a)       # positional residual rows
                z = _layernorm(proj + res)                              # [2, W]
                z_acc = z_acc + dot(pzrow_ref[hd], z)                   # place rows
            hid = _gelu(dot(z_acc, w1_t) + b1_t)
            out_a = z_acc + dot(hid, w2_t) + b2_t                       # [4, W]
            sv_new = sv_new + dot(pblk_ref[a], out_a)
        sv = sv_new                                                     # next block

    # ---- CNN decoder ---------------------------------------------------------
    # re-layout savespace [b, c(=i), h, w] -> rows (b, h), cols (c, w)
    d0 = (dot(dot(lcr_ref[0], sv), rcr_ref[0]) +
          dot(dot(lcr_ref[1], sv), rcr_ref[1]))                         # [6, 2*W]

    def conv_dec(act, md_ref, bd_ref):
        acc = jnp.zeros((act.shape[0], bd_ref.shape[1]), f32)
        for kh in range(3):
            acc = acc + dot(dot(hs_ref[kh], act), md_ref[kh])
        return jnp.maximum(acc + bd_ref[...], 0.0)

    g1 = conv_dec(d0, md1_ref, bd1_ref)                                 # [6, 32*W]
    g2 = conv_dec(g1, md2_ref, bd2_ref)                                 # [6, 64*W]

    pooled = dot(dot(prow_ref[...], g2), pcol_ref[...])                 # [6, 64*OW]

    # TODO(synk): nn.Dropout(0.2) before the fc is eval-mode identity here.
    logits = jnp.zeros((out_ref.shape[0], out_ref.shape[1]), f32)
    for ph in range(selph_ref.shape[0]):
        logits = logits + dot(dot(selph_ref[ph], pooled), fcw_ref[ph])
    logits = logits + fcb_ref[...]

    mx = jnp.max(logits, axis=-1, keepdims=True)
    ex = jnp.exp(logits - mx)
    out_ref[...] = ex / jnp.sum(ex, axis=-1, keepdims=True)


# ----------------------------------------------------------------------------
# Host-side precomputation (done once at init; no per-call XLA glue)
# ----------------------------------------------------------------------------

def _morlet_cwt_matrices(T, scales, precision=10):
    # pywt.cwt(data, scales, 'morl') reproduced as a [S, T, T] linear operator.
    x = np.linspace(-8.0, 8.0, 2 ** precision)
    psi = np.exp(-x ** 2 / 2.0) * np.cos(5.0 * x)
    step = x[1] - x[0]
    int_psi = np.cumsum(psi) * step
    eye = np.eye(T)
    mats = []
    for scale in scales:
        j = np.arange(scale * (x[-1] - x[0]) + 1) / (scale * step)
        j = j.astype(int)
        j = j[j < int_psi.size]
        filt = int_psi[j][::-1]
        rows = []
        for t in range(T):
            conv = np.convolve(eye[t], filt)
            coef = -np.sqrt(scale) * np.diff(conv)
            d = (coef.shape[-1] - T) / 2.0
            if d > 0:
                coef = coef[int(np.floor(d)): -int(np.ceil(d))]
            rows.append(coef)
        mats.append(np.stack(rows, axis=1))          # [out_t, in_t]
    return np.stack(mats, axis=0).astype(np.float32)  # [S, T, T]


def _adaptive_avgpool_matrix(in_size, out_size):
    P = np.zeros((out_size, in_size), np.float32)
    for i in range(out_size):
        s = (i * in_size) // out_size
        e = -((-(i + 1) * in_size) // out_size)
        P[i, s:e] = 1.0 / (e - s)
    return P


def init_params(key, *, B, T, num_cls, input_channels, num_blocks,
                num_heads, CF_second, m_dec):
    S = min(128, T // 2) - 1
    scales = list(range(1, min(128, T // 2)))
    W_emb, NH = T, num_heads
    DH = W_emb // NH
    keys = iter(jax.random.split(key, 64))

    def nrm(shape, scale=1.0):
        return scale * jax.random.normal(next(keys), shape, jnp.float32)

    p = {"wcwt": jnp.asarray(_morlet_cwt_matrices(T, scales))}
    p["cvf1_w"], p["cvf1_b"] = nrm((32, 1, 3, 3), 0.1), nrm((32,), 0.05)
    p["cvf2_w"], p["cvf2_b"] = nrm((64, 32, 3, 3), 0.05), nrm((64,), 0.05)
    p["cvf3_w"], p["cvf3_b"] = nrm((128, 64, 3, 3), 0.05), nrm((128,), 0.05)
    p["rtm_weight"] = nrm((B, S, T, 128), 1.0)
    p["tfb"] = []
    for _ in range(num_blocks):
        p["tfb"].append(dict(
            Wqkv=nrm((3, NH, DH, W_emb), 1.0),
            Wo=nrm((W_emb, W_emb), 1.0),
            w1=nrm((W_emb, 4 * W_emb), 0.1),
            b1=nrm((4 * W_emb,), 0.1),
            w2=nrm((4 * W_emb, W_emb), 0.1),
            b2=nrm((W_emb,), 0.1),
        ))
    p["cvd1_w"], p["cvd1_b"] = nrm((32, input_channels, 3, 3), 0.1), nrm((32,), 0.05)
    p["cvd2_w"], p["cvd2_b"] = nrm((64, 32, 3, 3), 0.05), nrm((64,), 0.05)
    fc_in = 64 * CF_second * (m_dec // 2)
    p["fc_w"] = nrm((fc_in, num_cls), 0.05)
    p["fc_b"] = nrm((num_cls,), 0.05)
    return p


def build_kernel_constants(p, *, B, S, T, NH, num_cls, CF_second, m_dec):
    f32 = np.float32
    H, W = S, T
    N = B * H * W
    assert B == 3 and H == 2 and NH == 2 and W % NH == 0, \
        "reference GenericTFB semantics require B=3, H=2, num_heads=2"

    def hostify(a):
        return np.asarray(jax.device_get(a), f32)

    kc = {}

    # wavelet operator tiled over (b, s, t) rows + batch-repeat matrix
    wcwt = hostify(p["wcwt"])                       # [S, T, T]
    rrep = np.zeros((N, B), f32)
    wct = np.zeros((N, T), f32)
    for b in range(B):
        for s in range(H):
            for t in range(W):
                r = b * H * W + s * W + t
                rrep[r, b] = 1.0
                wct[r, :] = wcwt[s, t, :]
    kc["rrep"], kc["wct"] = rrep, wct

    # 3x3 pad-1 spatial shift operators on the (b, h, w) row space
    staps = np.zeros((9, N, N), f32)
    for kh in range(3):
        for kw in range(3):
            k = kh * 3 + kw
            for b in range(B):
                for h in range(H):
                    for w in range(W):
                        hh, ww = h + kh - 1, w + kw - 1
                        if 0 <= hh < H and 0 <= ww < W:
                            staps[k, b * H * W + h * W + w,
                                  b * H * W + hh * W + ww] = 1.0
    kc["staps"] = staps

    def odcm_pack(wc, bc):
        wc, bc = hostify(wc), hostify(bc)
        co, ci = wc.shape[0], wc.shape[1]
        wcat = np.transpose(wc, (1, 2, 3, 0)).reshape(ci, 9 * co)
        return wcat.astype(f32), bc.reshape(1, co)

    kc["wcat1"], kc["bc1"] = odcm_pack(p["cvf1_w"], p["cvf1_b"])
    kc["wcat2"], kc["bc2"] = odcm_pack(p["cvf2_w"], p["cvf2_b"])
    kc["wcat3"], kc["bc3"] = odcm_pack(p["cvf3_w"], p["cvf3_b"])

    # RTM helpers (diag-trick relabel [36] -> [6, W] + cls/data placement)
    kc["wrtm"] = hostify(p["rtm_weight"]).reshape(N, -1)
    kc["eye_n"] = np.eye(N, dtype=f32)
    lrows = np.zeros((B * H, N), f32)
    rcols = np.zeros((N, W), f32)
    for b in range(B):
        for h in range(H):
            for w in range(W):
                r = b * H * W + h * W + w
                lrows[b * H + h, r] = 1.0
                rcols[r, w] = 1.0
    kc["lrows"], kc["rcols"] = lrows, rcols
    pdata = np.zeros((B * 2 * H, B * H), f32)
    for b in range(B):
        for j in range(H):
            pdata[b * 2 * H + H + j, b * H + j] = 1.0
    kc["pdata"] = pdata

    # transformer blocks: weights stacked over blocks, Wqkv pre-packed [W, 3*NH*DH]
    DH = W // NH
    nb = len(p["tfb"])
    wpack = np.zeros((nb, W, 3 * NH * DH), f32)
    wo = np.zeros((nb, W, W), f32)
    w1 = np.zeros((nb, W, 4 * W), f32)
    b1 = np.zeros((nb, 1, 4 * W), f32)
    w2 = np.zeros((nb, 4 * W, W), f32)
    b2 = np.zeros((nb, 1, W), f32)
    for t, blk in enumerate(p["tfb"]):
        wqkv = hostify(blk["Wqkv"])                 # [3, NH, DH, W]
        wpack[t] = np.transpose(wqkv, (3, 0, 1, 2)).reshape(W, 3 * NH * DH)
        wo[t] = hostify(blk["Wo"])
        w1[t] = hostify(blk["w1"])
        b1[t] = hostify(blk["b1"]).reshape(1, -1)
        w2[t] = hostify(blk["w2"])
        b2[t] = hostify(blk["b2"]).reshape(1, -1)
    kc.update(wpack=wpack, wo=wo, w1=w1, b1=b1, w2=w2, b2=b2)

    # batched attention helpers (rows = (i, j), key index j' in {0, 1})
    pj0 = np.zeros((2 * H, 2 * H), f32)
    pj1 = np.zeros((2 * H, 2 * H), f32)
    for i in range(2):
        for j in range(H):
            pj0[i * H + j, i * H + 0] = 1.0
            pj1[i * H + j, i * H + 1] = 1.0
    dsum = np.zeros((3 * NH * DH, 3 * NH), f32)
    for a in range(3):
        for hd in range(NH):
            for d in range(DH):
                dsum[a * NH * DH + hd * DH + d, a * NH + hd] = 1.0
    kc["pj0"], kc["pj1"] = pj0, pj1
    kc["dsum"], kc["dexp"] = dsum, dsum.T.copy()

    # row selectors / placers for the (a, j, hd) re-ordering
    rsel = np.zeros((NH, H, 2 * H), f32)
    pzrow = np.zeros((NH, 2 * H, H), f32)
    for hd in range(NH):
        for j in range(H):
            rsel[hd, j, j * H + hd] = 1.0
            pzrow[hd, j * H + hd, j] = 1.0
    pblk = np.zeros((3, B * 2 * H, 2 * H), f32)
    for a in range(3):
        for r in range(2 * H):
            pblk[a, a * 2 * H + r, r] = 1.0
    kc["rsel"], kc["pzrow"], kc["pblk"] = rsel, pzrow, pblk

    # savespace [b, c, h, w] -> decoder layout rows (b, h), cols (c, w)
    lcr = np.zeros((2, B * H, B * 2 * H), f32)
    rcr = np.zeros((2, W, 2 * W), f32)
    for c in range(2):
        for b in range(B):
            for h in range(H):
                lcr[c, b * H + h, b * 2 * H + c * H + h] = 1.0
        for w in range(W):
            rcr[c, w, c * W + w] = 1.0
    kc["lcr"], kc["rcr"] = lcr, rcr

    # decoder conv operators: h-shift (rows) + channel-mix-with-w-shift (cols)
    hsm = np.zeros((3, B * H, B * H), f32)
    for kh in range(3):
        for b in range(B):
            for h in range(H):
                hh = h + kh - 1
                if 0 <= hh < H:
                    hsm[kh, b * H + h, b * H + hh] = 1.0
    kc["hs"] = hsm

    def dec_pack(wc, bc):
        wc, bc = hostify(wc), hostify(bc)
        co, ci = wc.shape[0], wc.shape[1]
        md = np.zeros((3, ci * W, co * W), f32)
        ci_idx = np.arange(ci)[:, None]
        co_idx = np.arange(co)[None, :]
        for kh in range(3):
            for kw in range(3):
                for w in range(W):
                    wp = w + kw - 1
                    if 0 <= wp < W:
                        md[kh, ci_idx * W + wp, co_idx * W + w] = wc[:, :, kh, kw].T
        bd = np.zeros((1, co * W), f32)
        for co_i in range(co):
            bd[0, co_i * W:(co_i + 1) * W] = bc[co_i]
        return md, bd

    kc["md1"], kc["bd1"] = dec_pack(p["cvd1_w"], p["cvd1_b"])
    kc["md2"], kc["bd2"] = dec_pack(p["cvd2_w"], p["cvd2_b"])

    # adaptive avg-pool (separable) + fc folded to lane-friendly operators
    OH, OW = CF_second, m_dec // 2
    Ph = _adaptive_avgpool_matrix(H, OH)
    Pw = _adaptive_avgpool_matrix(W, OW)
    prow = np.zeros((B * OH, B * H), f32)
    for b in range(B):
        prow[b * OH:(b + 1) * OH, b * H:(b + 1) * H] = Ph
    c2 = kc["md2"].shape[2] // W                    # 64
    pcol = np.zeros((c2 * W, c2 * OW), f32)
    for c in range(c2):
        pcol[c * W:(c + 1) * W, c * OW:(c + 1) * OW] = Pw.T
    selph = np.zeros((OH, B, B * OH), f32)
    for ph in range(OH):
        for b in range(B):
            selph[ph, b, b * OH + ph] = 1.0
    fcw_full = hostify(p["fc_w"])                   # [c2*OH*OW, num_cls]
    fcw = np.zeros((OH, c2 * OW, num_cls), f32)
    for ph in range(OH):
        for c in range(c2):
            for pw_ in range(OW):
                fcw[ph, c * OW + pw_, :] = fcw_full[c * OH * OW + ph * OW + pw_, :]
    kc["prow"], kc["pcol"], kc["selph"] = prow, pcol, selph
    kc["fcw"], kc["fcb"] = fcw, hostify(p["fc_b"]).reshape(1, num_cls)

    return {k: jnp.asarray(v) for k, v in kc.items()}


# ----------------------------------------------------------------------------
# Forward wrapper: ONE pallas_call for the whole model
# ----------------------------------------------------------------------------

def eegformer_forward(x, kc):
    B = x.shape[0]
    xmat = x.reshape(B, x.shape[-1]).astype(jnp.float32)
    args = [xmat] + [kc[name] for name in _ARG_NAMES]
    num_cls = kc["fcb"].shape[1]
    probs = pl.pallas_call(
        _eegformer_kernel,
        out_shape=jax.ShapeDtypeStruct((B, num_cls), jnp.float32),
        in_specs=[pl.BlockSpec(memory_space=pltpu.MemorySpace.VMEM)] * len(args),
        out_specs=pl.BlockSpec(memory_space=pltpu.MemorySpace.VMEM),
        compiler_params=pltpu.CompilerParams(vmem_limit_bytes=32 * 1024 * 1024),
    )(*args)
    if probs.shape[1] == 1:           # torch .squeeze(1)
        probs = probs[:, 0]
    return probs


# ----------------------------------------------------------------------------

if __name__ == "__main__":
    # Shapes forced by the reference implementation's own semantics.
    B, C_raw, T = 3, 1, 6            # raw EEG input [batch=3, channels=1, time=6]
    num_cls = 4
    input_channels = 2               # EEGformer ctor arg -> decoder in_channels
    kernel_size = 3
    num_blocks = 2
    num_heads_rtm = 2                # required: 2*Dh == embedding_dim
    CF_second = 2
    template_len = 10                # EEGformer `input` template second dim
    m_dec = template_len - 3 * (kernel_size - 1)    # decoder self.m == 4
    S = min(128, T // 2) - 1         # wavelet scales == 2

    params = init_params(jax.random.PRNGKey(0), B=B, T=T, num_cls=num_cls,
                         input_channels=input_channels, num_blocks=num_blocks,
                         num_heads=num_heads_rtm, CF_second=CF_second,
                         m_dec=m_dec)
    kconsts = build_kernel_constants(params, B=B, S=S, T=T, NH=num_heads_rtm,
                                     num_cls=num_cls, CF_second=CF_second,
                                     m_dec=m_dec)

    x = jax.random.normal(jax.random.PRNGKey(0), (B, C_raw, T), jnp.float32)

    fwd = jax.jit(lambda inp: eegformer_forward(inp, kconsts))
    out = jax.block_until_ready(fwd(x))

    assert out.shape == (B, num_cls), out.shape
    assert bool(jnp.all(jnp.isfinite(out)))
    assert bool(jnp.allclose(jnp.sum(out, axis=-1), 1.0, atol=1e-5))
    print("KERNEL_OK")
</pallas_src>

<mosaic_0001>
module attributes {stable_mosaic.version = 11 : i64} {
  func.func @_eegformer_kernel(%arg0: memref<3x6xf32, #tpu.memory_space<vmem>>, %arg1: memref<36x3xf32, #tpu.memory_space<vmem>>, %arg2: memref<36x6xf32, #tpu.memory_space<vmem>>, %arg3: memref<9x36x36xf32, #tpu.memory_space<vmem>>, %arg4: memref<1x288xf32, #tpu.memory_space<vmem>>, %arg5: memref<1x32xf32, #tpu.memory_space<vmem>>, %arg6: memref<32x576xf32, #tpu.memory_space<vmem>>, %arg7: memref<1x64xf32, #tpu.memory_space<vmem>>, %arg8: memref<64x1152xf32, #tpu.memory_space<vmem>>, %arg9: memref<1x128xf32, #tpu.memory_space<vmem>>, %arg10: memref<36x128xf32, #tpu.memory_space<vmem>>, %arg11: memref<36x36xf32, #tpu.memory_space<vmem>>, %arg12: memref<6x36xf32, #tpu.memory_space<vmem>>, %arg13: memref<36x6xf32, #tpu.memory_space<vmem>>, %arg14: memref<12x6xf32, #tpu.memory_space<vmem>>, %arg15: memref<2x6x18xf32, #tpu.memory_space<vmem>>, %arg16: memref<2x6x6xf32, #tpu.memory_space<vmem>>, %arg17: memref<2x6x24xf32, #tpu.memory_space<vmem>>, %arg18: memref<2x1x24xf32, #tpu.memory_space<vmem>>, %arg19: memref<2x24x6xf32, #tpu.memory_space<vmem>>, %arg20: memref<2x1x6xf32, #tpu.memory_space<vmem>>, %arg21: memref<4x4xf32, #tpu.memory_space<vmem>>, %arg22: memref<4x4xf32, #tpu.memory_space<vmem>>, %arg23: memref<18x6xf32, #tpu.memory_space<vmem>>, %arg24: memref<6x18xf32, #tpu.memory_space<vmem>>, %arg25: memref<2x2x4xf32, #tpu.memory_space<vmem>>, %arg26: memref<2x4x2xf32, #tpu.memory_space<vmem>>, %arg27: memref<3x12x4xf32, #tpu.memory_space<vmem>>, %arg28: memref<2x6x12xf32, #tpu.memory_space<vmem>>, %arg29: memref<2x6x12xf32, #tpu.memory_space<vmem>>, %arg30: memref<3x6x6xf32, #tpu.memory_space<vmem>>, %arg31: memref<3x12x192xf32, #tpu.memory_space<vmem>>, %arg32: memref<1x192xf32, #tpu.memory_space<vmem>>, %arg33: memref<3x192x384xf32, #tpu.memory_space<vmem>>, %arg34: memref<1x384xf32, #tpu.memory_space<vmem>>, %arg35: memref<6x6xf32, #tpu.memory_space<vmem>>, %arg36: memref<384x128xf32, #tpu.memory_space<vmem>>, %arg37: memref<2x3x6xf32, #tpu.memory_space<vmem>>, %arg38: memref<2x128x4xf32, #tpu.memory_space<vmem>>, %arg39: memref<1x4xf32, #tpu.memory_space<vmem>>, %arg40: memref<3x4xf32, #tpu.memory_space<vmem>>) attributes {dimension_semantics = [], scalar_prefetch = 0 : i64, scratch_operands = 0 : i64, tpu.core_type = #tpu.core_type<tc>} {
    %c0 = arith.constant 0 : index
    %c0_0 = arith.constant 0 : index
    %0 = vector.load %arg1[%c0, %c0_0] : memref<36x3xf32, #tpu.memory_space<vmem>>, vector<36x3xf32>
    %c0_1 = arith.constant 0 : index
    %c0_2 = arith.constant 0 : index
    %1 = vector.load %arg0[%c0_1, %c0_2] : memref<3x6xf32, #tpu.memory_space<vmem>>, vector<3x6xf32>
    %cst = arith.constant dense<0.000000e+00> : vector<36x6xf32>
    %2 = tpu.matmul %0, %1, %cst {dimension_numbers = #tpu.dot_dimension_numbers<[1], [0], [0], [1], [0, 0, 1, 1], [], []>} : vector<36x3xf32>, vector<3x6xf32>, vector<36x6xf32> -> vector<36x6xf32>
    %c0_3 = arith.constant 0 : index
    %c0_4 = arith.constant 0 : index
    %3 = vector.load %arg2[%c0_3, %c0_4] : memref<36x6xf32, #tpu.memory_space<vmem>>, vector<36x6xf32>
    %4 = arith.mulf %2, %3 : vector<36x6xf32>
    %cst_5 = arith.constant 1.000000e+00 : f32
    %5 = vector.broadcast %cst_5 : f32 to vector<6x1xf32>
    %cst_6 = arith.constant dense<0.000000e+00> : vector<36x1xf32>
    %6 = tpu.matmul %4, %5, %cst_6 {dimension_numbers = #tpu.dot_dimension_numbers<[1], [0], [0], [1], [0, 0, 1, 1], [], []>} : vector<36x6xf32>, vector<6x1xf32>, vector<36x1xf32> -> vector<36x1xf32>
    %7 = math.absf %6 : vector<36x1xf32>
    %c0_7 = arith.constant 0 : index
    %c0_8 = arith.constant 0 : index
    %8 = vector.load %arg4[%c0_7, %c0_8] : memref<1x288xf32, #tpu.memory_space<vmem>>, vector<1x288xf32>
    %cst_9 = arith.constant dense<0.000000e+00> : vector<36x288xf32>
    %9 = tpu.matmul %7, %8, %cst_9 {dimension_numbers = #tpu.dot_dimension_numbers<[1], [0], [0], [1], [0, 0, 1, 1], [], []>} : vector<36x1xf32>, vector<1x288xf32>, vector<36x288xf32> -> vector<36x288xf32>
    %cst_10 = arith.constant 0.000000e+00 : f32
    %10 = vector.broadcast %cst_10 : f32 to vector<36x32xf32>
    %c0_11 = arith.constant 0 : index
    %c0_12 = arith.constant 0 : index
    %c0_13 = arith.constant 0 : index
    %11 = vector.load %arg3[%c0_11, %c0_12, %c0_13] : memref<9x36x36xf32, #tpu.memory_space<vmem>>, vector<1x36x36xf32>
    %12 = vector.shape_cast %11 : vector<1x36x36xf32> to vector<36x36xf32>
    %13 = vector.extract_strided_slice %9 {offsets = [0, 0], sizes = [36, 32], strides = [1, 1]} : vector<36x288xf32> to vector<36x32xf32>
    %cst_14 = arith.constant dense<0.000000e+00> : vector<36x32xf32>
    %14 = tpu.matmul %12, %13, %cst_14 {dimension_numbers = #tpu.dot_dimension_numbers<[1], [0], [0], [1], [0, 0, 1, 1], [], []>} : vector<36x36xf32>, vector<36x32xf32>, vector<36x32xf32> -> vector<36x32xf32>
    %15 = arith.addf %10, %14 : vector<36x32xf32>
    %c1 = arith.constant 1 : index
    %c0_15 = arith.constant 0 : index
    %c0_16 = arith.constant 0 : index
    %16 = vector.load %arg3[%c1, %c0_15, %c0_16] : memref<9x36x36xf32, #tpu.memory_space<vmem>>, vector<1x36x36xf32>
    %17 = vector.shape_cast %16 : vector<1x36x36xf32> to vector<36x36xf32>
    %18 = vector.extract_strided_slice %9 {offsets = [0, 32], sizes = [36, 32], strides = [1, 1]} : vector<36x288xf32> to vector<36x32xf32>
    %cst_17 = arith.constant dense<0.000000e+00> : vector<36x32xf32>
    %19 = tpu.matmul %17, %18, %cst_17 {dimension_numbers = #tpu.dot_dimension_numbers<[1], [0], [0], [1], [0, 0, 1, 1], [], []>} : vector<36x36xf32>, vector<36x32xf32>, vector<36x32xf32> -> vector<36x32xf32>
    %20 = arith.addf %15, %19 : vector<36x32xf32>
    %c2 = arith.constant 2 : index
    %c0_18 = arith.constant 0 : index
    %c0_19 = arith.constant 0 : index
    %21 = vector.load %arg3[%c2, %c0_18, %c0_19] : memref<9x36x36xf32, #tpu.memory_space<vmem>>, vector<1x36x36xf32>
    %22 = vector.shape_cast %21 : vector<1x36x36xf32> to vector<36x36xf32>
    %23 = vector.extract_strided_slice %9 {offsets = [0, 64], sizes = [36, 32], strides = [1, 1]} : vector<36x288xf32> to vector<36x32xf32>
    %cst_20 = arith.constant dense<0.000000e+00> : vector<36x32xf32>
    %24 = tpu.matmul %22, %23, %cst_20 {dimension_numbers = #tpu.dot_dimension_numbers<[1], [0], [0], [1], [0, 0, 1, 1], [], []>} : vector<36x36xf32>, vector<36x32xf32>, vector<36x32xf32> -> vector<36x32xf32>
    %25 = arith.addf %20, %24 : vector<36x32xf32>
    %c3 = arith.constant 3 : index
    %c0_21 = arith.constant 0 : index
    %c0_22 = arith.constant 0 : index
    %26 = vector.load %arg3[%c3, %c0_21, %c0_22] : memref<9x36x36xf32, #tpu.memory_space<vmem>>, vector<1x36x36xf32>
    %27 = vector.shape_cast %26 : vector<1x36x36xf32> to vector<36x36xf32>
    %28 = vector.extract_strided_slice %9 {offsets = [0, 96], sizes = [36, 32], strides = [1, 1]} : vector<36x288xf32> to vector<36x32xf32>
    %cst_23 = arith.constant dense<0.000000e+00> : vector<36x32xf32>
    %29 = tpu.matmul %27, %28, %cst_23 {dimension_numbers = #tpu.dot_dimension_numbers<[1], [0], [0], [1], [0, 0, 1, 1], [], []>} : vector<36x36xf32>, vector<36x32xf32>, vector<36x32xf32> -> vector<36x32xf32>
    %30 = arith.addf %25, %29 : vector<36x32xf32>
    %c4 = arith.constant 4 : index
    %c0_24 = arith.constant 0 : index
    %c0_25 = arith.constant 0 : index
    %31 = vector.load %arg3[%c4, %c0_24, %c0_25] : memref<9x36x36xf32, #tpu.memory_space<vmem>>, vector<1x36x36xf32>
    %32 = vector.shape_cast %31 : vector<1x36x36xf32> to vector<36x36xf32>
    %33 = vector.extract_strided_slice %9 {offsets = [0, 128], sizes = [36, 32], strides = [1, 1]} : vector<36x288xf32> to vector<36x32xf32>
    %cst_26 = arith.constant dense<0.000000e+00> : vector<36x32xf32>
    %34 = tpu.matmul %32, %33, %cst_26 {dimension_numbers = #tpu.dot_dimension_numbers<[1], [0], [0], [1], [0, 0, 1, 1], [], []>} : vector<36x36xf32>, vector<36x32xf32>, vector<36x32xf32> -> vector<36x32xf32>
    %35 = arith.addf %30, %34 : vector<36x32xf32>
    %c5 = arith.constant 5 : index
    %c0_27 = arith.constant 0 : index
    %c0_28 = arith.constant 0 : index
    %36 = vector.load %arg3[%c5, %c0_27, %c0_28] : memref<9x36x36xf32, #tpu.memory_space<vmem>>, vector<1x36x36xf32>
    %37 = vector.shape_cast %36 : vector<1x36x36xf32> to vector<36x36xf32>
    %38 = vector.extract_strided_slice %9 {offsets = [0, 160], sizes = [36, 32], strides = [1, 1]} : vector<36x288xf32> to vector<36x32xf32>
    %cst_29 = arith.constant dense<0.000000e+00> : vector<36x32xf32>
    %39 = tpu.matmul %37, %38, %cst_29 {dimension_numbers = #tpu.dot_dimension_numbers<[1], [0], [0], [1], [0, 0, 1, 1], [], []>} : vector<36x36xf32>, vector<36x32xf32>, vector<36x32xf32> -> vector<36x32xf32>
    %40 = arith.addf %35, %39 : vector<36x32xf32>
    %c6 = arith.constant 6 : index
    %c0_30 = arith.constant 0 : index
    %c0_31 = arith.constant 0 : index
    %41 = vector.load %arg3[%c6, %c0_30, %c0_31] : memref<9x36x36xf32, #tpu.memory_space<vmem>>, vector<1x36x36xf32>
    %42 = vector.shape_cast %41 : vector<1x36x36xf32> to vector<36x36xf32>
    %43 = vector.extract_strided_slice %9 {offsets = [0, 192], sizes = [36, 32], strides = [1, 1]} : vector<36x288xf32> to vector<36x32xf32>
    %cst_32 = arith.constant dense<0.000000e+00> : vector<36x32xf32>
    %44 = tpu.matmul %42, %43, %cst_32 {dimension_numbers = #tpu.dot_dimension_numbers<[1], [0], [0], [1], [0, 0, 1, 1], [], []>} : vector<36x36xf32>, vector<36x32xf32>, vector<36x32xf32> -> vector<36x32xf32>
    %45 = arith.addf %40, %44 : vector<36x32xf32>
    %c7 = arith.constant 7 : index
    %c0_33 = arith.constant 0 : index
    %c0_34 = arith.constant 0 : index
    %46 = vector.load %arg3[%c7, %c0_33, %c0_34] : memref<9x36x36xf32, #tpu.memory_space<vmem>>, vector<1x36x36xf32>
    %47 = vector.shape_cast %46 : vector<1x36x36xf32> to vector<36x36xf32>
    %48 = vector.extract_strided_slice %9 {offsets = [0, 224], sizes = [36, 32], strides = [1, 1]} : vector<36x288xf32> to vector<36x32xf32>
    %cst_35 = arith.constant dense<0.000000e+00> : vector<36x32xf32>
    %49 = tpu.matmul %47, %48, %cst_35 {dimension_numbers = #tpu.dot_dimension_numbers<[1], [0], [0], [1], [0, 0, 1, 1], [], []>} : vector<36x36xf32>, vector<36x32xf32>, vector<36x32xf32> -> vector<36x32xf32>
    %50 = arith.addf %45, %49 : vector<36x32xf32>
    %c8 = arith.constant 8 : index
    %c0_36 = arith.constant 0 : index
    %c0_37 = arith.constant 0 : index
    %51 = vector.load %arg3[%c8, %c0_36, %c0_37] : memref<9x36x36xf32, #tpu.memory_space<vmem>>, vector<1x36x36xf32>
    %52 = vector.shape_cast %51 : vector<1x36x36xf32> to vector<36x36xf32>
    %53 = vector.extract_strided_slice %9 {offsets = [0, 256], sizes = [36, 32], strides = [1, 1]} : vector<36x288xf32> to vector<36x32xf32>
    %cst_38 = arith.constant dense<0.000000e+00> : vector<36x32xf32>
    %54 = tpu.matmul %52, %53, %cst_38 {dimension_numbers = #tpu.dot_dimension_numbers<[1], [0], [0], [1], [0, 0, 1, 1], [], []>} : vector<36x36xf32>, vector<36x32xf32>, vector<36x32xf32> -> vector<36x32xf32>
    %55 = arith.addf %50, %54 : vector<36x32xf32>
    %c0_39 = arith.constant 0 : index
    %c0_40 = arith.constant 0 : index
    %56 = vector.load %arg5[%c0_39, %c0_40] : memref<1x32xf32, #tpu.memory_space<vmem>>, vector<1x32xf32>
    %57 = vector.broadcast %56 : vector<1x32xf32> to vector<36x32xf32>
    %58 = arith.addf %55, %57 : vector<36x32xf32>
    %cst_41 = arith.constant 0.000000e+00 : f32
    %59 = vector.broadcast %cst_41 : f32 to vector<36x32xf32>
    %60 = arith.maximumf %58, %59 : vector<36x32xf32>
    %c0_42 = arith.constant 0 : index
    %c0_43 = arith.constant 0 : index
    %61 = vector.load %arg6[%c0_42, %c0_43] : memref<32x576xf32, #tpu.memory_space<vmem>>, vector<32x576xf32>
    %cst_44 = arith.constant dense<0.000000e+00> : vector<36x576xf32>
    %62 = tpu.matmul %60, %61, %cst_44 {dimension_numbers = #tpu.dot_dimension_numbers<[1], [0], [0], [1], [0, 0, 1, 1], [], []>} : vector<36x32xf32>, vector<32x576xf32>, vector<36x576xf32> -> vector<36x576xf32>
    %cst_45 = arith.constant 0.000000e+00 : f32
    %63 = vector.broadcast %cst_45 : f32 to vector<36x64xf32>
    %c0_46 = arith.constant 0 : index
    %c0_47 = arith.constant 0 : index
    %c0_48 = arith.constant 0 : index
    %64 = vector.load %arg3[%c0_46, %c0_47, %c0_48] : memref<9x36x36xf32, #tpu.memory_space<vmem>>, vector<1x36x36xf32>
    %65 = vector.shape_cast %64 : vector<1x36x36xf32> to vector<36x36xf32>
    %66 = vector.extract_strided_slice %62 {offsets = [0, 0], sizes = [36, 64], strides = [1, 1]} : vector<36x576xf32> to vector<36x64xf32>
    %cst_49 = arith.constant dense<0.000000e+00> : vector<36x64xf32>
    %67 = tpu.matmul %65, %66, %cst_49 {dimension_numbers = #tpu.dot_dimension_numbers<[1], [0], [0], [1], [0, 0, 1, 1], [], []>} : vector<36x36xf32>, vector<36x64xf32>, vector<36x64xf32> -> vector<36x64xf32>
    %68 = arith.addf %63, %67 : vector<36x64xf32>
    %c1_50 = arith.constant 1 : index
    %c0_51 = arith.constant 0 : index
    %c0_52 = arith.constant 0 : index
    %69 = vector.load %arg3[%c1_50, %c0_51, %c0_52] : memref<9x36x36xf32, #tpu.memory_space<vmem>>, vector<1x36x36xf32>
    %70 = vector.shape_cast %69 : vector<1x36x36xf32> to vector<36x36xf32>
    %71 = vector.extract_strided_slice %62 {offsets = [0, 64], sizes = [36, 64], strides = [1, 1]} : vector<36x576xf32> to vector<36x64xf32>
    %cst_53 = arith.constant dense<0.000000e+00> : vector<36x64xf32>
    %72 = tpu.matmul %70, %71, %cst_53 {dimension_numbers = #tpu.dot_dimension_numbers<[1], [0], [0], [1], [0, 0, 1, 1], [], []>} : vector<36x36xf32>, vector<36x64xf32>, vector<36x64xf32> -> vector<36x64xf32>
    %73 = arith.addf %68, %72 : vector<36x64xf32>
    %c2_54 = arith.constant 2 : index
    %c0_55 = arith.constant 0 : index
    %c0_56 = arith.constant 0 : index
    %74 = vector.load %arg3[%c2_54, %c0_55, %c0_56] : memref<9x36x36xf32, #tpu.memory_space<vmem>>, vector<1x36x36xf32>
    %75 = vector.shape_cast %74 : vector<1x36x36xf32> to vector<36x36xf32>
    %76 = vector.extract_strided_slice %62 {offsets = [0, 128], sizes = [36, 64], strides = [1, 1]} : vector<36x576xf32> to vector<36x64xf32>
    %cst_57 = arith.constant dense<0.000000e+00> : vector<36x64xf32>
    %77 = tpu.matmul %75, %76, %cst_57 {dimension_numbers = #tpu.dot_dimension_numbers<[1], [0], [0], [1], [0, 0, 1, 1], [], []>} : vector<36x36xf32>, vector<36x64xf32>, vector<36x64xf32> -> vector<36x64xf32>
    %78 = arith.addf %73, %77 : vector<36x64xf32>
    %c3_58 = arith.constant 3 : index
    %c0_59 = arith.constant 0 : index
    %c0_60 = arith.constant 0 : index
    %79 = vector.load %arg3[%c3_58, %c0_59, %c0_60] : memref<9x36x36xf32, #tpu.memory_space<vmem>>, vector<1x36x36xf32>
    %80 = vector.shape_cast %79 : vector<1x36x36xf32> to vector<36x36xf32>
    %81 = vector.extract_strided_slice %62 {offsets = [0, 192], sizes = [36, 64], strides = [1, 1]} : vector<36x576xf32> to vector<36x64xf32>
    %cst_61 = arith.constant dense<0.000000e+00> : vector<36x64xf32>
    %82 = tpu.matmul %80, %81, %cst_61 {dimension_numbers = #tpu.dot_dimension_numbers<[1], [0], [0], [1], [0, 0, 1, 1], [], []>} : vector<36x36xf32>, vector<36x64xf32>, vector<36x64xf32> -> vector<36x64xf32>
    %83 = arith.addf %78, %82 : vector<36x64xf32>
    %c4_62 = arith.constant 4 : index
    %c0_63 = arith.constant 0 : index
    %c0_64 = arith.constant 0 : index
    %84 = vector.load %arg3[%c4_62, %c0_63, %c0_64] : memref<9x36x36xf32, #tpu.memory_space<vmem>>, vector<1x36x36xf32>
    %85 = vector.shape_cast %84 : vector<1x36x36xf32> to vector<36x36xf32>
    %86 = vector.extract_strided_slice %62 {offsets = [0, 256], sizes = [36, 64], strides = [1, 1]} : vector<36x576xf32> to vector<36x64xf32>
    %cst_65 = arith.constant dense<0.000000e+00> : vector<36x64xf32>
    %87 = tpu.matmul %85, %86, %cst_65 {dimension_numbers = #tpu.dot_dimension_numbers<[1], [0], [0], [1], [0, 0, 1, 1], [], []>} : vector<36x36xf32>, vector<36x64xf32>, vector<36x64xf32> -> vector<36x64xf32>
    %88 = arith.addf %83, %87 : vector<36x64xf32>
    %c5_66 = arith.constant 5 : index
    %c0_67 = arith.constant 0 : index
    %c0_68 = arith.constant 0 : index
    %89 = vector.load %arg3[%c5_66, %c0_67, %c0_68] : memref<9x36x36xf32, #tpu.memory_space<vmem>>, vector<1x36x36xf32>
    %90 = vector.shape_cast %89 : vector<1x36x36xf32> to vector<36x36xf32>
    %91 = vector.extract_strided_slice %62 {offsets = [0, 320], sizes = [36, 64], strides = [1, 1]} : vector<36x576xf32> to vector<36x64xf32>
    %cst_69 = arith.constant dense<0.000000e+00> : vector<36x64xf32>
    %92 = tpu.matmul %90, %91, %cst_69 {dimension_numbers = #tpu.dot_dimension_numbers<[1], [0], [0], [1], [0, 0, 1, 1], [], []>} : vector<36x36xf32>, vector<36x64xf32>, vector<36x64xf32> -> vector<36x64xf32>
    %93 = arith.addf %88, %92 : vector<36x64xf32>
    %c6_70 = arith.constant 6 : index
    %c0_71 = arith.constant 0 : index
    %c0_72 = arith.constant 0 : index
    %94 = vector.load %arg3[%c6_70, %c0_71, %c0_72] : memref<9x36x36xf32, #tpu.memory_space<vmem>>, vector<1x36x36xf32>
    %95 = vector.shape_cast %94 : vector<1x36x36xf32> to vector<36x36xf32>
    %96 = vector.extract_strided_slice %62 {offsets = [0, 384], sizes = [36, 64], strides = [1, 1]} : vector<36x576xf32> to vector<36x64xf32>
    %cst_73 = arith.constant dense<0.000000e+00> : vector<36x64xf32>
    %97 = tpu.matmul %95, %96, %cst_73 {dimension_numbers = #tpu.dot_dimension_numbers<[1], [0], [0], [1], [0, 0, 1, 1], [], []>} : vector<36x36xf32>, vector<36x64xf32>, vector<36x64xf32> -> vector<36x64xf32>
    %98 = arith.addf %93, %97 : vector<36x64xf32>
    %c7_74 = arith.constant 7 : index
    %c0_75 = arith.constant 0 : index
    %c0_76 = arith.constant 0 : index
    %99 = vector.load %arg3[%c7_74, %c0_75, %c0_76] : memref<9x36x36xf32, #tpu.memory_space<vmem>>, vector<1x36x36xf32>
    %100 = vector.shape_cast %99 : vector<1x36x36xf32> to vector<36x36xf32>
    %101 = vector.extract_strided_slice %62 {offsets = [0, 448], sizes = [36, 64], strides = [1, 1]} : vector<36x576xf32> to vector<36x64xf32>
    %cst_77 = arith.constant dense<0.000000e+00> : vector<36x64xf32>
    %102 = tpu.matmul %100, %101, %cst_77 {dimension_numbers = #tpu.dot_dimension_numbers<[1], [0], [0], [1], [0, 0, 1, 1], [], []>} : vector<36x36xf32>, vector<36x64xf32>, vector<36x64xf32> -> vector<36x64xf32>
    %103 = arith.addf %98, %102 : vector<36x64xf32>
    %c8_78 = arith.constant 8 : index
    %c0_79 = arith.constant 0 : index
    %c0_80 = arith.constant 0 : index
    %104 = vector.load %arg3[%c8_78, %c0_79, %c0_80] : memref<9x36x36xf32, #tpu.memory_space<vmem>>, vector<1x36x36xf32>
    %105 = vector.shape_cast %104 : vector<1x36x36xf32> to vector<36x36xf32>
    %106 = vector.extract_strided_slice %62 {offsets = [0, 512], sizes = [36, 64], strides = [1, 1]} : vector<36x576xf32> to vector<36x64xf32>
    %cst_81 = arith.constant dense<0.000000e+00> : vector<36x64xf32>
    %107 = tpu.matmul %105, %106, %cst_81 {dimension_numbers = #tpu.dot_dimension_numbers<[1], [0], [0], [1], [0, 0, 1, 1], [], []>} : vector<36x36xf32>, vector<36x64xf32>, vector<36x64xf32> -> vector<36x64xf32>
    %108 = arith.addf %103, %107 : vector<36x64xf32>
    %c0_82 = arith.constant 0 : index
    %c0_83 = arith.constant 0 : index
    %109 = vector.load %arg7[%c0_82, %c0_83] : memref<1x64xf32, #tpu.memory_space<vmem>>, vector<1x64xf32>
    %110 = vector.broadcast %109 : vector<1x64xf32> to vector<36x64xf32>
    %111 = arith.addf %108, %110 : vector<36x64xf32>
    %cst_84 = arith.constant 0.000000e+00 : f32
    %112 = vector.broadcast %cst_84 : f32 to vector<36x64xf32>
    %113 = arith.maximumf %111, %112 : vector<36x64xf32>
    %c0_85 = arith.constant 0 : index
    %c0_86 = arith.constant 0 : index
    %114 = vector.load %arg8[%c0_85, %c0_86] : memref<64x1152xf32, #tpu.memory_space<vmem>>, vector<64x1152xf32>
    %cst_87 = arith.constant dense<0.000000e+00> : vector<36x1152xf32>
    %115 = tpu.matmul %113, %114, %cst_87 {dimension_numbers = #tpu.dot_dimension_numbers<[1], [0], [0], [1], [0, 0, 1, 1], [], []>} : vector<36x64xf32>, vector<64x1152xf32>, vector<36x1152xf32> -> vector<36x1152xf32>
    %cst_88 = arith.constant 0.000000e+00 : f32
    %116 = vector.broadcast %cst_88 : f32 to vector<36x128xf32>
    %c0_89 = arith.constant 0 : index
    %c0_90 = arith.constant 0 : index
    %c0_91 = arith.constant 0 : index
    %117 = vector.load %arg3[%c0_89, %c0_90, %c0_91] : memref<9x36x36xf32, #tpu.memory_space<vmem>>, vector<1x36x36xf32>
    %118 = vector.shape_cast %117 : vector<1x36x36xf32> to vector<36x36xf32>
    %119 = vector.extract_strided_slice %115 {offsets = [0, 0], sizes = [36, 128], strides = [1, 1]} : vector<36x1152xf32> to vector<36x128xf32>
    %cst_92 = arith.constant dense<0.000000e+00> : vector<36x128xf32>
    %120 = tpu.matmul %118, %119, %cst_92 {dimension_numbers = #tpu.dot_dimension_numbers<[1], [0], [0], [1], [0, 0, 1, 1], [], []>} : vector<36x36xf32>, vector<36x128xf32>, vector<36x128xf32> -> vector<36x128xf32>
    %121 = arith.addf %116, %120 : vector<36x128xf32>
    %c1_93 = arith.constant 1 : index
    %c0_94 = arith.constant 0 : index
    %c0_95 = arith.constant 0 : index
    %122 = vector.load %arg3[%c1_93, %c0_94, %c0_95] : memref<9x36x36xf32, #tpu.memory_space<vmem>>, vector<1x36x36xf32>
    %123 = vector.shape_cast %122 : vector<1x36x36xf32> to vector<36x36xf32>
    %124 = vector.extract_strided_slice %115 {offsets = [0, 128], sizes = [36, 128], strides = [1, 1]} : vector<36x1152xf32> to vector<36x128xf32>
    %cst_96 = arith.constant dense<0.000000e+00> : vector<36x128xf32>
    %125 = tpu.matmul %123, %124, %cst_96 {dimension_numbers = #tpu.dot_dimension_numbers<[1], [0], [0], [1], [0, 0, 1, 1], [], []>} : vector<36x36xf32>, vector<36x128xf32>, vector<36x128xf32> -> vector<36x128xf32>
    %126 = arith.addf %121, %125 : vector<36x128xf32>
    %c2_97 = arith.constant 2 : index
    %c0_98 = arith.constant 0 : index
    %c0_99 = arith.constant 0 : index
    %127 = vector.load %arg3[%c2_97, %c0_98, %c0_99] : memref<9x36x36xf32, #tpu.memory_space<vmem>>, vector<1x36x36xf32>
    %128 = vector.shape_cast %127 : vector<1x36x36xf32> to vector<36x36xf32>
    %129 = vector.extract_strided_slice %115 {offsets = [0, 256], sizes = [36, 128], strides = [1, 1]} : vector<36x1152xf32> to vector<36x128xf32>
    %cst_100 = arith.constant dense<0.000000e+00> : vector<36x128xf32>
    %130 = tpu.matmul %128, %129, %cst_100 {dimension_numbers = #tpu.dot_dimension_numbers<[1], [0], [0], [1], [0, 0, 1, 1], [], []>} : vector<36x36xf32>, vector<36x128xf32>, vector<36x128xf32> -> vector<36x128xf32>
    %131 = arith.addf %126, %130 : vector<36x128xf32>
    %c3_101 = arith.constant 3 : index
    %c0_102 = arith.constant 0 : index
    %c0_103 = arith.constant 0 : index
    %132 = vector.load %arg3[%c3_101, %c0_102, %c0_103] : memref<9x36x36xf32, #tpu.memory_space<vmem>>, vector<1x36x36xf32>
    %133 = vector.shape_cast %132 : vector<1x36x36xf32> to vector<36x36xf32>
    %134 = vector.extract_strided_slice %115 {offsets = [0, 384], sizes = [36, 128], strides = [1, 1]} : vector<36x1152xf32> to vector<36x128xf32>
    %cst_104 = arith.constant dense<0.000000e+00> : vector<36x128xf32>
    %135 = tpu.matmul %133, %134, %cst_104 {dimension_numbers = #tpu.dot_dimension_numbers<[1], [0], [0], [1], [0, 0, 1, 1], [], []>} : vector<36x36xf32>, vector<36x128xf32>, vector<36x128xf32> -> vector<36x128xf32>
    %136 = arith.addf %131, %135 : vector<36x128xf32>
    %c4_105 = arith.constant 4 : index
    %c0_106 = arith.constant 0 : index
    %c0_107 = arith.constant 0 : index
    %137 = vector.load %arg3[%c4_105, %c0_106, %c0_107] : memref<9x36x36xf32, #tpu.memory_space<vmem>>, vector<1x36x36xf32>
    %138 = vector.shape_cast %137 : vector<1x36x36xf32> to vector<36x36xf32>
    %139 = vector.extract_strided_slice %115 {offsets = [0, 512], sizes = [36, 128], strides = [1, 1]} : vector<36x1152xf32> to vector<36x128xf32>
    %cst_108 = arith.constant dense<0.000000e+00> : vector<36x128xf32>
    %140 = tpu.matmul %138, %139, %cst_108 {dimension_numbers = #tpu.dot_dimension_numbers<[1], [0], [0], [1], [0, 0, 1, 1], [], []>} : vector<36x36xf32>, vector<36x128xf32>, vector<36x128xf32> -> vector<36x128xf32>
    %141 = arith.addf %136, %140 : vector<36x128xf32>
    %c5_109 = arith.constant 5 : index
    %c0_110 = arith.constant 0 : index
    %c0_111 = arith.constant 0 : index
    %142 = vector.load %arg3[%c5_109, %c0_110, %c0_111] : memref<9x36x36xf32, #tpu.memory_space<vmem>>, vector<1x36x36xf32>
    %143 = vector.shape_cast %142 : vector<1x36x36xf32> to vector<36x36xf32>
    %144 = vector.extract_strided_slice %115 {offsets = [0, 640], sizes = [36, 128], strides = [1, 1]} : vector<36x1152xf32> to vector<36x128xf32>
    %cst_112 = arith.constant dense<0.000000e+00> : vector<36x128xf32>
    %145 = tpu.matmul %143, %144, %cst_112 {dimension_numbers = #tpu.dot_dimension_numbers<[1], [0], [0], [1], [0, 0, 1, 1], [], []>} : vector<36x36xf32>, vector<36x128xf32>, vector<36x128xf32> -> vector<36x128xf32>
    %146 = arith.addf %141, %145 : vector<36x128xf32>
    %c6_113 = arith.constant 6 : index
    %c0_114 = arith.constant 0 : index
    %c0_115 = arith.constant 0 : index
    %147 = vector.load %arg3[%c6_113, %c0_114, %c0_115] : memref<9x36x36xf32, #tpu.memory_space<vmem>>, vector<1x36x36xf32>
    %148 = vector.shape_cast %147 : vector<1x36x36xf32> to vector<36x36xf32>
    %149 = vector.extract_strided_slice %115 {offsets = [0, 768], sizes = [36, 128], strides = [1, 1]} : vector<36x1152xf32> to vector<36x128xf32>
    %cst_116 = arith.constant dense<0.000000e+00> : vector<36x128xf32>
    %150 = tpu.matmul %148, %149, %cst_116 {dimension_numbers = #tpu.dot_dimension_numbers<[1], [0], [0], [1], [0, 0, 1, 1], [], []>} : vector<36x36xf32>, vector<36x128xf32>, vector<36x128xf32> -> vector<36x128xf32>
    %151 = arith.addf %146, %150 : vector<36x128xf32>
    %c7_117 = arith.constant 7 : index
    %c0_118 = arith.constant 0 : index
    %c0_119 = arith.constant 0 : index
    %152 = vector.load %arg3[%c7_117, %c0_118, %c0_119] : memref<9x36x36xf32, #tpu.memory_space<vmem>>, vector<1x36x36xf32>
    %153 = vector.shape_cast %152 : vector<1x36x36xf32> to vector<36x36xf32>
    %154 = vector.extract_strided_slice %115 {offsets = [0, 896], sizes = [36, 128], strides = [1, 1]} : vector<36x1152xf32> to vector<36x128xf32>
    %cst_120 = arith.constant dense<0.000000e+00> : vector<36x128xf32>
    %155 = tpu.matmul %153, %154, %cst_120 {dimension_numbers = #tpu.dot_dimension_numbers<[1], [0], [0], [1], [0, 0, 1, 1], [], []>} : vector<36x36xf32>, vector<36x128xf32>, vector<36x128xf32> -> vector<36x128xf32>
    %156 = arith.addf %151, %155 : vector<36x128xf32>
    %c8_121 = arith.constant 8 : index
    %c0_122 = arith.constant 0 : index
    %c0_123 = arith.constant 0 : index
    %157 = vector.load %arg3[%c8_121, %c0_122, %c0_123] : memref<9x36x36xf32, #tpu.memory_space<vmem>>, vector<1x36x36xf32>
    %158 = vector.shape_cast %157 : vector<1x36x36xf32> to vector<36x36xf32>
    %159 = vector.extract_strided_slice %115 {offsets = [0, 1024], sizes = [36, 128], strides = [1, 1]} : vector<36x1152xf32> to vector<36x128xf32>
    %cst_124 = arith.constant dense<0.000000e+00> : vector<36x128xf32>
    %160 = tpu.matmul %158, %159, %cst_124 {dimension_numbers = #tpu.dot_dimension_numbers<[1], [0], [0], [1], [0, 0, 1, 1], [], []>} : vector<36x36xf32>, vector<36x128xf32>, vector<36x128xf32> -> vector<36x128xf32>
    %161 = arith.addf %156, %160 : vector<36x128xf32>
    %c0_125 = arith.constant 0 : index
    %c0_126 = arith.constant 0 : index
    %162 = vector.load %arg9[%c0_125, %c0_126] : memref<1x128xf32, #tpu.memory_space<vmem>>, vector<1x128xf32>
    %163 = vector.broadcast %162 : vector<1x128xf32> to vector<36x128xf32>
    %164 = arith.addf %161, %163 : vector<36x128xf32>
    %cst_127 = arith.constant 0.000000e+00 : f32
    %165 = vector.broadcast %cst_127 : f32 to vector<36x128xf32>
    %166 = arith.maximumf %164, %165 : vector<36x128xf32>
    %c0_128 = arith.constant 0 : index
    %c0_129 = arith.constant 0 : index
    %167 = vector.load %arg10[%c0_128, %c0_129] : memref<36x128xf32, #tpu.memory_space<vmem>>, vector<36x128xf32>
    %168 = arith.mulf %166, %167 : vector<36x128xf32>
    %cst_130 = arith.constant 1.000000e+00 : f32
    %169 = vector.broadcast %cst_130 : f32 to vector<128x1xf32>
    %cst_131 = arith.constant dense<0.000000e+00> : vector<36x1xf32>
    %170 = tpu.matmul %168, %169, %cst_131 {dimension_numbers = #tpu.dot_dimension_numbers<[1], [0], [0], [1], [0, 0, 1, 1], [], []>} : vector<36x128xf32>, vector<128x1xf32>, vector<36x1xf32> -> vector<36x1xf32>
    %c0_132 = arith.constant 0 : index
    %c0_133 = arith.constant 0 : index
    %171 = vector.load %arg12[%c0_132, %c0_133] : memref<6x36xf32, #tpu.memory_space<vmem>>, vector<6x36xf32>
    %c0_134 = arith.constant 0 : index
    %c0_135 = arith.constant 0 : index
    %172 = vector.load %arg11[%c0_134, %c0_135] : memref<36x36xf32, #tpu.memory_space<vmem>>, vector<36x36xf32>
    %173 = vector.broadcast %170 : vector<36x1xf32> to vector<36x36xf32>
    %174 = arith.mulf %173, %172 : vector<36x36xf32>
    %cst_136 = arith.constant dense<0.000000e+00> : vector<6x36xf32>
    %175 = tpu.matmul %171, %174, %cst_136 {dimension_numbers = #tpu.dot_dimension_numbers<[1], [0], [0], [1], [0, 0, 1, 1], [], []>} : vector<6x36xf32>, vector<36x36xf32>, vector<6x36xf32> -> vector<6x36xf32>
    %c0_137 = arith.constant 0 : index
    %c0_138 = arith.constant 0 : index
    %176 = vector.load %arg13[%c0_137, %c0_138] : memref<36x6xf32, #tpu.memory_space<vmem>>, vector<36x6xf32>
    %cst_139 = arith.constant dense<0.000000e+00> : vector<6x6xf32>
    %177 = tpu.matmul %175, %176, %cst_139 {dimension_numbers = #tpu.dot_dimension_numbers<[1], [0], [0], [1], [0, 0, 1, 1], [], []>} : vector<6x36xf32>, vector<36x6xf32>, vector<6x6xf32> -> vector<6x6xf32>
    %c0_140 = arith.constant 0 : index
    %c0_141 = arith.constant 0 : index
    %178 = vector.load %arg14[%c0_140, %c0_141] : memref<12x6xf32, #tpu.memory_space<vmem>>, vector<12x6xf32>
    %cst_142 = arith.constant dense<0.000000e+00> : vector<12x6xf32>
    %179 = tpu.matmul %178, %177, %cst_142 {dimension_numbers = #tpu.dot_dimension_numbers<[1], [0], [0], [1], [0, 0, 1, 1], [], []>} : vector<12x6xf32>, vector<6x6xf32>, vector<12x6xf32> -> vector<12x6xf32>
    %cst_143 = arith.constant dense<0.000000e+00> : vector<12xf32>
    %180 = vector.multi_reduction <add>, %179, %cst_143 [1] : vector<12x6xf32> to vector<12xf32>
    %181 = vector.shape_cast %180 : vector<12xf32> to vector<12x1xf32>
    %cst_144 = arith.constant 6.000000e+00 : f32
    %182 = vector.broadcast %cst_144 : f32 to vector<12x1xf32>
    %183 = arith.divf %181, %182 : vector<12x1xf32>
    %184 = vector.broadcast %183 : vector<12x1xf32> to vector<12x6xf32>
    %185 = arith.subf %179, %184 : vector<12x6xf32>
    %186 = arith.mulf %185, %185 : vector<12x6xf32>
    %cst_145 = arith.constant dense<0.000000e+00> : vector<12xf32>
    %187 = vector.multi_reduction <add>, %186, %cst_145 [1] : vector<12x6xf32> to vector<12xf32>
    %188 = vector.shape_cast %187 : vector<12xf32> to vector<12x1xf32>
    %cst_146 = arith.constant 6.000000e+00 : f32
    %189 = vector.broadcast %cst_146 : f32 to vector<12x1xf32>
    %190 = arith.divf %188, %189 : vector<12x1xf32>
    %191 = vector.broadcast %183 : vector<12x1xf32> to vector<12x6xf32>
    %192 = arith.subf %179, %191 : vector<12x6xf32>
    %cst_147 = arith.constant 9.99999974E-6 : f32
    %193 = vector.broadcast %cst_147 : f32 to vector<12x1xf32>
    %194 = arith.addf %190, %193 : vector<12x1xf32>
    %195 = math.rsqrt %194 : vector<12x1xf32>
    %196 = vector.broadcast %195 : vector<12x1xf32> to vector<12x6xf32>
    %197 = arith.mulf %192, %196 : vector<12x6xf32>
    %c0_148 = arith.constant 0 : index
    %c0_149 = arith.constant 0 : index
    %c0_150 = arith.constant 0 : index
    %198 = vector.load %arg15[%c0_148, %c0_149, %c0_150] : memref<2x6x18xf32, #tpu.memory_space<vmem>>, vector<1x6x18xf32>
    %199 = vector.shape_cast %198 : vector<1x6x18xf32> to vector<6x18xf32>
    %cst_151 = arith.constant dense<0.000000e+00> : vector<12x18xf32>
    %200 = tpu.matmul %197, %199, %cst_151 {dimension_numbers = #tpu.dot_dimension_numbers<[1], [0], [0], [1], [0, 0, 1, 1], [], []>} : vector<12x6xf32>, vector<6x18xf32>, vector<12x18xf32> -> vector<12x18xf32>
    %201 = vector.extract_strided_slice %200 {offsets = [0, 0], sizes = [4, 18], strides = [1, 1]} : vector<12x18xf32> to vector<4x18xf32>
    %202 = vector.extract_strided_slice %200 {offsets = [4, 0], sizes = [4, 18], strides = [1, 1]} : vector<12x18xf32> to vector<4x18xf32>
    %203 = vector.extract_strided_slice %200 {offsets = [8, 0], sizes = [4, 18], strides = [1, 1]} : vector<12x18xf32> to vector<4x18xf32>
    %c0_152 = arith.constant 0 : index
    %c0_153 = arith.constant 0 : index
    %204 = vector.load %arg21[%c0_152, %c0_153] : memref<4x4xf32, #tpu.memory_space<vmem>>, vector<4x4xf32>
    %cst_154 = arith.constant dense<0.000000e+00> : vector<4x18xf32>
    %205 = tpu.matmul %204, %202, %cst_154 {dimension_numbers = #tpu.dot_dimension_numbers<[1], [0], [0], [1], [0, 0, 1, 1], [], []>} : vector<4x4xf32>, vector<4x18xf32>, vector<4x18xf32> -> vector<4x18xf32>
    %c0_155 = arith.constant 0 : index
    %c0_156 = arith.constant 0 : index
    %206 = vector.load %arg22[%c0_155, %c0_156] : memref<4x4xf32, #tpu.memory_space<vmem>>, vector<4x4xf32>
    %cst_157 = arith.constant dense<0.000000e+00> : vector<4x18xf32>
    %207 = tpu.matmul %206, %202, %cst_157 {dimension_numbers = #tpu.dot_dimension_numbers<[1], [0], [0], [1], [0, 0, 1, 1], [], []>} : vector<4x4xf32>, vector<4x18xf32>, vector<4x18xf32> -> vector<4x18xf32>
    %c0_158 = arith.constant 0 : index
    %c0_159 = arith.constant 0 : index
    %208 = vector.load %arg21[%c0_158, %c0_159] : memref<4x4xf32, #tpu.memory_space<vmem>>, vector<4x4xf32>
    %cst_160 = arith.constant dense<0.000000e+00> : vector<4x18xf32>
    %209 = tpu.matmul %208, %203, %cst_160 {dimension_numbers = #tpu.dot_dimension_numbers<[1], [0], [0], [1], [0, 0, 1, 1], [], []>} : vector<4x4xf32>, vector<4x18xf32>, vector<4x18xf32> -> vector<4x18xf32>
    %c0_161 = arith.constant 0 : index
    %c0_162 = arith.constant 0 : index
    %210 = vector.load %arg22[%c0_161, %c0_162] : memref<4x4xf32, #tpu.memory_space<vmem>>, vector<4x4xf32>
    %cst_163 = arith.constant dense<0.000000e+00> : vector<4x18xf32>
    %211 = tpu.matmul %210, %203, %cst_163 {dimension_numbers = #tpu.dot_dimension_numbers<[1], [0], [0], [1], [0, 0, 1, 1], [], []>} : vector<4x4xf32>, vector<4x18xf32>, vector<4x18xf32> -> vector<4x18xf32>
    %212 = arith.mulf %201, %205 : vector<4x18xf32>
    %c0_164 = arith.constant 0 : index
    %c0_165 = arith.constant 0 : index
    %213 = vector.load %arg23[%c0_164, %c0_165] : memref<18x6xf32, #tpu.memory_space<vmem>>, vector<18x6xf32>
    %cst_166 = arith.constant dense<0.000000e+00> : vector<4x6xf32>
    %214 = tpu.matmul %212, %213, %cst_166 {dimension_numbers = #tpu.dot_dimension_numbers<[1], [0], [0], [1], [0, 0, 1, 1], [], []>} : vector<4x18xf32>, vector<18x6xf32>, vector<4x6xf32> -> vector<4x6xf32>
    %cst_167 = arith.constant 0.408248305 : f32
    %215 = vector.broadcast %cst_167 : f32 to vector<4x6xf32>
    %216 = arith.mulf %214, %215 : vector<4x6xf32>
    %217 = arith.mulf %201, %207 : vector<4x18xf32>
    %c0_168 = arith.constant 0 : index
    %c0_169 = arith.constant 0 : index
    %218 = vector.load %arg23[%c0_168, %c0_169] : memref<18x6xf32, #tpu.memory_space<vmem>>, vector<18x6xf32>
    %cst_170 = arith.constant dense<0.000000e+00> : vector<4x6xf32>
    %219 = tpu.matmul %217, %218, %cst_170 {dimension_numbers = #tpu.dot_dimension_numbers<[1], [0], [0], [1], [0, 0, 1, 1], [], []>} : vector<4x18xf32>, vector<18x6xf32>, vector<4x6xf32> -> vector<4x6xf32>
    %cst_171 = arith.constant 0.408248305 : f32
    %220 = vector.broadcast %cst_171 : f32 to vector<4x6xf32>
    %221 = arith.mulf %219, %220 : vector<4x6xf32>
    %222 = arith.maximumf %216, %221 : vector<4x6xf32>
    %223 = arith.subf %216, %222 : vector<4x6xf32>
    %224 = math.exp %223 : vector<4x6xf32>
    %225 = arith.subf %221, %222 : vector<4x6xf32>
    %226 = math.exp %225 : vector<4x6xf32>
    %227 = arith.addf %224, %226 : vector<4x6xf32>
    %cst_172 = arith.constant 1.000000e+00 : f32
    %228 = vector.broadcast %cst_172 : f32 to vector<4x6xf32>
    %229 = arith.divf %228, %227 : vector<4x6xf32>
    %230 = arith.mulf %224, %229 : vector<4x6xf32>
    %231 = arith.mulf %226, %229 : vector<4x6xf32>
    %c0_173 = arith.constant 0 : index
    %c0_174 = arith.constant 0 : index
    %232 = vector.load %arg24[%c0_173, %c0_174] : memref<6x18xf32, #tpu.memory_space<vmem>>, vector<6x18xf32>
    %cst_175 = arith.constant dense<0.000000e+00> : vector<4x18xf32>
    %233 = tpu.matmul %230, %232, %cst_175 {dimension_numbers = #tpu.dot_dimension_numbers<[1], [0], [0], [1], [0, 0, 1, 1], [], []>} : vector<4x6xf32>, vector<6x18xf32>, vector<4x18xf32> -> vector<4x18xf32>
    %234 = arith.mulf %233, %209 : vector<4x18xf32>
    %c0_176 = arith.constant 0 : index
    %c0_177 = arith.constant 0 : index
    %235 = vector.load %arg24[%c0_176, %c0_177] : memref<6x18xf32, #tpu.memory_space<vmem>>, vector<6x18xf32>
    %cst_178 = arith.constant dense<0.000000e+00> : vector<4x18xf32>
    %236 = tpu.matmul %231, %235, %cst_178 {dimension_numbers = #tpu.dot_dimension_numbers<[1], [0], [0], [1], [0, 0, 1, 1], [], []>} : vector<4x6xf32>, vector<6x18xf32>, vector<4x18xf32> -> vector<4x18xf32>
    %237 = arith.mulf %236, %211 : vector<4x18xf32>
    %238 = arith.addf %234, %237 : vector<4x18xf32>
    %c0_179 = arith.constant 0 : index
    %c0_180 = arith.constant 0 : index
    %c0_181 = arith.constant 0 : index
    %239 = vector.load %arg16[%c0_179, %c0_180, %c0_181] : memref<2x6x6xf32, #tpu.memory_space<vmem>>, vector<1x6x6xf32>
    %240 = vector.shape_cast %239 : vector<1x6x6xf32> to vector<6x6xf32>
    %c0_182 = arith.constant 0 : index
    %c0_183 = arith.constant 0 : index
    %c0_184 = arith.constant 0 : index
    %241 = vector.load %arg17[%c0_182, %c0_183, %c0_184] : memref<2x6x24xf32, #tpu.memory_space<vmem>>, vector<1x6x24xf32>
    %242 = vector.shape_cast %241 : vector<1x6x24xf32> to vector<6x24xf32>
    %c0_185 = arith.constant 0 : index
    %c0_186 = arith.constant 0 : index
    %c0_187 = arith.constant 0 : index
    %243 = vector.load %arg18[%c0_185, %c0_186, %c0_187] : memref<2x1x24xf32, #tpu.memory_space<vmem>>, vector<1x1x24xf32>
    %244 = vector.shape_cast %243 : vector<1x1x24xf32> to vector<1x24xf32>
    %c0_188 = arith.constant 0 : index
    %c0_189 = arith.constant 0 : index
    %c0_190 = arith.constant 0 : index
    %245 = vector.load %arg19[%c0_188, %c0_189, %c0_190] : memref<2x24x6xf32, #tpu.memory_space<vmem>>, vector<1x24x6xf32>
    %246 = vector.shape_cast %245 : vector<1x24x6xf32> to vector<24x6xf32>
    %c0_191 = arith.constant 0 : index
    %c0_192 = arith.constant 0 : index
    %c0_193 = arith.constant 0 : index
    %247 = vector.load %arg20[%c0_191, %c0_192, %c0_193] : memref<2x1x6xf32, #tpu.memory_space<vmem>>, vector<1x1x6xf32>
    %248 = vector.shape_cast %247 : vector<1x1x6xf32> to vector<1x6xf32>
    %cst_194 = arith.constant 0.000000e+00 : f32
    %249 = vector.broadcast %cst_194 : f32 to vector<12x6xf32>
    %250 = vector.extract_strided_slice %179 {offsets = [0, 0], sizes = [4, 6], strides = [1, 1]} : vector<12x6xf32> to vector<4x6xf32>
    %cst_195 = arith.constant 0.000000e+00 : f32
    %251 = vector.broadcast %cst_195 : f32 to vector<4x6xf32>
    %252 = vector.extract_strided_slice %238 {offsets = [0, 0], sizes = [4, 3], strides = [1, 1]} : vector<4x18xf32> to vector<4x3xf32>
    %253 = vector.extract_strided_slice %252 {offsets = [0, 0], sizes = [2, 3], strides = [1, 1]} : vector<4x3xf32> to vector<2x3xf32>
    %254 = vector.extract_strided_slice %252 {offsets = [2, 0], sizes = [2, 3], strides = [1, 1]} : vector<4x3xf32> to vector<2x3xf32>
    %255 = tpu.concatenate %253, %254 in 1 : vector<2x3xf32>, vector<2x3xf32> -> vector<2x6xf32>
    %cst_196 = arith.constant dense<0.000000e+00> : vector<2x6xf32>
    %256 = tpu.matmul %255, %240, %cst_196 {dimension_numbers = #tpu.dot_dimension_numbers<[1], [0], [0], [1], [0, 0, 1, 1], [], []>} : vector<2x6xf32>, vector<6x6xf32>, vector<2x6xf32> -> vector<2x6xf32>
    %c0_197 = arith.constant 0 : index
    %c0_198 = arith.constant 0 : index
    %c0_199 = arith.constant 0 : index
    %257 = vector.load %arg25[%c0_197, %c0_198, %c0_199] : memref<2x2x4xf32, #tpu.memory_space<vmem>>, vector<1x2x4xf32>
    %258 = vector.shape_cast %257 : vector<1x2x4xf32> to vector<2x4xf32>
    %cst_200 = arith.constant dense<0.000000e+00> : vector<2x6xf32>
    %259 = tpu.matmul %258, %250, %cst_200 {dimension_numbers = #tpu.dot_dimension_numbers<[1], [0], [0], [1], [0, 0, 1, 1], [], []>} : vector<2x4xf32>, vector<4x6xf32>, vector<2x6xf32> -> vector<2x6xf32>
    %260 = arith.addf %256, %259 : vector<2x6xf32>
    %cst_201 = arith.constant dense<0.000000e+00> : vector<2xf32>
    %261 = vector.multi_reduction <add>, %260, %cst_201 [1] : vector<2x6xf32> to vector<2xf32>
    %262 = vector.shape_cast %261 : vector<2xf32> to vector<2x1xf32>
    %cst_202 = arith.constant 6.000000e+00 : f32
    %263 = vector.broadcast %cst_202 : f32 to vector<2x1xf32>
    %264 = arith.divf %262, %263 : vector<2x1xf32>
    %265 = vector.broadcast %264 : vector<2x1xf32> to vector<2x6xf32>
    %266 = arith.subf %260, %265 : vector<2x6xf32>
    %267 = arith.mulf %266, %266 : vector<2x6xf32>
    %cst_203 = arith.constant dense<0.000000e+00> : vector<2xf32>
    %268 = vector.multi_reduction <add>, %267, %cst_203 [1] : vector<2x6xf32> to vector<2xf32>
    %269 = vector.shape_cast %268 : vector<2xf32> to vector<2x1xf32>
    %cst_204 = arith.constant 6.000000e+00 : f32
    %270 = vector.broadcast %cst_204 : f32 to vector<2x1xf32>
    %271 = arith.divf %269, %270 : vector<2x1xf32>
    %272 = vector.broadcast %264 : vector<2x1xf32> to vector<2x6xf32>
    %273 = arith.subf %260, %272 : vector<2x6xf32>
    %cst_205 = arith.constant 9.99999974E-6 : f32
    %274 = vector.broadcast %cst_205 : f32 to vector<2x1xf32>
    %275 = arith.addf %271, %274 : vector<2x1xf32>
    %276 = math.rsqrt %275 : vector<2x1xf32>
    %277 = vector.broadcast %276 : vector<2x1xf32> to vector<2x6xf32>
    %278 = arith.mulf %273, %277 : vector<2x6xf32>
    %c0_206 = arith.constant 0 : index
    %c0_207 = arith.constant 0 : index
    %c0_208 = arith.constant 0 : index
    %279 = vector.load %arg26[%c0_206, %c0_207, %c0_208] : memref<2x4x2xf32, #tpu.memory_space<vmem>>, vector<1x4x2xf32>
    %280 = vector.shape_cast %279 : vector<1x4x2xf32> to vector<4x2xf32>
    %cst_209 = arith.constant dense<0.000000e+00> : vector<4x6xf32>
    %281 = tpu.matmul %280, %278, %cst_209 {dimension_numbers = #tpu.dot_dimension_numbers<[1], [0], [0], [1], [0, 0, 1, 1], [], []>} : vector<4x2xf32>, vector<2x6xf32>, vector<4x6xf32> -> vector<4x6xf32>
    %282 = arith.addf %251, %281 : vector<4x6xf32>
    %283 = vector.extract_strided_slice %238 {offsets = [0, 3], sizes = [4, 3], strides = [1, 1]} : vector<4x18xf32> to vector<4x3xf32>
    %284 = vector.extract_strided_slice %283 {offsets = [0, 0], sizes = [2, 3], strides = [1, 1]} : vector<4x3xf32> to vector<2x3xf32>
    %285 = vector.extract_strided_slice %283 {offsets = [2, 0], sizes = [2, 3], strides = [1, 1]} : vector<4x3xf32> to vector<2x3xf32>
    %286 = tpu.concatenate %284, %285 in 1 : vector<2x3xf32>, vector<2x3xf32> -> vector<2x6xf32>
    %cst_210 = arith.constant dense<0.000000e+00> : vector<2x6xf32>
    %287 = tpu.matmul %286, %240, %cst_210 {dimension_numbers = #tpu.dot_dimension_numbers<[1], [0], [0], [1], [0, 0, 1, 1], [], []>} : vector<2x6xf32>, vector<6x6xf32>, vector<2x6xf32> -> vector<2x6xf32>
    %c1_211 = arith.constant 1 : index
    %c0_212 = arith.constant 0 : index
    %c0_213 = arith.constant 0 : index
    %288 = vector.load %arg25[%c1_211, %c0_212, %c0_213] : memref<2x2x4xf32, #tpu.memory_space<vmem>>, vector<1x2x4xf32>
    %289 = vector.shape_cast %288 : vector<1x2x4xf32> to vector<2x4xf32>
    %cst_214 = arith.constant dense<0.000000e+00> : vector<2x6xf32>
    %290 = tpu.matmul %289, %250, %cst_214 {dimension_numbers = #tpu.dot_dimension_numbers<[1], [0], [0], [1], [0, 0, 1, 1], [], []>} : vector<2x4xf32>, vector<4x6xf32>, vector<2x6xf32> -> vector<2x6xf32>
    %291 = arith.addf %287, %290 : vector<2x6xf32>
    %cst_215 = arith.constant dense<0.000000e+00> : vector<2xf32>
    %292 = vector.multi_reduction <add>, %291, %cst_215 [1] : vector<2x6xf32> to vector<2xf32>
    %293 = vector.shape_cast %292 : vector<2xf32> to vector<2x1xf32>
    %cst_216 = arith.constant 6.000000e+00 : f32
    %294 = vector.broadcast %cst_216 : f32 to vector<2x1xf32>
    %295 = arith.divf %293, %294 : vector<2x1xf32>
    %296 = vector.broadcast %295 : vector<2x1xf32> to vector<2x6xf32>
    %297 = arith.subf %291, %296 : vector<2x6xf32>
    %298 = arith.mulf %297, %297 : vector<2x6xf32>
    %cst_217 = arith.constant dense<0.000000e+00> : vector<2xf32>
    %299 = vector.multi_reduction <add>, %298, %cst_217 [1] : vector<2x6xf32> to vector<2xf32>
    %300 = vector.shape_cast %299 : vector<2xf32> to vector<2x1xf32>
    %cst_218 = arith.constant 6.000000e+00 : f32
    %301 = vector.broadcast %cst_218 : f32 to vector<2x1xf32>
    %302 = arith.divf %300, %301 : vector<2x1xf32>
    %303 = vector.broadcast %295 : vector<2x1xf32> to vector<2x6xf32>
    %304 = arith.subf %291, %303 : vector<2x6xf32>
    %cst_219 = arith.constant 9.99999974E-6 : f32
    %305 = vector.broadcast %cst_219 : f32 to vector<2x1xf32>
    %306 = arith.addf %302, %305 : vector<2x1xf32>
    %307 = math.rsqrt %306 : vector<2x1xf32>
    %308 = vector.broadcast %307 : vector<2x1xf32> to vector<2x6xf32>
    %309 = arith.mulf %304, %308 : vector<2x6xf32>
    %c1_220 = arith.constant 1 : index
    %c0_221 = arith.constant 0 : index
    %c0_222 = arith.constant 0 : index
    %310 = vector.load %arg26[%c1_220, %c0_221, %c0_222] : memref<2x4x2xf32, #tpu.memory_space<vmem>>, vector<1x4x2xf32>
    %311 = vector.shape_cast %310 : vector<1x4x2xf32> to vector<4x2xf32>
    %cst_223 = arith.constant dense<0.000000e+00> : vector<4x6xf32>
    %312 = tpu.matmul %311, %309, %cst_223 {dimension_numbers = #tpu.dot_dimension_numbers<[1], [0], [0], [1], [0, 0, 1, 1], [], []>} : vector<4x2xf32>, vector<2x6xf32>, vector<4x6xf32> -> vector<4x6xf32>
    %313 = arith.addf %282, %312 : vector<4x6xf32>
    %cst_224 = arith.constant dense<0.000000e+00> : vector<4x24xf32>
    %314 = tpu.matmul %313, %242, %cst_224 {dimension_numbers = #tpu.dot_dimension_numbers<[1], [0], [0], [1], [0, 0, 1, 1], [], []>} : vector<4x6xf32>, vector<6x24xf32>, vector<4x24xf32> -> vector<4x24xf32>
    %315 = vector.broadcast %244 : vector<1x24xf32> to vector<4x24xf32>
    %316 = arith.addf %314, %315 : vector<4x24xf32>
    %cst_225 = arith.constant 5.000000e-01 : f32
    %317 = vector.broadcast %cst_225 : f32 to vector<4x24xf32>
    %318 = arith.mulf %317, %316 : vector<4x24xf32>
    %cst_226 = arith.constant 0.707106769 : f32
    %319 = vector.broadcast %cst_226 : f32 to vector<4x24xf32>
    %320 = arith.mulf %316, %319 : vector<4x24xf32>
    %cst_227 = arith.constant 0.000000e+00 : f32
    %321 = vector.broadcast %cst_227 : f32 to vector<4x24xf32>
    %322 = arith.cmpf oge, %320, %321 : vector<4x24xf32>
    %cst_228 = arith.constant 1.000000e+00 : f32
    %cst_229 = arith.constant -1.000000e+00 : f32
    %323 = vector.broadcast %cst_228 : f32 to vector<4x24xf32>
    %324 = vector.broadcast %cst_229 : f32 to vector<4x24xf32>
    %325 = arith.select %322, %323, %324 : vector<4x24xi1>, vector<4x24xf32>
    %326 = math.absf %320 : vector<4x24xf32>
    %cst_230 = arith.constant 0.327591091 : f32
    %327 = vector.broadcast %cst_230 : f32 to vector<4x24xf32>
    %328 = arith.mulf %327, %326 : vector<4x24xf32>
    %cst_231 = arith.constant 1.000000e+00 : f32
    %329 = vector.broadcast %cst_231 : f32 to vector<4x24xf32>
    %330 = arith.addf %329, %328 : vector<4x24xf32>
    %cst_232 = arith.constant 1.000000e+00 : f32
    %331 = vector.broadcast %cst_232 : f32 to vector<4x24xf32>
    %332 = arith.divf %331, %330 : vector<4x24xf32>
    %cst_233 = arith.constant 1.06140542 : f32
    %333 = vector.broadcast %cst_233 : f32 to vector<4x24xf32>
    %334 = arith.mulf %332, %333 : vector<4x24xf32>
    %cst_234 = arith.constant -1.45315206 : f32
    %335 = vector.broadcast %cst_234 : f32 to vector<4x24xf32>
    %336 = arith.addf %335, %334 : vector<4x24xf32>
    %337 = arith.mulf %332, %336 : vector<4x24xf32>
    %cst_235 = arith.constant 1.42141378 : f32
    %338 = vector.broadcast %cst_235 : f32 to vector<4x24xf32>
    %339 = arith.addf %338, %337 : vector<4x24xf32>
    %340 = arith.mulf %332, %339 : vector<4x24xf32>
    %cst_236 = arith.constant -0.284496725 : f32
    %341 = vector.broadcast %cst_236 : f32 to vector<4x24xf32>
    %342 = arith.addf %341, %340 : vector<4x24xf32>
    %343 = arith.mulf %332, %342 : vector<4x24xf32>
    %cst_237 = arith.constant 0.254829586 : f32
    %344 = vector.broadcast %cst_237 : f32 to vector<4x24xf32>
    %345 = arith.addf %344, %343 : vector<4x24xf32>
    %346 = arith.mulf %332, %345 : vector<4x24xf32>
    %cst_238 = arith.constant 0.000000e+00 : f32
    %347 = vector.broadcast %cst_238 : f32 to vector<4x24xf32>
    %348 = arith.subf %347, %326 : vector<4x24xf32>
    %349 = arith.mulf %348, %326 : vector<4x24xf32>
    %350 = math.exp %349 : vector<4x24xf32>
    %351 = arith.mulf %346, %350 : vector<4x24xf32>
    %cst_239 = arith.constant 1.000000e+00 : f32
    %352 = vector.broadcast %cst_239 : f32 to vector<4x24xf32>
    %353 = arith.subf %352, %351 : vector<4x24xf32>
    %354 = arith.mulf %325, %353 : vector<4x24xf32>
    %cst_240 = arith.constant 1.000000e+00 : f32
    %355 = vector.broadcast %cst_240 : f32 to vector<4x24xf32>
    %356 = arith.addf %355, %354 : vector<4x24xf32>
    %357 = arith.mulf %318, %356 : vector<4x24xf32>
    %cst_241 = arith.constant dense<0.000000e+00> : vector<4x6xf32>
    %358 = tpu.matmul %357, %246, %cst_241 {dimension_numbers = #tpu.dot_dimension_numbers<[1], [0], [0], [1], [0, 0, 1, 1], [], []>} : vector<4x24xf32>, vector<24x6xf32>, vector<4x6xf32> -> vector<4x6xf32>
    %359 = arith.addf %313, %358 : vector<4x6xf32>
    %360 = vector.broadcast %248 : vector<1x6xf32> to vector<4x6xf32>
    %361 = arith.addf %359, %360 : vector<4x6xf32>
    %c0_242 = arith.constant 0 : index
    %c0_243 = arith.constant 0 : index
    %c0_244 = arith.constant 0 : index
    %362 = vector.load %arg27[%c0_242, %c0_243, %c0_244] : memref<3x12x4xf32, #tpu.memory_space<vmem>>, vector<1x12x4xf32>
    %363 = vector.shape_cast %362 : vector<1x12x4xf32> to vector<12x4xf32>
    %cst_245 = arith.constant dense<0.000000e+00> : vector<12x6xf32>
    %364 = tpu.matmul %363, %361, %cst_245 {dimension_numbers = #tpu.dot_dimension_numbers<[1], [0], [0], [1], [0, 0, 1, 1], [], []>} : vector<12x4xf32>, vector<4x6xf32>, vector<12x6xf32> -> vector<12x6xf32>
    %365 = arith.addf %249, %364 : vector<12x6xf32>
    %366 = vector.extract_strided_slice %179 {offsets = [4, 0], sizes = [4, 6], strides = [1, 1]} : vector<12x6xf32> to vector<4x6xf32>
    %cst_246 = arith.constant 0.000000e+00 : f32
    %367 = vector.broadcast %cst_246 : f32 to vector<4x6xf32>
    %368 = vector.extract_strided_slice %238 {offsets = [0, 6], sizes = [4, 3], strides = [1, 1]} : vector<4x18xf32> to vector<4x3xf32>
    %369 = vector.extract_strided_slice %368 {offsets = [0, 0], sizes = [2, 3], strides = [1, 1]} : vector<4x3xf32> to vector<2x3xf32>
    %370 = vector.extract_strided_slice %368 {offsets = [2, 0], sizes = [2, 3], strides = [1, 1]} : vector<4x3xf32> to vector<2x3xf32>
    %371 = tpu.concatenate %369, %370 in 1 : vector<2x3xf32>, vector<2x3xf32> -> vector<2x6xf32>
    %cst_247 = arith.constant dense<0.000000e+00> : vector<2x6xf32>
    %372 = tpu.matmul %371, %240, %cst_247 {dimension_numbers = #tpu.dot_dimension_numbers<[1], [0], [0], [1], [0, 0, 1, 1], [], []>} : vector<2x6xf32>, vector<6x6xf32>, vector<2x6xf32> -> vector<2x6xf32>
    %c0_248 = arith.constant 0 : index
    %c0_249 = arith.constant 0 : index
    %c0_250 = arith.constant 0 : index
    %373 = vector.load %arg25[%c0_248, %c0_249, %c0_250] : memref<2x2x4xf32, #tpu.memory_space<vmem>>, vector<1x2x4xf32>
    %374 = vector.shape_cast %373 : vector<1x2x4xf32> to vector<2x4xf32>
    %cst_251 = arith.constant dense<0.000000e+00> : vector<2x6xf32>
    %375 = tpu.matmul %374, %366, %cst_251 {dimension_numbers = #tpu.dot_dimension_numbers<[1], [0], [0], [1], [0, 0, 1, 1], [], []>} : vector<2x4xf32>, vector<4x6xf32>, vector<2x6xf32> -> vector<2x6xf32>
    %376 = arith.addf %372, %375 : vector<2x6xf32>
    %cst_252 = arith.constant dense<0.000000e+00> : vector<2xf32>
    %377 = vector.multi_reduction <add>, %376, %cst_252 [1] : vector<2x6xf32> to vector<2xf32>
    %378 = vector.shape_cast %377 : vector<2xf32> to vector<2x1xf32>
    %cst_253 = arith.constant 6.000000e+00 : f32
    %379 = vector.broadcast %cst_253 : f32 to vector<2x1xf32>
    %380 = arith.divf %378, %379 : vector<2x1xf32>
    %381 = vector.broadcast %380 : vector<2x1xf32> to vector<2x6xf32>
    %382 = arith.subf %376, %381 : vector<2x6xf32>
    %383 = arith.mulf %382, %382 : vector<2x6xf32>
    %cst_254 = arith.constant dense<0.000000e+00> : vector<2xf32>
    %384 = vector.multi_reduction <add>, %383, %cst_254 [1] : vector<2x6xf32> to vector<2xf32>
    %385 = vector.shape_cast %384 : vector<2xf32> to vector<2x1xf32>
    %cst_255 = arith.constant 6.000000e+00 : f32
    %386 = vector.broadcast %cst_255 : f32 to vector<2x1xf32>
    %387 = arith.divf %385, %386 : vector<2x1xf32>
    %388 = vector.broadcast %380 : vector<2x1xf32> to vector<2x6xf32>
    %389 = arith.subf %376, %388 : vector<2x6xf32>
    %cst_256 = arith.constant 9.99999974E-6 : f32
    %390 = vector.broadcast %cst_256 : f32 to vector<2x1xf32>
    %391 = arith.addf %387, %390 : vector<2x1xf32>
    %392 = math.rsqrt %391 : vector<2x1xf32>
    %393 = vector.broadcast %392 : vector<2x1xf32> to vector<2x6xf32>
    %394 = arith.mulf %389, %393 : vector<2x6xf32>
    %c0_257 = arith.constant 0 : index
    %c0_258 = arith.constant 0 : index
    %c0_259 = arith.constant 0 : index
    %395 = vector.load %arg26[%c0_257, %c0_258, %c0_259] : memref<2x4x2xf32, #tpu.memory_space<vmem>>, vector<1x4x2xf32>
    %396 = vector.shape_cast %395 : vector<1x4x2xf32> to vector<4x2xf32>
    %cst_260 = arith.constant dense<0.000000e+00> : vector<4x6xf32>
    %397 = tpu.matmul %396, %394, %cst_260 {dimension_numbers = #tpu.dot_dimension_numbers<[1], [0], [0], [1], [0, 0, 1, 1], [], []>} : vector<4x2xf32>, vector<2x6xf32>, vector<4x6xf32> -> vector<4x6xf32>
    %398 = arith.addf %367, %397 : vector<4x6xf32>
    %399 = vector.extract_strided_slice %238 {offsets = [0, 9], sizes = [4, 3], strides = [1, 1]} : vector<4x18xf32> to vector<4x3xf32>
    %400 = vector.extract_strided_slice %399 {offsets = [0, 0], sizes = [2, 3], strides = [1, 1]} : vector<4x3xf32> to vector<2x3xf32>
    %401 = vector.extract_strided_slice %399 {offsets = [2, 0], sizes = [2, 3], strides = [1, 1]} : vector<4x3xf32> to vector<2x3xf32>
    %402 = tpu.concatenate %400, %401 in 1 : vector<2x3xf32>, vector<2x3xf32> -> vector<2x6xf32>
    %cst_261 = arith.constant dense<0.000000e+00> : vector<2x6xf32>
    %403 = tpu.matmul %402, %240, %cst_261 {dimension_numbers = #tpu.dot_dimension_numbers<[1], [0], [0], [1], [0, 0, 1, 1], [], []>} : vector<2x6xf32>, vector<6x6xf32>, vector<2x6xf32> -> vector<2x6xf32>
    %c1_262 = arith.constant 1 : index
    %c0_263 = arith.constant 0 : index
    %c0_264 = arith.constant 0 : index
    %404 = vector.load %arg25[%c1_262, %c0_263, %c0_264] : memref<2x2x4xf32, #tpu.memory_space<vmem>>, vector<1x2x4xf32>
    %405 = vector.shape_cast %404 : vector<1x2x4xf32> to vector<2x4xf32>
    %cst_265 = arith.constant dense<0.000000e+00> : vector<2x6xf32>
    %406 = tpu.matmul %405, %366, %cst_265 {dimension_numbers = #tpu.dot_dimension_numbers<[1], [0], [0], [1], [0, 0, 1, 1], [], []>} : vector<2x4xf32>, vector<4x6xf32>, vector<2x6xf32> -> vector<2x6xf32>
    %407 = arith.addf %403, %406 : vector<2x6xf32>
    %cst_266 = arith.constant dense<0.000000e+00> : vector<2xf32>
    %408 = vector.multi_reduction <add>, %407, %cst_266 [1] : vector<2x6xf32> to vector<2xf32>
    %409 = vector.shape_cast %408 : vector<2xf32> to vector<2x1xf32>
    %cst_267 = arith.constant 6.000000e+00 : f32
    %410 = vector.broadcast %cst_267 : f32 to vector<2x1xf32>
    %411 = arith.divf %409, %410 : vector<2x1xf32>
    %412 = vector.broadcast %411 : vector<2x1xf32> to vector<2x6xf32>
    %413 = arith.subf %407, %412 : vector<2x6xf32>
    %414 = arith.mulf %413, %413 : vector<2x6xf32>
    %cst_268 = arith.constant dense<0.000000e+00> : vector<2xf32>
    %415 = vector.multi_reduction <add>, %414, %cst_268 [1] : vector<2x6xf32> to vector<2xf32>
    %416 = vector.shape_cast %415 : vector<2xf32> to vector<2x1xf32>
    %cst_269 = arith.constant 6.000000e+00 : f32
    %417 = vector.broadcast %cst_269 : f32 to vector<2x1xf32>
    %418 = arith.divf %416, %417 : vector<2x1xf32>
    %419 = vector.broadcast %411 : vector<2x1xf32> to vector<2x6xf32>
    %420 = arith.subf %407, %419 : vector<2x6xf32>
    %cst_270 = arith.constant 9.99999974E-6 : f32
    %421 = vector.broadcast %cst_270 : f32 to vector<2x1xf32>
    %422 = arith.addf %418, %421 : vector<2x1xf32>
    %423 = math.rsqrt %422 : vector<2x1xf32>
    %424 = vector.broadcast %423 : vector<2x1xf32> to vector<2x6xf32>
    %425 = arith.mulf %420, %424 : vector<2x6xf32>
    %c1_271 = arith.constant 1 : index
    %c0_272 = arith.constant 0 : index
    %c0_273 = arith.constant 0 : index
    %426 = vector.load %arg26[%c1_271, %c0_272, %c0_273] : memref<2x4x2xf32, #tpu.memory_space<vmem>>, vector<1x4x2xf32>
    %427 = vector.shape_cast %426 : vector<1x4x2xf32> to vector<4x2xf32>
    %cst_274 = arith.constant dense<0.000000e+00> : vector<4x6xf32>
    %428 = tpu.matmul %427, %425, %cst_274 {dimension_numbers = #tpu.dot_dimension_numbers<[1], [0], [0], [1], [0, 0, 1, 1], [], []>} : vector<4x2xf32>, vector<2x6xf32>, vector<4x6xf32> -> vector<4x6xf32>
    %429 = arith.addf %398, %428 : vector<4x6xf32>
    %cst_275 = arith.constant dense<0.000000e+00> : vector<4x24xf32>
    %430 = tpu.matmul %429, %242, %cst_275 {dimension_numbers = #tpu.dot_dimension_numbers<[1], [0], [0], [1], [0, 0, 1, 1], [], []>} : vector<4x6xf32>, vector<6x24xf32>, vector<4x24xf32> -> vector<4x24xf32>
    %431 = vector.broadcast %244 : vector<1x24xf32> to vector<4x24xf32>
    %432 = arith.addf %430, %431 : vector<4x24xf32>
    %cst_276 = arith.constant 5.000000e-01 : f32
    %433 = vector.broadcast %cst_276 : f32 to vector<4x24xf32>
    %434 = arith.mulf %433, %432 : vector<4x24xf32>
    %cst_277 = arith.constant 0.707106769 : f32
    %435 = vector.broadcast %cst_277 : f32 to vector<4x24xf32>
    %436 = arith.mulf %432, %435 : vector<4x24xf32>
    %cst_278 = arith.constant 0.000000e+00 : f32
    %437 = vector.broadcast %cst_278 : f32 to vector<4x24xf32>
    %438 = arith.cmpf oge, %436, %437 : vector<4x24xf32>
    %cst_279 = arith.constant 1.000000e+00 : f32
    %cst_280 = arith.constant -1.000000e+00 : f32
    %439 = vector.broadcast %cst_279 : f32 to vector<4x24xf32>
    %440 = vector.broadcast %cst_280 : f32 to vector<4x24xf32>
    %441 = arith.select %438, %439, %440 : vector<4x24xi1>, vector<4x24xf32>
    %442 = math.absf %436 : vector<4x24xf32>
    %cst_281 = arith.constant 0.327591091 : f32
    %443 = vector.broadcast %cst_281 : f32 to vector<4x24xf32>
    %444 = arith.mulf %443, %442 : vector<4x24xf32>
    %cst_282 = arith.constant 1.000000e+00 : f32
    %445 = vector.broadcast %cst_282 : f32 to vector<4x24xf32>
    %446 = arith.addf %445, %444 : vector<4x24xf32>
    %cst_283 = arith.constant 1.000000e+00 : f32
    %447 = vector.broadcast %cst_283 : f32 to vector<4x24xf32>
    %448 = arith.divf %447, %446 : vector<4x24xf32>
    %cst_284 = arith.constant 1.06140542 : f32
    %449 = vector.broadcast %cst_284 : f32 to vector<4x24xf32>
    %450 = arith.mulf %448, %449 : vector<4x24xf32>
    %cst_285 = arith.constant -1.45315206 : f32
    %451 = vector.broadcast %cst_285 : f32 to vector<4x24xf32>
    %452 = arith.addf %451, %450 : vector<4x24xf32>
    %453 = arith.mulf %448, %452 : vector<4x24xf32>
    %cst_286 = arith.constant 1.42141378 : f32
    %454 = vector.broadcast %cst_286 : f32 to vector<4x24xf32>
    %455 = arith.addf %454, %453 : vector<4x24xf32>
    %456 = arith.mulf %448, %455 : vector<4x24xf32>
    %cst_287 = arith.constant -0.284496725 : f32
    %457 = vector.broadcast %cst_287 : f32 to vector<4x24xf32>
    %458 = arith.addf %457, %456 : vector<4x24xf32>
    %459 = arith.mulf %448, %458 : vector<4x24xf32>
    %cst_288 = arith.constant 0.254829586 : f32
    %460 = vector.broadcast %cst_288 : f32 to vector<4x24xf32>
    %461 = arith.addf %460, %459 : vector<4x24xf32>
    %462 = arith.mulf %448, %461 : vector<4x24xf32>
    %cst_289 = arith.constant 0.000000e+00 : f32
    %463 = vector.broadcast %cst_289 : f32 to vector<4x24xf32>
    %464 = arith.subf %463, %442 : vector<4x24xf32>
    %465 = arith.mulf %464, %442 : vector<4x24xf32>
    %466 = math.exp %465 : vector<4x24xf32>
    %467 = arith.mulf %462, %466 : vector<4x24xf32>
    %cst_290 = arith.constant 1.000000e+00 : f32
    %468 = vector.broadcast %cst_290 : f32 to vector<4x24xf32>
    %469 = arith.subf %468, %467 : vector<4x24xf32>
    %470 = arith.mulf %441, %469 : vector<4x24xf32>
    %cst_291 = arith.constant 1.000000e+00 : f32
    %471 = vector.broadcast %cst_291 : f32 to vector<4x24xf32>
    %472 = arith.addf %471, %470 : vector<4x24xf32>
    %473 = arith.mulf %434, %472 : vector<4x24xf32>
    %cst_292 = arith.constant dense<0.000000e+00> : vector<4x6xf32>
    %474 = tpu.matmul %473, %246, %cst_292 {dimension_numbers = #tpu.dot_dimension_numbers<[1], [0], [0], [1], [0, 0, 1, 1], [], []>} : vector<4x24xf32>, vector<24x6xf32>, vector<4x6xf32> -> vector<4x6xf32>
    %475 = arith.addf %429, %474 : vector<4x6xf32>
    %476 = vector.broadcast %248 : vector<1x6xf32> to vector<4x6xf32>
    %477 = arith.addf %475, %476 : vector<4x6xf32>
    %c1_293 = arith.constant 1 : index
    %c0_294 = arith.constant 0 : index
    %c0_295 = arith.constant 0 : index
    %478 = vector.load %arg27[%c1_293, %c0_294, %c0_295] : memref<3x12x4xf32, #tpu.memory_space<vmem>>, vector<1x12x4xf32>
    %479 = vector.shape_cast %478 : vector<1x12x4xf32> to vector<12x4xf32>
    %cst_296 = arith.constant dense<0.000000e+00> : vector<12x6xf32>
    %480 = tpu.matmul %479, %477, %cst_296 {dimension_numbers = #tpu.dot_dimension_numbers<[1], [0], [0], [1], [0, 0, 1, 1], [], []>} : vector<12x4xf32>, vector<4x6xf32>, vector<12x6xf32> -> vector<12x6xf32>
    %481 = arith.addf %365, %480 : vector<12x6xf32>
    %482 = vector.extract_strided_slice %179 {offsets = [8, 0], sizes = [4, 6], strides = [1, 1]} : vector<12x6xf32> to vector<4x6xf32>
    %cst_297 = arith.constant 0.000000e+00 : f32
    %483 = vector.broadcast %cst_297 : f32 to vector<4x6xf32>
    %484 = vector.extract_strided_slice %238 {offsets = [0, 12], sizes = [4, 3], strides = [1, 1]} : vector<4x18xf32> to vector<4x3xf32>
    %485 = vector.extract_strided_slice %484 {offsets = [0, 0], sizes = [2, 3], strides = [1, 1]} : vector<4x3xf32> to vector<2x3xf32>
    %486 = vector.extract_strided_slice %484 {offsets = [2, 0], sizes = [2, 3], strides = [1, 1]} : vector<4x3xf32> to vector<2x3xf32>
    %487 = tpu.concatenate %485, %486 in 1 : vector<2x3xf32>, vector<2x3xf32> -> vector<2x6xf32>
    %cst_298 = arith.constant dense<0.000000e+00> : vector<2x6xf32>
    %488 = tpu.matmul %487, %240, %cst_298 {dimension_numbers = #tpu.dot_dimension_numbers<[1], [0], [0], [1], [0, 0, 1, 1], [], []>} : vector<2x6xf32>, vector<6x6xf32>, vector<2x6xf32> -> vector<2x6xf32>
    %c0_299 = arith.constant 0 : index
    %c0_300 = arith.constant 0 : index
    %c0_301 = arith.constant 0 : index
    %489 = vector.load %arg25[%c0_299, %c0_300, %c0_301] : memref<2x2x4xf32, #tpu.memory_space<vmem>>, vector<1x2x4xf32>
    %490 = vector.shape_cast %489 : vector<1x2x4xf32> to vector<2x4xf32>
    %cst_302 = arith.constant dense<0.000000e+00> : vector<2x6xf32>
    %491 = tpu.matmul %490, %482, %cst_302 {dimension_numbers = #tpu.dot_dimension_numbers<[1], [0], [0], [1], [0, 0, 1, 1], [], []>} : vector<2x4xf32>, vector<4x6xf32>, vector<2x6xf32> -> vector<2x6xf32>
    %492 = arith.addf %488, %491 : vector<2x6xf32>
    %cst_303 = arith.constant dense<0.000000e+00> : vector<2xf32>
    %493 = vector.multi_reduction <add>, %492, %cst_303 [1] : vector<2x6xf32> to vector<2xf32>
    %494 = vector.shape_cast %493 : vector<2xf32> to vector<2x1xf32>
    %cst_304 = arith.constant 6.000000e+00 : f32
    %495 = vector.broadcast %cst_304 : f32 to vector<2x1xf32>
    %496 = arith.divf %494, %495 : vector<2x1xf32>
    %497 = vector.broadcast %496 : vector<2x1xf32> to vector<2x6xf32>
    %498 = arith.subf %492, %497 : vector<2x6xf32>
    %499 = arith.mulf %498, %498 : vector<2x6xf32>
    %cst_305 = arith.constant dense<0.000000e+00> : vector<2xf32>
    %500 = vector.multi_reduction <add>, %499, %cst_305 [1] : vector<2x6xf32> to vector<2xf32>
    %501 = vector.shape_cast %500 : vector<2xf32> to vector<2x1xf32>
    %cst_306 = arith.constant 6.000000e+00 : f32
    %502 = vector.broadcast %cst_306 : f32 to vector<2x1xf32>
    %503 = arith.divf %501, %502 : vector<2x1xf32>
    %504 = vector.broadcast %496 : vector<2x1xf32> to vector<2x6xf32>
    %505 = arith.subf %492, %504 : vector<2x6xf32>
    %cst_307 = arith.constant 9.99999974E-6 : f32
    %506 = vector.broadcast %cst_307 : f32 to vector<2x1xf32>
    %507 = arith.addf %503, %506 : vector<2x1xf32>
    %508 = math.rsqrt %507 : vector<2x1xf32>
    %509 = vector.broadcast %508 : vector<2x1xf32> to vector<2x6xf32>
    %510 = arith.mulf %505, %509 : vector<2x6xf32>
    %c0_308 = arith.constant 0 : index
    %c0_309 = arith.constant 0 : index
    %c0_310 = arith.constant 0 : index
    %511 = vector.load %arg26[%c0_308, %c0_309, %c0_310] : memref<2x4x2xf32, #tpu.memory_space<vmem>>, vector<1x4x2xf32>
    %512 = vector.shape_cast %511 : vector<1x4x2xf32> to vector<4x2xf32>
    %cst_311 = arith.constant dense<0.000000e+00> : vector<4x6xf32>
    %513 = tpu.matmul %512, %510, %cst_311 {dimension_numbers = #tpu.dot_dimension_numbers<[1], [0], [0], [1], [0, 0, 1, 1], [], []>} : vector<4x2xf32>, vector<2x6xf32>, vector<4x6xf32> -> vector<4x6xf32>
    %514 = arith.addf %483, %513 : vector<4x6xf32>
    %515 = vector.extract_strided_slice %238 {offsets = [0, 15], sizes = [4, 3], strides = [1, 1]} : vector<4x18xf32> to vector<4x3xf32>
    %516 = vector.extract_strided_slice %515 {offsets = [0, 0], sizes = [2, 3], strides = [1, 1]} : vector<4x3xf32> to vector<2x3xf32>
    %517 = vector.extract_strided_slice %515 {offsets = [2, 0], sizes = [2, 3], strides = [1, 1]} : vector<4x3xf32> to vector<2x3xf32>
    %518 = tpu.concatenate %516, %517 in 1 : vector<2x3xf32>, vector<2x3xf32> -> vector<2x6xf32>
    %cst_312 = arith.constant dense<0.000000e+00> : vector<2x6xf32>
    %519 = tpu.matmul %518, %240, %cst_312 {dimension_numbers = #tpu.dot_dimension_numbers<[1], [0], [0], [1], [0, 0, 1, 1], [], []>} : vector<2x6xf32>, vector<6x6xf32>, vector<2x6xf32> -> vector<2x6xf32>
    %c1_313 = arith.constant 1 : index
    %c0_314 = arith.constant 0 : index
    %c0_315 = arith.constant 0 : index
    %520 = vector.load %arg25[%c1_313, %c0_314, %c0_315] : memref<2x2x4xf32, #tpu.memory_space<vmem>>, vector<1x2x4xf32>
    %521 = vector.shape_cast %520 : vector<1x2x4xf32> to vector<2x4xf32>
    %cst_316 = arith.constant dense<0.000000e+00> : vector<2x6xf32>
    %522 = tpu.matmul %521, %482, %cst_316 {dimension_numbers = #tpu.dot_dimension_numbers<[1], [0], [0], [1], [0, 0, 1, 1], [], []>} : vector<2x4xf32>, vector<4x6xf32>, vector<2x6xf32> -> vector<2x6xf32>
    %523 = arith.addf %519, %522 : vector<2x6xf32>
    %cst_317 = arith.constant dense<0.000000e+00> : vector<2xf32>
    %524 = vector.multi_reduction <add>, %523, %cst_317 [1] : vector<2x6xf32> to vector<2xf32>
    %525 = vector.shape_cast %524 : vector<2xf32> to vector<2x1xf32>
    %cst_318 = arith.constant 6.000000e+00 : f32
    %526 = vector.broadcast %cst_318 : f32 to vector<2x1xf32>
    %527 = arith.divf %525, %526 : vector<2x1xf32>
    %528 = vector.broadcast %527 : vector<2x1xf32> to vector<2x6xf32>
    %529 = arith.subf %523, %528 : vector<2x6xf32>
    %530 = arith.mulf %529, %529 : vector<2x6xf32>
    %cst_319 = arith.constant dense<0.000000e+00> : vector<2xf32>
    %531 = vector.multi_reduction <add>, %530, %cst_319 [1] : vector<2x6xf32> to vector<2xf32>
    %532 = vector.shape_cast %531 : vector<2xf32> to vector<2x1xf32>
    %cst_320 = arith.constant 6.000000e+00 : f32
    %533 = vector.broadcast %cst_320 : f32 to vector<2x1xf32>
    %534 = arith.divf %532, %533 : vector<2x1xf32>
    %535 = vector.broadcast %527 : vector<2x1xf32> to vector<2x6xf32>
    %536 = arith.subf %523, %535 : vector<2x6xf32>
    %cst_321 = arith.constant 9.99999974E-6 : f32
    %537 = vector.broadcast %cst_321 : f32 to vector<2x1xf32>
    %538 = arith.addf %534, %537 : vector<2x1xf32>
    %539 = math.rsqrt %538 : vector<2x1xf32>
    %540 = vector.broadcast %539 : vector<2x1xf32> to vector<2x6xf32>
    %541 = arith.mulf %536, %540 : vector<2x6xf32>
    %c1_322 = arith.constant 1 : index
    %c0_323 = arith.constant 0 : index
    %c0_324 = arith.constant 0 : index
    %542 = vector.load %arg26[%c1_322, %c0_323, %c0_324] : memref<2x4x2xf32, #tpu.memory_space<vmem>>, vector<1x4x2xf32>
    %543 = vector.shape_cast %542 : vector<1x4x2xf32> to vector<4x2xf32>
    %cst_325 = arith.constant dense<0.000000e+00> : vector<4x6xf32>
    %544 = tpu.matmul %543, %541, %cst_325 {dimension_numbers = #tpu.dot_dimension_numbers<[1], [0], [0], [1], [0, 0, 1, 1], [], []>} : vector<4x2xf32>, vector<2x6xf32>, vector<4x6xf32> -> vector<4x6xf32>
    %545 = arith.addf %514, %544 : vector<4x6xf32>
    %cst_326 = arith.constant dense<0.000000e+00> : vector<4x24xf32>
    %546 = tpu.matmul %545, %242, %cst_326 {dimension_numbers = #tpu.dot_dimension_numbers<[1], [0], [0], [1], [0, 0, 1, 1], [], []>} : vector<4x6xf32>, vector<6x24xf32>, vector<4x24xf32> -> vector<4x24xf32>
    %547 = vector.broadcast %244 : vector<1x24xf32> to vector<4x24xf32>
    %548 = arith.addf %546, %547 : vector<4x24xf32>
    %cst_327 = arith.constant 5.000000e-01 : f32
    %549 = vector.broadcast %cst_327 : f32 to vector<4x24xf32>
    %550 = arith.mulf %549, %548 : vector<4x24xf32>
    %cst_328 = arith.constant 0.707106769 : f32
    %551 = vector.broadcast %cst_328 : f32 to vector<4x24xf32>
    %552 = arith.mulf %548, %551 : vector<4x24xf32>
    %cst_329 = arith.constant 0.000000e+00 : f32
    %553 = vector.broadcast %cst_329 : f32 to vector<4x24xf32>
    %554 = arith.cmpf oge, %552, %553 : vector<4x24xf32>
    %cst_330 = arith.constant 1.000000e+00 : f32
    %cst_331 = arith.constant -1.000000e+00 : f32
    %555 = vector.broadcast %cst_330 : f32 to vector<4x24xf32>
    %556 = vector.broadcast %cst_331 : f32 to vector<4x24xf32>
    %557 = arith.select %554, %555, %556 : vector<4x24xi1>, vector<4x24xf32>
    %558 = math.absf %552 : vector<4x24xf32>
    %cst_332 = arith.constant 0.327591091 : f32
    %559 = vector.broadcast %cst_332 : f32 to vector<4x24xf32>
    %560 = arith.mulf %559, %558 : vector<4x24xf32>
    %cst_333 = arith.constant 1.000000e+00 : f32
    %561 = vector.broadcast %cst_333 : f32 to vector<4x24xf32>
    %562 = arith.addf %561, %560 : vector<4x24xf32>
    %cst_334 = arith.constant 1.000000e+00 : f32
    %563 = vector.broadcast %cst_334 : f32 to vector<4x24xf32>
    %564 = arith.divf %563, %562 : vector<4x24xf32>
    %cst_335 = arith.constant 1.06140542 : f32
    %565 = vector.broadcast %cst_335 : f32 to vector<4x24xf32>
    %566 = arith.mulf %564, %565 : vector<4x24xf32>
    %cst_336 = arith.constant -1.45315206 : f32
    %567 = vector.broadcast %cst_336 : f32 to vector<4x24xf32>
    %568 = arith.addf %567, %566 : vector<4x24xf32>
    %569 = arith.mulf %564, %568 : vector<4x24xf32>
    %cst_337 = arith.constant 1.42141378 : f32
    %570 = vector.broadcast %cst_337 : f32 to vector<4x24xf32>
    %571 = arith.addf %570, %569 : vector<4x24xf32>
    %572 = arith.mulf %564, %571 : vector<4x24xf32>
    %cst_338 = arith.constant -0.284496725 : f32
    %573 = vector.broadcast %cst_338 : f32 to vector<4x24xf32>
    %574 = arith.addf %573, %572 : vector<4x24xf32>
    %575 = arith.mulf %564, %574 : vector<4x24xf32>
    %cst_339 = arith.constant 0.254829586 : f32
    %576 = vector.broadcast %cst_339 : f32 to vector<4x24xf32>
    %577 = arith.addf %576, %575 : vector<4x24xf32>
    %578 = arith.mulf %564, %577 : vector<4x24xf32>
    %cst_340 = arith.constant 0.000000e+00 : f32
    %579 = vector.broadcast %cst_340 : f32 to vector<4x24xf32>
    %580 = arith.subf %579, %558 : vector<4x24xf32>
    %581 = arith.mulf %580, %558 : vector<4x24xf32>
    %582 = math.exp %581 : vector<4x24xf32>
    %583 = arith.mulf %578, %582 : vector<4x24xf32>
    %cst_341 = arith.constant 1.000000e+00 : f32
    %584 = vector.broadcast %cst_341 : f32 to vector<4x24xf32>
    %585 = arith.subf %584, %583 : vector<4x24xf32>
    %586 = arith.mulf %557, %585 : vector<4x24xf32>
    %cst_342 = arith.constant 1.000000e+00 : f32
    %587 = vector.broadcast %cst_342 : f32 to vector<4x24xf32>
    %588 = arith.addf %587, %586 : vector<4x24xf32>
    %589 = arith.mulf %550, %588 : vector<4x24xf32>
    %cst_343 = arith.constant dense<0.000000e+00> : vector<4x6xf32>
    %590 = tpu.matmul %589, %246, %cst_343 {dimension_numbers = #tpu.dot_dimension_numbers<[1], [0], [0], [1], [0, 0, 1, 1], [], []>} : vector<4x24xf32>, vector<24x6xf32>, vector<4x6xf32> -> vector<4x6xf32>
    %591 = arith.addf %545, %590 : vector<4x6xf32>
    %592 = vector.broadcast %248 : vector<1x6xf32> to vector<4x6xf32>
    %593 = arith.addf %591, %592 : vector<4x6xf32>
    %c2_344 = arith.constant 2 : index
    %c0_345 = arith.constant 0 : index
    %c0_346 = arith.constant 0 : index
    %594 = vector.load %arg27[%c2_344, %c0_345, %c0_346] : memref<3x12x4xf32, #tpu.memory_space<vmem>>, vector<1x12x4xf32>
    %595 = vector.shape_cast %594 : vector<1x12x4xf32> to vector<12x4xf32>
    %cst_347 = arith.constant dense<0.000000e+00> : vector<12x6xf32>
    %596 = tpu.matmul %595, %593, %cst_347 {dimension_numbers = #tpu.dot_dimension_numbers<[1], [0], [0], [1], [0, 0, 1, 1], [], []>} : vector<12x4xf32>, vector<4x6xf32>, vector<12x6xf32> -> vector<12x6xf32>
    %597 = arith.addf %481, %596 : vector<12x6xf32>
    %cst_348 = arith.constant dense<0.000000e+00> : vector<12xf32>
    %598 = vector.multi_reduction <add>, %597, %cst_348 [1] : vector<12x6xf32> to vector<12xf32>
    %599 = vector.shape_cast %598 : vector<12xf32> to vector<12x1xf32>
    %cst_349 = arith.constant 6.000000e+00 : f32
    %600 = vector.broadcast %cst_349 : f32 to vector<12x1xf32>
    %601 = arith.divf %599, %600 : vector<12x1xf32>
    %602 = vector.broadcast %601 : vector<12x1xf32> to vector<12x6xf32>
    %603 = arith.subf %597, %602 : vector<12x6xf32>
    %604 = arith.mulf %603, %603 : vector<12x6xf32>
    %cst_350 = arith.constant dense<0.000000e+00> : vector<12xf32>
    %605 = vector.multi_reduction <add>, %604, %cst_350 [1] : vector<12x6xf32> to vector<12xf32>
    %606 = vector.shape_cast %605 : vector<12xf32> to vector<12x1xf32>
    %cst_351 = arith.constant 6.000000e+00 : f32
    %607 = vector.broadcast %cst_351 : f32 to vector<12x1xf32>
    %608 = arith.divf %606, %607 : vector<12x1xf32>
    %609 = vector.broadcast %601 : vector<12x1xf32> to vector<12x6xf32>
    %610 = arith.subf %597, %609 : vector<12x6xf32>
    %cst_352 = arith.constant 9.99999974E-6 : f32
    %611 = vector.broadcast %cst_352 : f32 to vector<12x1xf32>
    %612 = arith.addf %608, %611 : vector<12x1xf32>
    %613 = math.rsqrt %612 : vector<12x1xf32>
    %614 = vector.broadcast %613 : vector<12x1xf32> to vector<12x6xf32>
    %615 = arith.mulf %610, %614 : vector<12x6xf32>
    %c1_353 = arith.constant 1 : index
    %c0_354 = arith.constant 0 : index
    %c0_355 = arith.constant 0 : index
    %616 = vector.load %arg15[%c1_353, %c0_354, %c0_355] : memref<2x6x18xf32, #tpu.memory_space<vmem>>, vector<1x6x18xf32>
    %617 = vector.shape_cast %616 : vector<1x6x18xf32> to vector<6x18xf32>
    %cst_356 = arith.constant dense<0.000000e+00> : vector<12x18xf32>
    %618 = tpu.matmul %615, %617, %cst_356 {dimension_numbers = #tpu.dot_dimension_numbers<[1], [0], [0], [1], [0, 0, 1, 1], [], []>} : vector<12x6xf32>, vector<6x18xf32>, vector<12x18xf32> -> vector<12x18xf32>
    %619 = vector.extract_strided_slice %618 {offsets = [0, 0], sizes = [4, 18], strides = [1, 1]} : vector<12x18xf32> to vector<4x18xf32>
    %620 = vector.extract_strided_slice %618 {offsets = [4, 0], sizes = [4, 18], strides = [1, 1]} : vector<12x18xf32> to vector<4x18xf32>
    %621 = vector.extract_strided_slice %618 {offsets = [8, 0], sizes = [4, 18], strides = [1, 1]} : vector<12x18xf32> to vector<4x18xf32>
    %c0_357 = arith.constant 0 : index
    %c0_358 = arith.constant 0 : index
    %622 = vector.load %arg21[%c0_357, %c0_358] : memref<4x4xf32, #tpu.memory_space<vmem>>, vector<4x4xf32>
    %cst_359 = arith.constant dense<0.000000e+00> : vector<4x18xf32>
    %623 = tpu.matmul %622, %620, %cst_359 {dimension_numbers = #tpu.dot_dimension_numbers<[1], [0], [0], [1], [0, 0, 1, 1], [], []>} : vector<4x4xf32>, vector<4x18xf32>, vector<4x18xf32> -> vector<4x18xf32>
    %c0_360 = arith.constant 0 : index
    %c0_361 = arith.constant 0 : index
    %624 = vector.load %arg22[%c0_360, %c0_361] : memref<4x4xf32, #tpu.memory_space<vmem>>, vector<4x4xf32>
    %cst_362 = arith.constant dense<0.000000e+00> : vector<4x18xf32>
    %625 = tpu.matmul %624, %620, %cst_362 {dimension_numbers = #tpu.dot_dimension_numbers<[1], [0], [0], [1], [0, 0, 1, 1], [], []>} : vector<4x4xf32>, vector<4x18xf32>, vector<4x18xf32> -> vector<4x18xf32>
    %c0_363 = arith.constant 0 : index
    %c0_364 = arith.constant 0 : index
    %626 = vector.load %arg21[%c0_363, %c0_364] : memref<4x4xf32, #tpu.memory_space<vmem>>, vector<4x4xf32>
    %cst_365 = arith.constant dense<0.000000e+00> : vector<4x18xf32>
    %627 = tpu.matmul %626, %621, %cst_365 {dimension_numbers = #tpu.dot_dimension_numbers<[1], [0], [0], [1], [0, 0, 1, 1], [], []>} : vector<4x4xf32>, vector<4x18xf32>, vector<4x18xf32> -> vector<4x18xf32>
    %c0_366 = arith.constant 0 : index
    %c0_367 = arith.constant 0 : index
    %628 = vector.load %arg22[%c0_366, %c0_367] : memref<4x4xf32, #tpu.memory_space<vmem>>, vector<4x4xf32>
    %cst_368 = arith.constant dense<0.000000e+00> : vector<4x18xf32>
    %629 = tpu.matmul %628, %621, %cst_368 {dimension_numbers = #tpu.dot_dimension_numbers<[1], [0], [0], [1], [0, 0, 1, 1], [], []>} : vector<4x4xf32>, vector<4x18xf32>, vector<4x18xf32> -> vector<4x18xf32>
    %630 = arith.mulf %619, %623 : vector<4x18xf32>
    %c0_369 = arith.constant 0 : index
    %c0_370 = arith.constant 0 : index
    %631 = vector.load %arg23[%c0_369, %c0_370] : memref<18x6xf32, #tpu.memory_space<vmem>>, vector<18x6xf32>
    %cst_371 = arith.constant dense<0.000000e+00> : vector<4x6xf32>
    %632 = tpu.matmul %630, %631, %cst_371 {dimension_numbers = #tpu.dot_dimension_numbers<[1], [0], [0], [1], [0, 0, 1, 1], [], []>} : vector<4x18xf32>, vector<18x6xf32>, vector<4x6xf32> -> vector<4x6xf32>
    %cst_372 = arith.constant 0.408248305 : f32
    %633 = vector.broadcast %cst_372 : f32 to vector<4x6xf32>
    %634 = arith.mulf %632, %633 : vector<4x6xf32>
    %635 = arith.mulf %619, %625 : vector<4x18xf32>
    %c0_373 = arith.constant 0 : index
    %c0_374 = arith.constant 0 : index
    %636 = vector.load %arg23[%c0_373, %c0_374] : memref<18x6xf32, #tpu.memory_space<vmem>>, vector<18x6xf32>
    %cst_375 = arith.constant dense<0.000000e+00> : vector<4x6xf32>
    %637 = tpu.matmul %635, %636, %cst_375 {dimension_numbers = #tpu.dot_dimension_numbers<[1], [0], [0], [1], [0, 0, 1, 1], [], []>} : vector<4x18xf32>, vector<18x6xf32>, vector<4x6xf32> -> vector<4x6xf32>
    %cst_376 = arith.constant 0.408248305 : f32
    %638 = vector.broadcast %cst_376 : f32 to vector<4x6xf32>
    %639 = arith.mulf %637, %638 : vector<4x6xf32>
    %640 = arith.maximumf %634, %639 : vector<4x6xf32>
    %641 = arith.subf %634, %640 : vector<4x6xf32>
    %642 = math.exp %641 : vector<4x6xf32>
    %643 = arith.subf %639, %640 : vector<4x6xf32>
    %644 = math.exp %643 : vector<4x6xf32>
    %645 = arith.addf %642, %644 : vector<4x6xf32>
    %cst_377 = arith.constant 1.000000e+00 : f32
    %646 = vector.broadcast %cst_377 : f32 to vector<4x6xf32>
    %647 = arith.divf %646, %645 : vector<4x6xf32>
    %648 = arith.mulf %642, %647 : vector<4x6xf32>
    %649 = arith.mulf %644, %647 : vector<4x6xf32>
    %c0_378 = arith.constant 0 : index
    %c0_379 = arith.constant 0 : index
    %650 = vector.load %arg24[%c0_378, %c0_379] : memref<6x18xf32, #tpu.memory_space<vmem>>, vector<6x18xf32>
    %cst_380 = arith.constant dense<0.000000e+00> : vector<4x18xf32>
    %651 = tpu.matmul %648, %650, %cst_380 {dimension_numbers = #tpu.dot_dimension_numbers<[1], [0], [0], [1], [0, 0, 1, 1], [], []>} : vector<4x6xf32>, vector<6x18xf32>, vector<4x18xf32> -> vector<4x18xf32>
    %652 = arith.mulf %651, %627 : vector<4x18xf32>
    %c0_381 = arith.constant 0 : index
    %c0_382 = arith.constant 0 : index
    %653 = vector.load %arg24[%c0_381, %c0_382] : memref<6x18xf32, #tpu.memory_space<vmem>>, vector<6x18xf32>
    %cst_383 = arith.constant dense<0.000000e+00> : vector<4x18xf32>
    %654 = tpu.matmul %649, %653, %cst_383 {dimension_numbers = #tpu.dot_dimension_numbers<[1], [0], [0], [1], [0, 0, 1, 1], [], []>} : vector<4x6xf32>, vector<6x18xf32>, vector<4x18xf32> -> vector<4x18xf32>
    %655 = arith.mulf %654, %629 : vector<4x18xf32>
    %656 = arith.addf %652, %655 : vector<4x18xf32>
    %c1_384 = arith.constant 1 : index
    %c0_385 = arith.constant 0 : index
    %c0_386 = arith.constant 0 : index
    %657 = vector.load %arg16[%c1_384, %c0_385, %c0_386] : memref<2x6x6xf32, #tpu.memory_space<vmem>>, vector<1x6x6xf32>
    %658 = vector.shape_cast %657 : vector<1x6x6xf32> to vector<6x6xf32>
    %c1_387 = arith.constant 1 : index
    %c0_388 = arith.constant 0 : index
    %c0_389 = arith.constant 0 : index
    %659 = vector.load %arg17[%c1_387, %c0_388, %c0_389] : memref<2x6x24xf32, #tpu.memory_space<vmem>>, vector<1x6x24xf32>
    %660 = vector.shape_cast %659 : vector<1x6x24xf32> to vector<6x24xf32>
    %c1_390 = arith.constant 1 : index
    %c0_391 = arith.constant 0 : index
    %c0_392 = arith.constant 0 : index
    %661 = vector.load %arg18[%c1_390, %c0_391, %c0_392] : memref<2x1x24xf32, #tpu.memory_space<vmem>>, vector<1x1x24xf32>
    %662 = vector.shape_cast %661 : vector<1x1x24xf32> to vector<1x24xf32>
    %c1_393 = arith.constant 1 : index
    %c0_394 = arith.constant 0 : index
    %c0_395 = arith.constant 0 : index
    %663 = vector.load %arg19[%c1_393, %c0_394, %c0_395] : memref<2x24x6xf32, #tpu.memory_space<vmem>>, vector<1x24x6xf32>
    %664 = vector.shape_cast %663 : vector<1x24x6xf32> to vector<24x6xf32>
    %c1_396 = arith.constant 1 : index
    %c0_397 = arith.constant 0 : index
    %c0_398 = arith.constant 0 : index
    %665 = vector.load %arg20[%c1_396, %c0_397, %c0_398] : memref<2x1x6xf32, #tpu.memory_space<vmem>>, vector<1x1x6xf32>
    %666 = vector.shape_cast %665 : vector<1x1x6xf32> to vector<1x6xf32>
    %cst_399 = arith.constant 0.000000e+00 : f32
    %667 = vector.broadcast %cst_399 : f32 to vector<12x6xf32>
    %668 = vector.extract_strided_slice %597 {offsets = [0, 0], sizes = [4, 6], strides = [1, 1]} : vector<12x6xf32> to vector<4x6xf32>
    %cst_400 = arith.constant 0.000000e+00 : f32
    %669 = vector.broadcast %cst_400 : f32 to vector<4x6xf32>
    %670 = vector.extract_strided_slice %656 {offsets = [0, 0], sizes = [4, 3], strides = [1, 1]} : vector<4x18xf32> to vector<4x3xf32>
    %671 = vector.extract_strided_slice %670 {offsets = [0, 0], sizes = [2, 3], strides = [1, 1]} : vector<4x3xf32> to vector<2x3xf32>
    %672 = vector.extract_strided_slice %670 {offsets = [2, 0], sizes = [2, 3], strides = [1, 1]} : vector<4x3xf32> to vector<2x3xf32>
    %673 = tpu.concatenate %671, %672 in 1 : vector<2x3xf32>, vector<2x3xf32> -> vector<2x6xf32>
    %cst_401 = arith.constant dense<0.000000e+00> : vector<2x6xf32>
    %674 = tpu.matmul %673, %658, %cst_401 {dimension_numbers = #tpu.dot_dimension_numbers<[1], [0], [0], [1], [0, 0, 1, 1], [], []>} : vector<2x6xf32>, vector<6x6xf32>, vector<2x6xf32> -> vector<2x6xf32>
    %c0_402 = arith.constant 0 : index
    %c0_403 = arith.constant 0 : index
    %c0_404 = arith.constant 0 : index
    %675 = vector.load %arg25[%c0_402, %c0_403, %c0_404] : memref<2x2x4xf32, #tpu.memory_space<vmem>>, vector<1x2x4xf32>
    %676 = vector.shape_cast %675 : vector<1x2x4xf32> to vector<2x4xf32>
    %cst_405 = arith.constant dense<0.000000e+00> : vector<2x6xf32>
    %677 = tpu.matmul %676, %668, %cst_405 {dimension_numbers = #tpu.dot_dimension_numbers<[1], [0], [0], [1], [0, 0, 1, 1], [], []>} : vector<2x4xf32>, vector<4x6xf32>, vector<2x6xf32> -> vector<2x6xf32>
    %678 = arith.addf %674, %677 : vector<2x6xf32>
    %cst_406 = arith.constant dense<0.000000e+00> : vector<2xf32>
    %679 = vector.multi_reduction <add>, %678, %cst_406 [1] : vector<2x6xf32> to vector<2xf32>
    %680 = vector.shape_cast %679 : vector<2xf32> to vector<2x1xf32>
    %cst_407 = arith.constant 6.000000e+00 : f32
    %681 = vector.broadcast %cst_407 : f32 to vector<2x1xf32>
    %682 = arith.divf %680, %681 : vector<2x1xf32>
    %683 = vector.broadcast %682 : vector<2x1xf32> to vector<2x6xf32>
    %684 = arith.subf %678, %683 : vector<2x6xf32>
    %685 = arith.mulf %684, %684 : vector<2x6xf32>
    %cst_408 = arith.constant dense<0.000000e+00> : vector<2xf32>
    %686 = vector.multi_reduction <add>, %685, %cst_408 [1] : vector<2x6xf32> to vector<2xf32>
    %687 = vector.shape_cast %686 : vector<2xf32> to vector<2x1xf32>
    %cst_409 = arith.constant 6.000000e+00 : f32
    %688 = vector.broadcast %cst_409 : f32 to vector<2x1xf32>
    %689 = arith.divf %687, %688 : vector<2x1xf32>
    %690 = vector.broadcast %682 : vector<2x1xf32> to vector<2x6xf32>
    %691 = arith.subf %678, %690 : vector<2x6xf32>
    %cst_410 = arith.constant 9.99999974E-6 : f32
    %692 = vector.broadcast %cst_410 : f32 to vector<2x1xf32>
    %693 = arith.addf %689, %692 : vector<2x1xf32>
    %694 = math.rsqrt %693 : vector<2x1xf32>
    %695 = vector.broadcast %694 : vector<2x1xf32> to vector<2x6xf32>
    %696 = arith.mulf %691, %695 : vector<2x6xf32>
    %c0_411 = arith.constant 0 : index
    %c0_412 = arith.constant 0 : index
    %c0_413 = arith.constant 0 : index
    %697 = vector.load %arg26[%c0_411, %c0_412, %c0_413] : memref<2x4x2xf32, #tpu.memory_space<vmem>>, vector<1x4x2xf32>
    %698 = vector.shape_cast %697 : vector<1x4x2xf32> to vector<4x2xf32>
    %cst_414 = arith.constant dense<0.000000e+00> : vector<4x6xf32>
    %699 = tpu.matmul %698, %696, %cst_414 {dimension_numbers = #tpu.dot_dimension_numbers<[1], [0], [0], [1], [0, 0, 1, 1], [], []>} : vector<4x2xf32>, vector<2x6xf32>, vector<4x6xf32> -> vector<4x6xf32>
    %700 = arith.addf %669, %699 : vector<4x6xf32>
    %701 = vector.extract_strided_slice %656 {offsets = [0, 3], sizes = [4, 3], strides = [1, 1]} : vector<4x18xf32> to vector<4x3xf32>
    %702 = vector.extract_strided_slice %701 {offsets = [0, 0], sizes = [2, 3], strides = [1, 1]} : vector<4x3xf32> to vector<2x3xf32>
    %703 = vector.extract_strided_slice %701 {offsets = [2, 0], sizes = [2, 3], strides = [1, 1]} : vector<4x3xf32> to vector<2x3xf32>
    %704 = tpu.concatenate %702, %703 in 1 : vector<2x3xf32>, vector<2x3xf32> -> vector<2x6xf32>
    %cst_415 = arith.constant dense<0.000000e+00> : vector<2x6xf32>
    %705 = tpu.matmul %704, %658, %cst_415 {dimension_numbers = #tpu.dot_dimension_numbers<[1], [0], [0], [1], [0, 0, 1, 1], [], []>} : vector<2x6xf32>, vector<6x6xf32>, vector<2x6xf32> -> vector<2x6xf32>
    %c1_416 = arith.constant 1 : index
    %c0_417 = arith.constant 0 : index
    %c0_418 = arith.constant 0 : index
    %706 = vector.load %arg25[%c1_416, %c0_417, %c0_418] : memref<2x2x4xf32, #tpu.memory_space<vmem>>, vector<1x2x4xf32>
    %707 = vector.shape_cast %706 : vector<1x2x4xf32> to vector<2x4xf32>
    %cst_419 = arith.constant dense<0.000000e+00> : vector<2x6xf32>
    %708 = tpu.matmul %707, %668, %cst_419 {dimension_numbers = #tpu.dot_dimension_numbers<[1], [0], [0], [1], [0, 0, 1, 1], [], []>} : vector<2x4xf32>, vector<4x6xf32>, vector<2x6xf32> -> vector<2x6xf32>
    %709 = arith.addf %705, %708 : vector<2x6xf32>
    %cst_420 = arith.constant dense<0.000000e+00> : vector<2xf32>
    %710 = vector.multi_reduction <add>, %709, %cst_420 [1] : vector<2x6xf32> to vector<2xf32>
    %711 = vector.shape_cast %710 : vector<2xf32> to vector<2x1xf32>
    %cst_421 = arith.constant 6.000000e+00 : f32
    %712 = vector.broadcast %cst_421 : f32 to vector<2x1xf32>
    %713 = arith.divf %711, %712 : vector<2x1xf32>
    %714 = vector.broadcast %713 : vector<2x1xf32> to vector<2x6xf32>
    %715 = arith.subf %709, %714 : vector<2x6xf32>
    %716 = arith.mulf %715, %715 : vector<2x6xf32>
    %cst_422 = arith.constant dense<0.000000e+00> : vector<2xf32>
    %717 = vector.multi_reduction <add>, %716, %cst_422 [1] : vector<2x6xf32> to vector<2xf32>
    %718 = vector.shape_cast %717 : vector<2xf32> to vector<2x1xf32>
    %cst_423 = arith.constant 6.000000e+00 : f32
    %719 = vector.broadcast %cst_423 : f32 to vector<2x1xf32>
    %720 = arith.divf %718, %719 : vector<2x1xf32>
    %721 = vector.broadcast %713 : vector<2x1xf32> to vector<2x6xf32>
    %722 = arith.subf %709, %721 : vector<2x6xf32>
    %cst_424 = arith.constant 9.99999974E-6 : f32
    %723 = vector.broadcast %cst_424 : f32 to vector<2x1xf32>
    %724 = arith.addf %720, %723 : vector<2x1xf32>
    %725 = math.rsqrt %724 : vector<2x1xf32>
    %726 = vector.broadcast %725 : vector<2x1xf32> to vector<2x6xf32>
    %727 = arith.mulf %722, %726 : vector<2x6xf32>
    %c1_425 = arith.constant 1 : index
    %c0_426 = arith.constant 0 : index
    %c0_427 = arith.constant 0 : index
    %728 = vector.load %arg26[%c1_425, %c0_426, %c0_427] : memref<2x4x2xf32, #tpu.memory_space<vmem>>, vector<1x4x2xf32>
    %729 = vector.shape_cast %728 : vector<1x4x2xf32> to vector<4x2xf32>
    %cst_428 = arith.constant dense<0.000000e+00> : vector<4x6xf32>
    %730 = tpu.matmul %729, %727, %cst_428 {dimension_numbers = #tpu.dot_dimension_numbers<[1], [0], [0], [1], [0, 0, 1, 1], [], []>} : vector<4x2xf32>, vector<2x6xf32>, vector<4x6xf32> -> vector<4x6xf32>
    %731 = arith.addf %700, %730 : vector<4x6xf32>
    %cst_429 = arith.constant dense<0.000000e+00> : vector<4x24xf32>
    %732 = tpu.matmul %731, %660, %cst_429 {dimension_numbers = #tpu.dot_dimension_numbers<[1], [0], [0], [1], [0, 0, 1, 1], [], []>} : vector<4x6xf32>, vector<6x24xf32>, vector<4x24xf32> -> vector<4x24xf32>
    %733 = vector.broadcast %662 : vector<1x24xf32> to vector<4x24xf32>
    %734 = arith.addf %732, %733 : vector<4x24xf32>
    %cst_430 = arith.constant 5.000000e-01 : f32
    %735 = vector.broadcast %cst_430 : f32 to vector<4x24xf32>
    %736 = arith.mulf %735, %734 : vector<4x24xf32>
    %cst_431 = arith.constant 0.707106769 : f32
    %737 = vector.broadcast %cst_431 : f32 to vector<4x24xf32>
    %738 = arith.mulf %734, %737 : vector<4x24xf32>
    %cst_432 = arith.constant 0.000000e+00 : f32
    %739 = vector.broadcast %cst_432 : f32 to vector<4x24xf32>
    %740 = arith.cmpf oge, %738, %739 : vector<4x24xf32>
    %cst_433 = arith.constant 1.000000e+00 : f32
    %cst_434 = arith.constant -1.000000e+00 : f32
    %741 = vector.broadcast %cst_433 : f32 to vector<4x24xf32>
    %742 = vector.broadcast %cst_434 : f32 to vector<4x24xf32>
    %743 = arith.select %740, %741, %742 : vector<4x24xi1>, vector<4x24xf32>
    %744 = math.absf %738 : vector<4x24xf32>
    %cst_435 = arith.constant 0.327591091 : f32
    %745 = vector.broadcast %cst_435 : f32 to vector<4x24xf32>
    %746 = arith.mulf %745, %744 : vector<4x24xf32>
    %cst_436 = arith.constant 1.000000e+00 : f32
    %747 = vector.broadcast %cst_436 : f32 to vector<4x24xf32>
    %748 = arith.addf %747, %746 : vector<4x24xf32>
    %cst_437 = arith.constant 1.000000e+00 : f32
    %749 = vector.broadcast %cst_437 : f32 to vector<4x24xf32>
    %750 = arith.divf %749, %748 : vector<4x24xf32>
    %cst_438 = arith.constant 1.06140542 : f32
    %751 = vector.broadcast %cst_438 : f32 to vector<4x24xf32>
    %752 = arith.mulf %750, %751 : vector<4x24xf32>
    %cst_439 = arith.constant -1.45315206 : f32
    %753 = vector.broadcast %cst_439 : f32 to vector<4x24xf32>
    %754 = arith.addf %753, %752 : vector<4x24xf32>
    %755 = arith.mulf %750, %754 : vector<4x24xf32>
    %cst_440 = arith.constant 1.42141378 : f32
    %756 = vector.broadcast %cst_440 : f32 to vector<4x24xf32>
    %757 = arith.addf %756, %755 : vector<4x24xf32>
    %758 = arith.mulf %750, %757 : vector<4x24xf32>
    %cst_441 = arith.constant -0.284496725 : f32
    %759 = vector.broadcast %cst_441 : f32 to vector<4x24xf32>
    %760 = arith.addf %759, %758 : vector<4x24xf32>
    %761 = arith.mulf %750, %760 : vector<4x24xf32>
    %cst_442 = arith.constant 0.254829586 : f32
    %762 = vector.broadcast %cst_442 : f32 to vector<4x24xf32>
    %763 = arith.addf %762, %761 : vector<4x24xf32>
    %764 = arith.mulf %750, %763 : vector<4x24xf32>
    %cst_443 = arith.constant 0.000000e+00 : f32
    %765 = vector.broadcast %cst_443 : f32 to vector<4x24xf32>
    %766 = arith.subf %765, %744 : vector<4x24xf32>
    %767 = arith.mulf %766, %744 : vector<4x24xf32>
    %768 = math.exp %767 : vector<4x24xf32>
    %769 = arith.mulf %764, %768 : vector<4x24xf32>
    %cst_444 = arith.constant 1.000000e+00 : f32
    %770 = vector.broadcast %cst_444 : f32 to vector<4x24xf32>
    %771 = arith.subf %770, %769 : vector<4x24xf32>
    %772 = arith.mulf %743, %771 : vector<4x24xf32>
    %cst_445 = arith.constant 1.000000e+00 : f32
    %773 = vector.broadcast %cst_445 : f32 to vector<4x24xf32>
    %774 = arith.addf %773, %772 : vector<4x24xf32>
    %775 = arith.mulf %736, %774 : vector<4x24xf32>
    %cst_446 = arith.constant dense<0.000000e+00> : vector<4x6xf32>
    %776 = tpu.matmul %775, %664, %cst_446 {dimension_numbers = #tpu.dot_dimension_numbers<[1], [0], [0], [1], [0, 0, 1, 1], [], []>} : vector<4x24xf32>, vector<24x6xf32>, vector<4x6xf32> -> vector<4x6xf32>
    %777 = arith.addf %731, %776 : vector<4x6xf32>
    %778 = vector.broadcast %666 : vector<1x6xf32> to vector<4x6xf32>
    %779 = arith.addf %777, %778 : vector<4x6xf32>
    %c0_447 = arith.constant 0 : index
    %c0_448 = arith.constant 0 : index
    %c0_449 = arith.constant 0 : index
    %780 = vector.load %arg27[%c0_447, %c0_448, %c0_449] : memref<3x12x4xf32, #tpu.memory_space<vmem>>, vector<1x12x4xf32>
    %781 = vector.shape_cast %780 : vector<1x12x4xf32> to vector<12x4xf32>
    %cst_450 = arith.constant dense<0.000000e+00> : vector<12x6xf32>
    %782 = tpu.matmul %781, %779, %cst_450 {dimension_numbers = #tpu.dot_dimension_numbers<[1], [0], [0], [1], [0, 0, 1, 1], [], []>} : vector<12x4xf32>, vector<4x6xf32>, vector<12x6xf32> -> vector<12x6xf32>
    %783 = arith.addf %667, %782 : vector<12x6xf32>
    %784 = vector.extract_strided_slice %597 {offsets = [4, 0], sizes = [4, 6], strides = [1, 1]} : vector<12x6xf32> to vector<4x6xf32>
    %cst_451 = arith.constant 0.000000e+00 : f32
    %785 = vector.broadcast %cst_451 : f32 to vector<4x6xf32>
    %786 = vector.extract_strided_slice %656 {offsets = [0, 6], sizes = [4, 3], strides = [1, 1]} : vector<4x18xf32> to vector<4x3xf32>
    %787 = vector.extract_strided_slice %786 {offsets = [0, 0], sizes = [2, 3], strides = [1, 1]} : vector<4x3xf32> to vector<2x3xf32>
    %788 = vector.extract_strided_slice %786 {offsets = [2, 0], sizes = [2, 3], strides = [1, 1]} : vector<4x3xf32> to vector<2x3xf32>
    %789 = tpu.concatenate %787, %788 in 1 : vector<2x3xf32>, vector<2x3xf32> -> vector<2x6xf32>
    %cst_452 = arith.constant dense<0.000000e+00> : vector<2x6xf32>
    %790 = tpu.matmul %789, %658, %cst_452 {dimension_numbers = #tpu.dot_dimension_numbers<[1], [0], [0], [1], [0, 0, 1, 1], [], []>} : vector<2x6xf32>, vector<6x6xf32>, vector<2x6xf32> -> vector<2x6xf32>
    %c0_453 = arith.constant 0 : index
    %c0_454 = arith.constant 0 : index
    %c0_455 = arith.constant 0 : index
    %791 = vector.load %arg25[%c0_453, %c0_454, %c0_455] : memref<2x2x4xf32, #tpu.memory_space<vmem>>, vector<1x2x4xf32>
    %792 = vector.shape_cast %791 : vector<1x2x4xf32> to vector<2x4xf32>
    %cst_456 = arith.constant dense<0.000000e+00> : vector<2x6xf32>
    %793 = tpu.matmul %792, %784, %cst_456 {dimension_numbers = #tpu.dot_dimension_numbers<[1], [0], [0], [1], [0, 0, 1, 1], [], []>} : vector<2x4xf32>, vector<4x6xf32>, vector<2x6xf32> -> vector<2x6xf32>
    %794 = arith.addf %790, %793 : vector<2x6xf32>
    %cst_457 = arith.constant dense<0.000000e+00> : vector<2xf32>
    %795 = vector.multi_reduction <add>, %794, %cst_457 [1] : vector<2x6xf32> to vector<2xf32>
    %796 = vector.shape_cast %795 : vector<2xf32> to vector<2x1xf32>
    %cst_458 = arith.constant 6.000000e+00 : f32
    %797 = vector.broadcast %cst_458 : f32 to vector<2x1xf32>
    %798 = arith.divf %796, %797 : vector<2x1xf32>
    %799 = vector.broadcast %798 : vector<2x1xf32> to vector<2x6xf32>
    %800 = arith.subf %794, %799 : vector<2x6xf32>
    %801 = arith.mulf %800, %800 : vector<2x6xf32>
    %cst_459 = arith.constant dense<0.000000e+00> : vector<2xf32>
    %802 = vector.multi_reduction <add>, %801, %cst_459 [1] : vector<2x6xf32> to vector<2xf32>
    %803 = vector.shape_cast %802 : vector<2xf32> to vector<2x1xf32>
    %cst_460 = arith.constant 6.000000e+00 : f32
    %804 = vector.broadcast %cst_460 : f32 to vector<2x1xf32>
    %805 = arith.divf %803, %804 : vector<2x1xf32>
    %806 = vector.broadcast %798 : vector<2x1xf32> to vector<2x6xf32>
    %807 = arith.subf %794, %806 : vector<2x6xf32>
    %cst_461 = arith.constant 9.99999974E-6 : f32
    %808 = vector.broadcast %cst_461 : f32 to vector<2x1xf32>
    %809 = arith.addf %805, %808 : vector<2x1xf32>
    %810 = math.rsqrt %809 : vector<2x1xf32>
    %811 = vector.broadcast %810 : vector<2x1xf32> to vector<2x6xf32>
    %812 = arith.mulf %807, %811 : vector<2x6xf32>
    %c0_462 = arith.constant 0 : index
    %c0_463 = arith.constant 0 : index
    %c0_464 = arith.constant 0 : index
    %813 = vector.load %arg26[%c0_462, %c0_463, %c0_464] : memref<2x4x2xf32, #tpu.memory_space<vmem>>, vector<1x4x2xf32>
    %814 = vector.shape_cast %813 : vector<1x4x2xf32> to vector<4x2xf32>
    %cst_465 = arith.constant dense<0.000000e+00> : vector<4x6xf32>
    %815 = tpu.matmul %814, %812, %cst_465 {dimension_numbers = #tpu.dot_dimension_numbers<[1], [0], [0], [1], [0, 0, 1, 1], [], []>} : vector<4x2xf32>, vector<2x6xf32>, vector<4x6xf32> -> vector<4x6xf32>
    %816 = arith.addf %785, %815 : vector<4x6xf32>
    %817 = vector.extract_strided_slice %656 {offsets = [0, 9], sizes = [4, 3], strides = [1, 1]} : vector<4x18xf32> to vector<4x3xf32>
    %818 = vector.extract_strided_slice %817 {offsets = [0, 0], sizes = [2, 3], strides = [1, 1]} : vector<4x3xf32> to vector<2x3xf32>
    %819 = vector.extract_strided_slice %817 {offsets = [2, 0], sizes = [2, 3], strides = [1, 1]} : vector<4x3xf32> to vector<2x3xf32>
    %820 = tpu.concatenate %818, %819 in 1 : vector<2x3xf32>, vector<2x3xf32> -> vector<2x6xf32>
    %cst_466 = arith.constant dense<0.000000e+00> : vector<2x6xf32>
    %821 = tpu.matmul %820, %658, %cst_466 {dimension_numbers = #tpu.dot_dimension_numbers<[1], [0], [0], [1], [0, 0, 1, 1], [], []>} : vector<2x6xf32>, vector<6x6xf32>, vector<2x6xf32> -> vector<2x6xf32>
    %c1_467 = arith.constant 1 : index
    %c0_468 = arith.constant 0 : index
    %c0_469 = arith.constant 0 : index
    %822 = vector.load %arg25[%c1_467, %c0_468, %c0_469] : memref<2x2x4xf32, #tpu.memory_space<vmem>>, vector<1x2x4xf32>
    %823 = vector.shape_cast %822 : vector<1x2x4xf32> to vector<2x4xf32>
    %cst_470 = arith.constant dense<0.000000e+00> : vector<2x6xf32>
    %824 = tpu.matmul %823, %784, %cst_470 {dimension_numbers = #tpu.dot_dimension_numbers<[1], [0], [0], [1], [0, 0, 1, 1], [], []>} : vector<2x4xf32>, vector<4x6xf32>, vector<2x6xf32> -> vector<2x6xf32>
    %825 = arith.addf %821, %824 : vector<2x6xf32>
    %cst_471 = arith.constant dense<0.000000e+00> : vector<2xf32>
    %826 = vector.multi_reduction <add>, %825, %cst_471 [1] : vector<2x6xf32> to vector<2xf32>
    %827 = vector.shape_cast %826 : vector<2xf32> to vector<2x1xf32>
    %cst_472 = arith.constant 6.000000e+00 : f32
    %828 = vector.broadcast %cst_472 : f32 to vector<2x1xf32>
    %829 = arith.divf %827, %828 : vector<2x1xf32>
    %830 = vector.broadcast %829 : vector<2x1xf32> to vector<2x6xf32>
    %831 = arith.subf %825, %830 : vector<2x6xf32>
    %832 = arith.mulf %831, %831 : vector<2x6xf32>
    %cst_473 = arith.constant dense<0.000000e+00> : vector<2xf32>
    %833 = vector.multi_reduction <add>, %832, %cst_473 [1] : vector<2x6xf32> to vector<2xf32>
    %834 = vector.shape_cast %833 : vector<2xf32> to vector<2x1xf32>
    %cst_474 = arith.constant 6.000000e+00 : f32
    %835 = vector.broadcast %cst_474 : f32 to vector<2x1xf32>
    %836 = arith.divf %834, %835 : vector<2x1xf32>
    %837 = vector.broadcast %829 : vector<2x1xf32> to vector<2x6xf32>
    %838 = arith.subf %825, %837 : vector<2x6xf32>
    %cst_475 = arith.constant 9.99999974E-6 : f32
    %839 = vector.broadcast %cst_475 : f32 to vector<2x1xf32>
    %840 = arith.addf %836, %839 : vector<2x1xf32>
    %841 = math.rsqrt %840 : vector<2x1xf32>
    %842 = vector.broadcast %841 : vector<2x1xf32> to vector<2x6xf32>
    %843 = arith.mulf %838, %842 : vector<2x6xf32>
    %c1_476 = arith.constant 1 : index
    %c0_477 = arith.constant 0 : index
    %c0_478 = arith.constant 0 : index
    %844 = vector.load %arg26[%c1_476, %c0_477, %c0_478] : memref<2x4x2xf32, #tpu.memory_space<vmem>>, vector<1x4x2xf32>
    %845 = vector.shape_cast %844 : vector<1x4x2xf32> to vector<4x2xf32>
    %cst_479 = arith.constant dense<0.000000e+00> : vector<4x6xf32>
    %846 = tpu.matmul %845, %843, %cst_479 {dimension_numbers = #tpu.dot_dimension_numbers<[1], [0], [0], [1], [0, 0, 1, 1], [], []>} : vector<4x2xf32>, vector<2x6xf32>, vector<4x6xf32> -> vector<4x6xf32>
    %847 = arith.addf %816, %846 : vector<4x6xf32>
    %cst_480 = arith.constant dense<0.000000e+00> : vector<4x24xf32>
    %848 = tpu.matmul %847, %660, %cst_480 {dimension_numbers = #tpu.dot_dimension_numbers<[1], [0], [0], [1], [0, 0, 1, 1], [], []>} : vector<4x6xf32>, vector<6x24xf32>, vector<4x24xf32> -> vector<4x24xf32>
    %849 = vector.broadcast %662 : vector<1x24xf32> to vector<4x24xf32>
    %850 = arith.addf %848, %849 : vector<4x24xf32>
    %cst_481 = arith.constant 5.000000e-01 : f32
    %851 = vector.broadcast %cst_481 : f32 to vector<4x24xf32>
    %852 = arith.mulf %851, %850 : vector<4x24xf32>
    %cst_482 = arith.constant 0.707106769 : f32
    %853 = vector.broadcast %cst_482 : f32 to vector<4x24xf32>
    %854 = arith.mulf %850, %853 : vector<4x24xf32>
    %cst_483 = arith.constant 0.000000e+00 : f32
    %855 = vector.broadcast %cst_483 : f32 to vector<4x24xf32>
    %856 = arith.cmpf oge, %854, %855 : vector<4x24xf32>
    %cst_484 = arith.constant 1.000000e+00 : f32
    %cst_485 = arith.constant -1.000000e+00 : f32
    %857 = vector.broadcast %cst_484 : f32 to vector<4x24xf32>
    %858 = vector.broadcast %cst_485 : f32 to vector<4x24xf32>
    %859 = arith.select %856, %857, %858 : vector<4x24xi1>, vector<4x24xf32>
    %860 = math.absf %854 : vector<4x24xf32>
    %cst_486 = arith.constant 0.327591091 : f32
    %861 = vector.broadcast %cst_486 : f32 to vector<4x24xf32>
    %862 = arith.mulf %861, %860 : vector<4x24xf32>
    %cst_487 = arith.constant 1.000000e+00 : f32
    %863 = vector.broadcast %cst_487 : f32 to vector<4x24xf32>
    %864 = arith.addf %863, %862 : vector<4x24xf32>
    %cst_488 = arith.constant 1.000000e+00 : f32
    %865 = vector.broadcast %cst_488 : f32 to vector<4x24xf32>
    %866 = arith.divf %865, %864 : vector<4x24xf32>
    %cst_489 = arith.constant 1.06140542 : f32
    %867 = vector.broadcast %cst_489 : f32 to vector<4x24xf32>
    %868 = arith.mulf %866, %867 : vector<4x24xf32>
    %cst_490 = arith.constant -1.45315206 : f32
    %869 = vector.broadcast %cst_490 : f32 to vector<4x24xf32>
    %870 = arith.addf %869, %868 : vector<4x24xf32>
    %871 = arith.mulf %866, %870 : vector<4x24xf32>
    %cst_491 = arith.constant 1.42141378 : f32
    %872 = vector.broadcast %cst_491 : f32 to vector<4x24xf32>
    %873 = arith.addf %872, %871 : vector<4x24xf32>
    %874 = arith.mulf %866, %873 : vector<4x24xf32>
    %cst_492 = arith.constant -0.284496725 : f32
    %875 = vector.broadcast %cst_492 : f32 to vector<4x24xf32>
    %876 = arith.addf %875, %874 : vector<4x24xf32>
    %877 = arith.mulf %866, %876 : vector<4x24xf32>
    %cst_493 = arith.constant 0.254829586 : f32
    %878 = vector.broadcast %cst_493 : f32 to vector<4x24xf32>
    %879 = arith.addf %878, %877 : vector<4x24xf32>
    %880 = arith.mulf %866, %879 : vector<4x24xf32>
    %cst_494 = arith.constant 0.000000e+00 : f32
    %881 = vector.broadcast %cst_494 : f32 to vector<4x24xf32>
    %882 = arith.subf %881, %860 : vector<4x24xf32>
    %883 = arith.mulf %882, %860 : vector<4x24xf32>
    %884 = math.exp %883 : vector<4x24xf32>
    %885 = arith.mulf %880, %884 : vector<4x24xf32>
    %cst_495 = arith.constant 1.000000e+00 : f32
    %886 = vector.broadcast %cst_495 : f32 to vector<4x24xf32>
    %887 = arith.subf %886, %885 : vector<4x24xf32>
    %888 = arith.mulf %859, %887 : vector<4x24xf32>
    %cst_496 = arith.constant 1.000000e+00 : f32
    %889 = vector.broadcast %cst_496 : f32 to vector<4x24xf32>
    %890 = arith.addf %889, %888 : vector<4x24xf32>
    %891 = arith.mulf %852, %890 : vector<4x24xf32>
    %cst_497 = arith.constant dense<0.000000e+00> : vector<4x6xf32>
    %892 = tpu.matmul %891, %664, %cst_497 {dimension_numbers = #tpu.dot_dimension_numbers<[1], [0], [0], [1], [0, 0, 1, 1], [], []>} : vector<4x24xf32>, vector<24x6xf32>, vector<4x6xf32> -> vector<4x6xf32>
    %893 = arith.addf %847, %892 : vector<4x6xf32>
    %894 = vector.broadcast %666 : vector<1x6xf32> to vector<4x6xf32>
    %895 = arith.addf %893, %894 : vector<4x6xf32>
    %c1_498 = arith.constant 1 : index
    %c0_499 = arith.constant 0 : index
    %c0_500 = arith.constant 0 : index
    %896 = vector.load %arg27[%c1_498, %c0_499, %c0_500] : memref<3x12x4xf32, #tpu.memory_space<vmem>>, vector<1x12x4xf32>
    %897 = vector.shape_cast %896 : vector<1x12x4xf32> to vector<12x4xf32>
    %cst_501 = arith.constant dense<0.000000e+00> : vector<12x6xf32>
    %898 = tpu.matmul %897, %895, %cst_501 {dimension_numbers = #tpu.dot_dimension_numbers<[1], [0], [0], [1], [0, 0, 1, 1], [], []>} : vector<12x4xf32>, vector<4x6xf32>, vector<12x6xf32> -> vector<12x6xf32>
    %899 = arith.addf %783, %898 : vector<12x6xf32>
    %900 = vector.extract_strided_slice %597 {offsets = [8, 0], sizes = [4, 6], strides = [1, 1]} : vector<12x6xf32> to vector<4x6xf32>
    %cst_502 = arith.constant 0.000000e+00 : f32
    %901 = vector.broadcast %cst_502 : f32 to vector<4x6xf32>
    %902 = vector.extract_strided_slice %656 {offsets = [0, 12], sizes = [4, 3], strides = [1, 1]} : vector<4x18xf32> to vector<4x3xf32>
    %903 = vector.extract_strided_slice %902 {offsets = [0, 0], sizes = [2, 3], strides = [1, 1]} : vector<4x3xf32> to vector<2x3xf32>
    %904 = vector.extract_strided_slice %902 {offsets = [2, 0], sizes = [2, 3], strides = [1, 1]} : vector<4x3xf32> to vector<2x3xf32>
    %905 = tpu.concatenate %903, %904 in 1 : vector<2x3xf32>, vector<2x3xf32> -> vector<2x6xf32>
    %cst_503 = arith.constant dense<0.000000e+00> : vector<2x6xf32>
    %906 = tpu.matmul %905, %658, %cst_503 {dimension_numbers = #tpu.dot_dimension_numbers<[1], [0], [0], [1], [0, 0, 1, 1], [], []>} : vector<2x6xf32>, vector<6x6xf32>, vector<2x6xf32> -> vector<2x6xf32>
    %c0_504 = arith.constant 0 : index
    %c0_505 = arith.constant 0 : index
    %c0_506 = arith.constant 0 : index
    %907 = vector.load %arg25[%c0_504, %c0_505, %c0_506] : memref<2x2x4xf32, #tpu.memory_space<vmem>>, vector<1x2x4xf32>
    %908 = vector.shape_cast %907 : vector<1x2x4xf32> to vector<2x4xf32>
    %cst_507 = arith.constant dense<0.000000e+00> : vector<2x6xf32>
    %909 = tpu.matmul %908, %900, %cst_507 {dimension_numbers = #tpu.dot_dimension_numbers<[1], [0], [0], [1], [0, 0, 1, 1], [], []>} : vector<2x4xf32>, vector<4x6xf32>, vector<2x6xf32> -> vector<2x6xf32>
    %910 = arith.addf %906, %909 : vector<2x6xf32>
    %cst_508 = arith.constant dense<0.000000e+00> : vector<2xf32>
    %911 = vector.multi_reduction <add>, %910, %cst_508 [1] : vector<2x6xf32> to vector<2xf32>
    %912 = vector.shape_cast %911 : vector<2xf32> to vector<2x1xf32>
    %cst_509 = arith.constant 6.000000e+00 : f32
    %913 = vector.broadcast %cst_509 : f32 to vector<2x1xf32>
    %914 = arith.divf %912, %913 : vector<2x1xf32>
    %915 = vector.broadcast %914 : vector<2x1xf32> to vector<2x6xf32>
    %916 = arith.subf %910, %915 : vector<2x6xf32>
    %917 = arith.mulf %916, %916 : vector<2x6xf32>
    %cst_510 = arith.constant dense<0.000000e+00> : vector<2xf32>
    %918 = vector.multi_reduction <add>, %917, %cst_510 [1] : vector<2x6xf32> to vector<2xf32>
    %919 = vector.shape_cast %918 : vector<2xf32> to vector<2x1xf32>
    %cst_511 = arith.constant 6.000000e+00 : f32
    %920 = vector.broadcast %cst_511 : f32 to vector<2x1xf32>
    %921 = arith.divf %919, %920 : vector<2x1xf32>
    %922 = vector.broadcast %914 : vector<2x1xf32> to vector<2x6xf32>
    %923 = arith.subf %910, %922 : vector<2x6xf32>
    %cst_512 = arith.constant 9.99999974E-6 : f32
    %924 = vector.broadcast %cst_512 : f32 to vector<2x1xf32>
    %925 = arith.addf %921, %924 : vector<2x1xf32>
    %926 = math.rsqrt %925 : vector<2x1xf32>
    %927 = vector.broadcast %926 : vector<2x1xf32> to vector<2x6xf32>
    %928 = arith.mulf %923, %927 : vector<2x6xf32>
    %c0_513 = arith.constant 0 : index
    %c0_514 = arith.constant 0 : index
    %c0_515 = arith.constant 0 : index
    %929 = vector.load %arg26[%c0_513, %c0_514, %c0_515] : memref<2x4x2xf32, #tpu.memory_space<vmem>>, vector<1x4x2xf32>
    %930 = vector.shape_cast %929 : vector<1x4x2xf32> to vector<4x2xf32>
    %cst_516 = arith.constant dense<0.000000e+00> : vector<4x6xf32>
    %931 = tpu.matmul %930, %928, %cst_516 {dimension_numbers = #tpu.dot_dimension_numbers<[1], [0], [0], [1], [0, 0, 1, 1], [], []>} : vector<4x2xf32>, vector<2x6xf32>, vector<4x6xf32> -> vector<4x6xf32>
    %932 = arith.addf %901, %931 : vector<4x6xf32>
    %933 = vector.extract_strided_slice %656 {offsets = [0, 15], sizes = [4, 3], strides = [1, 1]} : vector<4x18xf32> to vector<4x3xf32>
    %934 = vector.extract_strided_slice %933 {offsets = [0, 0], sizes = [2, 3], strides = [1, 1]} : vector<4x3xf32> to vector<2x3xf32>
    %935 = vector.extract_strided_slice %933 {offsets = [2, 0], sizes = [2, 3], strides = [1, 1]} : vector<4x3xf32> to vector<2x3xf32>
    %936 = tpu.concatenate %934, %935 in 1 : vector<2x3xf32>, vector<2x3xf32> -> vector<2x6xf32>
    %cst_517 = arith.constant dense<0.000000e+00> : vector<2x6xf32>
    %937 = tpu.matmul %936, %658, %cst_517 {dimension_numbers = #tpu.dot_dimension_numbers<[1], [0], [0], [1], [0, 0, 1, 1], [], []>} : vector<2x6xf32>, vector<6x6xf32>, vector<2x6xf32> -> vector<2x6xf32>
    %c1_518 = arith.constant 1 : index
    %c0_519 = arith.constant 0 : index
    %c0_520 = arith.constant 0 : index
    %938 = vector.load %arg25[%c1_518, %c0_519, %c0_520] : memref<2x2x4xf32, #tpu.memory_space<vmem>>, vector<1x2x4xf32>
    %939 = vector.shape_cast %938 : vector<1x2x4xf32> to vector<2x4xf32>
    %cst_521 = arith.constant dense<0.000000e+00> : vector<2x6xf32>
    %940 = tpu.matmul %939, %900, %cst_521 {dimension_numbers = #tpu.dot_dimension_numbers<[1], [0], [0], [1], [0, 0, 1, 1], [], []>} : vector<2x4xf32>, vector<4x6xf32>, vector<2x6xf32> -> vector<2x6xf32>
    %941 = arith.addf %937, %940 : vector<2x6xf32>
    %cst_522 = arith.constant dense<0.000000e+00> : vector<2xf32>
    %942 = vector.multi_reduction <add>, %941, %cst_522 [1] : vector<2x6xf32> to vector<2xf32>
    %943 = vector.shape_cast %942 : vector<2xf32> to vector<2x1xf32>
    %cst_523 = arith.constant 6.000000e+00 : f32
    %944 = vector.broadcast %cst_523 : f32 to vector<2x1xf32>
    %945 = arith.divf %943, %944 : vector<2x1xf32>
    %946 = vector.broadcast %945 : vector<2x1xf32> to vector<2x6xf32>
    %947 = arith.subf %941, %946 : vector<2x6xf32>
    %948 = arith.mulf %947, %947 : vector<2x6xf32>
    %cst_524 = arith.constant dense<0.000000e+00> : vector<2xf32>
    %949 = vector.multi_reduction <add>, %948, %cst_524 [1] : vector<2x6xf32> to vector<2xf32>
    %950 = vector.shape_cast %949 : vector<2xf32> to vector<2x1xf32>
    %cst_525 = arith.constant 6.000000e+00 : f32
    %951 = vector.broadcast %cst_525 : f32 to vector<2x1xf32>
    %952 = arith.divf %950, %951 : vector<2x1xf32>
    %953 = vector.broadcast %945 : vector<2x1xf32> to vector<2x6xf32>
    %954 = arith.subf %941, %953 : vector<2x6xf32>
    %cst_526 = arith.constant 9.99999974E-6 : f32
    %955 = vector.broadcast %cst_526 : f32 to vector<2x1xf32>
    %956 = arith.addf %952, %955 : vector<2x1xf32>
    %957 = math.rsqrt %956 : vector<2x1xf32>
    %958 = vector.broadcast %957 : vector<2x1xf32> to vector<2x6xf32>
    %959 = arith.mulf %954, %958 : vector<2x6xf32>
    %c1_527 = arith.constant 1 : index
    %c0_528 = arith.constant 0 : index
    %c0_529 = arith.constant 0 : index
    %960 = vector.load %arg26[%c1_527, %c0_528, %c0_529] : memref<2x4x2xf32, #tpu.memory_space<vmem>>, vector<1x4x2xf32>
    %961 = vector.shape_cast %960 : vector<1x4x2xf32> to vector<4x2xf32>
    %cst_530 = arith.constant dense<0.000000e+00> : vector<4x6xf32>
    %962 = tpu.matmul %961, %959, %cst_530 {dimension_numbers = #tpu.dot_dimension_numbers<[1], [0], [0], [1], [0, 0, 1, 1], [], []>} : vector<4x2xf32>, vector<2x6xf32>, vector<4x6xf32> -> vector<4x6xf32>
    %963 = arith.addf %932, %962 : vector<4x6xf32>
    %cst_531 = arith.constant dense<0.000000e+00> : vector<4x24xf32>
    %964 = tpu.matmul %963, %660, %cst_531 {dimension_numbers = #tpu.dot_dimension_numbers<[1], [0], [0], [1], [0, 0, 1, 1], [], []>} : vector<4x6xf32>, vector<6x24xf32>, vector<4x24xf32> -> vector<4x24xf32>
    %965 = vector.broadcast %662 : vector<1x24xf32> to vector<4x24xf32>
    %966 = arith.addf %964, %965 : vector<4x24xf32>
    %cst_532 = arith.constant 5.000000e-01 : f32
    %967 = vector.broadcast %cst_532 : f32 to vector<4x24xf32>
    %968 = arith.mulf %967, %966 : vector<4x24xf32>
    %cst_533 = arith.constant 0.707106769 : f32
    %969 = vector.broadcast %cst_533 : f32 to vector<4x24xf32>
    %970 = arith.mulf %966, %969 : vector<4x24xf32>
    %cst_534 = arith.constant 0.000000e+00 : f32
    %971 = vector.broadcast %cst_534 : f32 to vector<4x24xf32>
    %972 = arith.cmpf oge, %970, %971 : vector<4x24xf32>
    %cst_535 = arith.constant 1.000000e+00 : f32
    %cst_536 = arith.constant -1.000000e+00 : f32
    %973 = vector.broadcast %cst_535 : f32 to vector<4x24xf32>
    %974 = vector.broadcast %cst_536 : f32 to vector<4x24xf32>
    %975 = arith.select %972, %973, %974 : vector<4x24xi1>, vector<4x24xf32>
    %976 = math.absf %970 : vector<4x24xf32>
    %cst_537 = arith.constant 0.327591091 : f32
    %977 = vector.broadcast %cst_537 : f32 to vector<4x24xf32>
    %978 = arith.mulf %977, %976 : vector<4x24xf32>
    %cst_538 = arith.constant 1.000000e+00 : f32
    %979 = vector.broadcast %cst_538 : f32 to vector<4x24xf32>
    %980 = arith.addf %979, %978 : vector<4x24xf32>
    %cst_539 = arith.constant 1.000000e+00 : f32
    %981 = vector.broadcast %cst_539 : f32 to vector<4x24xf32>
    %982 = arith.divf %981, %980 : vector<4x24xf32>
    %cst_540 = arith.constant 1.06140542 : f32
    %983 = vector.broadcast %cst_540 : f32 to vector<4x24xf32>
    %984 = arith.mulf %982, %983 : vector<4x24xf32>
    %cst_541 = arith.constant -1.45315206 : f32
    %985 = vector.broadcast %cst_541 : f32 to vector<4x24xf32>
    %986 = arith.addf %985, %984 : vector<4x24xf32>
    %987 = arith.mulf %982, %986 : vector<4x24xf32>
    %cst_542 = arith.constant 1.42141378 : f32
    %988 = vector.broadcast %cst_542 : f32 to vector<4x24xf32>
    %989 = arith.addf %988, %987 : vector<4x24xf32>
    %990 = arith.mulf %982, %989 : vector<4x24xf32>
    %cst_543 = arith.constant -0.284496725 : f32
    %991 = vector.broadcast %cst_543 : f32 to vector<4x24xf32>
    %992 = arith.addf %991, %990 : vector<4x24xf32>
    %993 = arith.mulf %982, %992 : vector<4x24xf32>
    %cst_544 = arith.constant 0.254829586 : f32
    %994 = vector.broadcast %cst_544 : f32 to vector<4x24xf32>
    %995 = arith.addf %994, %993 : vector<4x24xf32>
    %996 = arith.mulf %982, %995 : vector<4x24xf32>
    %cst_545 = arith.constant 0.000000e+00 : f32
    %997 = vector.broadcast %cst_545 : f32 to vector<4x24xf32>
    %998 = arith.subf %997, %976 : vector<4x24xf32>
    %999 = arith.mulf %998, %976 : vector<4x24xf32>
    %1000 = math.exp %999 : vector<4x24xf32>
    %1001 = arith.mulf %996, %1000 : vector<4x24xf32>
    %cst_546 = arith.constant 1.000000e+00 : f32
    %1002 = vector.broadcast %cst_546 : f32 to vector<4x24xf32>
    %1003 = arith.subf %1002, %1001 : vector<4x24xf32>
    %1004 = arith.mulf %975, %1003 : vector<4x24xf32>
    %cst_547 = arith.constant 1.000000e+00 : f32
    %1005 = vector.broadcast %cst_547 : f32 to vector<4x24xf32>
    %1006 = arith.addf %1005, %1004 : vector<4x24xf32>
    %1007 = arith.mulf %968, %1006 : vector<4x24xf32>
    %cst_548 = arith.constant dense<0.000000e+00> : vector<4x6xf32>
    %1008 = tpu.matmul %1007, %664, %cst_548 {dimension_numbers = #tpu.dot_dimension_numbers<[1], [0], [0], [1], [0, 0, 1, 1], [], []>} : vector<4x24xf32>, vector<24x6xf32>, vector<4x6xf32> -> vector<4x6xf32>
    %1009 = arith.addf %963, %1008 : vector<4x6xf32>
    %1010 = vector.broadcast %666 : vector<1x6xf32> to vector<4x6xf32>
    %1011 = arith.addf %1009, %1010 : vector<4x6xf32>
    %c2_549 = arith.constant 2 : index
    %c0_550 = arith.constant 0 : index
    %c0_551 = arith.constant 0 : index
    %1012 = vector.load %arg27[%c2_549, %c0_550, %c0_551] : memref<3x12x4xf32, #tpu.memory_space<vmem>>, vector<1x12x4xf32>
    %1013 = vector.shape_cast %1012 : vector<1x12x4xf32> to vector<12x4xf32>
    %cst_552 = arith.constant dense<0.000000e+00> : vector<12x6xf32>
    %1014 = tpu.matmul %1013, %1011, %cst_552 {dimension_numbers = #tpu.dot_dimension_numbers<[1], [0], [0], [1], [0, 0, 1, 1], [], []>} : vector<12x4xf32>, vector<4x6xf32>, vector<12x6xf32> -> vector<12x6xf32>
    %1015 = arith.addf %899, %1014 : vector<12x6xf32>
    %c0_553 = arith.constant 0 : index
    %c0_554 = arith.constant 0 : index
    %c0_555 = arith.constant 0 : index
    %1016 = vector.load %arg28[%c0_553, %c0_554, %c0_555] : memref<2x6x12xf32, #tpu.memory_space<vmem>>, vector<1x6x12xf32>
    %1017 = vector.shape_cast %1016 : vector<1x6x12xf32> to vector<6x12xf32>
    %cst_556 = arith.constant dense<0.000000e+00> : vector<6x6xf32>
    %1018 = tpu.matmul %1017, %1015, %cst_556 {dimension_numbers = #tpu.dot_dimension_numbers<[1], [0], [0], [1], [0, 0, 1, 1], [], []>} : vector<6x12xf32>, vector<12x6xf32>, vector<6x6xf32> -> vector<6x6xf32>
    %c0_557 = arith.constant 0 : index
    %c0_558 = arith.constant 0 : index
    %c0_559 = arith.constant 0 : index
    %1019 = vector.load %arg29[%c0_557, %c0_558, %c0_559] : memref<2x6x12xf32, #tpu.memory_space<vmem>>, vector<1x6x12xf32>
    %1020 = vector.shape_cast %1019 : vector<1x6x12xf32> to vector<6x12xf32>
    %cst_560 = arith.constant dense<0.000000e+00> : vector<6x12xf32>
    %1021 = tpu.matmul %1018, %1020, %cst_560 {dimension_numbers = #tpu.dot_dimension_numbers<[1], [0], [0], [1], [0, 0, 1, 1], [], []>} : vector<6x6xf32>, vector<6x12xf32>, vector<6x12xf32> -> vector<6x12xf32>
    %c1_561 = arith.constant 1 : index
    %c0_562 = arith.constant 0 : index
    %c0_563 = arith.constant 0 : index
    %1022 = vector.load %arg28[%c1_561, %c0_562, %c0_563] : memref<2x6x12xf32, #tpu.memory_space<vmem>>, vector<1x6x12xf32>
    %1023 = vector.shape_cast %1022 : vector<1x6x12xf32> to vector<6x12xf32>
    %cst_564 = arith.constant dense<0.000000e+00> : vector<6x6xf32>
    %1024 = tpu.matmul %1023, %1015, %cst_564 {dimension_numbers = #tpu.dot_dimension_numbers<[1], [0], [0], [1], [0, 0, 1, 1], [], []>} : vector<6x12xf32>, vector<12x6xf32>, vector<6x6xf32> -> vector<6x6xf32>
    %c1_565 = arith.constant 1 : index
    %c0_566 = arith.constant 0 : index
    %c0_567 = arith.constant 0 : index
    %1025 = vector.load %arg29[%c1_565, %c0_566, %c0_567] : memref<2x6x12xf32, #tpu.memory_space<vmem>>, vector<1x6x12xf32>
    %1026 = vector.shape_cast %1025 : vector<1x6x12xf32> to vector<6x12xf32>
    %cst_568 = arith.constant dense<0.000000e+00> : vector<6x12xf32>
    %1027 = tpu.matmul %1024, %1026, %cst_568 {dimension_numbers = #tpu.dot_dimension_numbers<[1], [0], [0], [1], [0, 0, 1, 1], [], []>} : vector<6x6xf32>, vector<6x12xf32>, vector<6x12xf32> -> vector<6x12xf32>
    %1028 = arith.addf %1021, %1027 : vector<6x12xf32>
    %cst_569 = arith.constant 0.000000e+00 : f32
    %1029 = vector.broadcast %cst_569 : f32 to vector<6x192xf32>
    %c0_570 = arith.constant 0 : index
    %c0_571 = arith.constant 0 : index
    %c0_572 = arith.constant 0 : index
    %1030 = vector.load %arg30[%c0_570, %c0_571, %c0_572] : memref<3x6x6xf32, #tpu.memory_space<vmem>>, vector<1x6x6xf32>
    %1031 = vector.shape_cast %1030 : vector<1x6x6xf32> to vector<6x6xf32>
    %cst_573 = arith.constant dense<0.000000e+00> : vector<6x12xf32>
    %1032 = tpu.matmul %1031, %1028, %cst_573 {dimension_numbers = #tpu.dot_dimension_numbers<[1], [0], [0], [1], [0, 0, 1, 1], [], []>} : vector<6x6xf32>, vector<6x12xf32>, vector<6x12xf32> -> vector<6x12xf32>
    %c0_574 = arith.constant 0 : index
    %c0_575 = arith.constant 0 : index
    %c0_576 = arith.constant 0 : index
    %1033 = vector.load %arg31[%c0_574, %c0_575, %c0_576] : memref<3x12x192xf32, #tpu.memory_space<vmem>>, vector<1x12x192xf32>
    %1034 = vector.shape_cast %1033 : vector<1x12x192xf32> to vector<12x192xf32>
    %cst_577 = arith.constant dense<0.000000e+00> : vector<6x192xf32>
    %1035 = tpu.matmul %1032, %1034, %cst_577 {dimension_numbers = #tpu.dot_dimension_numbers<[1], [0], [0], [1], [0, 0, 1, 1], [], []>} : vector<6x12xf32>, vector<12x192xf32>, vector<6x192xf32> -> vector<6x192xf32>
    %1036 = arith.addf %1029, %1035 : vector<6x192xf32>
    %c1_578 = arith.constant 1 : index
    %c0_579 = arith.constant 0 : index
    %c0_580 = arith.constant 0 : index
    %1037 = vector.load %arg30[%c1_578, %c0_579, %c0_580] : memref<3x6x6xf32, #tpu.memory_space<vmem>>, vector<1x6x6xf32>
    %1038 = vector.shape_cast %1037 : vector<1x6x6xf32> to vector<6x6xf32>
    %cst_581 = arith.constant dense<0.000000e+00> : vector<6x12xf32>
    %1039 = tpu.matmul %1038, %1028, %cst_581 {dimension_numbers = #tpu.dot_dimension_numbers<[1], [0], [0], [1], [0, 0, 1, 1], [], []>} : vector<6x6xf32>, vector<6x12xf32>, vector<6x12xf32> -> vector<6x12xf32>
    %c1_582 = arith.constant 1 : index
    %c0_583 = arith.constant 0 : index
    %c0_584 = arith.constant 0 : index
    %1040 = vector.load %arg31[%c1_582, %c0_583, %c0_584] : memref<3x12x192xf32, #tpu.memory_space<vmem>>, vector<1x12x192xf32>
    %1041 = vector.shape_cast %1040 : vector<1x12x192xf32> to vector<12x192xf32>
    %cst_585 = arith.constant dense<0.000000e+00> : vector<6x192xf32>
    %1042 = tpu.matmul %1039, %1041, %cst_585 {dimension_numbers = #tpu.dot_dimension_numbers<[1], [0], [0], [1], [0, 0, 1, 1], [], []>} : vector<6x12xf32>, vector<12x192xf32>, vector<6x192xf32> -> vector<6x192xf32>
    %1043 = arith.addf %1036, %1042 : vector<6x192xf32>
    %c2_586 = arith.constant 2 : index
    %c0_587 = arith.constant 0 : index
    %c0_588 = arith.constant 0 : index
    %1044 = vector.load %arg30[%c2_586, %c0_587, %c0_588] : memref<3x6x6xf32, #tpu.memory_space<vmem>>, vector<1x6x6xf32>
    %1045 = vector.shape_cast %1044 : vector<1x6x6xf32> to vector<6x6xf32>
    %cst_589 = arith.constant dense<0.000000e+00> : vector<6x12xf32>
    %1046 = tpu.matmul %1045, %1028, %cst_589 {dimension_numbers = #tpu.dot_dimension_numbers<[1], [0], [0], [1], [0, 0, 1, 1], [], []>} : vector<6x6xf32>, vector<6x12xf32>, vector<6x12xf32> -> vector<6x12xf32>
    %c2_590 = arith.constant 2 : index
    %c0_591 = arith.constant 0 : index
    %c0_592 = arith.constant 0 : index
    %1047 = vector.load %arg31[%c2_590, %c0_591, %c0_592] : memref<3x12x192xf32, #tpu.memory_space<vmem>>, vector<1x12x192xf32>
    %1048 = vector.shape_cast %1047 : vector<1x12x192xf32> to vector<12x192xf32>
    %cst_593 = arith.constant dense<0.000000e+00> : vector<6x192xf32>
    %1049 = tpu.matmul %1046, %1048, %cst_593 {dimension_numbers = #tpu.dot_dimension_numbers<[1], [0], [0], [1], [0, 0, 1, 1], [], []>} : vector<6x12xf32>, vector<12x192xf32>, vector<6x192xf32> -> vector<6x192xf32>
    %1050 = arith.addf %1043, %1049 : vector<6x192xf32>
    %c0_594 = arith.constant 0 : index
    %c0_595 = arith.constant 0 : index
    %1051 = vector.load %arg32[%c0_594, %c0_595] : memref<1x192xf32, #tpu.memory_space<vmem>>, vector<1x192xf32>
    %1052 = vector.broadcast %1051 : vector<1x192xf32> to vector<6x192xf32>
    %1053 = arith.addf %1050, %1052 : vector<6x192xf32>
    %cst_596 = arith.constant 0.000000e+00 : f32
    %1054 = vector.broadcast %cst_596 : f32 to vector<6x192xf32>
    %1055 = arith.maximumf %1053, %1054 : vector<6x192xf32>
    %cst_597 = arith.constant 0.000000e+00 : f32
    %1056 = vector.broadcast %cst_597 : f32 to vector<6x384xf32>
    %c0_598 = arith.constant 0 : index
    %c0_599 = arith.constant 0 : index
    %c0_600 = arith.constant 0 : index
    %1057 = vector.load %arg30[%c0_598, %c0_599, %c0_600] : memref<3x6x6xf32, #tpu.memory_space<vmem>>, vector<1x6x6xf32>
    %1058 = vector.shape_cast %1057 : vector<1x6x6xf32> to vector<6x6xf32>
    %cst_601 = arith.constant dense<0.000000e+00> : vector<6x192xf32>
    %1059 = tpu.matmul %1058, %1055, %cst_601 {dimension_numbers = #tpu.dot_dimension_numbers<[1], [0], [0], [1], [0, 0, 1, 1], [], []>} : vector<6x6xf32>, vector<6x192xf32>, vector<6x192xf32> -> vector<6x192xf32>
    %c0_602 = arith.constant 0 : index
    %c0_603 = arith.constant 0 : index
    %c0_604 = arith.constant 0 : index
    %1060 = vector.load %arg33[%c0_602, %c0_603, %c0_604] : memref<3x192x384xf32, #tpu.memory_space<vmem>>, vector<1x192x384xf32>
    %1061 = vector.shape_cast %1060 : vector<1x192x384xf32> to vector<192x384xf32>
    %cst_605 = arith.constant dense<0.000000e+00> : vector<6x384xf32>
    %1062 = tpu.matmul %1059, %1061, %cst_605 {dimension_numbers = #tpu.dot_dimension_numbers<[1], [0], [0], [1], [0, 0, 1, 1], [], []>} : vector<6x192xf32>, vector<192x384xf32>, vector<6x384xf32> -> vector<6x384xf32>
    %1063 = arith.addf %1056, %1062 : vector<6x384xf32>
    %c1_606 = arith.constant 1 : index
    %c0_607 = arith.constant 0 : index
    %c0_608 = arith.constant 0 : index
    %1064 = vector.load %arg30[%c1_606, %c0_607, %c0_608] : memref<3x6x6xf32, #tpu.memory_space<vmem>>, vector<1x6x6xf32>
    %1065 = vector.shape_cast %1064 : vector<1x6x6xf32> to vector<6x6xf32>
    %cst_609 = arith.constant dense<0.000000e+00> : vector<6x192xf32>
    %1066 = tpu.matmul %1065, %1055, %cst_609 {dimension_numbers = #tpu.dot_dimension_numbers<[1], [0], [0], [1], [0, 0, 1, 1], [], []>} : vector<6x6xf32>, vector<6x192xf32>, vector<6x192xf32> -> vector<6x192xf32>
    %c1_610 = arith.constant 1 : index
    %c0_611 = arith.constant 0 : index
    %c0_612 = arith.constant 0 : index
    %1067 = vector.load %arg33[%c1_610, %c0_611, %c0_612] : memref<3x192x384xf32, #tpu.memory_space<vmem>>, vector<1x192x384xf32>
    %1068 = vector.shape_cast %1067 : vector<1x192x384xf32> to vector<192x384xf32>
    %cst_613 = arith.constant dense<0.000000e+00> : vector<6x384xf32>
    %1069 = tpu.matmul %1066, %1068, %cst_613 {dimension_numbers = #tpu.dot_dimension_numbers<[1], [0], [0], [1], [0, 0, 1, 1], [], []>} : vector<6x192xf32>, vector<192x384xf32>, vector<6x384xf32> -> vector<6x384xf32>
    %1070 = arith.addf %1063, %1069 : vector<6x384xf32>
    %c2_614 = arith.constant 2 : index
    %c0_615 = arith.constant 0 : index
    %c0_616 = arith.constant 0 : index
    %1071 = vector.load %arg30[%c2_614, %c0_615, %c0_616] : memref<3x6x6xf32, #tpu.memory_space<vmem>>, vector<1x6x6xf32>
    %1072 = vector.shape_cast %1071 : vector<1x6x6xf32> to vector<6x6xf32>
    %cst_617 = arith.constant dense<0.000000e+00> : vector<6x192xf32>
    %1073 = tpu.matmul %1072, %1055, %cst_617 {dimension_numbers = #tpu.dot_dimension_numbers<[1], [0], [0], [1], [0, 0, 1, 1], [], []>} : vector<6x6xf32>, vector<6x192xf32>, vector<6x192xf32> -> vector<6x192xf32>
    %c2_618 = arith.constant 2 : index
    %c0_619 = arith.constant 0 : index
    %c0_620 = arith.constant 0 : index
    %1074 = vector.load %arg33[%c2_618, %c0_619, %c0_620] : memref<3x192x384xf32, #tpu.memory_space<vmem>>, vector<1x192x384xf32>
    %1075 = vector.shape_cast %1074 : vector<1x192x384xf32> to vector<192x384xf32>
    %cst_621 = arith.constant dense<0.000000e+00> : vector<6x384xf32>
    %1076 = tpu.matmul %1073, %1075, %cst_621 {dimension_numbers = #tpu.dot_dimension_numbers<[1], [0], [0], [1], [0, 0, 1, 1], [], []>} : vector<6x192xf32>, vector<192x384xf32>, vector<6x384xf32> -> vector<6x384xf32>
    %1077 = arith.addf %1070, %1076 : vector<6x384xf32>
    %c0_622 = arith.constant 0 : index
    %c0_623 = arith.constant 0 : index
    %1078 = vector.load %arg34[%c0_622, %c0_623] : memref<1x384xf32, #tpu.memory_space<vmem>>, vector<1x384xf32>
    %1079 = vector.broadcast %1078 : vector<1x384xf32> to vector<6x384xf32>
    %1080 = arith.addf %1077, %1079 : vector<6x384xf32>
    %cst_624 = arith.constant 0.000000e+00 : f32
    %1081 = vector.broadcast %cst_624 : f32 to vector<6x384xf32>
    %1082 = arith.maximumf %1080, %1081 : vector<6x384xf32>
    %c0_625 = arith.constant 0 : index
    %c0_626 = arith.constant 0 : index
    %1083 = vector.load %arg35[%c0_625, %c0_626] : memref<6x6xf32, #tpu.memory_space<vmem>>, vector<6x6xf32>
    %cst_627 = arith.constant dense<0.000000e+00> : vector<6x384xf32>
    %1084 = tpu.matmul %1083, %1082, %cst_627 {dimension_numbers = #tpu.dot_dimension_numbers<[1], [0], [0], [1], [0, 0, 1, 1], [], []>} : vector<6x6xf32>, vector<6x384xf32>, vector<6x384xf32> -> vector<6x384xf32>
    %c0_628 = arith.constant 0 : index
    %c0_629 = arith.constant 0 : index
    %1085 = vector.load %arg36[%c0_628, %c0_629] : memref<384x128xf32, #tpu.memory_space<vmem>>, vector<384x128xf32>
    %cst_630 = arith.constant dense<0.000000e+00> : vector<6x128xf32>
    %1086 = tpu.matmul %1084, %1085, %cst_630 {dimension_numbers = #tpu.dot_dimension_numbers<[1], [0], [0], [1], [0, 0, 1, 1], [], []>} : vector<6x384xf32>, vector<384x128xf32>, vector<6x128xf32> -> vector<6x128xf32>
    %cst_631 = arith.constant 0.000000e+00 : f32
    %1087 = vector.broadcast %cst_631 : f32 to vector<3x4xf32>
    %c0_632 = arith.constant 0 : index
    %c0_633 = arith.constant 0 : index
    %c0_634 = arith.constant 0 : index
    %1088 = vector.load %arg37[%c0_632, %c0_633, %c0_634] : memref<2x3x6xf32, #tpu.memory_space<vmem>>, vector<1x3x6xf32>
    %1089 = vector.shape_cast %1088 : vector<1x3x6xf32> to vector<3x6xf32>
    %cst_635 = arith.constant dense<0.000000e+00> : vector<3x128xf32>
    %1090 = tpu.matmul %1089, %1086, %cst_635 {dimension_numbers = #tpu.dot_dimension_numbers<[1], [0], [0], [1], [0, 0, 1, 1], [], []>} : vector<3x6xf32>, vector<6x128xf32>, vector<3x128xf32> -> vector<3x128xf32>
    %c0_636 = arith.constant 0 : index
    %c0_637 = arith.constant 0 : index
    %c0_638 = arith.constant 0 : index
    %1091 = vector.load %arg38[%c0_636, %c0_637, %c0_638] : memref<2x128x4xf32, #tpu.memory_space<vmem>>, vector<1x128x4xf32>
    %1092 = vector.shape_cast %1091 : vector<1x128x4xf32> to vector<128x4xf32>
    %cst_639 = arith.constant dense<0.000000e+00> : vector<3x4xf32>
    %1093 = tpu.matmul %1090, %1092, %cst_639 {dimension_numbers = #tpu.dot_dimension_numbers<[1], [0], [0], [1], [0, 0, 1, 1], [], []>} : vector<3x128xf32>, vector<128x4xf32>, vector<3x4xf32> -> vector<3x4xf32>
    %1094 = arith.addf %1087, %1093 : vector<3x4xf32>
    %c1_640 = arith.constant 1 : index
    %c0_641 = arith.constant 0 : index
    %c0_642 = arith.constant 0 : index
    %1095 = vector.load %arg37[%c1_640, %c0_641, %c0_642] : memref<2x3x6xf32, #tpu.memory_space<vmem>>, vector<1x3x6xf32>
    %1096 = vector.shape_cast %1095 : vector<1x3x6xf32> to vector<3x6xf32>
    %cst_643 = arith.constant dense<0.000000e+00> : vector<3x128xf32>
    %1097 = tpu.matmul %1096, %1086, %cst_643 {dimension_numbers = #tpu.dot_dimension_numbers<[1], [0], [0], [1], [0, 0, 1, 1], [], []>} : vector<3x6xf32>, vector<6x128xf32>, vector<3x128xf32> -> vector<3x128xf32>
    %c1_644 = arith.constant 1 : index
    %c0_645 = arith.constant 0 : index
    %c0_646 = arith.constant 0 : index
    %1098 = vector.load %arg38[%c1_644, %c0_645, %c0_646] : memref<2x128x4xf32, #tpu.memory_space<vmem>>, vector<1x128x4xf32>
    %1099 = vector.shape_cast %1098 : vector<1x128x4xf32> to vector<128x4xf32>
    %cst_647 = arith.constant dense<0.000000e+00> : vector<3x4xf32>
    %1100 = tpu.matmul %1097, %1099, %cst_647 {dimension_numbers = #tpu.dot_dimension_numbers<[1], [0], [0], [1], [0, 0, 1, 1], [], []>} : vector<3x128xf32>, vector<128x4xf32>, vector<3x4xf32> -> vector<3x4xf32>
    %1101 = arith.addf %1094, %1100 : vector<3x4xf32>
    %c0_648 = arith.constant 0 : index
    %c0_649 = arith.constant 0 : index
    %1102 = vector.load %arg39[%c0_648, %c0_649] : memref<1x4xf32, #tpu.memory_space<vmem>>, vector<1x4xf32>
    %1103 = vector.broadcast %1102 : vector<1x4xf32> to vector<3x4xf32>
    %1104 = arith.addf %1101, %1103 : vector<3x4xf32>
    %cst_650 = arith.constant dense<0xFF800000> : vector<3xf32>
    %1105 = vector.multi_reduction <maximumf>, %1104, %cst_650 [1] : vector<3x4xf32> to vector<3xf32>
    %1106 = vector.shape_cast %1105 : vector<3xf32> to vector<3x1xf32>
    %1107 = vector.broadcast %1106 : vector<3x1xf32> to vector<3x4xf32>
    %1108 = arith.subf %1104, %1107 : vector<3x4xf32>
    %1109 = math.exp %1108 : vector<3x4xf32>
    %cst_651 = arith.constant dense<0.000000e+00> : vector<3xf32>
    %1110 = vector.multi_reduction <add>, %1109, %cst_651 [1] : vector<3x4xf32> to vector<3xf32>
    %1111 = vector.shape_cast %1110 : vector<3xf32> to vector<3x1xf32>
    %1112 = vector.broadcast %1111 : vector<3x1xf32> to vector<3x4xf32>
    %1113 = arith.divf %1109, %1112 : vector<3x4xf32>
    %c0_652 = arith.constant 0 : index
    %c0_653 = arith.constant 0 : index
    %1114 = vector.load %arg40[%c0_652, %c0_653] : memref<3x4xf32, #tpu.memory_space<vmem>>, vector<3x4xf32>
    tpu.vector_store %arg40[%c0_652, %c0_653], %1113 {strides = array<i32>} : memref<3x4xf32, #tpu.memory_space<vmem>>, vector<3x4xf32>,
    return
  }
}

</mosaic_0001>

<bundles_post_ra>
// kernel: _lambda_.1
= control target key start
LH: loop header
LB: loop body
LE: loop exit
PB: predicated region body
PF: predicated region fallthrough
CT: control target
= control target key end

     0   :  { %s18056_s6 = smov 1   ;;  %s18057_s10 = smov 2   ;;  %s20653_s0 = inlined_call_operand.smem [shape: u32[41], index: -1, kind: input, shape index: {}] }
   0x1   :  { %s18167_s5 = sld [smem:[%s20653_s0]]   ;;  %s18058_s14 = smov 3  }
   0x2   :  { %s18172_s9 = sld [smem:[%s20653_s0 + %s18056_s6]]   ;;  %s18059_s18 = smov 4  }
   0x3   :  { %s18177_s13 = sld [smem:[%s20653_s0 + %s18057_s10]]   ;;  %s18060_s22 = smov 5  }
   0x4   :  { %s18182_s17 = sld [smem:[%s20653_s0 + %s18058_s14]]   ;;  %s18061_s26 = smov 6  }
   0x5   :  { %s18187_s21 = sld [smem:[%s20653_s0 + %s18059_s18]]   ;;  %s18062_s30 = smov 7  }
   0x6   :  { %s18192_s25 = sld [smem:[%s20653_s0 + %s18060_s22]]   ;;  %s18063_s4 = smov 8  }
   0x7   :  { %20693 = sst [smem:[#allocation72_spill]] %s18167_s5  ;;  %s18064_s10 = smov 9  }
   0x8   :  { %20694 = sst [smem:[#allocation73_spill]] %s18172_s9  ;;  %s18065_s15 = smov 10  }
   0x9   :  { %s18197_s29 = sld [smem:[%s20653_s0 + %s18061_s26]]   ;;  %s18066_s20 = smov 11  }
   0xa   :  { %20695 = sst [smem:[#allocation74_spill]] %s18182_s17  ;;  %s18067_s26 = smov 12  }
   0xb   :  { %s18202_s3 = sld [smem:[%s20653_s0 + %s18062_s30]]   ;;  %s18068_s1 = smov 13  }
   0xc   :  { %20696 = sst [smem:[#allocation75_spill]] %s18192_s25  ;;  %s18069_s7 = smov 14  }
   0xd   :  { %s18207_s8 = sld [smem:[%s20653_s0 + %s18063_s4]]   ;;  %s18071_s22 = smov 16  }
   0xe   :  { %s18212_s14 = sld [smem:[%s20653_s0 + %s18064_s10]]   ;;  %s18072_s28 = smov 17  }
   0xf   :  { %s18217_s19 = sld [smem:[%s20653_s0 + %s18065_s15]]   ;;  %s18070_s15 = smov 15  }
  0x10   :  { %s18222_s24 = sld [smem:[%s20653_s0 + %s18066_s20]]  }
  0x11   :  { %20697 = sst [smem:[#allocation76_spill]] %s18202_s3 }
  0x12   :  { %s18227_s30 = sld [smem:[%s20653_s0 + %s18067_s26]]  }
  0x13   :  { %s18232_s6 = sld [smem:[%s20653_s0 + %s18068_s1]]  }
  0x14   :  { %20698 = sst [smem:[#allocation77_spill]] %s18212_s14 }
  0x15   :  { %s18237_s12 = sld [smem:[%s20653_s0 + %s18069_s7]]   ;;  %s18073_s7 = smov 18  }
  0x16   :  { %20699 = sst [smem:[#allocation78_spill]] %s18222_s24 }
  0x17   :  { %s18242_s20 = sld [smem:[%s20653_s0 + %s18070_s15]]   ;;  %s18074_s15 = smov 19  }
  0x18   :  { %s18247_s27 = sld [smem:[%s20653_s0 + %s18071_s22]]   ;;  %s18075_s22 = smov 20  }
  0x19   :  { %20700 = sst [smem:[#allocation79_spill]] %s18232_s6 }
  0x1a   :  { %s18252_s4 = sld [smem:[%s20653_s0 + %s18072_s28]]   ;;  %s18076_s28 = smov 21  }
  0x1b   :  { %s18257_s5 = sld [smem:[%s20653_s0 + %s18073_s7]]   ;;  %s18077_s7 = smov 22  }
  0x1c   :  { %s18267_s6 = sld [smem:[%s20653_s0 + %s18075_s22]]   ;;  %s18079_s22 = smov 24  }
  0x1d   :  { %20701 = sst [smem:[#allocation80_spill]] %s18242_s20 }
  0x1e   :  { %s18262_s20 = sld [smem:[%s20653_s0 + %s18074_s15]]   ;;  %s18078_s15 = smov 23  }
  0x1f   :  { %s18277_s24 = sld [smem:[%s20653_s0 + %s18077_s7]]   ;;  %s18081_s7 = smov 26  }
  0x20   :  { %20702 = sst [smem:[#allocation81_spill]] %s18252_s4 }
  0x21   :  { %s18272_s4 = sld [smem:[%s20653_s0 + %s18076_s28]]   ;;  %s18080_s28 = smov 25  }
  0x22   :  { %s18287_s14 = sld [smem:[%s20653_s0 + %s18079_s22]]   ;;  %s18083_s22 = smov 28  }
  0x23   :  { %s18297_s3 = sld [smem:[%s20653_s0 + %s18081_s7]]   ;;  %s18085_s7 = smov 30  }
  0x24   :  { %20703 = sst [smem:[#allocation82_spill]] %s18262_s20 }
  0x25   :  { %s18282_s20 = sld [smem:[%s20653_s0 + %s18078_s15]]   ;;  %s18082_s15 = smov 27  }
  0x26   :  { %s18307_s25 = sld [smem:[%s20653_s0 + %s18083_s22]]   ;;  %s18087_s22 = smov 32  }
  0x27   :  { %20704 = sst [smem:[#allocation83_spill]] %s18272_s4 }
  0x28   :  { %s18292_s4 = sld [smem:[%s20653_s0 + %s18080_s28]]   ;;  %s18084_s28 = smov 29  }
  0x29   :  { %s18317_s17 = sld [smem:[%s20653_s0 + %s18085_s7]]   ;;  %s18089_s7 = smov 34  }
  0x2a   :  { %s18327_s9 = sld [smem:[%s20653_s0 + %s18087_s22]]   ;;  %s18091_s22 = smov 36  }
  0x2b   :  { %20705 = sst [smem:[#allocation84_spill]] %s18282_s20 }
  0x2c   :  { %s18302_s20 = sld [smem:[%s20653_s0 + %s18082_s15]]   ;;  %s18086_s15 = smov 31  }
  0x2e   :  { %20706 = sst [smem:[#allocation85_spill]] %s18292_s4 }
  0x2f   :  { %s18312_s4 = sld [smem:[%s20653_s0 + %s18084_s28]]   ;;  %s18088_s28 = smov 33  }
  0x30   :  { %20709 = sst [smem:[#allocation88_spill]] %s18317_s17 }
  0x31   :  { %20711 = sst [smem:[#allocation90_spill]] %s18327_s9 }
  0x32   :  { %20707 = sst [smem:[#allocation86_spill]] %s18302_s20 }
  0x33   :  { %s18322_s20 = sld [smem:[%s20653_s0 + %s18086_s15]]   ;;  %s18090_s15 = smov 35  }
  0x34   :  { %s18337_s17 = sld [smem:[%s20653_s0 + %s18089_s7]]   ;;  %s18093_s7 = smov 38  }
  0x35   :  { %20708 = sst [smem:[#allocation87_spill]] %s18312_s4 }
  0x36   :  { %s18332_s4 = sld [smem:[%s20653_s0 + %s18088_s28]]   ;;  %s18092_s28 = smov 37  }
  0x37   :  { %s18347_s9 = sld [smem:[%s20653_s0 + %s18091_s22]]   ;;  %s18095_s22 = smov 40  }
  0x39   :  { %20710 = sst [smem:[#allocation89_spill]] %s18322_s20 }
  0x3a   :  { %20713 = sst [smem:[#allocation92_spill]] %s18337_s17 }
  0x3b   :  { %s18342_s20 = sld [smem:[%s20653_s0 + %s18090_s15]]   ;;  %s18094_s15 = smov 39  }
  0x3c   :  { %20712 = sst [smem:[#allocation91_spill]] %s18332_s4 }
  0x3d   :  { %20715 = sst [smem:[#allocation94_spill]] %s18347_s9 }
  0x3e   :  { %s18352_s4 = sld [smem:[%s20653_s0 + %s18092_s28]]  }
  0x3f   :  { %s18357_s17 = sld [smem:[%s20653_s0 + %s18093_s7]]  }
  0x40   :  { %s18367_s9 = sld [smem:[%s20653_s0 + %s18095_s22]]  }
  0x41   :  { %20714 = sst [smem:[#allocation93_spill]] %s18342_s20 }
  0x42   :  { %s18362_s20 = sld [smem:[%s20653_s0 + %s18094_s15]]  }
  0x43   :  { %86 = vsyncpa [#allocation3], 0 }
  0x44   :  { %87 = vsyncpa [#allocation6], 0 }
  0x45   :  { %88 = vsyncpa [#allocation9], 0 }
  0x46   :  { %89 = vsyncpa [#allocation12], 0 }
  0x47   :  { %90 = vsyncpa [#allocation15], 0 }
  0x48   :  { %91 = vsyncpa [#allocation18], 0 }
  0x49   :  { %92 = vsyncpa [#allocation21], 0 }
  0x4a   :  { %93 = vsyncpa [#allocation24], 0 }
  0x4b   :  { %94 = vsyncpa [#allocation27], 0 }
  0x4c   :  { %95 = vsyncpa [#allocation30], 0 }
  0x4d   :  { %96 = vsyncpa [#allocation33], 0 }
  0x4e   :  { %97 = vsyncpa [#allocation36], 0 }
  0x4f   :  { %98 = vsyncpa [#allocation39], 0 }
  0x50   :  { %99 = vsyncpa [#allocation42], 0 }
  0x51   :  { %100 = vsyncpa [#allocation45], 0 }
  0x52   :  { %101 = vsyncpa [#allocation48], 0 }
  0x53   :  { %102 = vsyncpa [#allocation51], 0 }
  0x54   :  { %103 = vsyncpa [#allocation4], 0  ;;  %s18096_s0 = smov [#allocation5]   ;;  %s18097_s1 = smov [#allocation8]  }
  0x55   :  { %s123_s28 = sshll.u32 %s18096_s0, 4  ;;  %s148_s2 = sshll.u32 %s18097_s1, 4  ;;  %s124_s28 = int_to_ptr.vmem [resolvable:$true] %s123_s28  ;;  %s18369_s2 = int_to_ptr.vmem [resolvable:$true] %s148_s2 }
  0x56   :  { %s17272_s7 = scalar_lea.hbm %s18177_s13, 640 }
  0x57   :  { %p17273_p0 = scmp.ne.s32.totalorder %s18177_s13, %s17272_s7  ;;  %p17276_p1 = scmp.lt.u32.totalorder %s17272_s7, %s18177_s13 }
  0x59   :  { %p17278_p2 = pnand %p17276_p1, %p17273_p0 }
  0x5b   :  { %17281 = shalt.err (!%p17278_p2)
}
  0x5c   :  { %s17282_s10 = scalar_lea.vmem %s124_s28, 640  ;;  %p17287_p4 = scmp.lt.s32.totalorder %s124_s28, %s124_s28 }
  0x5d   :  { %p17283_p3 = scmp.ne.s32.totalorder %s124_s28, %s17282_s10  ;;  %p17288_p5 = scmp.lt.s32.totalorder %s17282_s10, %s17282_s10 }
  0x5f   :  { %p17289_p6 = por %p17288_p5, %p17287_p4 }
  0x61   :  { %p17290_p7 = pnand %p17289_p6, %p17283_p3 }
  0x63   :  { %17293 = shalt.err (!%p17290_p7)
}
  0x64   :  { %s18098_s11 = smov 128   ;;  %s18099_s15 = smov 8  }
  0x65   :  { %129 = dma.hbm_to_vmem [thread:$0]  %s18177_s13, 640, %s124_s28, [#allocation6], %s18098_s11, %s18098_s11, %s18099_s15  }
  0x66   :  { %s17294_s16 = scalar_lea.hbm %s18187_s21, 48 }
  0x67   :  { %p17295_p8 = scmp.ne.s32.totalorder %s18187_s21, %s17294_s16  ;;  %p17298_p9 = scmp.lt.u32.totalorder %s17294_s16, %s18187_s21 }
  0x69   :  { %p17300_p10 = pnand %p17298_p9, %p17295_p8 }
  0x6b   :  { %17303 = shalt.err (!%p17300_p10)
}
  0x6c   :  { %s17304_s18 = scalar_lea.vmem %s18369_s2, 48  ;;  %s17308_s22 = scalar_lea.vmem %s18369_s2, 64 }
  0x6d   :  { %p17305_p11 = scmp.ne.s32.totalorder %s18369_s2, %s17304_s18  ;;  %p17309_p12 = scmp.lt.s32.totalorder %s18369_s2, %s18369_s2 }
  0x6e   :  { %p17310_p13 = scmp.lt.s32.totalorder %s17308_s22, %s17304_s18 }
  0x70   :  { %p17311_p0 = por %p17310_p13, %p17309_p12 }
  0x72   :  { %p17312_p1 = pnand %p17311_p0, %p17305_p11 }
  0x74   :  { %17315 = shalt.err (!%p17312_p1)
}
  0x75   :  { %151 = dma.hbm_to_vmem [thread:$0]  %s18187_s21, 48, %s18369_s2, [#allocation9]  }
  0x76   :  { %s18100_s13 = smov [#allocation11]   ;;  %s17316_s26 = scalar_lea.hbm %s18197_s29, 2560 }
  0x77   :  { %s167_s23 = sshll.u32 %s18100_s13, 4  ;;  %p17317_p2 = scmp.ne.s32.totalorder %s18197_s29, %s17316_s26  ;;  %s168_s23 = int_to_ptr.vmem [resolvable:$true] %s167_s23 }
  0x78   :  { %p17320_p3 = scmp.lt.u32.totalorder %s17316_s26, %s18197_s29 }
  0x7a   :  { %p17322_p4 = pnand %p17320_p3, %p17317_p2 }
  0x7c   :  { %17325 = shalt.err (!%p17322_p4)
}
  0x7d   :  { %s17326_s0 = scalar_lea.vmem %s168_s23, 2560  ;;  %p17331_p6 = scmp.lt.s32.totalorder %s168_s23, %s168_s23 }
  0x7e   :  { %p17327_p5 = scmp.ne.s32.totalorder %s168_s23, %s17326_s0  ;;  %p17332_p7 = scmp.lt.s32.totalorder %s17326_s0, %s17326_s0 }
  0x80   :  { %p17333_p8 = por %p17332_p7, %p17331_p6 }
  0x82   :  { %p17334_p9 = pnand %p17333_p8, %p17327_p5 }
  0x84   :  { %17337 = shalt.err (!%p17334_p9)
}
  0x85   :  { %s18101_s28 = smov 640   ;;  %s18102_s21 = smov 40  }
  0x86   :  { %173 = dma.hbm_to_vmem [thread:$0]  %s18197_s29, 2560, %s168_s23, [#allocation12], %s18101_s28, %s18101_s28, %s18102_s21  }
  0x87   :  { %s18103_s1 = smov [#allocation14]   ;;  %s17338_s7 = scalar_lea.hbm %s18207_s8, 9216 }
  0x88   :  { %s189_s2 = sshll.u32 %s18103_s1, 4  ;;  %p17339_p10 = scmp.ne.s32.totalorder %s18207_s8, %s17338_s7  ;;  %s190_s2 = int_to_ptr.vmem [resolvable:$true] %s189_s2 }
  0x89   :  { %p17342_p11 = scmp.lt.u32.totalorder %s17338_s7, %s18207_s8 }
  0x8b   :  { %p17344_p12 = pnand %p17342_p11, %p17339_p10 }
  0x8d   :  { %17347 = shalt.err (!%p17344_p12)
}
  0x8e   :  { %s17348_s10 = scalar_lea.vmem %s190_s2, 9216  ;;  %p17353_p0 = scmp.lt.s32.totalorder %s190_s2, %s190_s2 }
  0x8f   :  { %p17349_p13 = scmp.ne.s32.totalorder %s190_s2, %s17348_s10  ;;  %p17354_p1 = scmp.lt.s32.totalorder %s17348_s10, %s17348_s10 }
  0x91   :  { %p17355_p2 = por %p17354_p1, %p17353_p0 }
  0x93   :  { %p17356_p3 = pnand %p17355_p2, %p17349_p13 }
  0x95   :  { %17359 = shalt.err (!%p17356_p3)
}
  0x96   :  { %s18104_s16 = smov 1152   ;;  %s18105_s29 = smov 72  }
  0x97   :  { %195 = dma.hbm_to_vmem [thread:$0]  %s18207_s8, 9216, %s190_s2, [#allocation15], %s18104_s16, %s18104_s16, %s18105_s29  }
  0x98   :  { %s18106_s18 = smov [#allocation17]   ;;  %s18107_s13 = smov [#allocation20]  }
  0x99   :  { %s211_s22 = sshll.u32 %s18106_s18, 4  ;;  %s236_s23 = sshll.u32 %s18107_s13, 4  ;;  %s212_s22 = int_to_ptr.vmem [resolvable:$true] %s211_s22  ;;  %s237_s23 = int_to_ptr.vmem [resolvable:$true] %s236_s23 }
  0x9a   :  { %s17360_s26 = scalar_lea.hbm %s18217_s19, 640 }
  0x9b   :  { %p17361_p4 = scmp.ne.s32.totalorder %s18217_s19, %s17360_s26  ;;  %p17364_p5 = scmp.lt.u32.totalorder %s17360_s26, %s18217_s19 }
  0x9d   :  { %p17366_p6 = pnand %p17364_p5, %p17361_p4 }
  0x9f   :  { %17369 = shalt.err (!%p17366_p6)
}
  0xa0   :  { %s17370_s0 = scalar_lea.vmem %s212_s22, 640  ;;  %p17375_p8 = scmp.lt.s32.totalorder %s212_s22, %s212_s22 }
  0xa1   :  { %p17371_p7 = scmp.ne.s32.totalorder %s212_s22, %s17370_s0  ;;  %p17376_p9 = scmp.lt.s32.totalorder %s17370_s0, %s17370_s0 }
  0xa3   :  { %p17377_p10 = por %p17376_p9, %p17375_p8 }
  0xa5   :  { %p17378_p11 = pnand %p17377_p10, %p17371_p7 }
  0xa7   :  { %17381 = shalt.err (!%p17378_p11)
}
  0xa8   :  { %217 = dma.hbm_to_vmem [thread:$0]  %s18217_s19, 640, %s212_s22, [#allocation18], %s18098_s11, %s18098_s11, %s18099_s15  }
  0xa9   :  { %s17382_s8 = scalar_lea.hbm %s18227_s30, 128 }
  0xaa   :  { %p17383_p12 = scmp.ne.s32.totalorder %s18227_s30, %s17382_s8  ;;  %p17386_p13 = scmp.lt.u32.totalorder %s17382_s8, %s18227_s30 }
  0xac   :  { %p17388_p0 = pnand %p17386_p13, %p17383_p12 }
  0xae   :  { %17391 = shalt.err (!%p17388_p0)
}
  0xaf   :  { %s17392_s28 = scalar_lea.vmem %s237_s23, 128  ;;  %p17397_p2 = scmp.lt.s32.totalorder %s237_s23, %s237_s23 }
  0xb0   :  { %p17393_p1 = scmp.ne.s32.totalorder %s237_s23, %s17392_s28  ;;  %p17398_p3 = scmp.lt.s32.totalorder %s17392_s28, %s17392_s28 }
  0xb2   :  { %p17399_p4 = por %p17398_p3, %p17397_p2 }
  0xb4   :  { %p17400_p5 = pnand %p17399_p4, %p17393_p1 }
  0xb6   :  { %17403 = shalt.err (!%p17400_p5)
}
  0xb7   :  { %239 = dma.hbm_to_vmem [thread:$0]  %s18227_s30, 128, %s237_s23, [#allocation21]  }
  0xb8   :  { %s18108_s21 = smov [#allocation23]   ;;  %s18109_s19 = smov [#allocation26]  }
  0xb9   :  { %s257_s1 = sshll.u32 %s18108_s21, 4  ;;  %s281_s2 = sshll.u32 %s18109_s19, 4  ;;  %s258_s1 = int_to_ptr.vmem [resolvable:$true] %s257_s1  ;;  %s18407_s2 = int_to_ptr.vmem [resolvable:$true] %s281_s2 }
  0xba   :  { %s17404_s7 = scalar_lea.hbm %s18237_s12, 256 }
  0xbb   :  { %p17405_p6 = scmp.ne.s32.totalorder %s18237_s12, %s17404_s7  ;;  %p17408_p7 = scmp.lt.u32.totalorder %s17404_s7, %s18237_s12 }
  0xbd   :  { %p17410_p8 = pnand %p17408_p7, %p17405_p6 }
  0xbf   :  { %17413 = shalt.err (!%p17410_p8)
}
  0xc0   :  { %s17414_s10 = scalar_lea.vmem %s258_s1, 256  ;;  %p17419_p10 = scmp.lt.s32.totalorder %s258_s1, %s258_s1 }
  0xc1   :  { %p17415_p9 = scmp.ne.s32.totalorder %s258_s1, %s17414_s10  ;;  %p17420_p11 = scmp.lt.s32.totalorder %s17414_s10, %s17414_s10 }
  0xc3   :  { %p17421_p12 = por %p17420_p11, %p17419_p10 }
  0xc5   :  { %p17422_p13 = pnand %p17421_p12, %p17415_p9 }
  0xc7   :  { %17425 = shalt.err (!%p17422_p13)
}
  0xc8   :  { %263 = dma.hbm_to_vmem [thread:$0]  %s18237_s12, 256, %s258_s1, [#allocation24], %s18098_s11, %s18098_s11, %s18099_s15  }
  0xc9   :  { %s17426_s30 = scalar_lea.hbm %s18247_s27, 256 }
  0xca   :  { %p17427_p0 = scmp.ne.s32.totalorder %s18247_s27, %s17426_s30  ;;  %p17430_p1 = scmp.lt.u32.totalorder %s17426_s30, %s18247_s27 }
  0xcc   :  { %p17432_p2 = pnand %p17430_p1, %p17427_p0 }
  0xce   :  { %17435 = shalt.err (!%p17432_p2)
}
  0xcf   :  { %s17436_s16 = scalar_lea.vmem %s18407_s2, 256  ;;  %p17441_p4 = scmp.lt.s32.totalorder %s18407_s2, %s18407_s2 }
  0xd0   :  { %p17437_p3 = scmp.ne.s32.totalorder %s18407_s2, %s17436_s16  ;;  %p17442_p5 = scmp.lt.s32.totalorder %s17436_s16, %s17436_s16 }
  0xd2   :  { %p17443_p6 = por %p17442_p5, %p17441_p4 }
  0xd4   :  { %p17444_p7 = pnand %p17443_p6, %p17437_p3 }
  0xd6   :  { %17447 = shalt.err (!%p17444_p7)
}
  0xd7   :  { %287 = dma.hbm_to_vmem [thread:$0]  %s18247_s27, 256, %s18407_s2, [#allocation27], %s18098_s11, %s18098_s11, %s18099_s15  }
  0xd8   :  { %s18110_s12 = smov [#allocation29]   ;;  %s17448_s18 = scalar_lea.hbm %s18257_s5, 32 }
  0xd9   :  { %s305_s29 = sshll.u32 %s18110_s12, 4  ;;  %p17449_p8 = scmp.ne.s32.totalorder %s18257_s5, %s17448_s18  ;;  %s306_s29 = int_to_ptr.vmem [resolvable:$true] %s305_s29 }
  0xda   :  { %p17452_p9 = scmp.lt.u32.totalorder %s17448_s18, %s18257_s5 }
  0xdc   :  { %p17454_p10 = pnand %p17452_p9, %p17449_p8 }
  0xde   :  { %17457 = shalt.err (!%p17454_p10)
}
  0xdf   :  { %s17458_s22 = scalar_lea.vmem %s306_s29, 32  ;;  %p17463_p12 = scmp.lt.s32.totalorder %s306_s29, %s306_s29 }
  0xe0   :  { %p17459_p11 = scmp.ne.s32.totalorder %s306_s29, %s17458_s22  ;;  %p17464_p13 = scmp.lt.s32.totalorder %s17458_s22, %s17458_s22 }
  0xe2   :  { %p17465_p0 = por %p17464_p13, %p17463_p12 }
  0xe4   :  { %p17466_p1 = pnand %p17465_p0, %p17459_p11 }
  0xe6   :  { %17469 = shalt.err (!%p17466_p1)
}
  0xe7   :  { %s18111_s13 = smov 16   ;;  %s18112_s27 = smov 1  }
  0xe8   :  { %311 = dma.hbm_to_vmem [thread:$0]  %s18257_s5, 32, %s306_s29, [#allocation30], %s18111_s13, %s18111_s13, %s18112_s27  }
  0xe9   :  { %s18113_s23 = smov [#allocation32]   ;;  %s18114_s0 = smov [#allocation35]  }
  0xea   :  { %s329_s26 = sshll.u32 %s18113_s23, 4  ;;  %s352_s8 = sshll.u32 %s18114_s0, 4  ;;  %s330_s26 = int_to_ptr.vmem [resolvable:$true] %s329_s26  ;;  %s353_s8 = int_to_ptr.vmem [resolvable:$true] %s352_s8 }
  0xeb   :  { %s17470_s28 = scalar_lea.hbm %s18267_s6, 32 }
  0xec   :  { %p17471_p2 = scmp.ne.s32.totalorder %s18267_s6, %s17470_s28  ;;  %p17474_p3 = scmp.lt.u32.totalorder %s17470_s28, %s18267_s6 }
  0xee   :  { %p17476_p4 = pnand %p17474_p3, %p17471_p2 }
  0xf0   :  { %17479 = shalt.err (!%p17476_p4)
}
  0xf1   :  { %s17480_s21 = scalar_lea.vmem %s330_s26, 32  ;;  %p17485_p6 = scmp.lt.s32.totalorder %s330_s26, %s330_s26 }
  0xf2   :  { %p17481_p5 = scmp.ne.s32.totalorder %s330_s26, %s17480_s21  ;;  %p17486_p7 = scmp.lt.s32.totalorder %s17480_s21, %s17480_s21 }
  0xf4   :  { %p17487_p8 = por %p17486_p7, %p17485_p6 }
  0xf6   :  { %p17488_p9 = pnand %p17487_p8, %p17481_p5 }
  0xf8   :  { %17491 = shalt.err (!%p17488_p9)
}
  0xf9   :  { %335 = dma.hbm_to_vmem [thread:$0]  %s18267_s6, 32, %s330_s26, [#allocation33], %s18111_s13, %s18111_s13, %s18112_s27  }
  0xfa   :  { %s17492_s5 = scalar_lea.hbm %s18277_s24, 64 }
  0xfb   :  { %p17493_p10 = scmp.ne.s32.totalorder %s18277_s24, %s17492_s5  ;;  %p17496_p11 = scmp.lt.u32.totalorder %s17492_s5, %s18277_s24 }
  0xfd   :  { %p17498_p12 = pnand %p17496_p11, %p17493_p10 }
  0xff   :  { %17501 = shalt.err (!%p17498_p12)
}
 0x100   :  { %s17502_s1 = scalar_lea.vmem %s353_s8, 64  ;;  %p17507_p0 = scmp.lt.s32.totalorder %s353_s8, %s353_s8 }
 0x101   :  { %p17503_p13 = scmp.ne.s32.totalorder %s353_s8, %s17502_s1  ;;  %p17508_p1 = scmp.lt.s32.totalorder %s17502_s1, %s17502_s1 }
 0x103   :  { %p17509_p2 = por %p17508_p1, %p17507_p0 }
 0x105   :  { %p17510_p3 = pnand %p17509_p2, %p17503_p13 }
 0x107   :  { %17513 = shalt.err (!%p17510_p3)
}
 0x108   :  { %355 = dma.hbm_to_vmem [thread:$0]  %s18277_s24, 64, %s353_s8, [#allocation36]  }
 0x109   :  { %s18115_s19 = smov [#allocation38]   ;;  %s18116_s2 = smov [#allocation41]  }
 0x10a   :  { %s374_s6 = sshll.u32 %s18115_s19, 4  ;;  %s395_s7 = sshll.u32 %s18116_s2, 4  ;;  %s375_s6 = int_to_ptr.vmem [resolvable:$true] %s374_s6  ;;  %s396_s7 = int_to_ptr.vmem [resolvable:$true] %s395_s7 }
 0x10b   :  { %s17514_s10 = scalar_lea.hbm %s18287_s14, 128 }
 0x10c   :  { %p17515_p4 = scmp.ne.s32.totalorder %s18287_s14, %s17514_s10  ;;  %p17518_p5 = scmp.lt.u32.totalorder %s17514_s10, %s18287_s14 }
 0x10e   :  { %p17520_p6 = pnand %p17518_p5, %p17515_p4 }
 0x110   :  { %17523 = shalt.err (!%p17520_p6)
}
 0x111   :  { %s17524_s30 = scalar_lea.vmem %s375_s6, 128  ;;  %p17529_p8 = scmp.lt.s32.totalorder %s375_s6, %s375_s6 }
 0x112   :  { %p17525_p7 = scmp.ne.s32.totalorder %s375_s6, %s17524_s30  ;;  %p17530_p9 = scmp.lt.s32.totalorder %s17524_s30, %s17524_s30 }
 0x114   :  { %p17531_p10 = por %p17530_p9, %p17529_p8 }
 0x116   :  { %p17532_p11 = pnand %p17531_p10, %p17525_p7 }
 0x118   :  { %17535 = shalt.err (!%p17532_p11)
}
 0x119   :  { %377 = dma.hbm_to_vmem [thread:$0]  %s18287_s14, 128, %s375_s6, [#allocation39]  }
 0x11a   :  { %s17536_s24 = scalar_lea.hbm %s18297_s3, 128 }
 0x11b   :  { %p17537_p12 = scmp.ne.s32.totalorder %s18297_s3, %s17536_s24  ;;  %p17540_p13 = scmp.lt.u32.totalorder %s17536_s24, %s18297_s3 }
 0x11d   :  { %p17542_p0 = pnand %p17540_p13, %p17537_p12 }
 0x11f   :  { %17545 = shalt.err (!%p17542_p0)
}
 0x120   :  { %s17546_s16 = scalar_lea.vmem %s396_s7, 128  ;;  %p17551_p2 = scmp.lt.s32.totalorder %s396_s7, %s396_s7 }
 0x121   :  { %p17547_p1 = scmp.ne.s32.totalorder %s396_s7, %s17546_s16  ;;  %p17552_p3 = scmp.lt.s32.totalorder %s17546_s16, %s17546_s16 }
 0x123   :  { %p17553_p4 = por %p17552_p3, %p17551_p2 }
 0x125   :  { %p17554_p5 = pnand %p17553_p4, %p17547_p1 }
 0x127   :  { %17557 = shalt.err (!%p17554_p5)
}
 0x128   :  { %s18117_s12 = smov 64   ;;  %s18118_s29 = smov 4  }
 0x129   :  { %401 = dma.hbm_to_vmem [thread:$0]  %s18297_s3, 128, %s396_s7, [#allocation42], %s18117_s12, %s18117_s12, %s18118_s29  }
 0x12a   :  { %s18119_s14 = smov [#allocation44]   ;;  %s18120_s22 = smov [#allocation47]  }
 0x12b   :  { %s419_s18 = sshll.u32 %s18119_s14, 4  ;;  %s448_s13 = sshll.u32 %s18120_s22, 4  ;;  %s420_s18 = int_to_ptr.vmem [resolvable:$true] %s419_s18  ;;  %s449_s13 = int_to_ptr.vmem [resolvable:$true] %s448_s13 }
 0x12c   :  { %s17558_s27 = scalar_lea.hbm %s18307_s25, 256 }
 0x12d   :  { %p17559_p6 = scmp.ne.s32.totalorder %s18307_s25, %s17558_s27  ;;  %p17562_p7 = scmp.lt.u32.totalorder %s17558_s27, %s18307_s25 }
 0x12f   :  { %p17564_p8 = pnand %p17562_p7, %p17559_p6 }
 0x131   :  { %17567 = shalt.err (!%p17564_p8)
}
 0x132   :  { %s17568_s23 = scalar_lea.vmem %s420_s18, 256  ;;  %p17573_p10 = scmp.lt.s32.totalorder %s420_s18, %s420_s18 }
 0x133   :  { %p17569_p9 = scmp.ne.s32.totalorder %s420_s18, %s17568_s23  ;;  %p17574_p11 = scmp.lt.s32.totalorder %s17568_s23, %s17568_s23 }
 0x135   :  { %p17575_p12 = por %p17574_p11, %p17573_p10 }
 0x137   :  { %p17576_p13 = pnand %p17575_p12, %p17569_p9 }
 0x139   :  { %17579 = shalt.err (!%p17576_p13)
}
 0x13a   :  { %s20716_s3 = sld [smem:[#allocation90_spill]] }
 0x13b   :  { %425 = dma.hbm_to_vmem [thread:$0]  %s18307_s25, 256, %s420_s18, [#allocation45], %s18098_s11, %s18098_s11, %s18099_s15  }
 0x140   :  { %s17580_s26 = scalar_lea.hbm %s20716_s3, 32 }
 0x141   :  { %p17581_p0 = scmp.ne.s32.totalorder %s20716_s3, %s17580_s26  ;;  %p17584_p1 = scmp.lt.u32.totalorder %s17580_s26, %s20716_s3 }
 0x143   :  { %p17586_p2 = pnand %p17584_p1, %p17581_p0 }
 0x145   :  { %17589 = shalt.err (!%p17586_p2)
}
 0x146   :  { %s17590_s0 = scalar_lea.vmem %s449_s13, 32  ;;  %p17595_p4 = scmp.lt.s32.totalorder %s449_s13, %s449_s13 }
 0x147   :  { %p17591_p3 = scmp.ne.s32.totalorder %s449_s13, %s17590_s0  ;;  %p17596_p5 = scmp.lt.s32.totalorder %s17590_s0, %s17590_s0 }
 0x149   :  { %p17597_p6 = por %p17596_p5, %p17595_p4 }
 0x14b   :  { %p17598_p7 = pnand %p17597_p6, %p17591_p3 }
 0x14d   :  { %17601 = shalt.err (!%p17598_p7)
}
 0x14e   :  { %s20717_s8 = sld [smem:[#allocation94_spill]]  ;;  %s18121_s28 = smov [#allocation50]  }
 0x14f   :  { %451 = dma.hbm_to_vmem [thread:$0]  %s20716_s3, 32, %s449_s13, [#allocation48]  }
 0x150   :  { %s473_s25 = sshll.u32 %s18121_s28, 4  ;;  %s18122_s21 = smov [#allocation2]   ;;  %s474_s25 = int_to_ptr.vmem [resolvable:$true] %s473_s25 }
 0x151   :  { %s111_s5 = sshll.u32 %s18122_s21, 4  ;;  %s112_s5 = int_to_ptr.vmem [resolvable:$true] %s111_s5 }
 0x154   :  { %s17602_s1 = scalar_lea.hbm %s20717_s8, 6144 }
 0x155   :  { %p17603_p8 = scmp.ne.s32.totalorder %s20717_s8, %s17602_s1  ;;  %p17606_p9 = scmp.lt.u32.totalorder %s17602_s1, %s20717_s8 }
 0x157   :  { %p17608_p10 = pnand %p17606_p9, %p17603_p8 }
 0x159   :  { %17611 = shalt.err (!%p17608_p10)
}
 0x15a   :  { %s17612_s19 = scalar_lea.vmem %s474_s25, 6144  ;;  %p17617_p12 = scmp.lt.s32.totalorder %s474_s25, %s474_s25 }
 0x15b   :  { %p17613_p11 = scmp.ne.s32.totalorder %s474_s25, %s17612_s19  ;;  %p17618_p13 = scmp.lt.s32.totalorder %s17612_s19, %s17612_s19 }
 0x15d   :  { %p17619_p0 = por %p17618_p13, %p17617_p12 }
 0x15f   :  { %p17620_p1 = pnand %p17619_p0, %p17613_p11 }
 0x161   :  { %17623 = shalt.err (!%p17620_p1)
}
 0x162   :  { %s20718_s6 = sld [smem:[#allocation73_spill]] }
 0x163   :  { %479 = dma.hbm_to_vmem [thread:$0]  %s20717_s8, 6144, %s474_s25, [#allocation51], %s18098_s11, %s18098_s11, %s18099_s15  }
 0x168   :  { %s17624_s2 = scalar_lea.hbm %s20718_s6, 640 }
 0x169   :  { %p17625_p2 = scmp.ne.s32.totalorder %s20718_s6, %s17624_s2  ;;  %p17628_p3 = scmp.lt.u32.totalorder %s17624_s2, %s20718_s6 }
 0x16b   :  { %p17630_p4 = pnand %p17628_p3, %p17625_p2 }
 0x16d   :  { %17633 = shalt.err (!%p17630_p4)
}
 0x16e   :  { %s17634_s7 = scalar_lea.vmem %s112_s5, 640  ;;  %p17639_p6 = scmp.lt.s32.totalorder %s112_s5, %s112_s5 }
 0x16f   :  { %p17635_p5 = scmp.ne.s32.totalorder %s112_s5, %s17634_s7  ;;  %p17640_p7 = scmp.lt.s32.totalorder %s17634_s7, %s17634_s7 }
 0x171   :  { %p17641_p8 = por %p17640_p7, %p17639_p6 }
 0x173   :  { %p17642_p9 = pnand %p17641_p8, %p17635_p5 }
 0x175   :  { %17645 = shalt.err (!%p17642_p9)
}
 0x176   :  { %s20719_s10 = sld [smem:[#allocation74_spill]]  ;;  %s18123_s30 = smov [#allocation7]  }
 0x177   :  { %117 = dma.hbm_to_vmem [thread:$0]  %s20718_s6, 640, %s112_s5, [#allocation3], %s18098_s11, %s18098_s11, %s18099_s15  }
 0x178   :  { %s135_s24 = sshll.u32 %s18123_s30, 4  ;;  %s18124_s16 = smov [#allocation10]   ;;  %s136_s24 = int_to_ptr.vmem [resolvable:$true] %s135_s24 }
 0x179   :  { %s158_s29 = sshll.u32 %s18124_s16, 4  ;;  %s159_s29 = int_to_ptr.vmem [resolvable:$true] %s158_s29 }
 0x17c   :  { %s17646_s14 = scalar_lea.hbm %s20719_s10, 5760 }
 0x17d   :  { %p17647_p10 = scmp.ne.s32.totalorder %s20719_s10, %s17646_s14  ;;  %p17650_p11 = scmp.lt.u32.totalorder %s17646_s14, %s20719_s10 }
 0x17f   :  { %p17652_p12 = pnand %p17650_p11, %p17647_p10 }
 0x181   :  { %17655 = shalt.err (!%p17652_p12)
}
 0x182   :  { %s17656_s18 = scalar_lea.vmem %s136_s24, 5760  ;;  %p17661_p0 = scmp.lt.s32.totalorder %s136_s24, %s136_s24 }
 0x183   :  { %p17657_p13 = scmp.ne.s32.totalorder %s136_s24, %s17656_s18  ;;  %p17662_p1 = scmp.lt.s32.totalorder %s17656_s18, %s17656_s18 }
 0x185   :  { %p17663_p2 = por %p17662_p1, %p17661_p0 }
 0x187   :  { %p17664_p3 = pnand %p17663_p2, %p17657_p13 }
 0x189   :  { %17667 = shalt.err (!%p17664_p3)
}
 0x18a   :  { %s20720_s22 = sld [smem:[#allocation75_spill]] }
 0x18b   :  { %141 = dma.hbm_to_vmem [thread:$0]  %s20719_s10, 5760, %s136_s24, [#allocation6], %s18098_s11, %s18098_s11, %s18099_s15  }
 0x190   :  { %s17668_s13 = scalar_lea.hbm %s20720_s22, 16 }
 0x191   :  { %p17669_p4 = scmp.ne.s32.totalorder %s20720_s22, %s17668_s13  ;;  %p17672_p5 = scmp.lt.u32.totalorder %s17668_s13, %s20720_s22 }
 0x193   :  { %p17674_p6 = pnand %p17672_p5, %p17669_p4 }
 0x195   :  { %17677 = shalt.err (!%p17674_p6)
}
 0x196   :  { %s17678_s27 = scalar_lea.vmem %s159_s29, 16  ;;  %s17682_s23 = scalar_lea.vmem %s159_s29, 32 }
 0x197   :  { %p17679_p7 = scmp.ne.s32.totalorder %s159_s29, %s17678_s27  ;;  %p17683_p8 = scmp.lt.s32.totalorder %s159_s29, %s159_s29 }
 0x198   :  { %p17684_p9 = scmp.lt.s32.totalorder %s17682_s23, %s17678_s27 }
 0x19a   :  { %p17685_p10 = por %p17684_p9, %p17683_p8 }
 0x19c   :  { %p17686_p11 = pnand %p17685_p10, %p17679_p7 }
 0x19e   :  { %17689 = shalt.err (!%p17686_p11)
}
 0x19f   :  { %s20721_s3 = sld [smem:[#allocation76_spill]]  ;;  %s18125_s26 = smov [#allocation13]  }
 0x1a0   :  { %161 = dma.hbm_to_vmem [thread:$0]  %s20720_s22, 16, %s159_s29, [#allocation9]  }
 0x1a1   :  { %s180_s0 = sshll.u32 %s18125_s26, 4  ;;  %s18126_s8 = smov [#allocation16]   ;;  %s181_s0 = int_to_ptr.vmem [resolvable:$true] %s180_s0 }
 0x1a2   :  { %s202_s28 = sshll.u32 %s18126_s8, 4  ;;  %s203_s28 = int_to_ptr.vmem [resolvable:$true] %s202_s28 }
 0x1a5   :  { %s17690_s25 = scalar_lea.hbm %s20721_s3, 16 }
 0x1a6   :  { %p17691_p12 = scmp.ne.s32.totalorder %s20721_s3, %s17690_s25  ;;  %p17694_p13 = scmp.lt.u32.totalorder %s17690_s25, %s20721_s3 }
 0x1a8   :  { %p17696_p0 = pnand %p17694_p13, %p17691_p12 }
 0x1aa   :  { %17699 = shalt.err (!%p17696_p0)
}
 0x1ab   :  { %s17700_s21 = scalar_lea.vmem %s181_s0, 16  ;;  %s17704_s5 = scalar_lea.vmem %s181_s0, 32 }
 0x1ac   :  { %p17701_p1 = scmp.ne.s32.totalorder %s181_s0, %s17700_s21  ;;  %p17705_p2 = scmp.lt.s32.totalorder %s181_s0, %s181_s0 }
 0x1ad   :  { %p17706_p3 = scmp.lt.s32.totalorder %s17704_s5, %s17700_s21 }
 0x1af   :  { %p17707_p4 = por %p17706_p3, %p17705_p2 }
 0x1b1   :  { %p17708_p5 = pnand %p17707_p4, %p17701_p1 }
 0x1b3   :  { %17711 = shalt.err (!%p17708_p5)
}
 0x1b4   :  { %s20722_s1 = sld [smem:[#allocation77_spill]] }
 0x1b5   :  { %183 = dma.hbm_to_vmem [thread:$0]  %s20721_s3, 16, %s181_s0, [#allocation12]  }
 0x1ba   :  { %s17712_s19 = scalar_lea.hbm %s20722_s1, 16 }
 0x1bb   :  { %p17713_p6 = scmp.ne.s32.totalorder %s20722_s1, %s17712_s19  ;;  %p17716_p7 = scmp.lt.u32.totalorder %s17712_s19, %s20722_s1 }
 0x1bd   :  { %p17718_p8 = pnand %p17716_p7, %p17713_p6 }
 0x1bf   :  { %17721 = shalt.err (!%p17718_p8)
}
 0x1c0   :  { %s17722_s6 = scalar_lea.vmem %s203_s28, 16  ;;  %s17726_s2 = scalar_lea.vmem %s203_s28, 32 }
 0x1c1   :  { %p17723_p9 = scmp.ne.s32.totalorder %s203_s28, %s17722_s6  ;;  %p17727_p10 = scmp.lt.s32.totalorder %s203_s28, %s203_s28 }
 0x1c2   :  { %p17728_p11 = scmp.lt.s32.totalorder %s17726_s2, %s17722_s6 }
 0x1c4   :  { %p17729_p12 = por %p17728_p11, %p17727_p10 }
 0x1c6   :  { %p17730_p13 = pnand %p17729_p12, %p17723_p9 }
 0x1c8   :  { %17733 = shalt.err (!%p17730_p13)
}
 0x1c9   :  { %s20723_s7 = sld [smem:[#allocation78_spill]]  ;;  %s18127_s10 = smov [#allocation19]  }
 0x1ca   :  { %205 = dma.hbm_to_vmem [thread:$0]  %s20722_s1, 16, %s203_s28, [#allocation15]  }
 0x1cb   :  { %s223_s30 = sshll.u32 %s18127_s10, 4  ;;  %s18128_s24 = smov [#allocation22]   ;;  %s224_s30 = int_to_ptr.vmem [resolvable:$true] %s223_s30 }
 0x1cc   :  { %s245_s16 = sshll.u32 %s18128_s24, 4  ;;  %s246_s16 = int_to_ptr.vmem [resolvable:$true] %s245_s16 }
 0x1cf   :  { %s17734_s29 = scalar_lea.hbm %s20723_s7, 640 }
 0x1d0   :  { %p17735_p0 = scmp.ne.s32.totalorder %s20723_s7, %s17734_s29  ;;  %p17738_p1 = scmp.lt.u32.totalorder %s17734_s29, %s20723_s7 }
 0x1d2   :  { %p17740_p2 = pnand %p17738_p1, %p17735_p0 }
 0x1d4   :  { %17743 = shalt.err (!%p17740_p2)
}
 0x1d5   :  { %s17744_s14 = scalar_lea.vmem %s224_s30, 640  ;;  %p17749_p4 = scmp.lt.s32.totalorder %s224_s30, %s224_s30 }
 0x1d6   :  { %p17745_p3 = scmp.ne.s32.totalorder %s224_s30, %s17744_s14  ;;  %p17750_p5 = scmp.lt.s32.totalorder %s17744_s14, %s17744_s14 }
 0x1d8   :  { %p17751_p6 = por %p17750_p5, %p17749_p4 }
 0x1da   :  { %p17752_p7 = pnand %p17751_p6, %p17745_p3 }
 0x1dc   :  { %17755 = shalt.err (!%p17752_p7)
}
 0x1dd   :  { %s20724_s18 = sld [smem:[#allocation79_spill]] }
 0x1de   :  { %229 = dma.hbm_to_vmem [thread:$0]  %s20723_s7, 640, %s224_s30, [#allocation18], %s18098_s11, %s18098_s11, %s18099_s15  }
 0x1e3   :  { %s17756_s22 = scalar_lea.hbm %s20724_s18, 640 }
 0x1e4   :  { %p17757_p8 = scmp.ne.s32.totalorder %s20724_s18, %s17756_s22  ;;  %p17760_p9 = scmp.lt.u32.totalorder %s17756_s22, %s20724_s18 }
 0x1e6   :  { %p17762_p10 = pnand %p17760_p9, %p17757_p8 }
 0x1e8   :  { %17765 = shalt.err (!%p17762_p10)
}
 0x1e9   :  { %s17766_s13 = scalar_lea.vmem %s246_s16, 640  ;;  %p17771_p12 = scmp.lt.s32.totalorder %s246_s16, %s246_s16 }
 0x1ea   :  { %p17767_p11 = scmp.ne.s32.totalorder %s246_s16, %s17766_s13  ;;  %p17772_p13 = scmp.lt.s32.totalorder %s17766_s13, %s17766_s13 }
 0x1ec   :  { %p17773_p0 = por %p17772_p13, %p17771_p12 }
 0x1ee   :  { %p17774_p1 = pnand %p17773_p0, %p17767_p11 }
 0x1f0   :  { %17777 = shalt.err (!%p17774_p1)
}
 0x1f1   :  { %s20725_s27 = sld [smem:[#allocation80_spill]]  ;;  %s18129_s23 = smov [#allocation25]  }
 0x1f2   :  { %251 = dma.hbm_to_vmem [thread:$0]  %s20724_s18, 640, %s246_s16, [#allocation21], %s18098_s11, %s18098_s11, %s18099_s15  }
 0x1f3   :  { %s269_s3 = sshll.u32 %s18129_s23, 4  ;;  %s18130_s26 = smov [#allocation28]   ;;  %s270_s3 = int_to_ptr.vmem [resolvable:$true] %s269_s3 }
 0x1f4   :  { %s293_s0 = sshll.u32 %s18130_s26, 4  ;;  %s294_s0 = int_to_ptr.vmem [resolvable:$true] %s293_s0 }
 0x1f7   :  { %s17778_s8 = scalar_lea.hbm %s20725_s27, 256 }
 0x1f8   :  { %p17779_p2 = scmp.ne.s32.totalorder %s20725_s27, %s17778_s8  ;;  %p17782_p3 = scmp.lt.u32.totalorder %s17778_s8, %s20725_s27 }
 0x1fa   :  { %p17784_p4 = pnand %p17782_p3, %p17779_p2 }
 0x1fc   :  { %17787 = shalt.err (!%p17784_p4)
}
 0x1fd   :  { %s17788_s28 = scalar_lea.vmem %s270_s3, 256  ;;  %p17793_p6 = scmp.lt.s32.totalorder %s270_s3, %s270_s3 }
 0x1fe   :  { %p17789_p5 = scmp.ne.s32.totalorder %s270_s3, %s17788_s28  ;;  %p17794_p7 = scmp.lt.s32.totalorder %s17788_s28, %s17788_s28 }
 0x200   :  { %p17795_p8 = por %p17794_p7, %p17793_p6 }
 0x202   :  { %p17796_p9 = pnand %p17795_p8, %p17789_p5 }
 0x204   :  { %17799 = shalt.err (!%p17796_p9)
}
 0x205   :  { %s20726_s25 = sld [smem:[#allocation81_spill]] }
 0x206   :  { %275 = dma.hbm_to_vmem [thread:$0]  %s20725_s27, 256, %s270_s3, [#allocation24], %s18098_s11, %s18098_s11, %s18099_s15  }
 0x20b   :  { %s17800_s21 = scalar_lea.hbm %s20726_s25, 256 }
 0x20c   :  { %p17801_p10 = scmp.ne.s32.totalorder %s20726_s25, %s17800_s21  ;;  %p17804_p11 = scmp.lt.u32.totalorder %s17800_s21, %s20726_s25 }
 0x20e   :  { %p17806_p12 = pnand %p17804_p11, %p17801_p10 }
 0x210   :  { %17809 = shalt.err (!%p17806_p12)
}
 0x211   :  { %s17810_s5 = scalar_lea.vmem %s294_s0, 256  ;;  %p17815_p0 = scmp.lt.s32.totalorder %s294_s0, %s294_s0 }
 0x212   :  { %p17811_p13 = scmp.ne.s32.totalorder %s294_s0, %s17810_s5  ;;  %p17816_p1 = scmp.lt.s32.totalorder %s17810_s5, %s17810_s5 }
 0x214   :  { %p17817_p2 = por %p17816_p1, %p17815_p0 }
 0x216   :  { %p17818_p3 = pnand %p17817_p2, %p17811_p13 }
 0x218   :  { %17821 = shalt.err (!%p17818_p3)
}
 0x219   :  { %s20727_s1 = sld [smem:[#allocation82_spill]]  ;;  %s18131_s19 = smov [#allocation31]  }
 0x21a   :  { %299 = dma.hbm_to_vmem [thread:$0]  %s20726_s25, 256, %s294_s0, [#allocation27], %s18098_s11, %s18098_s11, %s18099_s15  }
 0x21b   :  { %s317_s6 = sshll.u32 %s18131_s19, 4  ;;  %s18132_s2 = smov [#allocation34]   ;;  %s318_s6 = int_to_ptr.vmem [resolvable:$true] %s317_s6 }
 0x21c   :  { %s342_s7 = sshll.u32 %s18132_s2, 4  ;;  %s343_s7 = int_to_ptr.vmem [resolvable:$true] %s342_s7 }
 0x21f   :  { %s17822_s10 = scalar_lea.hbm %s20727_s1, 768 }
 0x220   :  { %p17823_p4 = scmp.ne.s32.totalorder %s20727_s1, %s17822_s10  ;;  %p17826_p5 = scmp.lt.u32.totalorder %s17822_s10, %s20727_s1 }
 0x222   :  { %p17828_p6 = pnand %p17826_p5, %p17823_p4 }
 0x224   :  { %17831 = shalt.err (!%p17828_p6)
}
 0x225   :  { %s17832_s30 = scalar_lea.vmem %s318_s6, 768  ;;  %p17837_p8 = scmp.lt.s32.totalorder %s318_s6, %s318_s6 }
 0x226   :  { %p17833_p7 = scmp.ne.s32.totalorder %s318_s6, %s17832_s30  ;;  %p17838_p9 = scmp.lt.s32.totalorder %s17832_s30, %s17832_s30 }
 0x228   :  { %p17839_p10 = por %p17838_p9, %p17837_p8 }
 0x22a   :  { %p17840_p11 = pnand %p17839_p10, %p17833_p7 }
 0x22c   :  { %17843 = shalt.err (!%p17840_p11)
}
 0x22d   :  { %s20728_s24 = sld [smem:[#allocation83_spill]] }
 0x22e   :  { %323 = dma.hbm_to_vmem [thread:$0]  %s20727_s1, 768, %s318_s6, [#allocation30], %s18098_s11, %s18098_s11, %s18099_s15  }
 0x233   :  { %s17844_s16 = scalar_lea.hbm %s20728_s24, 64 }
 0x234   :  { %p17845_p12 = scmp.ne.s32.totalorder %s20728_s24, %s17844_s16  ;;  %p17848_p13 = scmp.lt.u32.totalorder %s17844_s16, %s20728_s24 }
 0x236   :  { %p17850_p0 = pnand %p17848_p13, %p17845_p12 }
 0x238   :  { %17853 = shalt.err (!%p17850_p0)
}
 0x239   :  { %s17854_s29 = scalar_lea.vmem %s343_s7, 64  ;;  %p17859_p2 = scmp.lt.s32.totalorder %s343_s7, %s343_s7 }
 0x23a   :  { %p17855_p1 = scmp.ne.s32.totalorder %s343_s7, %s17854_s29  ;;  %p17860_p3 = scmp.lt.s32.totalorder %s17854_s29, %s17854_s29 }
 0x23c   :  { %p17861_p4 = por %p17860_p3, %p17859_p2 }
 0x23e   :  { %p17862_p5 = pnand %p17861_p4, %p17855_p1 }
 0x240   :  { %17865 = shalt.err (!%p17862_p5)
}
 0x241   :  { %s20729_s14 = sld [smem:[#allocation84_spill]]  ;;  %s18133_s18 = smov [#allocation37]  }
 0x242   :  { %345 = dma.hbm_to_vmem [thread:$0]  %s20728_s24, 64, %s343_s7, [#allocation33]  }
 0x243   :  { %s361_s22 = sshll.u32 %s18133_s18, 4  ;;  %s18134_s13 = smov [#allocation40]   ;;  %s362_s22 = int_to_ptr.vmem [resolvable:$true] %s361_s22 }
 0x244   :  { %s383_s27 = sshll.u32 %s18134_s13, 4  ;;  %s384_s27 = int_to_ptr.vmem [resolvable:$true] %s383_s27 }
 0x247   :  { %s17866_s23 = scalar_lea.hbm %s20729_s14, 384 }
 0x248   :  { %p17867_p6 = scmp.ne.s32.totalorder %s20729_s14, %s17866_s23  ;;  %p17870_p7 = scmp.lt.u32.totalorder %s17866_s23, %s20729_s14 }
 0x24a   :  { %p17872_p8 = pnand %p17870_p7, %p17867_p6 }
 0x24c   :  { %17875 = shalt.err (!%p17872_p8)
}
 0x24d   :  { %s17876_s3 = scalar_lea.vmem %s362_s22, 384  ;;  %p17881_p10 = scmp.lt.s32.totalorder %s362_s22, %s362_s22 }
 0x24e   :  { %p17877_p9 = scmp.ne.s32.totalorder %s362_s22, %s17876_s3  ;;  %p17882_p11 = scmp.lt.s32.totalorder %s17876_s3, %s17876_s3 }
 0x250   :  { %p17883_p12 = por %p17882_p11, %p17881_p10 }
 0x252   :  { %p17884_p13 = pnand %p17883_p12, %p17877_p9 }
 0x254   :  { %17887 = shalt.err (!%p17884_p13)
}
 0x255   :  { %s20730_s26 = sld [smem:[#allocation85_spill]] }
 0x256   :  { %367 = dma.hbm_to_vmem [thread:$0]  %s20729_s14, 384, %s362_s22, [#allocation36], %s18098_s11, %s18098_s11, %s18099_s15  }
 0x25b   :  { %s17888_s0 = scalar_lea.hbm %s20730_s26, 64 }
 0x25c   :  { %p17889_p0 = scmp.ne.s32.totalorder %s20730_s26, %s17888_s0  ;;  %p17892_p1 = scmp.lt.u32.totalorder %s17888_s0, %s20730_s26 }
 0x25e   :  { %p17894_p2 = pnand %p17892_p1, %p17889_p0 }
 0x260   :  { %17897 = shalt.err (!%p17894_p2)
}
 0x261   :  { %s17898_s8 = scalar_lea.vmem %s384_s27, 64  ;;  %p17903_p4 = scmp.lt.s32.totalorder %s384_s27, %s384_s27 }
 0x262   :  { %p17899_p3 = scmp.ne.s32.totalorder %s384_s27, %s17898_s8  ;;  %p17904_p5 = scmp.lt.s32.totalorder %s17898_s8, %s17898_s8 }
 0x264   :  { %p17905_p6 = por %p17904_p5, %p17903_p4 }
 0x266   :  { %p17906_p7 = pnand %p17905_p6, %p17899_p3 }
 0x268   :  { %17909 = shalt.err (!%p17906_p7)
}
 0x269   :  { %s18135_s28 = smov 32   ;;  %s20731_s25 = sld [smem:[#allocation86_spill]] }
 0x26a   :  { %s18136_s21 = smov 2   ;;  %s18137_s5 = smov [#allocation43]  }
 0x26b   :  { %389 = dma.hbm_to_vmem [thread:$0]  %s20730_s26, 64, %s384_s27, [#allocation39], %s18135_s28, %s18135_s28, %s18136_s21  }
 0x26c   :  { %s407_s1 = sshll.u32 %s18137_s5, 4  ;;  %s18138_s19 = smov [#allocation46]   ;;  %s408_s1 = int_to_ptr.vmem [resolvable:$true] %s407_s1 }
 0x26d   :  { %s431_s6 = sshll.u32 %s18138_s19, 4  ;;  %s432_s6 = int_to_ptr.vmem [resolvable:$true] %s431_s6 }
 0x26f   :  { %s17910_s2 = scalar_lea.hbm %s20731_s25, 768 }
 0x270   :  { %p17911_p8 = scmp.ne.s32.totalorder %s20731_s25, %s17910_s2  ;;  %p17914_p9 = scmp.lt.u32.totalorder %s17910_s2, %s20731_s25 }
 0x272   :  { %p17916_p10 = pnand %p17914_p9, %p17911_p8 }
 0x274   :  { %17919 = shalt.err (!%p17916_p10)
}
 0x275   :  { %s17920_s7 = scalar_lea.vmem %s408_s1, 768  ;;  %p17925_p12 = scmp.lt.s32.totalorder %s408_s1, %s408_s1 }
 0x276   :  { %p17921_p11 = scmp.ne.s32.totalorder %s408_s1, %s17920_s7  ;;  %p17926_p13 = scmp.lt.s32.totalorder %s17920_s7, %s17920_s7 }
 0x278   :  { %p17927_p0 = por %p17926_p13, %p17925_p12 }
 0x27a   :  { %p17928_p1 = pnand %p17927_p0, %p17921_p11 }
 0x27c   :  { %17931 = shalt.err (!%p17928_p1)
}
 0x27d   :  { %s20732_s10 = sld [smem:[#allocation87_spill]] }
 0x27e   :  { %413 = dma.hbm_to_vmem [thread:$0]  %s20731_s25, 768, %s408_s1, [#allocation42], %s18098_s11, %s18098_s11, %s18099_s15  }
 0x283   :  { %s17932_s30 = scalar_lea.hbm %s20732_s10, 256 }
 0x284   :  { %p17933_p2 = scmp.ne.s32.totalorder %s20732_s10, %s17932_s30  ;;  %p17936_p3 = scmp.lt.u32.totalorder %s17932_s30, %s20732_s10 }
 0x286   :  { %p17938_p4 = pnand %p17936_p3, %p17933_p2 }
 0x288   :  { %17941 = shalt.err (!%p17938_p4)
}
 0x289   :  { %s17942_s24 = scalar_lea.vmem %s432_s6, 256  ;;  %p17947_p6 = scmp.lt.s32.totalorder %s432_s6, %s432_s6 }
 0x28a   :  { %p17943_p5 = scmp.ne.s32.totalorder %s432_s6, %s17942_s24  ;;  %p17948_p7 = scmp.lt.s32.totalorder %s17942_s24, %s17942_s24 }
 0x28c   :  { %p17949_p8 = por %p17948_p7, %p17947_p6 }
 0x28e   :  { %p17950_p9 = pnand %p17949_p8, %p17943_p5 }
 0x290   :  { %17953 = shalt.err (!%p17950_p9)
}
 0x291   :  { %s20733_s16 = sld [smem:[#allocation91_spill]]  ;;  %s18139_s29 = smov [#allocation49]  }
 0x292   :  { %437 = dma.hbm_to_vmem [thread:$0]  %s20732_s10, 256, %s432_s6, [#allocation45], %s18098_s11, %s18098_s11, %s18099_s15  }
 0x293   :  { %s457_s14 = sshll.u32 %s18139_s29, 4  ;;  %s458_s14 = int_to_ptr.vmem [resolvable:$true] %s457_s14 }
 0x297   :  { %s17954_s18 = scalar_lea.hbm %s20733_s16, 27648 }
 0x298   :  { %p17955_p10 = scmp.ne.s32.totalorder %s20733_s16, %s17954_s18  ;;  %p17958_p11 = scmp.lt.u32.totalorder %s17954_s18, %s20733_s16 }
 0x29a   :  { %p17960_p12 = pnand %p17958_p11, %p17955_p10 }
 0x29c   :  { %17963 = shalt.err (!%p17960_p12)
}
 0x29d   :  { %s17964_s22 = scalar_lea.vmem %s458_s14, 27648  ;;  %p17969_p0 = scmp.lt.s32.totalorder %s458_s14, %s458_s14 }
 0x29e   :  { %p17965_p13 = scmp.ne.s32.totalorder %s458_s14, %s17964_s22  ;;  %p17970_p1 = scmp.lt.s32.totalorder %s17964_s22, %s17964_s22 }
 0x2a0   :  { %p17971_p2 = por %p17970_p1, %p17969_p0 }
 0x2a2   :  { %p17972_p3 = pnand %p17971_p2, %p17965_p13 }
 0x2a4   :  { %17975 = shalt.err (!%p17972_p3)
}
 0x2a5   :  { %s18140_s13 = smov 384   ;;  %s18141_s27 = smov 24  }
 0x2a6   :  { %463 = dma.hbm_to_vmem [thread:$0]  %s20733_s16, 27648, %s458_s14, [#allocation48], %s18140_s13, %s18140_s13, %s18141_s27  }
 0x2a7   :  { %s18142_s23 = smov [#allocation52]   ;;  %s17976_s26 = scalar_lea.hbm %s18357_s17, 4096 }
 0x2a8   :  { %s487_s3 = sshll.u32 %s18142_s23, 4  ;;  %p17977_p4 = scmp.ne.s32.totalorder %s18357_s17, %s17976_s26  ;;  %s488_s3 = int_to_ptr.vmem [resolvable:$true] %s487_s3 }
 0x2a9   :  { %p17980_p5 = scmp.lt.u32.totalorder %s17976_s26, %s18357_s17 }
 0x2ab   :  { %p17982_p6 = pnand %p17980_p5, %p17977_p4 }
 0x2ad   :  { %17985 = shalt.err (!%p17982_p6)
}
 0x2ae   :  { %s17986_s0 = scalar_lea.vmem %s488_s3, 4096  ;;  %p17991_p8 = scmp.lt.s32.totalorder %s488_s3, %s488_s3 }
 0x2af   :  { %p17987_p7 = scmp.ne.s32.totalorder %s488_s3, %s17986_s0  ;;  %p17992_p9 = scmp.lt.s32.totalorder %s17986_s0, %s17986_s0 }
 0x2b1   :  { %p17993_p10 = por %p17992_p9, %p17991_p8 }
 0x2b3   :  { %p17994_p11 = pnand %p17993_p10, %p17987_p7 }
 0x2b5   :  { %17997 = shalt.err (!%p17994_p11)
}
 0x2b6   :  { %493 = dma.hbm_to_vmem [thread:$0]  %s18357_s17, 4096, %s488_s3, [#allocation51], %s18098_s11, %s18098_s11, %s18099_s15  }
 0x2b7   :  { %18020 = dma.done.wait [#allocation3], 640  }
 0x2b8   :  { %18021 = vsyncadd [#allocation3], 4294966656 }
 0x2b9   :  { %18022 = dma.done.wait [#allocation6], 6400  }
 0x2ba   :  { %18023 = vsyncadd [#allocation6], 4294960896 }
 0x2bb   :  { %18024 = dma.done.wait [#allocation9], 64  }
 0x2bc   :  { %18025 = vsyncadd [#allocation9], 4294967232 }
 0x2bd   :  { %18026 = dma.done.wait [#allocation12], 2576  }
 0x2be   :  { %18027 = vsyncadd [#allocation12], 4294964720 }
 0x2bf   :  { %18028 = dma.done.wait [#allocation15], 9232  }
 0x2c0   :  { %18029 = vsyncadd [#allocation15], 4294958064 }
 0x2c1   :  { %18030 = dma.done.wait [#allocation18], 1280  }
 0x2c2   :  { %18031 = vsyncadd [#allocation18], 4294966016 }
 0x2c3   :  { %18032 = dma.done.wait [#allocation21], 768  }
 0x2c4   :  { %18033 = vsyncadd [#allocation21], 4294966528 }
 0x2c5   :  { %18034 = dma.done.wait [#allocation24], 512  }
 0x2c6   :  { %18035 = vsyncadd [#allocation24], 4294966784 }
 0x2c7   :  { %18036 = dma.done.wait [#allocation27], 512  }
 0x2c8   :  { %18037 = vsyncadd [#allocation27], 4294966784 }
 0x2c9   :  { %18038 = dma.done.wait [#allocation30], 800  }
 0x2ca   :  { %18039 = vsyncadd [#allocation30], 4294966496 }
 0x2cb   :  { %18040 = dma.done.wait [#allocation33], 96  }
 0x2cc   :  { %18041 = vsyncadd [#allocation33], 4294967200 }
 0x2cd   :  { %18042 = dma.done.wait [#allocation36], 448  }
 0x2ce   :  { %18043 = vsyncadd [#allocation36], 4294966848 }
 0x2cf   :  { %18044 = dma.done.wait [#allocation39], 192  }
 0x2d0   :  { %18045 = vsyncadd [#allocation39], 4294967104 }
 0x2d1   :  { %18046 = dma.done.wait [#allocation42], 896  }
 0x2d2   :  { %18047 = vsyncadd [#allocation42], 4294966400 }
 0x2d3   :  { %18048 = dma.done.wait [#allocation45], 512  }
 0x2d4   :  { %18049 = vsyncadd [#allocation45], 4294966784 }
 0x2d5   :  { %18050 = dma.done.wait [#allocation48], 27680  }
 0x2d6   :  { %18051 = vsyncadd [#allocation48], 4294939616 }
 0x2d7   :  { %18052 = dma.done.wait [#allocation51], 10240  }
 0x2d8   :  { %18053 = vsyncadd [#allocation51], 4294957056  ;;  %s20734_s17 = sld [smem:[#allocation72_spill]]  ;;  %v20675_v0 = vmov 0.0   ;;  %vm18144_vm0 = vmmov 0   ;;  %vm617_vm1 = vcmask 1042432   ;;  %v838_v28 = vlaneseq }
 0x2d9   :  { %14765 = vmatprep.subr.mxu0 %v20675_v0  ;;  %14767 = vmatprep.mubr.msk.f32.mxu0 %vm18144_vm0, %v20675_v0  ;;  %vm601_vm2 = vcmask 23552   ;;  %v595_v2 = vld [vmem:[#allocation2] sm:$0xff]  ;;  %v596_v3 = vld [vmem:[#allocation2 + $0x8] sm:$0xff]  ;;  %v597_v4 = vld [vmem:[#allocation2 + $0x10] sm:$0xff]  ;;  %vm737_vm3 = vcmask 1045504   ;;  %v18145_v7 = vmov 1.0  }
 0x2da   :  { %14782 = vmatprep.subr.mxu1 %v20675_v0  ;;  %14784 = vmatprep.mubr.msk.f32.mxu1 %vm18144_vm0, %v20675_v0  ;;  %v598_v5 = vld [vmem:[#allocation2 + $0x18] sm:$0xff]  ;;  %v599_v6 = vld [vmem:[#allocation2 + $0x20] sm:$0xf]  ;;  %v711_v8 = vld [vmem:[#allocation5] sm:$0xff]  ;;  %vm721_vm4 = vcmask 48128   ;;  %v18609_v29 = vshrl.u32 %v838_v28, 7 }
 0x2db   :  { %14783 = vmatpush3.msk.msra.mxu1 %vm737_vm3, %v18145_v7  ;;  %v712_v12 = vld [vmem:[#allocation5 + $0x8] sm:$0xff]  ;;  %v713_v16 = vld [vmem:[#allocation5 + $0x10] sm:$0xff]  ;;  %v714_v20 = vld [vmem:[#allocation5 + $0x18] sm:$0xff]  ;;  %vm866_vm5 = vcmask 1040384   ;;  %vm850_vm6 = vcmask 7168   ;;  %v20677_v52 = vmov 0.0|0.0  }
 0x2dc   :  { %14799 = vmatprep.subr.mxu1 %v20675_v0  ;;  %v715_v24 = vld [vmem:[#allocation5 + $0x20] sm:$0xf]  ;;  %20735 = vst [vmem:[#allocation95_spill] sm:$0xff] %v18609_v29  ;;  %v18612_v30 = vsub.s32 1, %v18609_v29  ;;  %v836_v31 = vld [vmem:[#allocation8] sm:$0x7] }
 0x2dd   :  { %v18615_v32 = vsub.s32 0, %v18609_v29  ;;  %v20674_v33 = vsub.s32 2, %v18609_v29  ;;  %s18147_s11 = smov 96   ;;  %vm1104_vm7 = vcmask 1043456   ;;  %vm1088_vm8 = vcmask 293888   ;;  %s18150_s15 = smov 125  }
 0x2de   :  { %v600_v1 = vld [vmem:[%s20734_s17] sm:$0x7]  ;;  %20736 = vst [vmem:[#allocation96_spill] sm:$0xff] %v18612_v30  ;;  %v845_v34 = vrot.slane %v836_v31, %v18612_v30  ;;  %vm2243_vm9 = vcmask 261120   ;;  %vm3568_vm10 = vcmask 523264   ;;  %vm5325_vm11 = vcmask 44032  }
 0x2df   :  { %14766 = vmatpush3.msk.msra.mxu0 %vm617_vm1, %v600_v1  ;;  %20737 = vst [vmem:[#allocation97_spill] sm:$0xff] %v18615_v32  ;;  %v841_v35 = vrot.slane %v836_v31, %v18615_v32  ;;  %v849_v36 = vrot.slane %v836_v31, %v20674_v33  ;;  %v2233_v33 = vld [vmem:[#allocation11 + $0x50] sm:$0xff]  ;;  %vm5438_vm12 = vcmask 31744   ;;  %vm5739_vm13 = vcmask 1041408   ;;  %s18152_s8 = smov 119   ;;  %s18154_s25 = smov 113  }
 0x2e0   :  { %14768 = vmatmul.mubr.msk.f32.vlgmr.msra.gmra.mrb[0].mxu0 %vm601_vm2, %v595_v2  ;;  %13705 = vmatprep.subr.msk.mxu0 %vm866_vm5, %v845_v34  ;;  %vm5735_vm14 = vcmask 146432   ;;  %vm6220_vm15 = vcmask 41984   ;;  %vm6403_vm1 = vcmask 15360   ;;  %s18155_s21 = smov 116   ;;  %s20770_s5 = sld [smem:[#allocation89_spill]] }
 0x2e1   :  { %14770 = vmatprep.mubr.msk.f32.mxu0 %vm18144_vm0, %v20675_v0  ;;  %13706 = vmatpush1.msk.msra.mxu0 %vm866_vm5, %v841_v35  ;;  %s20771_s1 = sld [smem:[#allocation88_spill]]  ;;  %s20774_s19 = sld [smem:[#allocation92_spill]] }
 0x2e2   :  { %16182 = vmatprep.subr.bf16.mxu0 %v20677_v52  ;;  %s20777_s6 = sld [smem:[#allocation93_spill]] }
 0x2e4   :  { %14771 = vmatmul.mubr.msk.f32.gmra.mrb[2].mxu0 %vm601_vm2, %v596_v3 }
 0x2e5   :  { %14773 = vmatprep.mubr.msk.f32.mxu0 %vm18144_vm0, %v20675_v0 }
 0x2e8   :  { %14774 = vmatmul.mubr.msk.f32.gmra.mrb[4].mxu0 %vm601_vm2, %v597_v4 }
 0x2e9   :  { %14776 = vmatprep.mubr.msk.f32.mxu0 %vm18144_vm0, %v20675_v0 }
 0x2ec   :  { %14777 = vmatmul.mubr.msk.f32.gmra.mrb[6].mxu0 %vm601_vm2, %v598_v5 }
 0x2ed   :  { %14779 = vmatprep.mubr.msk.f32.mxu0 %vm18144_vm0, %v20675_v0 }
 0x2f0   :  { %14780 = vmatmul.mubr.msk.f32.gmra.mrb[8].mxu0 %vm601_vm2, %v599_v6 }
 0x2f1   :  { %937 = vmatprep.mubr.f32.mxu0 %v20675_v0 }
 0x3b3   :  { %v687_v9 = vpop.f32.mrb[0].mxu0 }
 0x3b4   :  { %v716_v10 = vmul.f32 %v711_v8, %v687_v9  ;;  %v14769_v11 = vpop.f32.mrb[1].mxu0 }
 0x3b6   :  { %14785 = vmatmul.mubr.msk.f32.vlgmr.msra.gmra.mrb[0].mxu1 %vm721_vm4, %v716_v10 }
 0x3b7   :  { %v692_v13 = vpop.f32.mrb[2].mxu0  ;;  %14787 = vmatprep.mubr.msk.f32.mxu1 %vm18144_vm0, %v20675_v0  ;;  %14800 = vmatpush3.msk.msra.mxu1 %vm866_vm5, %v849_v36 }
 0x3b8   :  { %v717_v14 = vmul.f32 %v712_v12, %v692_v13  ;;  %v14772_v15 = vpop.f32.mrb[3].mxu0  ;;  %16188 = vmatprep.subr.bf16.mxu1 %v20677_v52 }
 0x3ba   :  { %14788 = vmatmul.mubr.msk.f32.gmra.mrb[2].mxu1 %vm721_vm4, %v717_v14 }
 0x3bb   :  { %v697_v17 = vpop.f32.mrb[4].mxu0  ;;  %14790 = vmatprep.mubr.msk.f32.mxu1 %vm18144_vm0, %v20675_v0 }
 0x3bc   :  { %v718_v18 = vmul.f32 %v713_v16, %v697_v17  ;;  %v14775_v19 = vpop.f32.mrb[5].mxu0 }
 0x3be   :  { %14791 = vmatmul.mubr.msk.f32.gmra.mrb[4].mxu1 %vm721_vm4, %v718_v18 }
 0x3bf   :  { %v702_v21 = vpop.f32.mrb[6].mxu0  ;;  %14793 = vmatprep.mubr.msk.f32.mxu1 %vm18144_vm0, %v20675_v0 }
 0x3c0   :  { %v719_v22 = vmul.f32 %v714_v20, %v702_v21  ;;  %v14778_v23 = vpop.f32.mrb[7].mxu0  ;;  %v1058_v20 = vld [vmem:[#allocation7] sm:$0xff]  ;;  %v1059_v21 = vld [vmem:[#allocation7 + $0x8] sm:$0xff] }
 0x3c1   :  { %v1061_v23 = vld [vmem:[#allocation7 + $0x18] sm:$0xff] }
 0x3c2   :  { %14794 = vmatmul.mubr.msk.f32.gmra.mrb[6].mxu1 %vm721_vm4, %v719_v22  ;;  %v1060_v22 = vld [vmem:[#allocation7 + $0x10] sm:$0xff] }
 0x3c3   :  { %v707_v25 = vpop.f32.mrb[8].mxu0  ;;  %14796 = vmatprep.mubr.msk.f32.mxu1 %vm18144_vm0, %v20675_v0 }
 0x3c4   :  { %v720_v26 = vmul.f32 %v715_v24, %v707_v25  ;;  %v14781_v27 = vpop.f32.mrb[9].mxu0  ;;  %v1062_v24 = vld [vmem:[#allocation7 + $0x20] sm:$0xf] }
 0x3c6   :  { %14797 = vmatmul.mubr.msk.f32.gmra.mrb[8].mxu1 %vm721_vm4, %v720_v26 }
 0x3c7   :  { %14801 = vmatprep.mubr.msk.f32.mxu1 %vm18144_vm0, %v20675_v0 }
 0x489   :  { %v807_v37 = vpop.f32.mrb[0].mxu1 }
 0x48a   :  { %v831_v38 = vand.u32 2147483647, %v807_v37  ;;  %v14786_v39 = vpop.f32.mrb[1].mxu1 }
 0x48c   :  { %13707 = vmatmul.mubr.msk.f32.vlgmr.msra.gmra.mrb[10].mxu0 %vm850_vm6, %v831_v38  ;;  %14802 = vmatmul.mubr.msk.f32.vlgmr.msra.gmra.mrb[10].mxu1 %vm850_vm6, %v831_v38 }
 0x48d   :  { %v812_v40 = vpop.f32.mrb[2].mxu1  ;;  %943 = vmatprep.mubr.f32.mxu0 %v20675_v0  ;;  %14804 = vmatprep.mubr.msk.f32.mxu1 %vm18144_vm0, %v20675_v0 }
 0x48e   :  { %v832_v41 = vand.u32 2147483647, %v812_v40  ;;  %v14789_v42 = vpop.f32.mrb[3].mxu1 }
 0x48f   :  { %v1064_v42 = vld [vmem:[#allocation7 + $0x28] sm:$0xff] }
 0x490   :  { %13708 = vmatmul.mubr.msk.f32.gmra.mrb[12].mxu0 %vm850_vm6, %v832_v41  ;;  %14805 = vmatmul.mubr.msk.f32.gmra.mrb[12].mxu1 %vm850_vm6, %v832_v41 }
 0x491   :  { %v817_v43 = vpop.f32.mrb[4].mxu1  ;;  %949 = vmatprep.mubr.f32.mxu0 %v20675_v0  ;;  %14807 = vmatprep.mubr.msk.f32.mxu1 %vm18144_vm0, %v20675_v0 }
 0x492   :  { %v833_v44 = vand.u32 2147483647, %v817_v43  ;;  %v14792_v45 = vpop.f32.mrb[5].mxu1 }
 0x494   :  { %13709 = vmatmul.mubr.msk.f32.gmra.mrb[14].mxu0 %vm850_vm6, %v833_v44  ;;  %14808 = vmatmul.mubr.msk.f32.gmra.mrb[14].mxu1 %vm850_vm6, %v833_v44 }
 0x495   :  { %v822_v46 = vpop.f32.mrb[6].mxu1  ;;  %955 = vmatprep.mubr.f32.mxu0 %v20675_v0  ;;  %14810 = vmatprep.mubr.msk.f32.mxu1 %vm18144_vm0, %v20675_v0 }
 0x496   :  { %v834_v47 = vand.u32 2147483647, %v822_v46  ;;  %v14795_v48 = vpop.f32.mrb[7].mxu1 }
 0x498   :  { %13710 = vmatmul.mubr.msk.f32.gmra.mrb[16].mxu0 %vm850_vm6, %v834_v47  ;;  %14811 = vmatmul.mubr.msk.f32.gmra.mrb[16].mxu1 %vm850_vm6, %v834_v47 }
 0x499   :  { %v827_v49 = vpop.f32.mrb[8].mxu1  ;;  %961 = vmatprep.mubr.f32.mxu0 %v20675_v0  ;;  %14813 = vmatprep.mubr.msk.f32.mxu1 %vm18144_vm0, %v20675_v0 }
 0x49a   :  { %v835_v50 = vand.u32 2147483647, %v827_v49  ;;  %v14798_v51 = vpop.f32.mrb[9].mxu1 }
 0x49b   :  { %v1065_v51 = vld [vmem:[#allocation7 + $0x30] sm:$0xff] }
 0x49c   :  { %13711 = vmatmul.mubr.msk.f32.gmra.mrb[18].mxu0 %vm850_vm6, %v835_v50  ;;  %14814 = vmatmul.mubr.msk.f32.gmra.mrb[18].mxu1 %vm850_vm6, %v835_v50  ;;  %vm6665_vm6 = vcmask 195584  }
 0x49d   :  { %14851 = vmatprep.mubr.msk.f32.mxu1 %vm18144_vm0, %v20675_v0  ;;  %14826 = vmatprep.mubr.msk.f32.mxu0 %vm18144_vm0, %v20675_v0 }
 0x55f   :  { %v939_v53 = vpop.f32.mrb[10].mxu0  ;;  %v18650_v54 = vpop.f32.mrb[10].mxu1 }
 0x560   :  { %v18652_v55 = vpop.f32.mrb[11].mxu0  ;;  %v14803_v56 = vpop.f32.mrb[11].mxu1 }
 0x563   :  { %v945_v57 = vpop.f32.mrb[12].mxu0  ;;  %v18654_v58 = vpop.f32.mrb[12].mxu1 }
 0x564   :  { %v16231_v59 = vpack.c.bf16 %v18654_v58, %v18650_v54  ;;  %v18658_v60 = vpop.f32.mrb[13].mxu0  ;;  %v14806_v61 = vpop.f32.mrb[13].mxu1  ;;  %v17039_v62 = vpack.i.bf16 %v945_v57, %v939_v53  ;;  %v16189_v63 = vpack.c.bf16 %v945_v57, %v939_v53  ;;  %v18944_v54 = vld [vmem:[#allocation7 + $0x100] sm:$0xff]  ;;  %v18951_v58 = vld [vmem:[#allocation7 + $0x138] sm:$0xf] }
 0x565   :  { %v17074_v1 = vpack.i.bf16 %v18658_v60, %v18652_v55  ;;  %v16207_v2 = vpack.c.bf16 %v18658_v60, %v18652_v55  ;;  %v18801_v55 = vld [vmem:[#allocation7 + $0x60] sm:$0xff]  ;;  %20738 = vst [vmem:[#allocation98_spill] sm:$0xff] %v18944_v54 }
 0x566   :  { %17040 = vrot.lane.b32.xlu0 %v17039_v62, %s18147_s11  ;;  %16190 = vmatpush3.bf16.msra.mxu1 %v16189_v63 }
 0x567   :  { %v951_v3 = vpop.f32.mrb[14].mxu0  ;;  %v18665_v4 = vpop.f32.mrb[14].mxu1  ;;  %16191 = vmatprep.subr.bf16.mxu1 %v20677_v52 }
 0x568   :  { %v18668_v5 = vpop.f32.mrb[15].mxu0  ;;  %v14809_v6 = vpop.f32.mrb[15].mxu1 }
 0x56b   :  { %v957_v7 = vpop.f32.mrb[16].mxu0  ;;  %v18670_v8 = vpop.f32.mrb[16].mxu1 }
 0x56c   :  { %v16234_v9 = vpack.c.bf16 %v18670_v8, %v18665_v4  ;;  %v18674_v10 = vpop.f32.mrb[17].mxu0  ;;  %v14812_v11 = vpop.f32.mrb[17].mxu1  ;;  %v17044_v12 = vpack.i.bf16 %v957_v7, %v951_v3  ;;  %v16192_v13 = vpack.c.bf16 %v957_v7, %v951_v3  ;;  %v18968_v4 = vld [vmem:[#allocation7 + $0x110] sm:$0xf]  ;;  %v18974_v8 = vld [vmem:[#allocation7 + $0x140] sm:$0xff] }
 0x56d   :  { %v17084_v14 = vpack.i.bf16 %v18674_v10, %v18668_v5  ;;  %v16210_v15 = vpack.c.bf16 %v18674_v10, %v18668_v5  ;;  %v1067_v11 = vld [vmem:[#allocation7 + $0x40] sm:$0xff]  ;;  %20740 = vst [vmem:[#allocation100_spill] sm:$0xff] %v18968_v4  ;;  %20741 = vst [vmem:[#allocation101_spill] sm:$0xff] %v18974_v8 }
 0x56e   :  { %17045 = vrot.lane.b32.xlu0 %v17044_v12, %s18147_s11  ;;  %16193 = vmatpush3.bf16.msra.mxu1 %v16192_v13 }
 0x56f   :  { %v963_v16 = vpop.f32.mrb[18].mxu0  ;;  %v18681_v17 = vpop.f32.mrb[18].mxu1  ;;  %14849 = vmatprep.subr.mxu1 %v20675_v0 }
 0x570   :  { %1082 = vrot.lane.b32.xlu1 %v963_v16, %s18147_s11  ;;  %v18685_v18 = vpop.f32.mrb[19].mxu0  ;;  %v14815_v19 = vpop.f32.mrb[19].mxu1 }
 0x572   :  { %17055 = vrot.lane.b32.xlu0 %v17044_v12, %s18117_s12  ;;  %14850 = vmatpush3.msk.msra.mxu1 %vm1104_vm7, %v963_v16 }
 0x573   :  { %14852 = vmatmul.mubr.msk.f32.vlgmr.msra.gmra.mrb[20].mxu1 %vm1088_vm8, %v1058_v20  ;;  %16200 = vmatprep.subr.bf16.mxu1 %v20677_v52 }
 0x574   :  { %17050 = vrot.lane.b32.xlu1 %v17039_v62, %s18117_s12  ;;  %14854 = vmatprep.mubr.msk.f32.mxu1 %vm18144_vm0, %v20675_v0 }
 0x576   :  { %17060 = vrot.lane.b32.xlu0 %v17039_v62, %s18135_s28  ;;  %v1066_v62 = vld [vmem:[#allocation7 + $0x38] sm:$0xff] }
 0x577   :  { %14855 = vmatmul.mubr.msk.f32.gmra.mrb[22].mxu1 %vm1088_vm8, %v1059_v21  ;;  %v18749_v21 = vld [vmem:[#allocation7 + $0x48] sm:$0xf] }
 0x578   :  { %1318 = vrot.lane.b32.xlu1 %v963_v16, %s18117_s12  ;;  %14857 = vmatprep.mubr.msk.f32.mxu1 %vm18144_vm0, %v20675_v0 }
 0x57a   :  { %1450 = vrot.lane.b32.xlu0 %v963_v16, %s18135_s28 }
 0x57b   :  { %14858 = vmatmul.mubr.msk.f32.gmra.mrb[24].mxu1 %vm1088_vm8, %v1060_v22  ;;  %v18756_v22 = vld [vmem:[#allocation7 + $0x80] sm:$0xff] }
 0x57c   :  { %17065 = vrot.lane.b32.xlu1 %v17044_v12, %s18135_s28  ;;  %14860 = vmatprep.mubr.msk.f32.mxu1 %vm18144_vm0, %v20675_v0  ;;  %v18740_v12 = vld [vmem:[#allocation7 + $0x78] sm:$0xff] }
 0x57e   :  { %17075 = vrot.lane.b32.xlu0 %v17074_v1, %s18117_s12 }
 0x57f   :  { %14861 = vmatmul.mubr.msk.f32.gmra.mrb[26].mxu1 %vm1088_vm8, %v1061_v23 }
 0x580   :  { %17070 = vrot.lane.b32.xlu1 %v17074_v1, %s18147_s11  ;;  %14863 = vmatprep.mubr.msk.f32.mxu1 %vm18144_vm0, %v20675_v0 }
 0x582   :  { %17085 = vrot.lane.b32.xlu0 %v17084_v14, %s18117_s12 }
 0x583   :  { %14864 = vmatmul.mubr.msk.f32.gmra.mrb[28].mxu1 %vm1088_vm8, %v1062_v24  ;;  %v18763_v24 = vld [vmem:[#allocation7 + $0x50] sm:$0xff] }
 0x584   :  { %17080 = vrot.lane.b32.xlu1 %v17084_v14, %s18147_s11  ;;  %14901 = vmatprep.mubr.msk.f32.mxu1 %vm18144_vm0, %v20675_v0 }
 0x586   :  { %1837 = vrot.lane.b32.xlu0 %v18685_v18, %s18117_s12 }
 0x588   :  { %1705 = vrot.lane.b32.xlu1 %v18685_v18, %s18147_s11 }
 0x58a   :  { %17095 = vrot.lane.b32.xlu0 %v17084_v14, %s18135_s28 }
 0x58c   :  { %17090 = vrot.lane.b32.xlu1 %v17074_v1, %s18135_s28 }
 0x590   :  { %1969 = vrot.lane.b32.xlu1 %v18685_v18, %s18135_s28  ;;  %s18153_s28 = smov 122  }
 0x5d8   :  { %v17041_v25 = vpop.permute.xlu0 %17040 }
 0x5d9   :  { %v17043_v26 = vunpack.i.h.bf16 %v17041_v25  ;;  %v17042_v27 = vunpack.i.l.bf16 %v17041_v25 }
 0x5db   :  { %v16183_v28 = vpack.c.bf16 %v17043_v26, %v17042_v27  ;;  %v18771_v26 = vld [vmem:[#allocation7 + $0x88] sm:$0xff] }
 0x5dd   :  { %16184 = vmatpush3.bf16.msra.mxu0 %v16183_v28  ;;  %v18781_v28 = vld [vmem:[#allocation7 + $0x58] sm:$0xff] }
 0x5de   :  { %16185 = vmatprep.subr.bf16.mxu0 %v20677_v52 }
 0x5e0   :  { %v17046_v31 = vpop.permute.xlu0 %17045 }
 0x5e1   :  { %v17048_v34 = vunpack.i.h.bf16 %v17046_v31  ;;  %v17047_v35 = vunpack.i.l.bf16 %v17046_v31  ;;  %v18789_v31 = vld [vmem:[#allocation7 + $0x90] sm:$0xff] }
 0x5e2   :  { %v1083_v36 = vpop.permute.xlu1 %1082 }
 0x5e3   :  { %v16186_v37 = vpack.c.bf16 %v17048_v34, %v17047_v35 }
 0x5e4   :  { %v17056_v38 = vpop.permute.xlu0 %17055 }
 0x5e5   :  { %16187 = vmatpush3.bf16.msra.mxu0 %v16186_v37  ;;  %v17058_v43 = vunpack.i.h.bf16 %v17056_v38  ;;  %v17057_v45 = vunpack.i.l.bf16 %v17056_v38 }
 0x5e6   :  { %v17051_v39 = vpop.permute.xlu1 %17050  ;;  %14824 = vmatprep.subr.mxu0 %v20675_v0 }
 0x5e7   :  { %v17053_v40 = vunpack.i.h.bf16 %v17051_v39  ;;  %v17052_v41 = vunpack.i.l.bf16 %v17051_v39  ;;  %v16198_v53 = vpack.c.bf16 %v17058_v43, %v17057_v45  ;;  %v18829_v39 = vld [vmem:[#allocation7 + $0x70] sm:$0xf] }
 0x5e8   :  { %v17061_v44 = vpop.permute.xlu0 %17060 }
 0x5e9   :  { %v16195_v46 = vpack.c.bf16 %v17053_v40, %v17052_v41  ;;  %v17063_v47 = vunpack.i.h.bf16 %v17061_v44  ;;  %v17062_v48 = vunpack.i.l.bf16 %v17061_v44  ;;  %14825 = vmatpush3.msk.msra.mxu0 %vm1104_vm7, %v1083_v36  ;;  %v18823_v36 = vld [vmem:[#allocation7 + $0xc8] sm:$0xff]  ;;  %v18844_v44 = vld [vmem:[#allocation7 + $0xa0] sm:$0xff] }
 0x5ea   :  { %14827 = vmatmul.mubr.msk.f32.vlgmr.msra.gmra.mrb[20].mxu0 %vm1088_vm8, %v1064_v42  ;;  %16194 = vmatprep.subr.bf16.mxu0 %v20677_v52  ;;  %v1319_v49 = vpop.permute.xlu1 %1318  ;;  %v18837_v42 = vld [vmem:[#allocation7 + $0xd0] sm:$0xff] }
 0x5eb   :  { %v16201_v50 = vpack.c.bf16 %v17063_v47, %v17062_v48  ;;  %16196 = vmatpush3.bf16.msra.mxu0 %v16195_v46  ;;  %14829 = vmatprep.mubr.msk.f32.mxu0 %vm18144_vm0, %v20675_v0  ;;  %v18852_v48 = vld [vmem:[#allocation7 + $0xd8] sm:$0xff] }
 0x5ec   :  { %16197 = vmatprep.subr.bf16.mxu0 %v20677_v52  ;;  %v1451_v63 = vpop.permute.xlu0 %1450 }
 0x5ed   :  { %16202 = vmatpush3.bf16.msra.mxu1 %v16201_v50 }
 0x5ee   :  { %14830 = vmatmul.mubr.msk.f32.gmra.mrb[22].mxu0 %vm1088_vm8, %v1065_v51  ;;  %v17066_v56 = vpop.permute.xlu1 %17065  ;;  %16203 = vmatprep.subr.bf16.mxu1 %v20677_v52 }
 0x5ef   :  { %v17068_v57 = vunpack.i.h.bf16 %v17066_v56  ;;  %v17067_v61 = vunpack.i.l.bf16 %v17066_v56  ;;  %16199 = vmatpush3.bf16.msra.mxu0 %v16198_v53  ;;  %14832 = vmatprep.mubr.msk.f32.mxu0 %vm18144_vm0, %v20675_v0  ;;  %v18867_v53 = vld [vmem:[#allocation7 + $0xe0] sm:$0xff]  ;;  %v18873_v56 = vld [vmem:[#allocation7 + $0xb0] sm:$0xff] }
 0x5f0   :  { %14874 = vmatprep.subr.mxu0 %v20675_v0  ;;  %v18743_v13 = vpop.permute.xlu0 %17075 }
 0x5f1   :  { %v16204_v1 = vpack.c.bf16 %v17068_v57, %v17067_v61  ;;  %v17078_v40 = vunpack.i.h.bf16 %v18743_v13  ;;  %v17077_v41 = vunpack.i.l.bf16 %v18743_v13  ;;  %v18880_v57 = vld [vmem:[#allocation7 + $0xe8] sm:$0xf]  ;;  %v18888_v61 = vld [vmem:[#allocation7 + $0xb8] sm:$0xff] }
 0x5f2   :  { %14833 = vmatmul.mubr.msk.f32.gmra.mrb[24].mxu0 %vm1088_vm8, %v1066_v62  ;;  %v17071_v3 = vpop.permute.xlu1 %17070  ;;  %v18895_v62 = vld [vmem:[#allocation7 + $0x118] sm:$0xff] }
 0x5f3   :  { %v17073_v6 = vunpack.i.h.bf16 %v17071_v3  ;;  %v17072_v7 = vunpack.i.l.bf16 %v17071_v3  ;;  %14875 = vmatpush3.msk.msra.mxu0 %vm1104_vm7, %v1319_v49  ;;  %16205 = vmatpush3.bf16.msra.mxu1 %v16204_v1  ;;  %v16219_v45 = vpack.c.bf16 %v17078_v40, %v17077_v41  ;;  %v18859_v49 = vld [vmem:[#allocation7 + $0xa8] sm:$0xff]  ;;  %v18907_v1 = vld [vmem:[#allocation7 + $0x120] sm:$0xff]  ;;  %v18913_v3 = vld [vmem:[#allocation7 + $0xf0] sm:$0xff] }
 0x5f4   :  { %14835 = vmatprep.mubr.msk.f32.mxu0 %vm18144_vm0, %v20675_v0  ;;  %14899 = vmatprep.subr.mxu1 %v20675_v0  ;;  %v18765_v25 = vpop.permute.xlu0 %17085  ;;  %v18992_v13 = vld [vmem:[#allocation7 + $0x158] sm:$0xff]  ;;  %v2231_v40 = vld [vmem:[#allocation11 + $0x40] sm:$0xff] }
 0x5f5   :  { %16206 = vmatprep.subr.bf16.mxu0 %v20677_v52  ;;  %v16213_v16 = vpack.c.bf16 %v17073_v6, %v17072_v7  ;;  %v17088_v46 = vunpack.i.h.bf16 %v18765_v25  ;;  %v17087_v47 = vunpack.i.l.bf16 %v18765_v25  ;;  %v18919_v6 = vld [vmem:[#allocation7 + $0x128] sm:$0xff]  ;;  %v18928_v7 = vld [vmem:[#allocation7 + $0xf8] sm:$0xff]  ;;  %20744 = vst [vmem:[#allocation104_spill] sm:$0xff] %v18992_v13 }
 0x5f6   :  { %14836 = vmatmul.mubr.msk.f32.gmra.mrb[26].mxu0 %vm1088_vm8, %v1067_v11  ;;  %v17081_v14 = vpop.permute.xlu1 %17080  ;;  %v18935_v11 = vld [vmem:[#allocation7 + $0x130] sm:$0xff] }
 0x5f7   :  { %v17083_v19 = vunpack.i.h.bf16 %v17081_v14  ;;  %v17082_v20 = vunpack.i.l.bf16 %v17081_v14  ;;  %14900 = vmatpush3.msk.msra.mxu1 %vm1104_vm7, %v1451_v63  ;;  %14838 = vmatprep.mubr.msk.f32.mxu0 %vm18144_vm0, %v20675_v0  ;;  %v16222_v51 = vpack.c.bf16 %v17088_v46, %v17087_v47  ;;  %v18901_v63 = vld [vmem:[#allocation7 + $0xc0] sm:$0xf]  ;;  %v2223_v41 = vld [vmem:[#allocation11] sm:$0xff] }
 0x5f8   :  { %14902 = vmatmul.mubr.msk.f32.vlgmr.msra.gmra.mrb[30].mxu1 %vm1088_vm8, %v18740_v12  ;;  %16212 = vmatprep.subr.bf16.mxu1 %v20677_v52  ;;  %v18791_v34 = vpop.permute.xlu0 %1837  ;;  %v2225_v47 = vld [vmem:[#allocation11 + $0x10] sm:$0xff] }
 0x5f9   :  { %16214 = vmatpush3.bf16.msra.mxu1 %v16213_v16  ;;  %14904 = vmatprep.mubr.msk.f32.mxu1 %vm18144_vm0, %v20675_v0  ;;  %v16216_v23 = vpack.c.bf16 %v17083_v19, %v17082_v20  ;;  %v18998_v16 = vld [vmem:[#allocation7 + $0x160] sm:$0xf] }
 0x5fa   :  { %14839 = vmatmul.mubr.msk.f32.gmra.mrb[28].mxu0 %vm1088_vm8, %v18749_v21  ;;  %16215 = vmatprep.subr.bf16.mxu1 %v20677_v52  ;;  %v1706_v27 = vpop.permute.xlu1 %1705  ;;  %20745 = vst [vmem:[#allocation105_spill] sm:$0xff] %v18998_v16 }
 0x5fb   :  { %14876 = vmatprep.mubr.msk.f32.mxu0 %vm18144_vm0, %v20675_v0 }
 0x5fc   :  { %14905 = vmatmul.mubr.msk.f32.gmra.mrb[32].mxu1 %vm1088_vm8, %v18756_v22  ;;  %v17096_v35 = vpop.permute.xlu0 %17095 }
 0x5fd   :  { %16217 = vmatpush3.bf16.msra.mxu1 %v16216_v23  ;;  %14907 = vmatprep.mubr.msk.f32.mxu1 %vm18144_vm0, %v20675_v0  ;;  %v17097_v37 = vunpack.i.l.bf16 %v17096_v35 }
 0x5fe   :  { %14877 = vmatmul.mubr.msk.f32.vlgmr.msra.gmra.mrb[30].mxu0 %vm1088_vm8, %v18763_v24  ;;  %14949 = vmatprep.subr.mxu1 %v20675_v0  ;;  %v17091_v60 = vpop.permute.xlu1 %17090 }
 0x5ff   :  { %16208 = vmatpush3.bf16.msra.mxu0 %v16207_v2  ;;  %14879 = vmatprep.mubr.msk.f32.mxu0 %vm18144_vm0, %v20675_v0  ;;  %v18808_v2 = vld [vmem:[#allocation7 + $0x98] sm:$0xf]  ;;  %v17093_v5 = vunpack.i.h.bf16 %v17091_v60  ;;  %v17092_v10 = vunpack.i.l.bf16 %v17091_v60 }
 0x600   :  { %14908 = vmatmul.mubr.msk.f32.gmra.mrb[34].mxu1 %vm1088_vm8, %v18771_v26  ;;  %16209 = vmatprep.subr.bf16.mxu0 %v20677_v52 }
 0x601   :  { %14950 = vmatpush3.msk.msra.mxu1 %vm1104_vm7, %v1706_v27  ;;  %14910 = vmatprep.mubr.msk.f32.mxu1 %vm18144_vm0, %v20675_v0  ;;  %v16225_v38 = vpack.c.bf16 %v17093_v5, %v17092_v10 }
 0x602   :  { %14880 = vmatmul.mubr.msk.f32.gmra.mrb[32].mxu0 %vm1088_vm8, %v18781_v28  ;;  %16224 = vmatprep.subr.bf16.mxu1 %v20677_v52  ;;  %v1970_v50 = vpop.permute.xlu1 %1969 }
 0x603   :  { %16211 = vmatpush3.bf16.msra.mxu0 %v16210_v15  ;;  %14882 = vmatprep.mubr.msk.f32.mxu0 %vm18144_vm0, %v20675_v0  ;;  %v18816_v15 = vld [vmem:[#allocation7 + $0x68] sm:$0xff] }
 0x604   :  { %14911 = vmatmul.mubr.msk.f32.gmra.mrb[36].mxu1 %vm1088_vm8, %v18789_v31  ;;  %14924 = vmatprep.subr.mxu0 %v20675_v0 }
 0x605   :  { %14913 = vmatprep.mubr.msk.f32.mxu1 %vm18144_vm0, %v20675_v0 }
 0x606   :  { %14883 = vmatmul.mubr.msk.f32.gmra.mrb[34].mxu0 %vm1088_vm8, %v18801_v55 }
 0x607   :  { %14925 = vmatpush3.msk.msra.mxu0 %vm1104_vm7, %v18685_v18  ;;  %14885 = vmatprep.mubr.msk.f32.mxu0 %vm18144_vm0, %v20675_v0  ;;  %v17098_v18 = vunpack.i.h.bf16 %v17096_v35  ;;  %v2224_v35 = vld [vmem:[#allocation11 + $0x8] sm:$0xff] }
 0x608   :  { %14914 = vmatmul.mubr.msk.f32.gmra.mrb[38].mxu1 %vm1088_vm8, %v18808_v2  ;;  %16218 = vmatprep.subr.bf16.mxu0 %v20677_v52 }
 0x609   :  { %14951 = vmatprep.mubr.msk.f32.mxu1 %vm18144_vm0, %v20675_v0  ;;  %v16228_v43 = vpack.c.bf16 %v17098_v18, %v17097_v37  ;;  %v2229_v18 = vld [vmem:[#allocation11 + $0x30] sm:$0xff]  ;;  %v2226_v37 = vld [vmem:[#allocation11 + $0x18] sm:$0xff] }
 0x60a   :  { %14886 = vmatmul.mubr.msk.f32.gmra.mrb[36].mxu0 %vm1088_vm8, %v18816_v15 }
 0x60b   :  { %14888 = vmatprep.mubr.msk.f32.mxu0 %vm18144_vm0, %v20675_v0 }
 0x60c   :  { %14952 = vmatmul.mubr.msk.f32.vlgmr.msra.gmra.mrb[40].mxu1 %vm1088_vm8, %v18823_v36 }
 0x60d   :  { %16226 = vmatpush3.bf16.msra.mxu1 %v16225_v38  ;;  %14954 = vmatprep.mubr.msk.f32.mxu1 %vm18144_vm0, %v20675_v0  ;;  %v16236_v38 = vpack.c.bf16 %v2229_v18, %v2224_v35  ;;  %v2238_v35 = vld [vmem:[#allocation11 + $0x78] sm:$0xff]  ;;  %v2235_v18 = vld [vmem:[#allocation11 + $0x60] sm:$0xff] }
 0x60e   :  { %14889 = vmatmul.mubr.msk.f32.gmra.mrb[38].mxu0 %vm1088_vm8, %v18829_v39  ;;  %16227 = vmatprep.subr.bf16.mxu1 %v20677_v52 }
 0x60f   :  { %14926 = vmatprep.mubr.msk.f32.mxu0 %vm18144_vm0, %v20675_v0 }
 0x610   :  { %14955 = vmatmul.mubr.msk.f32.gmra.mrb[42].mxu1 %vm1088_vm8, %v18837_v42 }
 0x611   :  { %16229 = vmatpush3.bf16.msra.mxu1 %v16228_v43  ;;  %14957 = vmatprep.mubr.msk.f32.mxu1 %vm18144_vm0, %v20675_v0  ;;  %v2228_v43 = vld [vmem:[#allocation11 + $0x28] sm:$0xff] }
 0x612   :  { %14927 = vmatmul.mubr.msk.f32.vlgmr.msra.gmra.mrb[40].mxu0 %vm1088_vm8, %v18844_v44  ;;  %14999 = vmatprep.subr.mxu1 %v20675_v0  ;;  %v16238_v46 = vpack.c.bf16 %v2228_v43, %v2223_v41 }
 0x613   :  { %16220 = vmatpush3.bf16.msra.mxu0 %v16219_v45  ;;  %14929 = vmatprep.mubr.msk.f32.mxu0 %vm18144_vm0, %v20675_v0  ;;  %v16244_v45 = vpack.c.bf16 %v2231_v40, %v2226_v37  ;;  %v16242_v37 = vpack.c.bf16 %v2238_v35, %v2233_v33 }
 0x614   :  { %16221 = vmatprep.subr.bf16.mxu0 %v20677_v52  ;;  %14958 = vmatmul.mubr.msk.f32.gmra.mrb[44].mxu1 %vm1088_vm8, %v18852_v48 }
 0x615   :  { %15000 = vmatpush3.msk.msra.mxu1 %vm1104_vm7, %v1970_v50  ;;  %14960 = vmatprep.mubr.msk.f32.mxu1 %vm18144_vm0, %v20675_v0  ;;  %v2230_v50 = vld [vmem:[#allocation11 + $0x38] sm:$0xff] }
 0x616   :  { %14930 = vmatmul.mubr.msk.f32.gmra.mrb[42].mxu0 %vm1088_vm8, %v18859_v49  ;;  %16237 = vmatprep.subr.bf16.mxu1 %v16236_v38  ;;  %v20746_v38 = vmov 0.0|0.0  }
 0x617   :  { %16223 = vmatpush3.bf16.msra.mxu0 %v16222_v51  ;;  %14932 = vmatprep.mubr.msk.f32.mxu0 %vm18144_vm0, %v20675_v0  ;;  %v16246_v51 = vpack.c.bf16 %v2230_v50, %v2225_v47 }
 0x618   :  { %14974 = vmatprep.subr.mxu0 %v20675_v0  ;;  %14961 = vmatmul.mubr.msk.f32.gmra.mrb[46].mxu1 %vm1088_vm8, %v18867_v53 }
 0x619   :  { %14963 = vmatprep.mubr.msk.f32.mxu1 %vm18144_vm0, %v20675_v0 }
 0x61a   :  { %14933 = vmatmul.mubr.msk.f32.gmra.mrb[44].mxu0 %vm1088_vm8, %v18873_v56 }
 0x61b   :  { %14975 = vmatpush3.msk.msra.mxu0 %vm1104_vm7, %v18791_v34  ;;  %14935 = vmatprep.mubr.msk.f32.mxu0 %vm18144_vm0, %v20675_v0 }
 0x61c   :  { %14964 = vmatmul.mubr.msk.f32.gmra.mrb[48].mxu1 %vm1088_vm8, %v18880_v57  ;;  %16230 = vmatprep.subr.bf16.mxu0 %v20677_v52 }
 0x61d   :  { %15001 = vmatprep.mubr.msk.f32.mxu1 %vm18144_vm0, %v20675_v0 }
 0x61e   :  { %14936 = vmatmul.mubr.msk.f32.gmra.mrb[46].mxu0 %vm1088_vm8, %v18888_v61 }
 0x61f   :  { %14938 = vmatprep.mubr.msk.f32.mxu0 %vm18144_vm0, %v20675_v0 }
 0x620   :  { %15002 = vmatmul.mubr.msk.f32.vlgmr.msra.gmra.mrb[50].mxu1 %vm1088_vm8, %v18895_v62 }
 0x621   :  { %15004 = vmatprep.mubr.msk.f32.mxu1 %vm18144_vm0, %v20675_v0  ;;  %16239 = vmatpush1.bf16.msra.mxu1 %v16238_v46 }
 0x622   :  { %14939 = vmatmul.mubr.msk.f32.gmra.mrb[48].mxu0 %vm1088_vm8, %v18901_v63 }
 0x623   :  { %14976 = vmatprep.mubr.msk.f32.mxu0 %vm18144_vm0, %v20675_v0 }
 0x624   :  { %15005 = vmatmul.mubr.msk.f32.gmra.mrb[52].mxu1 %vm1088_vm8, %v18907_v1 }
 0x625   :  { %15007 = vmatprep.mubr.msk.f32.mxu1 %vm18144_vm0, %v20675_v0 }
 0x626   :  { %14977 = vmatmul.mubr.msk.f32.vlgmr.msra.gmra.mrb[50].mxu0 %vm1088_vm8, %v18913_v3 }
 0x627   :  { %16232 = vmatpush3.bf16.msra.mxu0 %v16231_v59  ;;  %14979 = vmatprep.mubr.msk.f32.mxu0 %vm18144_vm0, %v20675_v0  ;;  %v18959_v59 = vld [vmem:[#allocation7 + $0x108] sm:$0xff] }
 0x628   :  { %16233 = vmatprep.subr.bf16.mxu0 %v20677_v52  ;;  %15008 = vmatmul.mubr.msk.f32.gmra.mrb[54].mxu1 %vm1088_vm8, %v18919_v6  ;;  %20739 = vst [vmem:[#allocation99_spill] sm:$0xff] %v18959_v59  ;;  %v2240_v52 = vld [vmem:[#allocation11 + $0x88] sm:$0xff] }
 0x629   :  { %15010 = vmatprep.mubr.msk.f32.mxu1 %vm18144_vm0, %v20675_v0  ;;  %v16250_v40 = vpack.c.bf16 %v2240_v52, %v2235_v18 }
 0x62a   :  { %14980 = vmatmul.mubr.msk.f32.gmra.mrb[52].mxu0 %vm1088_vm8, %v18928_v7 }
 0x62b   :  { %16235 = vmatpush3.bf16.msra.mxu0 %v16234_v9  ;;  %14982 = vmatprep.mubr.msk.f32.mxu0 %vm18144_vm0, %v20675_v0  ;;  %v18980_v9 = vld [vmem:[#allocation7 + $0x148] sm:$0xff] }
 0x62c   :  { %15024 = vmatprep.subr.mxu0 %v20675_v0  ;;  %15011 = vmatmul.mubr.msk.f32.gmra.mrb[56].mxu1 %vm1088_vm8, %v18935_v11  ;;  %20742 = vst [vmem:[#allocation102_spill] sm:$0xff] %v18980_v9 }
 0x62d   :  { %15013 = vmatprep.mubr.msk.f32.mxu1 %vm18144_vm0, %v20675_v0 }
 0x62e   :  { %14983 = vmatmul.mubr.msk.f32.gmra.mrb[54].mxu0 %vm1088_vm8, %v18944_v54 }
 0x62f   :  { %15025 = vmatpush3.msk.msra.mxu0 %vm1104_vm7, %v18681_v17  ;;  %14985 = vmatprep.mubr.msk.f32.mxu0 %vm18144_vm0, %v20675_v0  ;;  %v18986_v17 = vld [vmem:[#allocation7 + $0x150] sm:$0xff] }
 0x630   :  { %15014 = vmatmul.mubr.msk.f32.gmra.mrb[58].mxu1 %vm1088_vm8, %v18951_v58  ;;  %20743 = vst [vmem:[#allocation103_spill] sm:$0xff] %v18986_v17  ;;  %16245 = vmatprep.subr.bf16.mxu0 %v16244_v45 }
 0x631   :  { %2323 = vmatprep.mubr.f32.mxu1 %v20675_v0 }
 0x632   :  { %14986 = vmatmul.mubr.msk.f32.gmra.mrb[56].mxu0 %vm1088_vm8, %v18959_v59 }
 0x633   :  { %14988 = vmatprep.mubr.msk.f32.mxu0 %vm18144_vm0, %v20675_v0 }
 0x636   :  { %14989 = vmatmul.mubr.msk.f32.gmra.mrb[58].mxu0 %vm1088_vm8, %v18968_v4 }
 0x637   :  { %15026 = vmatprep.mubr.msk.f32.mxu0 %vm18144_vm0, %v20675_v0 }
 0x63a   :  { %15027 = vmatmul.mubr.msk.f32.vlgmr.msra.gmra.mrb[60].mxu0 %vm1088_vm8, %v18974_v8 }
 0x63b   :  { %15029 = vmatprep.mubr.msk.f32.mxu0 %vm18144_vm0, %v20675_v0  ;;  %16247 = vmatpush1.bf16.msra.mxu0 %v16246_v51 }
 0x63e   :  { %15030 = vmatmul.mubr.msk.f32.gmra.mrb[62].mxu0 %vm1088_vm8, %v18980_v9 }
 0x63f   :  { %15032 = vmatprep.mubr.msk.f32.mxu0 %vm18144_vm0, %v20675_v0 }
 0x642   :  { %15033 = vmatmul.mubr.msk.f32.gmra.mrb[64].mxu0 %vm1088_vm8, %v18986_v17 }
 0x643   :  { %15035 = vmatprep.mubr.msk.f32.mxu0 %vm18144_vm0, %v20675_v0 }
 0x646   :  { %15036 = vmatmul.mubr.msk.f32.gmra.mrb[66].mxu0 %vm1088_vm8, %v18992_v13  ;;  %v1280_v14 = vpop.f32.mrb[20].mxu1 }
 0x647   :  { %15038 = vmatprep.mubr.msk.f32.mxu0 %vm18144_vm0, %v20675_v0  ;;  %v14853_v19 = vpop.f32.mrb[21].mxu1 }
 0x648   :  { %v2234_v19 = vld [vmem:[#allocation11 + $0x58] sm:$0xff] }
 0x64a   :  { %15039 = vmatmul.mubr.msk.f32.gmra.mrb[68].mxu0 %vm1088_vm8, %v18998_v16  ;;  %v1285_v20 = vpop.f32.mrb[22].mxu1 }
 0x64b   :  { %v14856_v23 = vpop.f32.mrb[23].mxu1  ;;  %2418 = vmatprep.mubr.f32.mxu0 %v20675_v0 }
 0x64c   :  { %v2239_v23 = vld [vmem:[#allocation11 + $0x80] sm:$0xff] }
 0x64e   :  { %v1290_v25 = vpop.f32.mrb[24].mxu1 }
 0x64f   :  { %v14859_v27 = vpop.f32.mrb[25].mxu1 }
 0x650   :  { %v16240_v27 = vpack.c.bf16 %v2239_v23, %v2234_v19 }
 0x652   :  { %v1295_v34 = vpop.f32.mrb[26].mxu1  ;;  %16241 = vmatprep.subr.bf16.mxu1 %v16240_v27 }
 0x653   :  { %v14862_v60 = vpop.f32.mrb[27].mxu1  ;;  %16243 = vmatpush1.bf16.msra.mxu1 %v16242_v37 }
 0x654   :  { %v2236_v60 = vld [vmem:[#allocation11 + $0x68] sm:$0xff]  ;;  %16252 = vmatprep.subr.bf16.mxu1 %v20746_v38 }
 0x656   :  { %v1300_v5 = vpop.f32.mrb[28].mxu1 }
 0x657   :  { %v14865_v10 = vpop.f32.mrb[29].mxu1 }
 0x658   :  { %v2241_v10 = vld [vmem:[#allocation11 + $0x90] sm:$0xff] }
 0x659   :  { %v16248_v0 = vpack.c.bf16 %v2241_v10, %v2236_v60 }
 0x65b   :  { %16249 = vmatprep.subr.bf16.mxu0 %v16248_v0 }
 0x65c   :  { %16251 = vmatpush1.bf16.msra.mxu0 %v16250_v40 }
 0x65d   :  { %16258 = vmatprep.subr.bf16.mxu0 %v20746_v38 }
 0x6bd   :  { %v1173_v41 = vpop.f32.mrb[20].mxu0 }
 0x6be   :  { %v1281_v43 = vadd.f32 %v1280_v14, %v1173_v41  ;;  %v14828_v45 = vpop.f32.mrb[21].mxu0 }
 0x6c1   :  { %v1178_v46 = vpop.f32.mrb[22].mxu0 }
 0x6c2   :  { %v1286_v47 = vadd.f32 %v1285_v20, %v1178_v46  ;;  %v14831_v50 = vpop.f32.mrb[23].mxu0 }
 0x6c5   :  { %v1183_v51 = vpop.f32.mrb[24].mxu0 }
 0x6c6   :  { %v1291_v19 = vadd.f32 %v1290_v25, %v1183_v51  ;;  %v14834_v23 = vpop.f32.mrb[25].mxu0 }
 0x6c9   :  { %v1188_v60 = vpop.f32.mrb[26].mxu0 }
 0x6ca   :  { %v1296_v27 = vadd.f32 %v1295_v34, %v1188_v60  ;;  %v14837_v33 = vpop.f32.mrb[27].mxu0 }
 0x6cb   :  { %v1539_v52 = vpop.f32.mrb[30].mxu1 }
 0x6cc   :  { %v14903_v0 = vpop.f32.mrb[31].mxu1 }
 0x6cd   :  { %v1193_v10 = vpop.f32.mrb[28].mxu0 }
 0x6ce   :  { %v1301_v35 = vadd.f32 %v1300_v5, %v1193_v10  ;;  %v14840_v18 = vpop.f32.mrb[29].mxu0 }
 0x6cf   :  { %v1544_v37 = vpop.f32.mrb[32].mxu1 }
 0x6d0   :  { %v14906_v40 = vpop.f32.mrb[33].mxu1 }
 0x6d1   :  { %v1407_v29 = vpop.f32.mrb[30].mxu0 }
 0x6d2   :  { %v1431_v30 = vadd.f32 %v1407_v29, %v1281_v43  ;;  %v14878_v14 = vpop.f32.mrb[31].mxu0 }
 0x6d3   :  { %v1549_v41 = vpop.f32.mrb[34].mxu1 }
 0x6d4   :  { %v1563_v45 = vadd.f32 %v1539_v52, %v1431_v30  ;;  %v14909_v20 = vpop.f32.mrb[35].mxu1 }
 0x6d5   :  { %v1412_v46 = vpop.f32.mrb[32].mxu0 }
 0x6d6   :  { %v1432_v50 = vadd.f32 %v1412_v46, %v1286_v47  ;;  %v14881_v25 = vpop.f32.mrb[33].mxu0 }
 0x6d7   :  { %v1554_v51 = vpop.f32.mrb[36].mxu1 }
 0x6d8   :  { %v1564_v23 = vadd.f32 %v1544_v37, %v1432_v50  ;;  %v14912_v34 = vpop.f32.mrb[37].mxu1 }
 0x6d9   :  { %v1417_v60 = vpop.f32.mrb[34].mxu0 }
 0x6da   :  { %v1433_v33 = vadd.f32 %v1417_v60, %v1291_v19  ;;  %v14884_v0 = vpop.f32.mrb[35].mxu0 }
 0x6db   :  { %v1559_v32 = vpop.f32.mrb[38].mxu1 }
 0x6dc   :  { %v1565_v5 = vadd.f32 %v1549_v41, %v1433_v33  ;;  %v14915_v10 = vpop.f32.mrb[39].mxu1 }
 0x6dd   :  { %v1422_v18 = vpop.f32.mrb[36].mxu0 }
 0x6de   :  { %v1434_v40 = vadd.f32 %v1422_v18, %v1296_v27  ;;  %v14887_v16 = vpop.f32.mrb[37].mxu0 }
 0x6df   :  { %v1794_v29 = vpop.f32.mrb[40].mxu1 }
 0x6e0   :  { %v1566_v43 = vadd.f32 %v1554_v51, %v1434_v40  ;;  %v14953_v14 = vpop.f32.mrb[41].mxu1 }
 0x6e1   :  { %v1427_v30 = vpop.f32.mrb[38].mxu0 }
 0x6e2   :  { %v1435_v52 = vadd.f32 %v1427_v30, %v1301_v35  ;;  %v14890_v20 = vpop.f32.mrb[39].mxu0 }
 0x6e3   :  { %v1799_v47 = vpop.f32.mrb[42].mxu1 }
 0x6e4   :  { %v1567_v46 = vadd.f32 %v1559_v32, %v1435_v52  ;;  %v14956_v25 = vpop.f32.mrb[43].mxu1 }
 0x6e5   :  { %v1658_v37 = vpop.f32.mrb[40].mxu0 }
 0x6e6   :  { %v1682_v50 = vadd.f32 %v1658_v37, %v1563_v45  ;;  %v14928_v34 = vpop.f32.mrb[41].mxu0 }
 0x6e7   :  { %v1804_v19 = vpop.f32.mrb[44].mxu1 }
 0x6e8   :  { %v1818_v60 = vadd.f32 %v1794_v29, %v1682_v50  ;;  %v14959_v0 = vpop.f32.mrb[45].mxu1 }
 0x6e9   :  { %v1663_v41 = vpop.f32.mrb[42].mxu0 }
 0x6ea   :  { %v1683_v33 = vadd.f32 %v1663_v41, %v1564_v23  ;;  %v14931_v10 = vpop.f32.mrb[43].mxu0 }
 0x6eb   :  { %v1809_v27 = vpop.f32.mrb[46].mxu1 }
 0x6ec   :  { %v1819_v16 = vadd.f32 %v1799_v47, %v1683_v33  ;;  %v14962_v18 = vpop.f32.mrb[47].mxu1 }
 0x6ed   :  { %v1668_v51 = vpop.f32.mrb[44].mxu0 }
 0x6ee   :  { %v1684_v40 = vadd.f32 %v1668_v51, %v1565_v5  ;;  %v14934_v14 = vpop.f32.mrb[45].mxu0 }
 0x6ef   :  { %v1814_v35 = vpop.f32.mrb[48].mxu1 }
 0x6f0   :  { %v1820_v30 = vadd.f32 %v1804_v19, %v1684_v40  ;;  %v14965_v20 = vpop.f32.mrb[49].mxu1 }
 0x6f1   :  { %v1673_v32 = vpop.f32.mrb[46].mxu0 }
 0x6f2   :  { %v1685_v52 = vadd.f32 %v1673_v32, %v1566_v43  ;;  %v14937_v25 = vpop.f32.mrb[47].mxu0 }
 0x6f3   :  { %v2058_v45 = vpop.f32.mrb[50].mxu1 }
 0x6f4   :  { %v1821_v37 = vadd.f32 %v1809_v27, %v1685_v52  ;;  %v15003_v34 = vpop.f32.mrb[51].mxu1 }
 0x6f5   :  { %v1678_v29 = vpop.f32.mrb[48].mxu0 }
 0x6f6   :  { %v1686_v50 = vadd.f32 %v1678_v29, %v1567_v46  ;;  %v14940_v0 = vpop.f32.mrb[49].mxu0 }
 0x6f7   :  { %v2063_v23 = vpop.f32.mrb[52].mxu1 }
 0x6f8   :  { %v1822_v41 = vadd.f32 %v1814_v35, %v1686_v50  ;;  %v15006_v10 = vpop.f32.mrb[53].mxu1 }
 0x6f9   :  { %v1926_v47 = vpop.f32.mrb[50].mxu0 }
 0x6fa   :  { %v1950_v33 = vadd.f32 %v1926_v47, %v1818_v60  ;;  %v14978_v18 = vpop.f32.mrb[51].mxu0 }
 0x6fb   :  { %v2068_v5 = vpop.f32.mrb[54].mxu1 }
 0x6fc   :  { %v2082_v51 = vadd.f32 %v2058_v45, %v1950_v33  ;;  %v15009_v14 = vpop.f32.mrb[55].mxu1 }
 0x6fd   :  { %v1931_v19 = vpop.f32.mrb[52].mxu0 }
 0x6fe   :  { %v1951_v40 = vadd.f32 %v1931_v19, %v1819_v16  ;;  %v14981_v20 = vpop.f32.mrb[53].mxu0  ;;  %v13772_v16 = vld [vmem:[#allocation10] ss:$0 sm:$0xff] }
 0x6ff   :  { %v2073_v43 = vpop.f32.mrb[56].mxu1 }
 0x700   :  { %v2083_v32 = vadd.f32 %v2063_v23, %v1951_v40  ;;  %v15012_v25 = vpop.f32.mrb[57].mxu1  ;;  %v2227_v23 = vld [vmem:[#allocation11 + $0x20] sm:$0xff]  ;;  %v2232_v40 = vld [vmem:[#allocation11 + $0x48] sm:$0xff] }
 0x701   :  { %v1936_v27 = vpop.f32.mrb[54].mxu0 }
 0x702   :  { %v1952_v52 = vadd.f32 %v1936_v27, %v1820_v30  ;;  %v14984_v34 = vpop.f32.mrb[55].mxu0 }
 0x703   :  { %v2078_v46 = vpop.f32.mrb[58].mxu1  ;;  %v16253_v34 = vpack.c.bf16 %v2232_v40, %v2227_v23 }
 0x704   :  { %v2084_v29 = vadd.f32 %v2068_v5, %v1952_v52  ;;  %v15015_v0 = vpop.f32.mrb[59].mxu1 }
 0x705   :  { %v1941_v35 = vpop.f32.mrb[56].mxu0  ;;  %v2242_v0 = vld [vmem:[#allocation11 + $0x98] sm:$0xff] }
 0x706   :  { %v1953_v50 = vadd.f32 %v1941_v35, %v1821_v37  ;;  %v14987_v10 = vpop.f32.mrb[57].mxu0  ;;  %v2237_v37 = vld [vmem:[#allocation11 + $0x70] sm:$0xff] }
 0x707   :  { %v16256_v10 = vpack.c.bf16 %v2242_v0, %v2237_v37 }
 0x708   :  { %v2085_v60 = vadd.f32 %v2073_v43, %v1953_v50 }
 0x709   :  { %v1946_v47 = vpop.f32.mrb[58].mxu0 }
 0x70a   :  { %v1954_v18 = vadd.f32 %v1946_v47, %v1822_v41  ;;  %v14990_v45 = vpop.f32.mrb[59].mxu0 }
 0x70c   :  { %v2086_v33 = vadd.f32 %v2078_v46, %v1954_v18  ;;  %v20747_v46 = vmov 0.0  }
 0x70d   :  { %v2177_v14 = vpop.f32.mrb[60].mxu0 }
 0x70e   :  { %v2201_v19 = vadd.f32 %v2177_v14, %v2082_v51  ;;  %v15028_v20 = vpop.f32.mrb[61].mxu0 }
 0x710   :  { %v2213_v25 = vadd.f32 %v13772_v16, %v2201_v19 }
 0x711   :  { %v2182_v30 = vpop.f32.mrb[62].mxu0 }
 0x712   :  { %v2218_v27 = vmax.f32 %v2213_v25, 0.0  ;;  %v2202_v5 = vadd.f32 %v2182_v30, %v2083_v32  ;;  %v15031_v52 = vpop.f32.mrb[63].mxu0 }
 0x714   :  { %v2214_v43 = vadd.f32 %v13772_v16, %v2202_v5  ;;  %13773 = vmatmul.mubr.msk.f32.vlgmr.msra.gmra.mrb[60].mxu1 %vm2243_vm9, %v2218_v27  ;;  %13778 = vmatmul.mubr.msk.f32.vlgmr.msra.gmra.mrb[70].mxu0 %vm2243_vm9, %v2218_v27 }
 0x715   :  { %v2187_v41 = vpop.f32.mrb[64].mxu0  ;;  %2329 = vmatprep.mubr.f32.mxu1 %v20747_v46  ;;  %2424 = vmatprep.mubr.f32.mxu0 %v20747_v46 }
 0x716   :  { %v2219_v51 = vmax.f32 %v2214_v43, 0.0  ;;  %v2203_v35 = vadd.f32 %v2187_v41, %v2084_v29  ;;  %v15034_v50 = vpop.f32.mrb[65].mxu0  ;;  %16254 = vmatpush3.bf16.msra.mxu1 %v16253_v34 }
 0x717   :  { %16255 = vmatprep.subr.bf16.mxu1 %v20746_v38 }
 0x718   :  { %v2215_v32 = vadd.f32 %v13772_v16, %v2203_v35  ;;  %13774 = vmatmul.mubr.msk.f32.gmra.mrb[62].mxu1 %vm2243_vm9, %v2219_v51  ;;  %13779 = vmatmul.mubr.msk.f32.gmra.mrb[72].mxu0 %vm2243_vm9, %v2219_v51 }
 0x719   :  { %v2192_v47 = vpop.f32.mrb[66].mxu0  ;;  %2335 = vmatprep.mubr.f32.mxu1 %v20747_v46  ;;  %2430 = vmatprep.mubr.f32.mxu0 %v20747_v46 }
 0x71a   :  { %v2220_v18 = vmax.f32 %v2215_v32, 0.0  ;;  %v2204_v45 = vadd.f32 %v2192_v47, %v2085_v60  ;;  %v15037_v14 = vpop.f32.mrb[67].mxu0  ;;  %16257 = vmatpush3.bf16.msra.mxu1 %v16256_v10 }
 0x71b   :  { %16264 = vmatprep.subr.bf16.mxu1 %v20746_v38 }
 0x71c   :  { %v2216_v29 = vadd.f32 %v13772_v16, %v2204_v45  ;;  %13775 = vmatmul.mubr.msk.f32.gmra.mrb[64].mxu1 %vm2243_vm9, %v2220_v18  ;;  %13780 = vmatmul.mubr.msk.f32.gmra.mrb[74].mxu0 %vm2243_vm9, %v2220_v18 }
 0x71d   :  { %v2197_v19 = vpop.f32.mrb[68].mxu0  ;;  %2341 = vmatprep.mubr.f32.mxu1 %v20747_v46  ;;  %2436 = vmatprep.mubr.f32.mxu0 %v20747_v46 }
 0x71e   :  { %v2221_v20 = vmax.f32 %v2216_v29, 0.0  ;;  %v2205_v23 = vadd.f32 %v2197_v19, %v2086_v33  ;;  %v15040_v40 = vpop.f32.mrb[69].mxu0 }
 0x720   :  { %v2217_v25 = vadd.f32 %v13772_v16, %v2205_v23  ;;  %13776 = vmatmul.mubr.msk.f32.gmra.mrb[66].mxu1 %vm2243_vm9, %v2221_v20  ;;  %13781 = vmatmul.mubr.msk.f32.gmra.mrb[76].mxu0 %vm2243_vm9, %v2221_v20 }
 0x721   :  { %2347 = vmatprep.mubr.f32.mxu1 %v20747_v46  ;;  %2442 = vmatprep.mubr.f32.mxu0 %v20747_v46 }
 0x722   :  { %v2222_v60 = vmax.f32 %v2217_v25, 0.0 }
 0x724   :  { %13777 = vmatmul.mubr.msk.f32.gmra.mrb[68].mxu1 %vm2243_vm9, %v2222_v60  ;;  %13782 = vmatmul.mubr.msk.f32.gmra.mrb[78].mxu0 %vm2243_vm9, %v2222_v60 }
 0x725   :  { %15049 = vmatprep.mubr.msk.f32.mxu1 %vm18144_vm0, %v20747_v46  ;;  %15074 = vmatprep.mubr.msk.f32.mxu0 %vm18144_vm0, %v20747_v46 }
 0x728   :  { %15050 = vmatmul.mubr.msk.f32.vlgmr.msra.gmra.mrb[70].mxu1 %vm2243_vm9, %v2218_v27 }
 0x729   :  { %15052 = vmatprep.mubr.msk.f32.mxu1 %vm18144_vm0, %v20747_v46 }
 0x72c   :  { %15053 = vmatmul.mubr.msk.f32.gmra.mrb[72].mxu1 %vm2243_vm9, %v2219_v51 }
 0x72d   :  { %15055 = vmatprep.mubr.msk.f32.mxu1 %vm18144_vm0, %v20747_v46 }
 0x730   :  { %15056 = vmatmul.mubr.msk.f32.gmra.mrb[74].mxu1 %vm2243_vm9, %v2220_v18 }
 0x731   :  { %15058 = vmatprep.mubr.msk.f32.mxu1 %vm18144_vm0, %v20747_v46 }
 0x734   :  { %15059 = vmatmul.mubr.msk.f32.gmra.mrb[76].mxu1 %vm2243_vm9, %v2221_v20 }
 0x735   :  { %15061 = vmatprep.mubr.msk.f32.mxu1 %vm18144_vm0, %v20747_v46 }
 0x738   :  { %15062 = vmatmul.mubr.msk.f32.gmra.mrb[78].mxu1 %vm2243_vm9, %v2222_v60 }
 0x739   :  { %15099 = vmatprep.mubr.msk.f32.mxu1 %vm18144_vm0, %v20747_v46 }
 0x7e7   :  { %v2325_v33 = vpop.f32.mrb[60].mxu1  ;;  %v19044_v16 = vpop.f32.mrb[70].mxu0 }
 0x7e8   :  { %v19046_v30 = vpop.f32.mrb[61].mxu1  ;;  %v19048_v27 = vpop.f32.mrb[71].mxu0 }
 0x7eb   :  { %v2331_v5 = vpop.f32.mrb[62].mxu1  ;;  %v19050_v52 = vpop.f32.mrb[72].mxu0 }
 0x7ec   :  { %v16265_v34 = vpack.c.bf16 %v2331_v5, %v2325_v33  ;;  %v19054_v0 = vpop.f32.mrb[63].mxu1  ;;  %v19056_v43 = vpop.f32.mrb[73].mxu0  ;;  %v17099_v41 = vpack.i.bf16 %v2331_v5, %v2325_v33  ;;  %v17119_v51 = vpack.i.bf16 %v19050_v52, %v19044_v16  ;;  %v17213_v5 = vld [vmem:[#allocation7] sm:$0xff] }
 0x7ed   :  { %v17109_v10 = vpack.i.bf16 %v19054_v0, %v19046_v30  ;;  %v17129_v32 = vpack.i.bf16 %v19056_v43, %v19048_v27 }
 0x7ee   :  { %17100 = vrot.lane.b32.xlu0 %v17099_v41, %s18117_s12  ;;  %16266 = vmatpush3.bf16.msra.mxu1 %v16265_v34 }
 0x7ef   :  { %v2337_v47 = vpop.f32.mrb[64].mxu1  ;;  %v19069_v18 = vpop.f32.mrb[74].mxu0  ;;  %16267 = vmatprep.subr.bf16.mxu1 %v20746_v38 }
 0x7f0   :  { %v19072_v45 = vpop.f32.mrb[65].mxu1  ;;  %v19074_v14 = vpop.f32.mrb[75].mxu0 }
 0x7f3   :  { %v2343_v29 = vpop.f32.mrb[66].mxu1  ;;  %v19076_v19 = vpop.f32.mrb[76].mxu0 }
 0x7f4   :  { %v16268_v20 = vpack.c.bf16 %v2343_v29, %v2337_v47  ;;  %v19080_v40 = vpop.f32.mrb[67].mxu1  ;;  %v19082_v25 = vpop.f32.mrb[77].mxu0  ;;  %v17104_v60 = vpack.i.bf16 %v2343_v29, %v2337_v47  ;;  %v17124_v33 = vpack.i.bf16 %v19076_v19, %v19069_v18 }
 0x7f5   :  { %v17114_v41 = vpack.i.bf16 %v19080_v40, %v19072_v45  ;;  %v17134_v50 = vpack.i.bf16 %v19082_v25, %v19074_v14 }
 0x7f6   :  { %17105 = vrot.lane.b32.xlu1 %v17104_v60, %s18117_s12  ;;  %16269 = vmatpush3.bf16.msra.mxu1 %v16268_v20 }
 0x7f7   :  { %v2349_v23 = vpop.f32.mrb[68].mxu1  ;;  %v19095_v47 = vpop.f32.mrb[78].mxu0  ;;  %15097 = vmatprep.subr.mxu1 %v20747_v46 }
 0x7f8   :  { %2552 = vrot.lane.b32.xlu0 %v2349_v23, %s18117_s12  ;;  %v19099_v29 = vpop.f32.mrb[69].mxu1  ;;  %v19101_v37 = vpop.f32.mrb[79].mxu0 }
 0x7fa   :  { %17110 = vrot.lane.b32.xlu1 %v17109_v10, %s18117_s12  ;;  %15098 = vmatpush3.msk.msra.mxu1 %vm1104_vm7, %v2349_v23  ;;  %v17214_v10 = vld [vmem:[#allocation7 + $0x8] sm:$0xff] }
 0x7fb   :  { %v19105_v34 = vpop.f32.mrb[70].mxu1  ;;  %15100 = vmatmul.mubr.msk.f32.vlgmr.msra.gmra.mrb[80].mxu1 %vm1088_vm8, %v17213_v5  ;;  %16276 = vmatprep.subr.bf16.mxu1 %v20746_v38 }
 0x7fc   :  { %17115 = vrot.lane.b32.xlu0 %v17114_v41, %s18117_s12  ;;  %v15051_v20 = vpop.f32.mrb[71].mxu1  ;;  %15102 = vmatprep.mubr.msk.f32.mxu1 %vm18144_vm0, %v20747_v46 }
 0x7fd   :  { %v17215_v20 = vld [vmem:[#allocation7 + $0x10] sm:$0xff] }
 0x7fe   :  { %2852 = vrot.lane.b32.xlu1 %v19099_v29, %s18117_s12 }
 0x7ff   :  { %v19114_v60 = vpop.f32.mrb[72].mxu1  ;;  %15103 = vmatmul.mubr.msk.f32.gmra.mrb[82].mxu1 %vm1088_vm8, %v17214_v10  ;;  %v17216_v10 = vld [vmem:[#allocation7 + $0x18] sm:$0xff] }
 0x800   :  { %v15054_v5 = vpop.f32.mrb[73].mxu1  ;;  %17120 = vrot.lane.b32.xlu0 %v17119_v51, %s18117_s12  ;;  %15105 = vmatprep.mubr.msk.f32.mxu1 %vm18144_vm0, %v20747_v46 }
 0x802   :  { %17125 = vrot.lane.b32.xlu1 %v17124_v33, %s18117_s12 }
 0x803   :  { %v19123_v41 = vpop.f32.mrb[74].mxu1  ;;  %15106 = vmatmul.mubr.msk.f32.gmra.mrb[84].mxu1 %vm1088_vm8, %v17215_v20 }
 0x804   :  { %20748 = vst [vmem:[#allocation106_spill] sm:$0xff] %v19123_v41  ;;  %v15057_v35 = vpop.f32.mrb[75].mxu1  ;;  %3065 = vrot.lane.b32.xlu0 %v19095_v47, %s18117_s12  ;;  %15108 = vmatprep.mubr.msk.f32.mxu1 %vm18144_vm0, %v20747_v46 }
 0x806   :  { %17130 = vrot.lane.b32.xlu1 %v17129_v32, %s18117_s12  ;;  %v17217_v32 = vld [vmem:[#allocation7 + $0x20] sm:$0xf] }
 0x807   :  { %v19131_v51 = vpop.f32.mrb[76].mxu1  ;;  %15109 = vmatmul.mubr.msk.f32.gmra.mrb[86].mxu1 %vm1088_vm8, %v17216_v10 }
 0x808   :  { %v15060_v5 = vpop.f32.mrb[77].mxu1  ;;  %17135 = vrot.lane.b32.xlu0 %v17134_v50, %s18117_s12  ;;  %15111 = vmatprep.mubr.msk.f32.mxu1 %vm18144_vm0, %v20747_v46 }
 0x80a   :  { %3278 = vrot.lane.b32.xlu1 %v19101_v37, %s18117_s12  ;;  %s18151_s12 = smov 3  }
 0x80b   :  { %v19141_v35 = vpop.f32.mrb[78].mxu1  ;;  %15112 = vmatmul.mubr.msk.f32.gmra.mrb[88].mxu1 %vm1088_vm8, %v17217_v32 }
 0x80c   :  { %20749 = vst [vmem:[#allocation107_spill] sm:$0xff] %v19141_v35  ;;  %v15063_v20 = vpop.f32.mrb[79].mxu1  ;;  %15149 = vmatprep.mubr.msk.f32.mxu1 %vm18144_vm0, %v20747_v46 }
 0x860   :  { %v17101_v10 = vpop.permute.xlu0 %17100 }
 0x861   :  { %v17103_v33 = vunpack.i.h.bf16 %v17101_v10  ;;  %v17102_v5 = vunpack.i.l.bf16 %v17101_v10 }
 0x863   :  { %v16259_v23 = vpack.c.bf16 %v17103_v33, %v17102_v5 }
 0x865   :  { %16260 = vmatpush3.bf16.msra.mxu0 %v16259_v23  ;;  %v17218_v23 = vld [vmem:[#allocation7 + $0x28] sm:$0xff] }
 0x866   :  { %16261 = vmatprep.subr.bf16.mxu0 %v20746_v38 }
 0x868   :  { %v17106_v50 = vpop.permute.xlu1 %17105 }
 0x869   :  { %v17108_v13 = vunpack.i.h.bf16 %v17106_v50  ;;  %v17107_v17 = vunpack.i.l.bf16 %v17106_v50 }
 0x86a   :  { %v2553_v9 = vpop.permute.xlu0 %2552 }
 0x86b   :  { %v16262_v8 = vpack.c.bf16 %v17108_v13, %v17107_v17 }
 0x86c   :  { %v17111_v4 = vpop.permute.xlu1 %17110 }
 0x86d   :  { %v17113_v59 = vunpack.i.h.bf16 %v17111_v4  ;;  %v17112_v35 = vunpack.i.l.bf16 %v17111_v4  ;;  %16263 = vmatpush3.bf16.msra.mxu0 %v16262_v8  ;;  %v20750_v4 = vpack.c.bf16 %v19054_v0, %v19046_v30  ;;  %v20751_v30 = vpack.c.bf16 %v19080_v40, %v19072_v45  ;;  %v17221_v40 = vld [vmem:[#allocation7 + $0x40] sm:$0xff] }
 0x86e   :  { %v17116_v32 = vpop.permute.xlu0 %17115  ;;  %15072 = vmatprep.subr.mxu0 %v20747_v46 }
 0x86f   :  { %v16277_v20 = vpack.c.bf16 %v17113_v59, %v17112_v35  ;;  %v17118_v54 = vunpack.i.h.bf16 %v17116_v32  ;;  %v17117_v41 = vunpack.i.l.bf16 %v17116_v32  ;;  %v17220_v35 = vld [vmem:[#allocation7 + $0x38] sm:$0xff] }
 0x870   :  { %v2853_v10 = vpop.permute.xlu1 %2852 }
 0x871   :  { %15073 = vmatpush3.msk.msra.mxu0 %vm1104_vm7, %v2553_v9  ;;  %16278 = vmatpush3.bf16.msra.mxu1 %v16277_v20  ;;  %v16280_v17 = vpack.c.bf16 %v17118_v54, %v17117_v41  ;;  %v17219_v9 = vld [vmem:[#allocation7 + $0x30] sm:$0xff]  ;;  %v3498_v20 = vld [vmem:[#allocation14 + $0x10] sm:$0xff] }
 0x872   :  { %15075 = vmatmul.mubr.msk.f32.vlgmr.msra.gmra.mrb[80].mxu0 %vm1088_vm8, %v17218_v23  ;;  %16270 = vmatprep.subr.bf16.mxu0 %v20746_v38  ;;  %v17121_v13 = vpop.permute.xlu0 %17120 }
 0x873   :  { %16272 = vmatpush3.bf16.msra.mxu0 %v20750_v4  ;;  %16279 = vmatprep.subr.bf16.mxu1 %v20746_v38  ;;  %v17123_v59 = vunpack.i.h.bf16 %v17121_v13  ;;  %v17122_v8 = vunpack.i.l.bf16 %v17121_v13  ;;  %v3524_v13 = vld [vmem:[#allocation14 + $0xe0] sm:$0xff]  ;;  %v3517_v4 = vld [vmem:[#allocation14 + $0xa8] sm:$0xff] }
 0x874   :  { %15077 = vmatprep.mubr.msk.f32.mxu0 %vm18144_vm0, %v20747_v46  ;;  %16273 = vmatprep.subr.bf16.mxu0 %v20746_v38  ;;  %v17126_v54 = vpop.permute.xlu1 %17125 }
 0x875   :  { %16281 = vmatpush3.bf16.msra.mxu1 %v16280_v17  ;;  %v16289_v0 = vpack.c.bf16 %v17123_v59, %v17122_v8  ;;  %v17128_v41 = vunpack.i.h.bf16 %v17126_v54  ;;  %v17127_v33 = vunpack.i.l.bf16 %v17126_v54  ;;  %v3515_v17 = vld [vmem:[#allocation14 + $0x98] sm:$0xff]  ;;  %v3526_v8 = vld [vmem:[#allocation14 + $0xf0] sm:$0xff] }
 0x876   :  { %15078 = vmatmul.mubr.msk.f32.gmra.mrb[82].mxu0 %vm1088_vm8, %v17219_v9  ;;  %15147 = vmatprep.subr.mxu1 %v20747_v46  ;;  %v16316_v59 = vpack.c.bf16 %v3524_v13, %v3515_v17  ;;  %v3514_v9 = vld [vmem:[#allocation14 + $0x90] sm:$0xff]  ;;  %v3523_v54 = vld [vmem:[#allocation14 + $0xd8] sm:$0xff] }
 0x877   :  { %16275 = vmatpush3.bf16.msra.mxu0 %v20751_v30  ;;  %15080 = vmatprep.mubr.msk.f32.mxu0 %vm18144_vm0, %v20747_v46  ;;  %v16292_v45 = vpack.c.bf16 %v17128_v41, %v17127_v33  ;;  %v16332_v30 = vpack.c.bf16 %v3526_v8, %v3517_v4  ;;  %v3516_v41 = vld [vmem:[#allocation14 + $0xa0] sm:$0xff]  ;;  %v3525_v33 = vld [vmem:[#allocation14 + $0xe8] sm:$0xff] }
 0x878   :  { %15122 = vmatprep.subr.mxu0 %v20747_v46 }
 0x879   :  { %15148 = vmatpush3.msk.msra.mxu1 %vm1104_vm7, %v2853_v10  ;;  %v3507_v10 = vld [vmem:[#allocation14 + $0x58] sm:$0xff] }
 0x87a   :  { %15081 = vmatmul.mubr.msk.f32.gmra.mrb[84].mxu0 %vm1088_vm8, %v17220_v35  ;;  %15150 = vmatmul.mubr.msk.f32.vlgmr.msra.gmra.mrb[90].mxu1 %vm1088_vm8, %v18740_v12  ;;  %v3066_v12 = vpop.permute.xlu0 %3065  ;;  %v16330_v23 = vpack.c.bf16 %v3507_v10, %v3498_v20  ;;  %v16334_v35 = vpack.c.bf16 %v3525_v33, %v3516_v41 }
 0x87b   :  { %16288 = vmatprep.subr.bf16.mxu1 %v20746_v38  ;;  %15123 = vmatpush3.msk.msra.mxu0 %vm1104_vm7, %v19099_v29 }
 0x87c   :  { %16290 = vmatpush3.bf16.msra.mxu1 %v16289_v0  ;;  %15083 = vmatprep.mubr.msk.f32.mxu0 %vm18144_vm0, %v20747_v46  ;;  %v16318_v0 = vpack.c.bf16 %v3523_v54, %v3514_v9 }
 0x87d   :  { %15152 = vmatprep.mubr.msk.f32.mxu1 %vm18144_vm0, %v20747_v46  ;;  %16291 = vmatprep.subr.bf16.mxu1 %v20746_v38 }
 0x87e   :  { %15084 = vmatmul.mubr.msk.f32.gmra.mrb[86].mxu0 %vm1088_vm8, %v17221_v40  ;;  %15153 = vmatmul.mubr.msk.f32.gmra.mrb[92].mxu1 %vm1088_vm8, %v18756_v22  ;;  %v17131_v22 = vpop.permute.xlu1 %17130  ;;  %v17136_v5 = vpop.permute.xlu0 %17135  ;;  %v3542_v40 = vld [vmem:[#allocation14 + $0x170] sm:$0xff] }
 0x87f   :  { %15086 = vmatprep.mubr.msk.f32.mxu0 %vm18144_vm0, %v20747_v46  ;;  %15155 = vmatprep.mubr.msk.f32.mxu1 %vm18144_vm0, %v20747_v46  ;;  %v17132_v29 = vunpack.i.l.bf16 %v17131_v22 }
 0x880   :  { %16293 = vmatpush3.bf16.msra.mxu1 %v16292_v45  ;;  %16282 = vmatprep.subr.bf16.mxu0 %v20746_v38  ;;  %v3533_v45 = vld [vmem:[#allocation14 + $0x128] sm:$0xff] }
 0x881   :  { %15197 = vmatprep.subr.mxu1 %v20747_v46 }
 0x882   :  { %15087 = vmatmul.mubr.msk.f32.gmra.mrb[88].mxu0 %vm1088_vm8, %v18749_v21  ;;  %15156 = vmatmul.mubr.msk.f32.gmra.mrb[94].mxu1 %vm1088_vm8, %v18771_v26  ;;  %v20752_v21 = vpack.c.bf16 %v19050_v52, %v19044_v16  ;;  %v17133_v26 = vunpack.i.h.bf16 %v17131_v22  ;;  %v17138_v16 = vunpack.i.h.bf16 %v17136_v5  ;;  %v17137_v52 = vunpack.i.l.bf16 %v17136_v5 }
 0x883   :  { %15124 = vmatprep.mubr.msk.f32.mxu0 %vm18144_vm0, %v20747_v46  ;;  %15158 = vmatprep.mubr.msk.f32.mxu1 %vm18144_vm0, %v20747_v46  ;;  %v16320_v22 = vpack.c.bf16 %v3542_v40, %v3533_v45 }
 0x884   :  { %15198 = vmatpush3.msk.msra.mxu1 %vm1104_vm7, %v3066_v12  ;;  %v3535_v12 = vld [vmem:[#allocation14 + $0x138] sm:$0xff] }
 0x885   :  { %16300 = vmatprep.subr.bf16.mxu1 %v20746_v38 }
 0x886   :  { %15125 = vmatmul.mubr.msk.f32.vlgmr.msra.gmra.mrb[90].mxu0 %vm1088_vm8, %v18763_v24  ;;  %15159 = vmatmul.mubr.msk.f32.gmra.mrb[96].mxu1 %vm1088_vm8, %v18789_v31  ;;  %v20753_v24 = vpack.c.bf16 %v19076_v19, %v19069_v18  ;;  %v16301_v31 = vpack.c.bf16 %v17133_v26, %v17132_v29  ;;  %v3506_v19 = vld [vmem:[#allocation14 + $0x50] sm:$0xff]  ;;  %v3532_v26 = vld [vmem:[#allocation14 + $0x120] sm:$0xff]  ;;  %v3541_v29 = vld [vmem:[#allocation14 + $0x168] sm:$0xff] }
 0x887   :  { %16284 = vmatpush3.bf16.msra.mxu0 %v20752_v21  ;;  %15127 = vmatprep.mubr.msk.f32.mxu0 %vm18144_vm0, %v20747_v46  ;;  %v3544_v21 = vld [vmem:[#allocation14 + $0x180] sm:$0xff] }
 0x888   :  { %15161 = vmatprep.mubr.msk.f32.mxu1 %vm18144_vm0, %v20747_v46  ;;  %16285 = vmatprep.subr.bf16.mxu0 %v20746_v38  ;;  %v16336_v5 = vpack.c.bf16 %v3544_v21, %v3535_v12 }
 0x88a   :  { %15128 = vmatmul.mubr.msk.f32.gmra.mrb[92].mxu0 %vm1088_vm8, %v18781_v28  ;;  %15162 = vmatmul.mubr.msk.f32.gmra.mrb[98].mxu1 %vm1088_vm8, %v18808_v2  ;;  %v16304_v28 = vpack.c.bf16 %v17138_v16, %v17137_v52  ;;  %v20754_v2 = vpack.c.bf16 %v19056_v43, %v19048_v27  ;;  %v3543_v16 = vld [vmem:[#allocation14 + $0x178] sm:$0xff] }
 0x88b   :  { %16287 = vmatpush3.bf16.msra.mxu0 %v20753_v24  ;;  %15130 = vmatprep.mubr.msk.f32.mxu0 %vm18144_vm0, %v20747_v46  ;;  %v16322_v24 = vpack.c.bf16 %v3541_v29, %v3532_v26 }
 0x88c   :  { %15172 = vmatprep.subr.mxu0 %v20747_v46  ;;  %15199 = vmatprep.mubr.msk.f32.mxu1 %vm18144_vm0, %v20747_v46 }
 0x88e   :  { %15131 = vmatmul.mubr.msk.f32.gmra.mrb[94].mxu0 %vm1088_vm8, %v18801_v55  ;;  %15200 = vmatmul.mubr.msk.f32.vlgmr.msra.gmra.mrb[100].mxu1 %vm1088_vm8, %v18823_v36  ;;  %v3279_v55 = vpop.permute.xlu1 %3278  ;;  %v20756_v36 = vpack.c.bf16 %v19114_v60, %v19105_v34  ;;  %v3496_v60 = vld [vmem:[#allocation14] sm:$0xff] }
 0x88f   :  { %15173 = vmatpush3.msk.msra.mxu0 %vm1104_vm7, %v19095_v47  ;;  %16302 = vmatpush3.bf16.msra.mxu1 %v16301_v31  ;;  %v3508_v47 = vld [vmem:[#allocation14 + $0x60] sm:$0xff]  ;;  %v3534_v31 = vld [vmem:[#allocation14 + $0x130] sm:$0xff] }
 0x890   :  { %15133 = vmatprep.mubr.msk.f32.mxu0 %vm18144_vm0, %v20747_v46  ;;  %16303 = vmatprep.subr.bf16.mxu1 %v20746_v38  ;;  %v16338_v52 = vpack.c.bf16 %v3543_v16, %v3534_v31 }
 0x891   :  { %16294 = vmatprep.subr.bf16.mxu0 %v20746_v38  ;;  %15202 = vmatprep.mubr.msk.f32.mxu1 %vm18144_vm0, %v20747_v46 }
 0x892   :  { %15134 = vmatmul.mubr.msk.f32.gmra.mrb[96].mxu0 %vm1088_vm8, %v18816_v15  ;;  %15203 = vmatmul.mubr.msk.f32.gmra.mrb[102].mxu1 %vm1088_vm8, %v18837_v42  ;;  %v20755_v15 = vpack.c.bf16 %v19082_v25, %v19074_v14  ;;  %v3497_v14 = vld [vmem:[#allocation14 + $0x8] sm:$0xff]  ;;  %v3499_v25 = vld [vmem:[#allocation14 + $0x18] sm:$0xff] }
 0x893   :  { %16305 = vmatpush3.bf16.msra.mxu1 %v16304_v28  ;;  %15136 = vmatprep.mubr.msk.f32.mxu0 %vm18144_vm0, %v20747_v46  ;;  %v16312_v34 = vpack.c.bf16 %v3506_v19, %v3497_v14  ;;  %v16328_v50 = vpack.c.bf16 %v3508_v47, %v3499_v25  ;;  %v3551_v28 = vld [vmem:[#allocation14 + $0x1b8] sm:$0xff] }
 0x894   :  { %15247 = vmatprep.subr.mxu1 %v20747_v46  ;;  %15205 = vmatprep.mubr.msk.f32.mxu1 %vm18144_vm0, %v20747_v46 }
 0x896   :  { %15137 = vmatmul.mubr.msk.f32.gmra.mrb[98].mxu0 %vm1088_vm8, %v18829_v39  ;;  %15206 = vmatmul.mubr.msk.f32.gmra.mrb[104].mxu1 %vm1088_vm8, %v18852_v48  ;;  %v20757_v39 = vld [vmem:[#allocation106_spill] sm:$0xff]  ;;  %v20760_v48 = vld [vmem:[#allocation107_spill] sm:$0xff] }
 0x897   :  { %15248 = vmatpush3.msk.msra.mxu1 %vm1104_vm7, %v3279_v55  ;;  %15174 = vmatprep.mubr.msk.f32.mxu0 %vm18144_vm0, %v20747_v46  ;;  %v20758_v42 = vpack.c.bf16 %v19131_v51, %v20757_v39  ;;  %v3505_v51 = vld [vmem:[#allocation14 + $0x48] sm:$0xff]  ;;  %v3560_v55 = vld [vmem:[#allocation14 + $0x200] sm:$0xff]  ;;  %v3550_v39 = vld [vmem:[#allocation14 + $0x1b0] sm:$0xff] }
 0x898   :  { %15208 = vmatprep.mubr.msk.f32.mxu1 %vm18144_vm0, %v20747_v46  ;;  %v16314_v32 = vpack.c.bf16 %v3505_v51, %v3496_v60  ;;  %16313 = vmatprep.subr.bf16.mxu1 %v16312_v34 }
 0x89a   :  { %15175 = vmatmul.mubr.msk.f32.vlgmr.msra.gmra.mrb[100].mxu0 %vm1088_vm8, %v18844_v44  ;;  %15209 = vmatmul.mubr.msk.f32.gmra.mrb[106].mxu1 %vm1088_vm8, %v18867_v53  ;;  %v20759_v44 = vld [vmem:[#allocation98_spill] sm:$0xff]  ;;  %v20762_v53 = vld [vmem:[#allocation100_spill] sm:$0xff] }
 0x89b   :  { %16296 = vmatpush3.bf16.msra.mxu0 %v20754_v2  ;;  %15177 = vmatprep.mubr.msk.f32.mxu0 %vm18144_vm0, %v20747_v46  ;;  %v16324_v2 = vpack.c.bf16 %v3560_v55, %v3551_v28 }
 0x89c   :  { %16297 = vmatprep.subr.bf16.mxu0 %v20746_v38  ;;  %15211 = vmatprep.mubr.msk.f32.mxu1 %vm18144_vm0, %v20747_v46 }
 0x89e   :  { %15178 = vmatmul.mubr.msk.f32.gmra.mrb[102].mxu0 %vm1088_vm8, %v18859_v49  ;;  %15212 = vmatmul.mubr.msk.f32.gmra.mrb[108].mxu1 %vm1088_vm8, %v18880_v57  ;;  %v20761_v49 = vld [vmem:[#allocation99_spill] sm:$0xff]  ;;  %v20764_v57 = vld [vmem:[#allocation102_spill] sm:$0xff] }
 0x89f   :  { %16299 = vmatpush3.bf16.msra.mxu0 %v20755_v15  ;;  %15180 = vmatprep.mubr.msk.f32.mxu0 %vm18144_vm0, %v20747_v46  ;;  %v3553_v15 = vld [vmem:[#allocation14 + $0x1c8] sm:$0xff] }
 0x8a0   :  { %15222 = vmatprep.subr.mxu0 %v20747_v46  ;;  %15249 = vmatprep.mubr.msk.f32.mxu1 %vm18144_vm0, %v20747_v46 }
 0x8a2   :  { %15181 = vmatmul.mubr.msk.f32.gmra.mrb[104].mxu0 %vm1088_vm8, %v18873_v56  ;;  %15250 = vmatmul.mubr.msk.f32.vlgmr.msra.gmra.mrb[110].mxu1 %vm1088_vm8, %v18895_v62  ;;  %v20763_v56 = vld [vmem:[#allocation101_spill] sm:$0xff]  ;;  %v20766_v62 = vld [vmem:[#allocation104_spill] sm:$0xff] }
 0x8a3   :  { %15223 = vmatpush3.msk.msra.mxu0 %vm1104_vm7, %v19101_v37  ;;  %15183 = vmatprep.mubr.msk.f32.mxu0 %vm18144_vm0, %v20747_v46 }
 0x8a4   :  { %16306 = vmatprep.subr.bf16.mxu0 %v20746_v38  ;;  %15252 = vmatprep.mubr.msk.f32.mxu1 %vm18144_vm0, %v20747_v46 }
 0x8a5   :  { %16315 = vmatpush1.bf16.msra.mxu1 %v16314_v32 }
 0x8a6   :  { %15184 = vmatmul.mubr.msk.f32.gmra.mrb[106].mxu0 %vm1088_vm8, %v18888_v61  ;;  %15253 = vmatmul.mubr.msk.f32.gmra.mrb[112].mxu1 %vm1088_vm8, %v18907_v1  ;;  %v20765_v61 = vld [vmem:[#allocation103_spill] sm:$0xff] }
 0x8a7   :  { %15186 = vmatprep.mubr.msk.f32.mxu0 %vm18144_vm0, %v20747_v46  ;;  %15255 = vmatprep.mubr.msk.f32.mxu1 %vm18144_vm0, %v20747_v46 }
 0x8a8   :  { %16317 = vmatprep.subr.bf16.mxu1 %v16316_v59 }
 0x8a9   :  { %16319 = vmatpush1.bf16.msra.mxu1 %v16318_v0 }
 0x8aa   :  { %15187 = vmatmul.mubr.msk.f32.gmra.mrb[108].mxu0 %vm1088_vm8, %v18901_v63  ;;  %15256 = vmatmul.mubr.msk.f32.gmra.mrb[114].mxu1 %vm1088_vm8, %v18919_v6 }
 0x8ab   :  { %15224 = vmatprep.mubr.msk.f32.mxu0 %vm18144_vm0, %v20747_v46  ;;  %15258 = vmatprep.mubr.msk.f32.mxu1 %vm18144_vm0, %v20747_v46 }
 0x8ac   :  { %16321 = vmatprep.subr.bf16.mxu1 %v16320_v22 }
 0x8ad   :  { %16323 = vmatpush1.bf16.msra.mxu1 %v16322_v24 }
 0x8ae   :  { %15225 = vmatmul.mubr.msk.f32.vlgmr.msra.gmra.mrb[110].mxu0 %vm1088_vm8, %v18913_v3  ;;  %15259 = vmatmul.mubr.msk.f32.gmra.mrb[116].mxu1 %vm1088_vm8, %v18935_v11  ;;  %v20767_v3 = vld [vmem:[#allocation105_spill] sm:$0xff] }
 0x8af   :  { %16308 = vmatpush3.bf16.msra.mxu0 %v20756_v36  ;;  %15227 = vmatprep.mubr.msk.f32.mxu0 %vm18144_vm0, %v20747_v46  ;;  %v3562_v36 = vld [vmem:[#allocation14 + $0x210] sm:$0xff] }
 0x8b0   :  { %16309 = vmatprep.subr.bf16.mxu0 %v20746_v38  ;;  %15261 = vmatprep.mubr.msk.f32.mxu1 %vm18144_vm0, %v20747_v46 }
 0x8b1   :  { %16325 = vmatprep.subr.bf16.mxu1 %v16324_v2 }
 0x8b2   :  { %15228 = vmatmul.mubr.msk.f32.gmra.mrb[112].mxu0 %vm1088_vm8, %v18928_v7  ;;  %15262 = vmatmul.mubr.msk.f32.gmra.mrb[118].mxu1 %vm1088_vm8, %v18951_v58 }
 0x8b3   :  { %16311 = vmatpush3.bf16.msra.mxu0 %v20758_v42  ;;  %15230 = vmatprep.mubr.msk.f32.mxu0 %vm18144_vm0, %v20747_v46  ;;  %v16340_v42 = vpack.c.bf16 %v3562_v36, %v3553_v15 }
 0x8b4   :  { %15272 = vmatprep.subr.mxu0 %v20747_v46  ;;  %3648 = vmatprep.mubr.f32.mxu1 %v20747_v46 }
 0x8b6   :  { %15231 = vmatmul.mubr.msk.f32.gmra.mrb[114].mxu0 %vm1088_vm8, %v20759_v44  ;;  %v3559_v44 = vld [vmem:[#allocation14 + $0x1f8] sm:$0xff] }
 0x8b7   :  { %15273 = vmatpush3.msk.msra.mxu0 %vm1104_vm7, %v20760_v48  ;;  %15233 = vmatprep.mubr.msk.f32.mxu0 %vm18144_vm0, %v20747_v46  ;;  %v3552_v48 = vld [vmem:[#allocation14 + $0x1c0] sm:$0xff] }
 0x8b8   :  { %16329 = vmatprep.subr.bf16.mxu0 %v16328_v50 }
 0x8ba   :  { %15234 = vmatmul.mubr.msk.f32.gmra.mrb[116].mxu0 %vm1088_vm8, %v20761_v49  ;;  %v3561_v49 = vld [vmem:[#allocation14 + $0x208] sm:$0xff] }
 0x8bb   :  { %15236 = vmatprep.mubr.msk.f32.mxu0 %vm18144_vm0, %v20747_v46 }
 0x8be   :  { %15237 = vmatmul.mubr.msk.f32.gmra.mrb[118].mxu0 %vm1088_vm8, %v20762_v53  ;;  %v16326_v53 = vpack.c.bf16 %v3559_v44, %v3550_v39 }
 0x8bf   :  { %15274 = vmatprep.mubr.msk.f32.mxu0 %vm18144_vm0, %v20747_v46 }
 0x8c0   :  { %16327 = vmatpush1.bf16.msra.mxu1 %v16326_v53 }
 0x8c2   :  { %15275 = vmatmul.mubr.msk.f32.vlgmr.msra.gmra.mrb[120].mxu0 %vm1088_vm8, %v20763_v56  ;;  %v16342_v56 = vpack.c.bf16 %v3561_v49, %v3552_v48 }
 0x8c3   :  { %15277 = vmatprep.mubr.msk.f32.mxu0 %vm18144_vm0, %v20747_v46  ;;  %16331 = vmatpush1.bf16.msra.mxu0 %v16330_v23 }
 0x8c4   :  { %16333 = vmatprep.subr.bf16.mxu0 %v16332_v30 }
 0x8c6   :  { %15278 = vmatmul.mubr.msk.f32.gmra.mrb[122].mxu0 %vm1088_vm8, %v20764_v57  ;;  %v3501_v57 = vld [vmem:[#allocation14 + $0x28] sm:$0xff] }
 0x8c7   :  { %15280 = vmatprep.mubr.msk.f32.mxu0 %vm18144_vm0, %v20747_v46  ;;  %16335 = vmatpush1.bf16.msra.mxu0 %v16334_v35 }
 0x8c8   :  { %16337 = vmatprep.subr.bf16.mxu0 %v16336_v5 }
 0x8ca   :  { %15281 = vmatmul.mubr.msk.f32.gmra.mrb[124].mxu0 %vm1088_vm8, %v20765_v61  ;;  %v3510_v61 = vld [vmem:[#allocation14 + $0x70] sm:$0xff] }
 0x8cb   :  { %15283 = vmatprep.mubr.msk.f32.mxu0 %vm18144_vm0, %v20747_v46  ;;  %16339 = vmatpush1.bf16.msra.mxu0 %v16338_v52 }
 0x8cc   :  { %16341 = vmatprep.subr.bf16.mxu0 %v16340_v42 }
 0x8ce   :  { %15284 = vmatmul.mubr.msk.f32.gmra.mrb[126].mxu0 %vm1088_vm8, %v20766_v62  ;;  %v19353_v63 = vpop.f32.mrb[80].mxu1  ;;  %v3503_v62 = vld [vmem:[#allocation14 + $0x38] sm:$0xff] }
 0x8cf   :  { %15286 = vmatprep.mubr.msk.f32.mxu0 %vm18144_vm0, %v20747_v46  ;;  %v15101_v1 = vpop.f32.mrb[81].mxu1  ;;  %16343 = vmatpush1.bf16.msra.mxu0 %v16342_v56 }
 0x8d0   :  { %v16344_v1 = vpack.c.bf16 %v3510_v61, %v3501_v57 }
 0x8d2   :  { %15287 = vmatmul.mubr.msk.f32.gmra.mrb[128].mxu0 %vm1088_vm8, %v20767_v3  ;;  %v19359_v6 = vpop.f32.mrb[82].mxu1  ;;  %v3512_v3 = vld [vmem:[#allocation14 + $0x80] sm:$0xff]  ;;  %16345 = vmatprep.subr.bf16.mxu1 %v16344_v1 }
 0x8d3   :  { %v15104_v7 = vpop.f32.mrb[83].mxu1  ;;  %3743 = vmatprep.mubr.f32.mxu0 %v20747_v46 }
 0x8d4   :  { %v16360_v7 = vpack.c.bf16 %v3512_v3, %v3503_v62 }
 0x8d6   :  { %v19362_v11 = vpop.f32.mrb[84].mxu1  ;;  %16361 = vmatprep.subr.bf16.mxu0 %v16360_v7 }
 0x8d7   :  { %v15107_v58 = vpop.f32.mrb[85].mxu1 }
 0x8da   :  { %v19364_v27 = vpop.f32.mrb[86].mxu1 }
 0x8db   :  { %v15110_v37 = vpop.f32.mrb[87].mxu1 }
 0x8de   :  { %v19366_v43 = vpop.f32.mrb[88].mxu1 }
 0x8df   :  { %v15113_v18 = vpop.f32.mrb[89].mxu1 }
 0x945   :  { %v2626_v58 = vpop.f32.mrb[80].mxu0 }
 0x946   :  { %v2719_v37 = vadd.f32 %v19353_v63, %v2626_v58  ;;  %v15076_v18 = vpop.f32.mrb[81].mxu0 }
 0x949   :  { %v2631_v14 = vpop.f32.mrb[82].mxu0 }
 0x94a   :  { %v2724_v19 = vadd.f32 %v19359_v6, %v2631_v14  ;;  %v15079_v25 = vpop.f32.mrb[83].mxu0 }
 0x94d   :  { %v2636_v34 = vpop.f32.mrb[84].mxu0  ;;  %v2926_v47 = vpop.f32.mrb[90].mxu1 }
 0x94e   :  { %v2729_v60 = vadd.f32 %v19362_v11, %v2636_v34  ;;  %v15082_v51 = vpop.f32.mrb[85].mxu0  ;;  %v15151_v50 = vpop.f32.mrb[91].mxu1 }
 0x951   :  { %v2641_v32 = vpop.f32.mrb[86].mxu0  ;;  %v2931_v20 = vpop.f32.mrb[92].mxu1 }
 0x952   :  { %v2734_v10 = vadd.f32 %v19364_v27, %v2641_v32  ;;  %v15085_v23 = vpop.f32.mrb[87].mxu0  ;;  %v15154_v17 = vpop.f32.mrb[93].mxu1 }
 0x955   :  { %v2646_v13 = vpop.f32.mrb[88].mxu0  ;;  %v2936_v4 = vpop.f32.mrb[94].mxu1 }
 0x956   :  { %v2739_v63 = vadd.f32 %v19366_v43, %v2646_v13  ;;  %v15088_v59 = vpop.f32.mrb[89].mxu0  ;;  %v15157_v8 = vpop.f32.mrb[95].mxu1 }
 0x959   :  { %v2811_v6 = vpop.f32.mrb[90].mxu0  ;;  %v2941_v9 = vpop.f32.mrb[96].mxu1 }
 0x95a   :  { %v2835_v54 = vadd.f32 %v2811_v6, %v2719_v37  ;;  %v15126_v30 = vpop.f32.mrb[91].mxu0  ;;  %v15160_v0 = vpop.f32.mrb[97].mxu1 }
 0x95c   :  { %v2950_v11 = vadd.f32 %v2926_v47, %v2835_v54 }
 0x95d   :  { %v2816_v41 = vpop.f32.mrb[92].mxu0  ;;  %v2946_v33 = vpop.f32.mrb[98].mxu1 }
 0x95e   :  { %v2836_v35 = vadd.f32 %v2816_v41, %v2724_v19  ;;  %v15129_v45 = vpop.f32.mrb[93].mxu0  ;;  %v15163_v40 = vpop.f32.mrb[99].mxu1 }
 0x960   :  { %v2951_v27 = vadd.f32 %v2931_v20, %v2836_v35 }
 0x961   :  { %v2821_v12 = vpop.f32.mrb[94].mxu0  ;;  %v3139_v22 = vpop.f32.mrb[100].mxu1 }
 0x962   :  { %v2837_v21 = vadd.f32 %v2821_v12, %v2729_v60  ;;  %v15132_v26 = vpop.f32.mrb[95].mxu0  ;;  %v15201_v29 = vpop.f32.mrb[101].mxu1 }
 0x964   :  { %v2952_v43 = vadd.f32 %v2936_v4, %v2837_v21 }
 0x965   :  { %v2826_v5 = vpop.f32.mrb[96].mxu0  ;;  %v3144_v24 = vpop.f32.mrb[102].mxu1 }
 0x966   :  { %v2838_v31 = vadd.f32 %v2826_v5, %v2734_v10  ;;  %v15135_v16 = vpop.f32.mrb[97].mxu0  ;;  %v15204_v52 = vpop.f32.mrb[103].mxu1 }
 0x968   :  { %v2953_v28 = vadd.f32 %v2941_v9, %v2838_v31 }
 0x969   :  { %v2831_v55 = vpop.f32.mrb[98].mxu0  ;;  %v3149_v2 = vpop.f32.mrb[104].mxu1 }
 0x96a   :  { %v2839_v15 = vadd.f32 %v2831_v55, %v2739_v63  ;;  %v15138_v36 = vpop.f32.mrb[99].mxu0  ;;  %v15207_v39 = vpop.f32.mrb[105].mxu1 }
 0x96b   :  { %v3509_v36 = vld [vmem:[#allocation14 + $0x68] sm:$0xff]  ;;  %v3502_v39 = vld [vmem:[#allocation14 + $0x30] sm:$0xff] }
 0x96c   :  { %v2954_v42 = vadd.f32 %v2946_v33, %v2839_v15  ;;  %v3500_v15 = vld [vmem:[#allocation14 + $0x20] sm:$0xff] }
 0x96d   :  { %v3024_v44 = vpop.f32.mrb[100].mxu0  ;;  %v3154_v48 = vpop.f32.mrb[106].mxu1 }
 0x96e   :  { %v3048_v49 = vadd.f32 %v3024_v44, %v2950_v11  ;;  %v15176_v53 = vpop.f32.mrb[101].mxu0  ;;  %v15210_v56 = vpop.f32.mrb[107].mxu1  ;;  %v3519_v44 = vld [vmem:[#allocation14 + $0xb8] sm:$0xff] }
 0x96f   :  { %v3521_v53 = vld [vmem:[#allocation14 + $0xc8] sm:$0xff]  ;;  %v3530_v56 = vld [vmem:[#allocation14 + $0x110] sm:$0xff] }
 0x970   :  { %v3163_v57 = vadd.f32 %v3139_v22, %v3048_v49  ;;  %v3528_v49 = vld [vmem:[#allocation14 + $0x100] sm:$0xff] }
 0x971   :  { %v3029_v61 = vpop.f32.mrb[102].mxu0  ;;  %v3159_v62 = vpop.f32.mrb[108].mxu1 }
 0x972   :  { %v3049_v1 = vadd.f32 %v3029_v61, %v2951_v27  ;;  %v15179_v3 = vpop.f32.mrb[103].mxu0  ;;  %v15213_v7 = vpop.f32.mrb[109].mxu1 }
 0x973   :  { %v16346_v3 = vpack.c.bf16 %v3509_v36, %v3500_v15 }
 0x974   :  { %v3164_v58 = vadd.f32 %v3144_v24, %v3049_v1 }
 0x975   :  { %v3034_v37 = vpop.f32.mrb[104].mxu0  ;;  %v3352_v18 = vpop.f32.mrb[110].mxu1 }
 0x976   :  { %v3050_v14 = vadd.f32 %v3034_v37, %v2952_v43  ;;  %v15182_v19 = vpop.f32.mrb[105].mxu0  ;;  %v15251_v25 = vpop.f32.mrb[111].mxu1  ;;  %v3527_v37 = vld [vmem:[#allocation14 + $0xf8] sm:$0xff] }
 0x977   :  { %v3520_v19 = vld [vmem:[#allocation14 + $0xc0] sm:$0xff]  ;;  %v3529_v25 = vld [vmem:[#allocation14 + $0x108] sm:$0xff] }
 0x978   :  { %v3165_v34 = vadd.f32 %v3149_v2, %v3050_v14  ;;  %v16364_v14 = vpack.c.bf16 %v3530_v56, %v3521_v53  ;;  %v3540_v56 = vld [vmem:[#allocation14 + $0x160] sm:$0xff] }
 0x979   :  { %v3039_v47 = vpop.f32.mrb[106].mxu0  ;;  %v3357_v60 = vpop.f32.mrb[112].mxu1 }
 0x97a   :  { %v3051_v51 = vadd.f32 %v3039_v47, %v2953_v28  ;;  %v15185_v50 = vpop.f32.mrb[107].mxu0  ;;  %v15254_v32 = vpop.f32.mrb[113].mxu1  ;;  %v19377_v28 = vld [vmem:[#allocation13] ss:$0 sm:$0xff] }
 0x97b   :  { %v3548_v50 = vld [vmem:[#allocation14 + $0x1a0] sm:$0xff] }
 0x97c   :  { %v3166_v20 = vadd.f32 %v3154_v48, %v3051_v51  ;;  %v3539_v51 = vld [vmem:[#allocation14 + $0x158] sm:$0xff] }
 0x97d   :  { %v3044_v10 = vpop.f32.mrb[108].mxu0  ;;  %v3362_v23 = vpop.f32.mrb[114].mxu1 }
 0x97e   :  { %v3052_v17 = vadd.f32 %v3044_v10, %v2954_v42  ;;  %v15188_v13 = vpop.f32.mrb[109].mxu0  ;;  %v15257_v4 = vpop.f32.mrb[115].mxu1  ;;  %v3511_v42 = vld [vmem:[#allocation14 + $0x78] sm:$0xff] }
 0x97f   :  { %v16362_v7 = vpack.c.bf16 %v3511_v42, %v3502_v39  ;;  %v16366_v13 = vpack.c.bf16 %v3529_v25, %v3520_v19  ;;  %v3536_v4 = vld [vmem:[#allocation14 + $0x140] sm:$0xff] }
 0x980   :  { %v3167_v63 = vadd.f32 %v3159_v62, %v3052_v17  ;;  %v3504_v42 = vld [vmem:[#allocation14 + $0x40] sm:$0xff] }
 0x981   :  { %v3237_v59 = vpop.f32.mrb[110].mxu0  ;;  %v3367_v8 = vpop.f32.mrb[116].mxu1 }
 0x982   :  { %v3261_v6 = vadd.f32 %v3237_v59, %v3163_v57  ;;  %v15226_v9 = vpop.f32.mrb[111].mxu0  ;;  %v15260_v54 = vpop.f32.mrb[117].mxu1 }
 0x983   :  { %v3547_v9 = vld [vmem:[#allocation14 + $0x198] sm:$0xff] }
 0x984   :  { %v3376_v30 = vadd.f32 %v3352_v18, %v3261_v6  ;;  %v16348_v18 = vpack.c.bf16 %v3528_v49, %v3519_v44  ;;  %v3538_v6 = vld [vmem:[#allocation14 + $0x150] sm:$0xff]  ;;  %v3555_v54 = vld [vmem:[#allocation14 + $0x1d8] sm:$0xff]  ;;  %v3513_v44 = vld [vmem:[#allocation14 + $0x88] sm:$0xff] }
 0x985   :  { %v3242_v0 = vpop.f32.mrb[112].mxu0  ;;  %v3372_v11 = vpop.f32.mrb[118].mxu1  ;;  %v3531_v49 = vld [vmem:[#allocation14 + $0x118] sm:$0xff] }
 0x986   :  { %v3262_v41 = vadd.f32 %v3242_v0, %v3164_v58  ;;  %v15229_v33 = vpop.f32.mrb[113].mxu0  ;;  %v15263_v35 = vpop.f32.mrb[119].mxu1  ;;  %v3518_v58 = vld [vmem:[#allocation14 + $0xb0] sm:$0xff]  ;;  %v3564_v0 = vld [vmem:[#allocation14 + $0x220] sm:$0xff] }
 0x987   :  { %v16350_v17 = vpack.c.bf16 %v3527_v37, %v3518_v58 }
 0x988   :  { %v3377_v45 = vadd.f32 %v3357_v60, %v3262_v41  ;;  %v3546_v60 = vld [vmem:[#allocation14 + $0x190] sm:$0xff] }
 0x989   :  { %v3247_v40 = vpop.f32.mrb[114].mxu0  ;;  %v3566_v41 = vld [vmem:[#allocation14 + $0x230] sm:$0xff] }
 0x98a   :  { %v3263_v27 = vadd.f32 %v3247_v40, %v3165_v34  ;;  %v15232_v12 = vpop.f32.mrb[115].mxu0  ;;  %v3537_v34 = vld [vmem:[#allocation14 + $0x148] sm:$0xff] }
 0x98b   :  { %v16352_v59 = vpack.c.bf16 %v3546_v60, %v3537_v34  ;;  %v16370_v12 = vpack.c.bf16 %v3547_v9, %v3538_v6 }
 0x98c   :  { %v3378_v22 = vadd.f32 %v3362_v23, %v3263_v27 }
 0x98d   :  { %v3252_v21 = vpop.f32.mrb[116].mxu0 }
 0x98e   :  { %v3264_v26 = vadd.f32 %v3252_v21, %v3166_v20  ;;  %v15235_v29 = vpop.f32.mrb[117].mxu0  ;;  %v16356_v21 = vpack.c.bf16 %v3564_v0, %v3555_v54 }
 0x98f   :  { %v3563_v29 = vld [vmem:[#allocation14 + $0x218] sm:$0xff] }
 0x990   :  { %v19373_v43 = vadd.f32 %v3367_v8, %v3264_v26  ;;  %v16368_v8 = vpack.c.bf16 %v3548_v50, %v3539_v51 }
 0x991   :  { %v3257_v5 = vpop.f32.mrb[118].mxu0 }
 0x992   :  { %v3265_v24 = vadd.f32 %v3257_v5, %v3167_v63  ;;  %v15238_v31 = vpop.f32.mrb[119].mxu0  ;;  %v3545_v63 = vld [vmem:[#allocation14 + $0x188] sm:$0xff]  ;;  %v3556_v5 = vld [vmem:[#allocation14 + $0x1e0] sm:$0xff] }
 0x993   :  { %v16354_v27 = vpack.c.bf16 %v3545_v63, %v3536_v4 }
 0x994   :  { %v19375_v16 = vadd.f32 %v3372_v11, %v3265_v24  ;;  %v3557_v11 = vld [vmem:[#allocation14 + $0x1e8] sm:$0xff] }
 0x995   :  { %v3450_v52 = vpop.f32.mrb[120].mxu0  ;;  %v16372_v26 = vpack.c.bf16 %v3566_v41, %v3557_v11  ;;  %v3565_v24 = vld [vmem:[#allocation14 + $0x228] sm:$0xff] }
 0x996   :  { %v3474_v55 = vadd.f32 %v3450_v52, %v3376_v30  ;;  %v15276_v2 = vpop.f32.mrb[121].mxu0  ;;  %v16374_v36 = vpack.c.bf16 %v3565_v24, %v3556_v5 }
 0x998   :  { %v3486_v48 = vadd.f32 %v19377_v28, %v3474_v55 }
 0x999   :  { %v3455_v57 = vpop.f32.mrb[122].mxu0 }
 0x99a   :  { %v19380_v61 = vmax.f32 %v3486_v48, 0.0  ;;  %v3475_v62 = vadd.f32 %v3455_v57, %v3377_v45  ;;  %v15279_v1 = vpop.f32.mrb[123].mxu0  ;;  %v3522_v48 = vld [vmem:[#allocation14 + $0xd0] sm:$0xff]  ;;  %v3549_v57 = vld [vmem:[#allocation14 + $0x1a8] sm:$0xff] }
 0x99b   :  { %v16380_v53 = vpack.c.bf16 %v3531_v49, %v3522_v48  ;;  %v3558_v1 = vld [vmem:[#allocation14 + $0x1f0] sm:$0xff] }
 0x99c   :  { %v3487_v47 = vadd.f32 %v19377_v28, %v3475_v62  ;;  %13843 = vmatmul.mubr.msk.f32.vlgmr.msra.gmra.mrb[120].mxu1 %vm3568_vm10, %v19380_v61  ;;  %13848 = vmatmul.mubr.msk.f32.vlgmr.msra.gmra.mrb[130].mxu0 %vm3568_vm10, %v19380_v61  ;;  %v16383_v62 = vpack.c.bf16 %v3549_v57, %v3540_v56  ;;  %v17229_v57 = vld [vmem:[#allocation7 + $0x40] sm:$0xff] }
 0x99d   :  { %v3460_v32 = vpop.f32.mrb[124].mxu0  ;;  %3654 = vmatprep.mubr.f32.mxu1 %v20747_v46  ;;  %3749 = vmatprep.mubr.f32.mxu0 %v20747_v46 }
 0x99e   :  { %v19389_v20 = vmax.f32 %v3487_v47, 0.0  ;;  %v3476_v10 = vadd.f32 %v3460_v32, %v3378_v22  ;;  %v15282_v23 = vpop.f32.mrb[125].mxu0  ;;  %16347 = vmatpush1.bf16.msra.mxu1 %v16346_v3  ;;  %16363 = vmatpush1.bf16.msra.mxu0 %v16362_v7  ;;  %v3554_v22 = vld [vmem:[#allocation14 + $0x1d0] sm:$0xff]  ;;  %v3567_v3 = vld [vmem:[#allocation14 + $0x238] sm:$0xff] }
 0x99f   :  { %16349 = vmatprep.subr.bf16.mxu1 %v16348_v18  ;;  %16365 = vmatprep.subr.bf16.mxu0 %v16364_v14  ;;  %v16358_v15 = vpack.c.bf16 %v3563_v29, %v3554_v22  ;;  %v16386_v7 = vpack.c.bf16 %v3567_v3, %v3558_v1 }
 0x9a0   :  { %v3488_v30 = vadd.f32 %v19377_v28, %v3476_v10  ;;  %13844 = vmatmul.mubr.msk.f32.gmra.mrb[122].mxu1 %vm3568_vm10, %v19389_v20  ;;  %13849 = vmatmul.mubr.msk.f32.gmra.mrb[132].mxu0 %vm3568_vm10, %v19389_v20 }
 0x9a1   :  { %v3465_v33 = vpop.f32.mrb[126].mxu0  ;;  %3660 = vmatprep.mubr.f32.mxu1 %v20747_v46  ;;  %3755 = vmatprep.mubr.f32.mxu0 %v20747_v46 }
 0x9a2   :  { %v19398_v35 = vmax.f32 %v3488_v30, 0.0  ;;  %v3477_v45 = vadd.f32 %v3465_v33, %v19373_v43  ;;  %v15285_v40 = vpop.f32.mrb[127].mxu0  ;;  %16351 = vmatpush1.bf16.msra.mxu1 %v16350_v17  ;;  %16367 = vmatpush1.bf16.msra.mxu0 %v16366_v13 }
 0x9a3   :  { %16353 = vmatprep.subr.bf16.mxu1 %v16352_v59  ;;  %16369 = vmatprep.subr.bf16.mxu0 %v16368_v8 }
 0x9a4   :  { %v3489_v31 = vadd.f32 %v19377_v28, %v3477_v45  ;;  %13845 = vmatmul.mubr.msk.f32.gmra.mrb[124].mxu1 %vm3568_vm10, %v19398_v35  ;;  %13850 = vmatmul.mubr.msk.f32.gmra.mrb[134].mxu0 %vm3568_vm10, %v19398_v35 }
 0x9a5   :  { %v3470_v43 = vpop.f32.mrb[128].mxu0  ;;  %3666 = vmatprep.mubr.f32.mxu1 %v20747_v46  ;;  %3761 = vmatprep.mubr.f32.mxu0 %v20747_v46 }
 0x9a6   :  { %v19408_v52 = vmax.f32 %v3489_v31, 0.0  ;;  %v3478_v55 = vadd.f32 %v3470_v43, %v19375_v16  ;;  %v15288_v2 = vpop.f32.mrb[129].mxu0  ;;  %16355 = vmatpush1.bf16.msra.mxu1 %v16354_v27  ;;  %16371 = vmatpush1.bf16.msra.mxu0 %v16370_v12  ;;  %v17223_v27 = vld [vmem:[#allocation7 + $0x28] sm:$0xff]  ;;  %v17225_v31 = vld [vmem:[#allocation7 + $0x30] sm:$0xff] }
 0x9a7   :  { %16357 = vmatprep.subr.bf16.mxu1 %v16356_v21  ;;  %16373 = vmatprep.subr.bf16.mxu0 %v16372_v26  ;;  %v17224_v21 = vld [vmem:[#allocation7 + $0x8] sm:$0xff] }
 0x9a8   :  { %v3490_v39 = vadd.f32 %v19377_v28, %v3478_v55  ;;  %13846 = vmatmul.mubr.msk.f32.gmra.mrb[126].mxu1 %vm3568_vm10, %v19408_v52  ;;  %13851 = vmatmul.mubr.msk.f32.gmra.mrb[136].mxu0 %vm3568_vm10, %v19408_v52  ;;  %v16377_v28 = vpack.c.bf16 %v3513_v44, %v3504_v42 }
 0x9a9   :  { %3672 = vmatprep.mubr.f32.mxu1 %v20747_v46  ;;  %3767 = vmatprep.mubr.f32.mxu0 %v20747_v46 }
 0x9aa   :  { %v3495_v16 = vmax.f32 %v3490_v39, 0.0  ;;  %16359 = vmatpush1.bf16.msra.mxu1 %v16358_v15  ;;  %16375 = vmatpush1.bf16.msra.mxu0 %v16374_v36  ;;  %v17226_v15 = vld [vmem:[#allocation7 + $0x10] sm:$0xff] }
 0x9ab   :  { %16376 = vmatprep.subr.bf16.mxu1 %v20746_v38  ;;  %16388 = vmatprep.subr.bf16.mxu0 %v20746_v38 }
 0x9ac   :  { %13847 = vmatmul.mubr.msk.f32.gmra.mrb[128].mxu1 %vm3568_vm10, %v3495_v16  ;;  %13852 = vmatmul.mubr.msk.f32.gmra.mrb[138].mxu0 %vm3568_vm10, %v3495_v16 }
 0x9ad   :  { %3838 = vmatprep.mubr.f32.mxu1 %v20747_v46  ;;  %3933 = vmatprep.mubr.f32.mxu0 %v20747_v46 }
 0x9b0   :  { %13853 = vmatmul.mubr.msk.f32.vlgmr.msra.gmra.mrb[130].mxu1 %vm3568_vm10, %v19380_v61  ;;  %13858 = vmatmul.mubr.msk.f32.vlgmr.msra.gmra.mrb[140].mxu0 %vm3568_vm10, %v19380_v61 }
 0x9b1   :  { %3844 = vmatprep.mubr.f32.mxu1 %v20747_v46  ;;  %3939 = vmatprep.mubr.f32.mxu0 %v20747_v46 }
 0x9b2   :  { %16378 = vmatpush3.bf16.msra.mxu1 %v16377_v28  ;;  %v17228_v28 = vld [vmem:[#allocation7 + $0x18] sm:$0xff] }
 0x9b3   :  { %16379 = vmatprep.subr.bf16.mxu1 %v20746_v38 }
 0x9b4   :  { %13854 = vmatmul.mubr.msk.f32.gmra.mrb[132].mxu1 %vm3568_vm10, %v19389_v20  ;;  %13859 = vmatmul.mubr.msk.f32.gmra.mrb[142].mxu0 %vm3568_vm10, %v19389_v20 }
 0x9b5   :  { %3850 = vmatprep.mubr.f32.mxu1 %v20747_v46  ;;  %3945 = vmatprep.mubr.f32.mxu0 %v20747_v46 }
 0x9b6   :  { %16381 = vmatpush3.bf16.msra.mxu1 %v16380_v53 }
 0x9b7   :  { %16382 = vmatprep.subr.bf16.mxu1 %v20746_v38 }
 0x9b8   :  { %13855 = vmatmul.mubr.msk.f32.gmra.mrb[134].mxu1 %vm3568_vm10, %v19398_v35  ;;  %13860 = vmatmul.mubr.msk.f32.gmra.mrb[144].mxu0 %vm3568_vm10, %v19398_v35 }
 0x9b9   :  { %3856 = vmatprep.mubr.f32.mxu1 %v20747_v46  ;;  %3951 = vmatprep.mubr.f32.mxu0 %v20747_v46 }
 0x9ba   :  { %16384 = vmatpush3.bf16.msra.mxu1 %v16383_v62 }
 0x9bb   :  { %16385 = vmatprep.subr.bf16.mxu1 %v20746_v38 }
 0x9bc   :  { %13856 = vmatmul.mubr.msk.f32.gmra.mrb[136].mxu1 %vm3568_vm10, %v19408_v52  ;;  %13861 = vmatmul.mubr.msk.f32.gmra.mrb[146].mxu0 %vm3568_vm10, %v19408_v52 }
 0x9bd   :  { %3862 = vmatprep.mubr.f32.mxu1 %v20747_v46  ;;  %3957 = vmatprep.mubr.f32.mxu0 %v20747_v46 }
 0x9be   :  { %16387 = vmatpush3.bf16.msra.mxu1 %v16386_v7 }
 0x9bf   :  { %16394 = vmatprep.subr.bf16.mxu1 %v20746_v38 }
 0x9c0   :  { %13857 = vmatmul.mubr.msk.f32.gmra.mrb[138].mxu1 %vm3568_vm10, %v3495_v16  ;;  %13862 = vmatmul.mubr.msk.f32.gmra.mrb[148].mxu0 %vm3568_vm10, %v3495_v16 }
 0x9c1   :  { %15305 = vmatprep.mubr.msk.f32.mxu1 %vm18144_vm0, %v20747_v46  ;;  %15330 = vmatprep.mubr.msk.f32.mxu0 %vm18144_vm0, %v20747_v46 }
 0x9c4   :  { %15306 = vmatmul.mubr.msk.f32.vlgmr.msra.gmra.mrb[140].mxu1 %vm3568_vm10, %v19380_v61 }
 0x9c5   :  { %15308 = vmatprep.mubr.msk.f32.mxu1 %vm18144_vm0, %v20747_v46 }
 0x9c8   :  { %15309 = vmatmul.mubr.msk.f32.gmra.mrb[142].mxu1 %vm3568_vm10, %v19389_v20 }
 0x9c9   :  { %15311 = vmatprep.mubr.msk.f32.mxu1 %vm18144_vm0, %v20747_v46 }
 0x9cc   :  { %15312 = vmatmul.mubr.msk.f32.gmra.mrb[144].mxu1 %vm3568_vm10, %v19398_v35  ;;  %v17222_v35 = vld [vmem:[#allocation7] sm:$0xff] }
 0x9cd   :  { %15314 = vmatprep.mubr.msk.f32.mxu1 %vm18144_vm0, %v20747_v46 }
 0x9d0   :  { %15315 = vmatmul.mubr.msk.f32.gmra.mrb[146].mxu1 %vm3568_vm10, %v19408_v52 }
 0x9d1   :  { %15317 = vmatprep.mubr.msk.f32.mxu1 %vm18144_vm0, %v20747_v46 }
 0x9d4   :  { %15318 = vmatmul.mubr.msk.f32.gmra.mrb[148].mxu1 %vm3568_vm10, %v3495_v16  ;;  %v17227_v16 = vld [vmem:[#allocation7 + $0x38] sm:$0xff] }
 0x9d5   :  { %15355 = vmatprep.mubr.msk.f32.mxu1 %vm18144_vm0, %v20747_v46 }
 0xa6f   :  { %v3650_v61 = vpop.f32.mrb[120].mxu1  ;;  %v3745_v58 = vpop.f32.mrb[130].mxu0 }
 0xa70   :  { %v3652_v37 = vpop.f32.mrb[121].mxu1  ;;  %v3747_v18 = vpop.f32.mrb[131].mxu0 }
 0xa73   :  { %v3656_v14 = vpop.f32.mrb[122].mxu1  ;;  %v3751_v19 = vpop.f32.mrb[132].mxu0 }
 0xa74   :  { %v16395_v25 = vpack.c.bf16 %v3656_v14, %v3650_v61  ;;  %v16401_v34 = vpack.c.bf16 %v3751_v19, %v3745_v58  ;;  %v3658_v47 = vpop.f32.mrb[123].mxu1  ;;  %v3753_v60 = vpop.f32.mrb[133].mxu0  ;;  %v17230_v61 = vld [vmem:[#allocation7 + $0x20] sm:$0xf]  ;;  %v17232_v19 = vld [vmem:[#allocation7 + $0x78] sm:$0xff] }
 0xa75   :  { %v16389_v51 = vpack.c.bf16 %v3658_v47, %v3652_v37  ;;  %v16407_v50 = vpack.c.bf16 %v3753_v60, %v3747_v18  ;;  %v17231_v18 = vld [vmem:[#allocation7 + $0x48] sm:$0xf]  ;;  %v17234_v60 = vld [vmem:[#allocation7 + $0x80] sm:$0xff] }
 0xa76   :  { %16396 = vmatpush3.bf16.msra.mxu1 %v16395_v25 }
 0xa77   :  { %v3662_v32 = vpop.f32.mrb[124].mxu1  ;;  %v3757_v20 = vpop.f32.mrb[134].mxu0  ;;  %16390 = vmatpush3.bf16.msra.mxu0 %v16389_v51  ;;  %16397 = vmatprep.subr.bf16.mxu1 %v20746_v38 }
 0xa78   :  { %v3664_v10 = vpop.f32.mrb[125].mxu1  ;;  %v3759_v23 = vpop.f32.mrb[135].mxu0  ;;  %16391 = vmatprep.subr.bf16.mxu0 %v20746_v38 }
 0xa7b   :  { %v3668_v17 = vpop.f32.mrb[126].mxu1  ;;  %v3763_v13 = vpop.f32.mrb[136].mxu0 }
 0xa7c   :  { %v16398_v4 = vpack.c.bf16 %v3668_v17, %v3662_v32  ;;  %v16404_v63 = vpack.c.bf16 %v3763_v13, %v3757_v20  ;;  %v3670_v59 = vpop.f32.mrb[127].mxu1  ;;  %v3765_v8 = vpop.f32.mrb[137].mxu0  ;;  %v17235_v32 = vld [vmem:[#allocation7 + $0x58] sm:$0xff]  ;;  %v17237_v17 = vld [vmem:[#allocation7 + $0x60] sm:$0xff] }
 0xa7d   :  { %v16392_v6 = vpack.c.bf16 %v3670_v59, %v3664_v10  ;;  %v16410_v9 = vpack.c.bf16 %v3765_v8, %v3759_v23  ;;  %v17236_v10 = vld [vmem:[#allocation7 + $0x88] sm:$0xff] }
 0xa7e   :  { %16399 = vmatpush3.bf16.msra.mxu1 %v16398_v4  ;;  %v17238_v4 = vld [vmem:[#allocation7 + $0x90] sm:$0xff]  ;;  %v17239_v8 = vld [vmem:[#allocation7 + $0x68] sm:$0xff] }
 0xa7f   :  { %v3674_v54 = vpop.f32.mrb[128].mxu1  ;;  %v3769_v30 = vpop.f32.mrb[138].mxu0  ;;  %16393 = vmatpush3.bf16.msra.mxu0 %v16392_v6  ;;  %15353 = vmatprep.subr.mxu1 %v20747_v46 }
 0xa80   :  { %v3676_v0 = vpop.f32.mrb[129].mxu1  ;;  %v3771_v11 = vpop.f32.mrb[139].mxu0  ;;  %15328 = vmatprep.subr.mxu0 %v20747_v46 }
 0xa82   :  { %15354 = vmatpush3.msk.msra.mxu1 %vm1104_vm7, %v3674_v54 }
 0xa83   :  { %v19482_v41 = vpop.f32.mrb[130].mxu1  ;;  %v19484_v33 = vpop.f32.mrb[140].mxu0  ;;  %15329 = vmatpush3.msk.msra.mxu0 %vm1104_vm7, %v3676_v0  ;;  %15356 = vmatmul.mubr.msk.f32.vlgmr.msra.gmra.mrb[150].mxu1 %vm1088_vm8, %v17222_v35  ;;  %v17242_v0 = vld [vmem:[#allocation7 + $0xc8] sm:$0xff]  ;;  %v17246_v35 = vld [vmem:[#allocation7 + $0xb0] sm:$0xff] }
 0xa84   :  { %16406 = vmatprep.subr.bf16.mxu1 %v20746_v38  ;;  %v19489_v45 = vpop.f32.mrb[131].mxu1  ;;  %v19491_v40 = vpop.f32.mrb[141].mxu0  ;;  %15331 = vmatmul.mubr.msk.f32.vlgmr.msra.gmra.mrb[150].mxu0 %vm1088_vm8, %v17223_v27  ;;  %v17249_v27 = vld [vmem:[#allocation7 + $0xe0] sm:$0xff] }
 0xa85   :  { %16400 = vmatprep.subr.bf16.mxu0 %v20746_v38  ;;  %16408 = vmatpush3.bf16.msra.mxu1 %v16407_v50 }
 0xa86   :  { %16402 = vmatpush3.bf16.msra.mxu0 %v16401_v34  ;;  %15358 = vmatprep.mubr.msk.f32.mxu1 %vm18144_vm0, %v20747_v46  ;;  %v17233_v34 = vld [vmem:[#allocation7 + $0x50] sm:$0xff] }
 0xa87   :  { %v19497_v12 = vpop.f32.mrb[132].mxu1  ;;  %v19499_v22 = vpop.f32.mrb[142].mxu0  ;;  %15333 = vmatprep.mubr.msk.f32.mxu0 %vm18144_vm0, %v20747_v46  ;;  %15359 = vmatmul.mubr.msk.f32.gmra.mrb[152].mxu1 %vm1088_vm8, %v17224_v21  ;;  %v17252_v21 = vld [vmem:[#allocation7 + $0xf0] sm:$0xff] }
 0xa88   :  { %v16413_v26 = vpack.c.bf16 %v19497_v12, %v19482_v41  ;;  %v16425_v29 = vpack.c.bf16 %v19499_v22, %v19484_v33  ;;  %16409 = vmatprep.subr.bf16.mxu1 %v20746_v38  ;;  %v3848_v5 = vpop.f32.mrb[133].mxu1  ;;  %v19509_v24 = vpop.f32.mrb[143].mxu0  ;;  %15334 = vmatmul.mubr.msk.f32.gmra.mrb[152].mxu0 %vm1088_vm8, %v17225_v31  ;;  %v17244_v41 = vld [vmem:[#allocation7 + $0xa8] sm:$0xff]  ;;  %v17245_v33 = vld [vmem:[#allocation7 + $0xd0] sm:$0xff]  ;;  %v17250_v12 = vld [vmem:[#allocation7 + $0xc0] sm:$0xf] }
 0xa89   :  { %v16419_v43 = vpack.c.bf16 %v3848_v5, %v19489_v45  ;;  %v16431_v52 = vpack.c.bf16 %v19509_v24, %v19491_v40  ;;  %16403 = vmatprep.subr.bf16.mxu0 %v20746_v38  ;;  %16411 = vmatpush3.bf16.msra.mxu1 %v16410_v9  ;;  %v17240_v9 = vld [vmem:[#allocation7 + $0x98] sm:$0xf]  ;;  %v17251_v22 = vld [vmem:[#allocation7 + $0xe8] sm:$0xf]  ;;  %v17255_v5 = vld [vmem:[#allocation7 + $0x120] sm:$0xff] }
 0xa8a   :  { %16405 = vmatpush3.bf16.msra.mxu0 %v16404_v63  ;;  %15361 = vmatprep.mubr.msk.f32.mxu1 %vm18144_vm0, %v20747_v46  ;;  %v17247_v45 = vld [vmem:[#allocation7 + $0xd8] sm:$0xff]  ;;  %v17256_v24 = vld [vmem:[#allocation7 + $0x100] sm:$0xff]  ;;  %v17257_v31 = vld [vmem:[#allocation7 + $0x128] sm:$0xff] }
 0xa8b   :  { %v3852_v55 = vpop.f32.mrb[134].mxu1  ;;  %v19518_v2 = vpop.f32.mrb[144].mxu0  ;;  %15336 = vmatprep.mubr.msk.f32.mxu0 %vm18144_vm0, %v20747_v46  ;;  %15362 = vmatmul.mubr.msk.f32.gmra.mrb[154].mxu1 %vm1088_vm8, %v17226_v15  ;;  %v17248_v40 = vld [vmem:[#allocation7 + $0xb8] sm:$0xff]  ;;  %v17262_v15 = vld [vmem:[#allocation7 + $0x140] sm:$0xff] }
 0xa8c   :  { %15403 = vmatprep.subr.mxu1 %v20747_v46  ;;  %v3854_v36 = vpop.f32.mrb[135].mxu1  ;;  %v19524_v39 = vpop.f32.mrb[145].mxu0  ;;  %15337 = vmatmul.mubr.msk.f32.gmra.mrb[154].mxu0 %vm1088_vm8, %v17227_v16  ;;  %v17265_v16 = vld [vmem:[#allocation7 + $0x158] sm:$0xff] }
 0xa8d   :  { %15378 = vmatprep.subr.mxu0 %v20747_v46  ;;  %15404 = vmatpush3.msk.msra.mxu1 %vm1104_vm7, %v3771_v11  ;;  %v17243_v11 = vld [vmem:[#allocation7 + $0xa0] sm:$0xff] }
 0xa8e   :  { %15379 = vmatpush3.msk.msra.mxu0 %vm1104_vm7, %v3769_v30  ;;  %15364 = vmatprep.mubr.msk.f32.mxu1 %vm18144_vm0, %v20747_v46  ;;  %v17241_v30 = vld [vmem:[#allocation7 + $0x70] sm:$0xf] }
 0xa8f   :  { %v3858_v42 = vpop.f32.mrb[136].mxu1  ;;  %v19532_v44 = vpop.f32.mrb[146].mxu0  ;;  %15339 = vmatprep.mubr.msk.f32.mxu0 %vm18144_vm0, %v20747_v46  ;;  %15365 = vmatmul.mubr.msk.f32.gmra.mrb[156].mxu1 %vm1088_vm8, %v17228_v28  ;;  %v18149_v28 = vmov 0  }
 0xa90   :  { %v16416_v48 = vpack.c.bf16 %v3858_v42, %v3852_v55  ;;  %v16428_v49 = vpack.c.bf16 %v19532_v44, %v19518_v2  ;;  %v3860_v53 = vpop.f32.mrb[137].mxu1  ;;  %v19539_v56 = vpop.f32.mrb[147].mxu0  ;;  %15340 = vmatmul.mubr.msk.f32.gmra.mrb[156].mxu0 %vm1088_vm8, %v17229_v57  ;;  %15367 = vmatprep.mubr.msk.f32.mxu1 %vm18144_vm0, %v20747_v46  ;;  %v17260_v55 = vld [vmem:[#allocation7 + $0x110] sm:$0xf]  ;;  %v17261_v2 = vld [vmem:[#allocation7 + $0x138] sm:$0xf] }
 0xa91   :  { %v16422_v62 = vpack.c.bf16 %v3860_v53, %v3854_v36  ;;  %v16434_v1 = vpack.c.bf16 %v19539_v56, %v19524_v39  ;;  %15342 = vmatprep.mubr.msk.f32.mxu0 %vm18144_vm0, %v20747_v46  ;;  %16418 = vmatprep.subr.bf16.mxu1 %v20746_v38  ;;  %v17263_v36 = vld [vmem:[#allocation7 + $0x148] sm:$0xff]  ;;  %v17264_v39 = vld [vmem:[#allocation7 + $0x150] sm:$0xff]  ;;  %v17266_v42 = vld [vmem:[#allocation7 + $0x160] sm:$0xf]  ;;  %v18148_v44 = vmov 1.0|1.0  }
 0xa92   :  { %16412 = vmatprep.subr.bf16.mxu0 %v20746_v38  ;;  %17139 = vset.pattern.permute.xlu0 %v18149_v28 }
 0xa93   :  { %v3864_v3 = vpop.f32.mrb[138].mxu1  ;;  %v19550_v7 = vpop.f32.mrb[148].mxu0  ;;  %15368 = vmatmul.mubr.msk.f32.gmra.mrb[158].mxu1 %vm1088_vm8, %v17230_v61  ;;  %17140 = vset.pattern.permute.xlu1 %v18149_v28 }
 0xa94   :  { %v3866_v58 = vpop.f32.mrb[139].mxu1  ;;  %v19553_v37 = vpop.f32.mrb[149].mxu0  ;;  %15343 = vmatmul.mubr.msk.f32.gmra.mrb[158].mxu0 %vm1088_vm8, %v17231_v18  ;;  %15405 = vmatprep.mubr.msk.f32.mxu1 %vm18144_vm0, %v20747_v46 }
 0xa95   :  { %15380 = vmatprep.mubr.msk.f32.mxu0 %vm18144_vm0, %v20747_v46 }
 0xa97   :  { %v19560_v14 = vpop.f32.mrb[140].mxu1  ;;  %15406 = vmatmul.mubr.msk.f32.vlgmr.msra.gmra.mrb[160].mxu1 %vm1088_vm8, %v17232_v19 }
 0xa98   :  { %16420 = vmatpush3.bf16.msra.mxu1 %v16419_v43  ;;  %v15307_v25 = vpop.f32.mrb[141].mxu1  ;;  %15381 = vmatmul.mubr.msk.f32.vlgmr.msra.gmra.mrb[160].mxu0 %vm1088_vm8, %v17233_v34  ;;  %v17258_v43 = vld [vmem:[#allocation7 + $0x108] sm:$0xff] }
 0xa99   :  { %16414 = vmatpush3.bf16.msra.mxu0 %v16413_v26  ;;  %15408 = vmatprep.mubr.msk.f32.mxu1 %vm18144_vm0, %v20747_v46  ;;  %v17253_v26 = vld [vmem:[#allocation7 + $0x118] sm:$0xff] }
 0xa9a   :  { %16421 = vmatprep.subr.bf16.mxu1 %v20746_v38  ;;  %15383 = vmatprep.mubr.msk.f32.mxu0 %vm18144_vm0, %v20747_v46 }
 0xa9b   :  { %v19569_v47 = vpop.f32.mrb[142].mxu1  ;;  %15409 = vmatmul.mubr.msk.f32.gmra.mrb[162].mxu1 %vm1088_vm8, %v17234_v60  ;;  %16415 = vmatprep.subr.bf16.mxu0 %v20746_v38 }
 0xa9c   :  { %v16437_v51 = vpack.c.bf16 %v19569_v47, %v19560_v14  ;;  %16423 = vmatpush3.bf16.msra.mxu1 %v16422_v62  ;;  %v15310_v50 = vpop.f32.mrb[143].mxu1  ;;  %15384 = vmatmul.mubr.msk.f32.gmra.mrb[162].mxu0 %vm1088_vm8, %v17235_v32 }
 0xa9d   :  { %16417 = vmatpush3.bf16.msra.mxu0 %v16416_v48  ;;  %15411 = vmatprep.mubr.msk.f32.mxu1 %vm18144_vm0, %v20747_v46 }
 0xa9e   :  { %15453 = vmatprep.subr.mxu1 %v20747_v46  ;;  %15386 = vmatprep.mubr.msk.f32.mxu0 %vm18144_vm0, %v20747_v46 }
 0xa9f   :  { %v19581_v20 = vpop.f32.mrb[144].mxu1  ;;  %15412 = vmatmul.mubr.msk.f32.gmra.mrb[164].mxu1 %vm1088_vm8, %v17236_v10  ;;  %15428 = vmatprep.subr.mxu0 %v20747_v46 }
 0xaa0   :  { %15454 = vmatpush3.msk.msra.mxu1 %vm1104_vm7, %v3866_v58  ;;  %v15313_v23 = vpop.f32.mrb[145].mxu1  ;;  %15387 = vmatmul.mubr.msk.f32.gmra.mrb[164].mxu0 %vm1088_vm8, %v17237_v17 }
 0xaa1   :  { %15429 = vmatpush3.msk.msra.mxu0 %vm1104_vm7, %v3864_v3  ;;  %15414 = vmatprep.mubr.msk.f32.mxu1 %vm18144_vm0, %v20747_v46 }
 0xaa2   :  { %15389 = vmatprep.mubr.msk.f32.mxu0 %vm18144_vm0, %v20747_v46  ;;  %16430 = vmatprep.subr.bf16.mxu1 %v20746_v38 }
 0xaa3   :  { %v19593_v13 = vpop.f32.mrb[146].mxu1  ;;  %15415 = vmatmul.mubr.msk.f32.gmra.mrb[166].mxu1 %vm1088_vm8, %v17238_v4  ;;  %16424 = vmatprep.subr.bf16.mxu0 %v20746_v38 }
 0xaa4   :  { %v16440_v63 = vpack.c.bf16 %v19593_v13, %v19581_v20  ;;  %v15316_v59 = vpop.f32.mrb[147].mxu1  ;;  %15390 = vmatmul.mubr.msk.f32.gmra.mrb[166].mxu0 %vm1088_vm8, %v17239_v8  ;;  %15417 = vmatprep.mubr.msk.f32.mxu1 %vm18144_vm0, %v20747_v46 }
 0xaa5   :  { %15392 = vmatprep.mubr.msk.f32.mxu0 %vm18144_vm0, %v20747_v46 }
 0xaa7   :  { %v19604_v6 = vpop.f32.mrb[148].mxu1  ;;  %15418 = vmatmul.mubr.msk.f32.gmra.mrb[168].mxu1 %vm1088_vm8, %v17240_v9 }
 0xaa8   :  { %v15319_v54 = vpop.f32.mrb[149].mxu1  ;;  %15393 = vmatmul.mubr.msk.f32.gmra.mrb[168].mxu0 %vm1088_vm8, %v17241_v30  ;;  %15455 = vmatprep.mubr.msk.f32.mxu1 %vm18144_vm0, %v20747_v46 }
 0xaa9   :  { %15430 = vmatprep.mubr.msk.f32.mxu0 %vm18144_vm0, %v20747_v46 }
 0xaab   :  { %15456 = vmatmul.mubr.msk.f32.vlgmr.msra.gmra.mrb[170].mxu1 %vm1088_vm8, %v17242_v0 }
 0xaac   :  { %16432 = vmatpush3.bf16.msra.mxu1 %v16431_v52  ;;  %15431 = vmatmul.mubr.msk.f32.vlgmr.msra.gmra.mrb[170].mxu0 %vm1088_vm8, %v17243_v11  ;;  %v17259_v52 = vld [vmem:[#allocation7 + $0x130] sm:$0xff] }
 0xaad   :  { %16426 = vmatpush3.bf16.msra.mxu0 %v16425_v29  ;;  %16433 = vmatprep.subr.bf16.mxu1 %v20746_v38  ;;  %v17254_v29 = vld [vmem:[#allocation7 + $0xf8] sm:$0xff] }
 0xaae   :  { %15433 = vmatprep.mubr.msk.f32.mxu0 %vm18144_vm0, %v20747_v46  ;;  %16427 = vmatprep.subr.bf16.mxu0 %v20746_v38 }
 0xaaf   :  { %15458 = vmatprep.mubr.msk.f32.mxu1 %vm18144_vm0, %v20747_v46 }
 0xab0   :  { %16435 = vmatpush3.bf16.msra.mxu1 %v16434_v1  ;;  %15434 = vmatmul.mubr.msk.f32.gmra.mrb[172].mxu0 %vm1088_vm8, %v17244_v41 }
 0xab1   :  { %16429 = vmatpush3.bf16.msra.mxu0 %v16428_v49  ;;  %15459 = vmatmul.mubr.msk.f32.gmra.mrb[172].mxu1 %vm1088_vm8, %v17245_v33 }
 0xab2   :  { %15503 = vmatprep.subr.mxu1 %v20747_v46  ;;  %15436 = vmatprep.mubr.msk.f32.mxu0 %vm18144_vm0, %v20747_v46 }
 0xab3   :  { %15478 = vmatprep.subr.mxu0 %v20747_v46  ;;  %15461 = vmatprep.mubr.msk.f32.mxu1 %vm18144_vm0, %v20747_v46 }
 0xab4   :  { %15504 = vmatpush3.msk.msra.mxu1 %vm1104_vm7, %v19553_v37  ;;  %15437 = vmatmul.mubr.msk.f32.gmra.mrb[174].mxu0 %vm1088_vm8, %v17246_v35 }
 0xab5   :  { %15479 = vmatpush3.msk.msra.mxu0 %vm1104_vm7, %v19550_v7  ;;  %15462 = vmatmul.mubr.msk.f32.gmra.mrb[174].mxu1 %vm1088_vm8, %v17247_v45 }
 0xab6   :  { %15439 = vmatprep.mubr.msk.f32.mxu0 %vm18144_vm0, %v20747_v46  ;;  %15464 = vmatprep.mubr.msk.f32.mxu1 %vm18144_vm0, %v20747_v46 }
 0xab7   :  { %16436 = vmatprep.subr.bf16.mxu0 %v20746_v38  ;;  %16442 = vmatprep.subr.bf16.mxu1 %v20746_v38 }
 0xab8   :  { %15440 = vmatmul.mubr.msk.f32.gmra.mrb[176].mxu0 %vm1088_vm8, %v17248_v40 }
 0xab9   :  { %15465 = vmatmul.mubr.msk.f32.gmra.mrb[176].mxu1 %vm1088_vm8, %v17249_v27  ;;  %15442 = vmatprep.mubr.msk.f32.mxu0 %vm18144_vm0, %v20747_v46 }
 0xaba   :  { %15467 = vmatprep.mubr.msk.f32.mxu1 %vm18144_vm0, %v20747_v46 }
 0xabc   :  { %15443 = vmatmul.mubr.msk.f32.gmra.mrb[178].mxu0 %vm1088_vm8, %v17250_v12 }
 0xabd   :  { %15468 = vmatmul.mubr.msk.f32.gmra.mrb[178].mxu1 %vm1088_vm8, %v17251_v22  ;;  %15480 = vmatprep.mubr.msk.f32.mxu0 %vm18144_vm0, %v20747_v46 }
 0xabe   :  { %15505 = vmatprep.mubr.msk.f32.mxu1 %vm18144_vm0, %v20747_v46 }
 0xac0   :  { %15481 = vmatmul.mubr.msk.f32.vlgmr.msra.gmra.mrb[180].mxu0 %vm1088_vm8, %v17252_v21 }
 0xac1   :  { %16438 = vmatpush3.bf16.msra.mxu0 %v16437_v51  ;;  %15506 = vmatmul.mubr.msk.f32.vlgmr.msra.gmra.mrb[180].mxu1 %vm1088_vm8, %v17253_v26 }
 0xac2   :  { %15483 = vmatprep.mubr.msk.f32.mxu0 %vm18144_vm0, %v20747_v46  ;;  %16439 = vmatprep.subr.bf16.mxu0 %v20746_v38 }
 0xac3   :  { %15508 = vmatprep.mubr.msk.f32.mxu1 %vm18144_vm0, %v20747_v46  ;;  %16443 = vmatpush3.bf16.msra.mxu1 %v18148_v44 }
 0xac4   :  { %15484 = vmatmul.mubr.msk.f32.gmra.mrb[182].mxu0 %vm1088_vm8, %v17254_v29  ;;  %16444 = vmatprep.subr.bf16.mxu1 %v20746_v38 }
 0xac5   :  { %16441 = vmatpush3.bf16.msra.mxu0 %v16440_v63  ;;  %15509 = vmatmul.mubr.msk.f32.gmra.mrb[182].mxu1 %vm1088_vm8, %v17255_v5 }
 0xac6   :  { %15486 = vmatprep.mubr.msk.f32.mxu0 %vm18144_vm0, %v20747_v46  ;;  %15528 = vmatprep.subr.mxu0 %v20747_v46 }
 0xac7   :  { %15511 = vmatprep.mubr.msk.f32.mxu1 %vm18144_vm0, %v20747_v46  ;;  %16445 = vmatpush3.bf16.msra.mxu1 %v18148_v44 }
 0xac8   :  { %15487 = vmatmul.mubr.msk.f32.gmra.mrb[184].mxu0 %vm1088_vm8, %v17256_v24  ;;  %16446 = vmatprep.subr.bf16.mxu1 %v20746_v38 }
 0xac9   :  { %15529 = vmatpush3.msk.msra.mxu0 %vm1104_vm7, %v19604_v6  ;;  %15512 = vmatmul.mubr.msk.f32.gmra.mrb[184].mxu1 %vm1088_vm8, %v17257_v31 }
 0xaca   :  { %15489 = vmatprep.mubr.msk.f32.mxu0 %vm18144_vm0, %v20747_v46  ;;  %15514 = vmatprep.mubr.msk.f32.mxu1 %vm18144_vm0, %v20747_v46 }
 0xacb   :  { %16458 = vmatprep.subr.bf16.mxu0 %v20746_v38  ;;  %16447 = vmatpush3.bf16.msra.mxu1 %v18148_v44 }
 0xacc   :  { %15490 = vmatmul.mubr.msk.f32.gmra.mrb[186].mxu0 %vm1088_vm8, %v17258_v43  ;;  %16448 = vmatprep.subr.bf16.mxu1 %v20746_v38 }
 0xacd   :  { %15515 = vmatmul.mubr.msk.f32.gmra.mrb[186].mxu1 %vm1088_vm8, %v17259_v52  ;;  %15492 = vmatprep.mubr.msk.f32.mxu0 %vm18144_vm0, %v20747_v46 }
 0xace   :  { %15517 = vmatprep.mubr.msk.f32.mxu1 %vm18144_vm0, %v20747_v46 }
 0xacf   :  { %16449 = vmatpush3.bf16.msra.mxu1 %v18148_v44 }
 0xad0   :  { %15493 = vmatmul.mubr.msk.f32.gmra.mrb[188].mxu0 %vm1088_vm8, %v17260_v55  ;;  %16450 = vmatprep.subr.bf16.mxu1 %v20746_v38 }
 0xad1   :  { %15518 = vmatmul.mubr.msk.f32.gmra.mrb[188].mxu1 %vm1088_vm8, %v17261_v2  ;;  %15530 = vmatprep.mubr.msk.f32.mxu0 %vm18144_vm0, %v20747_v46 }
 0xad2   :  { %15577 = vmatprep.mubr.msk.f32.mxu1 %vm18144_vm0, %v20747_v46 }
 0xad3   :  { %16451 = vmatpush3.bf16.msra.mxu1 %v18148_v44 }
 0xad4   :  { %15531 = vmatmul.mubr.msk.f32.vlgmr.msra.gmra.mrb[190].mxu0 %vm1088_vm8, %v17262_v15  ;;  %16452 = vmatprep.subr.bf16.mxu1 %v20746_v38 }
 0xad5   :  { %15533 = vmatprep.mubr.msk.f32.mxu0 %vm18144_vm0, %v20747_v46 }
 0xad7   :  { %16453 = vmatpush3.bf16.msra.mxu1 %v18148_v44 }
 0xad8   :  { %15534 = vmatmul.mubr.msk.f32.gmra.mrb[192].mxu0 %vm1088_vm8, %v17263_v36  ;;  %16454 = vmatprep.subr.bf16.mxu1 %v20746_v38 }
 0xad9   :  { %15536 = vmatprep.mubr.msk.f32.mxu0 %vm18144_vm0, %v20747_v46 }
 0xadb   :  { %16455 = vmatpush3.bf16.msra.mxu1 %v18148_v44 }
 0xadc   :  { %15537 = vmatmul.mubr.msk.f32.gmra.mrb[194].mxu0 %vm1088_vm8, %v17264_v39  ;;  %16456 = vmatprep.subr.bf16.mxu1 %v20746_v38 }
 0xadd   :  { %15539 = vmatprep.mubr.msk.f32.mxu0 %vm18144_vm0, %v20747_v46 }
 0xadf   :  { %16457 = vmatpush3.bf16.msra.mxu1 %v18148_v44 }
 0xae0   :  { %15540 = vmatmul.mubr.msk.f32.gmra.mrb[196].mxu0 %vm1088_vm8, %v17265_v16 }
 0xae1   :  { %15542 = vmatprep.mubr.msk.f32.mxu0 %vm18144_vm0, %v20747_v46 }
 0xae4   :  { %15543 = vmatmul.mubr.msk.f32.gmra.mrb[198].mxu0 %vm1088_vm8, %v17266_v42 }
 0xae5   :  { %15602 = vmatprep.mubr.msk.f32.mxu0 %vm18144_vm0, %v20747_v46 }
 0xb56   :  { %v4216_v48 = vpop.f32.mrb[150].mxu1 }
 0xb57   :  { %v4123_v49 = vpop.f32.mrb[150].mxu0  ;;  %v15357_v53 = vpop.f32.mrb[151].mxu1 }
 0xb58   :  { %v4217_v56 = vadd.f32 %v4216_v48, %v4123_v49  ;;  %v15332_v57 = vpop.f32.mrb[151].mxu0 }
 0xb5a   :  { %v4221_v62 = vpop.f32.mrb[152].mxu1 }
 0xb5b   :  { %v4128_v1 = vpop.f32.mrb[152].mxu0  ;;  %v15360_v3 = vpop.f32.mrb[153].mxu1 }
 0xb5c   :  { %v4222_v7 = vadd.f32 %v4221_v62, %v4128_v1  ;;  %v15335_v61 = vpop.f32.mrb[153].mxu0 }
 0xb5e   :  { %v4226_v58 = vpop.f32.mrb[154].mxu1 }
 0xb5f   :  { %v4133_v37 = vpop.f32.mrb[154].mxu0  ;;  %v15363_v18 = vpop.f32.mrb[155].mxu1 }
 0xb60   :  { %v4227_v14 = vadd.f32 %v4226_v58, %v4133_v37  ;;  %v15338_v19 = vpop.f32.mrb[155].mxu0 }
 0xb62   :  { %v4231_v25 = vpop.f32.mrb[156].mxu1 }
 0xb63   :  { %v4138_v34 = vpop.f32.mrb[156].mxu0  ;;  %v15366_v47 = vpop.f32.mrb[157].mxu1 }
 0xb64   :  { %v4232_v60 = vadd.f32 %v4231_v25, %v4138_v34  ;;  %v15341_v51 = vpop.f32.mrb[157].mxu0 }
 0xb66   :  { %v4236_v50 = vpop.f32.mrb[158].mxu1 }
 0xb67   :  { %v4143_v32 = vpop.f32.mrb[158].mxu0  ;;  %v15369_v20 = vpop.f32.mrb[159].mxu1 }
 0xb68   :  { %v4237_v10 = vadd.f32 %v4236_v50, %v4143_v32  ;;  %v15344_v23 = vpop.f32.mrb[159].mxu0 }
 0xb6a   :  { %v4407_v17 = vpop.f32.mrb[160].mxu1 }
 0xb6b   :  { %v4309_v13 = vpop.f32.mrb[160].mxu0  ;;  %v15407_v4 = vpop.f32.mrb[161].mxu1 }
 0xb6c   :  { %v4333_v63 = vadd.f32 %v4309_v13, %v4217_v56  ;;  %v15382_v59 = vpop.f32.mrb[161].mxu0 }
 0xb6e   :  { %v4431_v8 = vadd.f32 %v4407_v17, %v4333_v63  ;;  %v4412_v6 = vpop.f32.mrb[162].mxu1 }
 0xb6f   :  { %v4314_v9 = vpop.f32.mrb[162].mxu0  ;;  %v15410_v54 = vpop.f32.mrb[163].mxu1 }
 0xb70   :  { %v4334_v30 = vadd.f32 %v4314_v9, %v4222_v7  ;;  %v15385_v0 = vpop.f32.mrb[163].mxu0 }
 0xb72   :  { %v4432_v11 = vadd.f32 %v4412_v6, %v4334_v30  ;;  %v4417_v41 = vpop.f32.mrb[164].mxu1 }
 0xb73   :  { %v4319_v33 = vpop.f32.mrb[164].mxu0  ;;  %v15413_v35 = vpop.f32.mrb[165].mxu1 }
 0xb74   :  { %v4335_v45 = vadd.f32 %v4319_v33, %v4227_v14  ;;  %v15388_v40 = vpop.f32.mrb[165].mxu0 }
 0xb76   :  { %v4433_v27 = vadd.f32 %v4417_v41, %v4335_v45  ;;  %v4422_v12 = vpop.f32.mrb[166].mxu1 }
 0xb77   :  { %v4324_v22 = vpop.f32.mrb[166].mxu0  ;;  %v15416_v21 = vpop.f32.mrb[167].mxu1 }
 0xb78   :  { %v4336_v26 = vadd.f32 %v4324_v22, %v4232_v60  ;;  %v15391_v29 = vpop.f32.mrb[167].mxu0 }
 0xb7a   :  { %v4434_v5 = vadd.f32 %v4422_v12, %v4336_v26  ;;  %v4427_v24 = vpop.f32.mrb[168].mxu1 }
 0xb7b   :  { %v4329_v31 = vpop.f32.mrb[168].mxu0  ;;  %v15419_v43 = vpop.f32.mrb[169].mxu1 }
 0xb7c   :  { %v4337_v52 = vadd.f32 %v4329_v31, %v4237_v10  ;;  %v15394_v55 = vpop.f32.mrb[169].mxu0 }
 0xb7e   :  { %v4435_v2 = vadd.f32 %v4427_v24, %v4337_v52  ;;  %v4603_v15 = vpop.f32.mrb[170].mxu1 }
 0xb7f   :  { %v4505_v36 = vpop.f32.mrb[170].mxu0  ;;  %v15457_v39 = vpop.f32.mrb[171].mxu1 }
 0xb80   :  { %v4529_v16 = vadd.f32 %v4505_v36, %v4431_v8  ;;  %v15432_v42 = vpop.f32.mrb[171].mxu0 }
 0xb82   :  { %v4627_v44 = vadd.f32 %v4603_v15, %v4529_v16  ;;  %v4943_v16 = vld [vmem:[#allocation17] sm:$0xff] }
 0xb83   :  { %v4510_v28 = vpop.f32.mrb[172].mxu0 }
 0xb84   :  { %v4530_v48 = vadd.f32 %v4510_v28, %v4432_v11  ;;  %v15435_v49 = vpop.f32.mrb[173].mxu0  ;;  %v4608_v53 = vpop.f32.mrb[172].mxu1 }
 0xb85   :  { %v15460_v56 = vpop.f32.mrb[173].mxu1 }
 0xb86   :  { %v4628_v57 = vadd.f32 %v4608_v53, %v4530_v48 }
 0xb87   :  { %v4515_v62 = vpop.f32.mrb[174].mxu0 }
 0xb88   :  { %v4531_v1 = vadd.f32 %v4515_v62, %v4433_v27  ;;  %v15438_v3 = vpop.f32.mrb[175].mxu0  ;;  %v4613_v7 = vpop.f32.mrb[174].mxu1 }
 0xb89   :  { %v15463_v61 = vpop.f32.mrb[175].mxu1 }
 0xb8a   :  { %v4629_v58 = vadd.f32 %v4613_v7, %v4531_v1 }
 0xb8b   :  { %v4520_v37 = vpop.f32.mrb[176].mxu0 }
 0xb8c   :  { %v4532_v18 = vadd.f32 %v4520_v37, %v4434_v5  ;;  %v15441_v14 = vpop.f32.mrb[177].mxu0  ;;  %v4618_v19 = vpop.f32.mrb[176].mxu1  ;;  %v4945_v37 = vld [vmem:[#allocation17 + $0x10] sm:$0xff] }
 0xb8d   :  { %v15466_v25 = vpop.f32.mrb[177].mxu1 }
 0xb8e   :  { %v4630_v34 = vadd.f32 %v4618_v19, %v4532_v18 }
 0xb8f   :  { %v4525_v47 = vpop.f32.mrb[178].mxu0 }
 0xb90   :  { %v4533_v60 = vadd.f32 %v4525_v47, %v4435_v2  ;;  %v15444_v51 = vpop.f32.mrb[179].mxu0  ;;  %v4623_v50 = vpop.f32.mrb[178].mxu1  ;;  %v13922_v2 = vld [vmem:[#allocation16] ss:$0 sm:$0xff] }
 0xb91   :  { %v15469_v32 = vpop.f32.mrb[179].mxu1 }
 0xb92   :  { %v4631_v20 = vadd.f32 %v4623_v50, %v4533_v60  ;;  %v4946_v60 = vld [vmem:[#allocation17 + $0x18] sm:$0xff] }
 0xb93   :  { %v4701_v10 = vpop.f32.mrb[180].mxu0 }
 0xb94   :  { %v4725_v23 = vadd.f32 %v4701_v10, %v4627_v44  ;;  %v15482_v17 = vpop.f32.mrb[181].mxu0  ;;  %v4799_v13 = vpop.f32.mrb[180].mxu1 }
 0xb95   :  { %v15507_v4 = vpop.f32.mrb[181].mxu1 }
 0xb96   :  { %v4823_v63 = vadd.f32 %v4799_v13, %v4725_v23  ;;  %v4947_v23 = vld [vmem:[#allocation17 + $0x20] sm:$0xf] }
 0xb97   :  { %v4706_v59 = vpop.f32.mrb[182].mxu0 }
 0xb98   :  { %v4726_v8 = vadd.f32 %v4706_v59, %v4628_v57  ;;  %v15485_v6 = vpop.f32.mrb[183].mxu0  ;;  %v4804_v9 = vpop.f32.mrb[182].mxu1  ;;  %v4944_v57 = vld [vmem:[#allocation17 + $0x8] sm:$0xff] }
 0xb99   :  { %v15510_v54 = vpop.f32.mrb[183].mxu1 }
 0xb9a   :  { %v4824_v30 = vadd.f32 %v4804_v9, %v4726_v8 }
 0xb9b   :  { %v4711_v0 = vpop.f32.mrb[184].mxu0 }
 0xb9c   :  { %v4727_v11 = vadd.f32 %v4711_v0, %v4629_v58  ;;  %v15488_v41 = vpop.f32.mrb[185].mxu0  ;;  %v4809_v33 = vpop.f32.mrb[184].mxu1 }
 0xb9d   :  { %v15513_v35 = vpop.f32.mrb[185].mxu1  ;;  %v5044_v41 = vld [vmem:[#allocation19] sm:$0xff] }
 0xb9e   :  { %v4825_v45 = vadd.f32 %v4809_v33, %v4727_v11  ;;  %v5045_v35 = vld [vmem:[#allocation19 + $0x8] sm:$0xff] }
 0xb9f   :  { %v4716_v40 = vpop.f32.mrb[186].mxu0 }
 0xba0   :  { %v4728_v27 = vadd.f32 %v4716_v40, %v4630_v34  ;;  %v15491_v12 = vpop.f32.mrb[187].mxu0  ;;  %v4814_v22 = vpop.f32.mrb[186].mxu1 }
 0xba1   :  { %v15516_v21 = vpop.f32.mrb[187].mxu1 }
 0xba2   :  { %v4826_v26 = vadd.f32 %v4814_v22, %v4728_v27  ;;  %v5046_v22 = vld [vmem:[#allocation19 + $0x10] sm:$0xff] }
 0xba3   :  { %v4721_v29 = vpop.f32.mrb[188].mxu0 }
 0xba4   :  { %v4729_v5 = vadd.f32 %v4721_v29, %v4631_v20  ;;  %v15494_v24 = vpop.f32.mrb[189].mxu0  ;;  %v4819_v31 = vpop.f32.mrb[188].mxu1 }
 0xba5   :  { %v15519_v43 = vpop.f32.mrb[189].mxu1 }
 0xba6   :  { %v4827_v52 = vadd.f32 %v4819_v31, %v4729_v5  ;;  %v5048_v43 = vld [vmem:[#allocation19 + $0x20] sm:$0xf] }
 0xba7   :  { %v4897_v55 = vpop.f32.mrb[190].mxu0 }
 0xba8   :  { %v4921_v15 = vadd.f32 %v4897_v55, %v4823_v63  ;;  %v15532_v36 = vpop.f32.mrb[191].mxu0  ;;  %v5155_v55 = vld [vmem:[#allocation22] sm:$0xff] }
 0xba9   :  { %v5043_v36 = vld [vmem:[#allocation20] sm:$0x3f] }
 0xbaa   :  { %v4933_v39 = vadd.f32 %v13922_v2, %v4921_v15 }
 0xbab   :  { %v4902_v42 = vpop.f32.mrb[192].mxu0 }
 0xbac   :  { %v4938_v44 = vmax.f32 %v4933_v39, 0.0  ;;  %v4922_v28 = vadd.f32 %v4902_v42, %v4824_v30  ;;  %v15535_v48 = vpop.f32.mrb[193].mxu0  ;;  %v5158_v42 = vld [vmem:[#allocation22 + $0x18] sm:$0xff] }
 0xbae   :  { %v4948_v49 = vmul.f32 %v4943_v16, %v4938_v44  ;;  %v4934_v53 = vadd.f32 %v13922_v2, %v4922_v28  ;;  %v5157_v16 = vld [vmem:[#allocation22 + $0x10] sm:$0xff]  ;;  %v5159_v28 = vld [vmem:[#allocation22 + $0x20] sm:$0xf] }
 0xbaf   :  { %v4907_v56 = vpop.f32.mrb[194].mxu0  ;;  %v16468_v44 = vpack.c.bf16 %v5158_v42, %v5157_v16 }
 0xbb0   :  { %v4939_v62 = vmax.f32 %v4934_v53, 0.0  ;;  %v4923_v1 = vadd.f32 %v4907_v56, %v4825_v45  ;;  %v15538_v3 = vpop.f32.mrb[195].mxu0  ;;  %15578 = vmatmul.mubr.f32.vlgmr.msra.gmra.mrb[190].mxu1 %v4948_v49  ;;  %v5236_v53 = vld [vmem:[#allocation23] sm:$0xff] }
 0xbb1   :  { %15580 = vmatprep.mubr.msk.f32.mxu1 %vm18144_vm0, %v20747_v46 }
 0xbb2   :  { %v4935_v7 = vadd.f32 %v13922_v2, %v4923_v1  ;;  %v4949_v61 = vmul.f32 %v4944_v57, %v4939_v62  ;;  %v5237_v57 = vld [vmem:[#allocation23 + $0x8] sm:$0xf] }
 0xbb3   :  { %v4912_v58 = vpop.f32.mrb[196].mxu0 }
 0xbb4   :  { %v4940_v18 = vmax.f32 %v4935_v7, 0.0  ;;  %v4924_v14 = vadd.f32 %v4912_v58, %v4826_v26  ;;  %v15541_v19 = vpop.f32.mrb[197].mxu0  ;;  %15581 = vmatmul.mubr.f32.gmra.mrb[192].mxu1 %v4949_v61  ;;  %v5047_v26 = vld [vmem:[#allocation19 + $0x18] sm:$0xff] }
 0xbb5   :  { %15583 = vmatprep.mubr.msk.f32.mxu1 %vm18144_vm0, %v20747_v46 }
 0xbb6   :  { %v4936_v25 = vadd.f32 %v13922_v2, %v4924_v14  ;;  %v4950_v34 = vmul.f32 %v4945_v37, %v4940_v18 }
 0xbb7   :  { %v4917_v47 = vpop.f32.mrb[198].mxu0 }
 0xbb8   :  { %v4941_v51 = vmax.f32 %v4936_v25, 0.0  ;;  %v4925_v50 = vadd.f32 %v4917_v47, %v4827_v52  ;;  %15584 = vmatmul.mubr.f32.gmra.mrb[194].mxu1 %v4950_v34  ;;  %v15544_v32 = vpop.f32.mrb[199].mxu0 }
 0xbb9   :  { %15586 = vmatprep.mubr.msk.f32.mxu1 %vm18144_vm0, %v20747_v46 }
 0xbba   :  { %v4937_v20 = vadd.f32 %v13922_v2, %v4925_v50  ;;  %v4951_v10 = vmul.f32 %v4946_v60, %v4941_v51  ;;  %v5156_v2 = vld [vmem:[#allocation22 + $0x8] sm:$0xff]  ;;  %v5350_v50 = vld [vmem:[#allocation25] sm:$0x3f] }
 0xbbb   :  { %v16465_v39 = vpack.c.bf16 %v5156_v2, %v5155_v55 }
 0xbbc   :  { %v4942_v17 = vmax.f32 %v4937_v20, 0.0  ;;  %15587 = vmatmul.mubr.f32.gmra.mrb[196].mxu1 %v4951_v10 }
 0xbbd   :  { %15589 = vmatprep.mubr.msk.f32.mxu1 %vm18144_vm0, %v20747_v46 }
 0xbbe   :  { %v4952_v13 = vmul.f32 %v4947_v23, %v4942_v17 }
 0xbc0   :  { %15590 = vmatmul.mubr.f32.gmra.mrb[198].mxu1 %v4952_v13 }
 0xbc1   :  { %15620 = vmatprep.mubr.msk.f32.mxu1 %vm721_vm4, %v5236_v53 }
 0xc83   :  { %v5019_v4 = vpop.f32.mrb[190].mxu1 }
 0xc84   :  { %5051 = vperm.xlu0 %17139, %v5019_v4   ;;  %v15579_v63 = vpop.f32.mrb[191].mxu1 }
 0xc87   :  { %v5024_v59 = vpop.f32.mrb[192].mxu1 }
 0xc88   :  { %5056 = vperm.xlu1 %17140, %v5024_v59   ;;  %v15582_v8 = vpop.f32.mrb[193].mxu1 }
 0xc8b   :  { %v5029_v6 = vpop.f32.mrb[194].mxu1 }
 0xc8c   :  { %5061 = vperm.xlu1 %17140, %v5029_v6   ;;  %v15585_v9 = vpop.f32.mrb[195].mxu1 }
 0xc8f   :  { %v5034_v54 = vpop.f32.mrb[196].mxu1 }
 0xc90   :  { %5066 = vperm.xlu0 %17139, %v5034_v54   ;;  %v15588_v30 = vpop.f32.mrb[197].mxu1 }
 0xc91   :  { %v19772_v30 = vld [vmem:[#allocation34] sm:$0xf] }
 0xc93   :  { %v5039_v0 = vpop.f32.mrb[198].mxu1 }
 0xc94   :  { %5071 = vperm.xlu1 %17140, %v5039_v0   ;;  %v15591_v11 = vpop.f32.mrb[199].mxu1  ;;  %v19774_v0 = vld [vmem:[#allocation35] sm:$0xf] }
 0xc95   :  { %v5732_v11 = vld [vmem:[#allocation37] sm:$0xff] }
 0xd03   :  { %v5052_v33 = vpop.permute.xlu0 %5051 }
 0xd04   :  { %v5074_v40 = vmul.f32 %v5052_v33, %v5044_v41  ;;  %v5733_v41 = vld [vmem:[#allocation37 + $0x8] sm:$0xff] }
 0xd05   :  { %v19786_v33 = vpack.c.bf16 %v5733_v41, %v5732_v11 }
 0xd07   :  { %v5057_v45 = vpop.permute.xlu1 %5056 }
 0xd08   :  { %v5075_v27 = vmul.f32 %v5057_v45, %v5045_v35  ;;  %v19806_v35 = vld [vmem:[#allocation37 + $0x10] sm:$0x3] }
 0xd0a   :  { %v16459_v12 = vpack.c.bf16 %v5075_v27, %v5074_v40 }
 0xd0b   :  { %v5062_v21 = vpop.permute.xlu1 %5061 }
 0xd0c   :  { %16460 = vmatpush3.bf16.msra.mxu0 %v16459_v12  ;;  %v5076_v5 = vmul.f32 %v5062_v21, %v5046_v22 }
 0xd0d   :  { %16461 = vmatprep.subr.bf16.mxu0 %v20746_v38 }
 0xd0f   :  { %v5067_v29 = vpop.permute.xlu0 %5066 }
 0xd10   :  { %v5077_v24 = vmul.f32 %v5067_v29, %v5047_v26 }
 0xd12   :  { %v16462_v31 = vpack.c.bf16 %v5077_v24, %v5076_v5 }
 0xd13   :  { %v5072_v52 = vpop.permute.xlu1 %5071 }
 0xd14   :  { %16463 = vmatpush3.bf16.msra.mxu0 %v16462_v31  ;;  %v5078_v15 = vmul.f32 %v5072_v52, %v5048_v43  ;;  %v19820_v31 = vld [vmem:[#allocation38] sm:$0x3f] }
 0xd15   :  { %15600 = vmatprep.subr.mxu0 %v20747_v46 }
 0xd18   :  { %15601 = vmatpush3.msk.msra.mxu0 %vm1104_vm7, %v5078_v15 }
 0xd19   :  { %15603 = vmatmul.mubr.msk.f32.vlgmr.msra.gmra.mrb[200].mxu0 %vm1088_vm8, %v5043_v36  ;;  %16464 = vmatprep.subr.bf16.mxu0 %v20746_v38 }
 0xd1a   :  { %16466 = vmatpush3.bf16.msra.mxu0 %v16465_v39  ;;  %15615 = vmatprep.mubr.msk.f32.mxu0 %vm18144_vm0, %v20747_v46 }
 0xd1b   :  { %16467 = vmatprep.subr.bf16.mxu0 %v20746_v38 }
 0xd1e   :  { %16469 = vmatpush3.bf16.msra.mxu0 %v16468_v44 }
 0xd1f   :  { %15613 = vmatprep.subr.mxu0 %v20747_v46 }
 0xd22   :  { %15614 = vmatpush3.msk.msra.mxu0 %vm1104_vm7, %v5159_v28 }
 0xd23   :  { %15623 = vmatprep.subr.msk.mxu0 %vm737_vm3, %v5350_v50 }
 0xdec   :  { %v5151_v48 = vpop.f32.mrb[200].mxu0 }
 0xded   :  { %v15604_v49 = vpop.f32.mrb[201].mxu0  ;;  %15616 = vmatmul.mubr.msk.f32.vlgmr.msra.gmra.mrb[202].mxu0 %vm1088_vm8, %v5151_v48 }
 0xdee   :  { %15624 = vmatpush3.msk.msra.mxu0 %vm737_vm3, %v5350_v50 }
 0xdef   :  { %15633 = vmatprep.subr.mxu0 %v20747_v46 }
 0xec0   :  { %v5232_v56 = vpop.f32.mrb[202].mxu0 }
 0xec1   :  { %v15617_v62 = vpop.f32.mrb[203].mxu0  ;;  %15618 = vmatprep.subr.msk.mxu1 %vm737_vm3, %v5232_v56 }
 0xec2   :  { %15619 = vmatpush3.msk.msra.mxu1 %vm737_vm3, %v5232_v56 }
 0xec3   :  { %15621 = vmatmul.mubr.msk.f32.vlgmr.msra.gmra.mrb[200].mxu1 %vm721_vm4, %v5237_v57  ;;  %15628 = vmatprep.subr.mxu1 %v20747_v46 }
 0xec4   :  { %15630 = vmatprep.mubr.msk.f32.mxu1 %vm18144_vm0, %v20747_v46 }
 0xf96   :  { %v19753_v1 = vpop.f32.mrb[200].mxu1 }
 0xf97   :  { %v19755_v3 = vpop.f32.mrb[201].mxu1  ;;  %v5326_v7 = vsel %vm5325_vm11, %v19753_v1, 0.0 }
 0xf98   :  { %5327 = vadd.xlane.f32.xlu1 %v5326_v7  ;;  %v5322_v61 = vsel %vm721_vm4, %v19755_v3, 0.0  ;;  %v19840_v7 = vld [vmem:[#allocation40 + $0x2] sm:$0x3] }
 0xf99   :  { %5323 = vadd.xlane.f32.xlu0 %v5322_v61  ;;  %v19842_v61 = vld [vmem:[#allocation40] sm:$0x3] }
0x1025   :  { %v5328_v58 = vpop.xlane.xlu1 %5327 }
0x1026   :  { %v5331_v37 = vmul.f32 0.16666667, %v5328_v58  ;;  %v5324_v18 = vpop.xlane.xlu0 %5323  ;;  %v19852_v58 = vld [vmem:[#allocation26] sm:$0x3f] }
0x1027   :  { %v5330_v14 = vmul.f32 0.16666667, %v5324_v18 }
0x1028   :  { %v5333_v19 = vsub.f32 %v19753_v1, %v5331_v37 }
0x1029   :  { %v5332_v25 = vsub.f32 %v19755_v3, %v5330_v14 }
0x102a   :  { %v5335_v60 = vmul.f32 %v5333_v19, %v5333_v19 }
0x102b   :  { %v5334_v34 = vmul.f32 %v5332_v25, %v5332_v25 }
0x102c   :  { %v5339_v51 = vsel %vm5325_vm11, %v5335_v60, 0.0 }
0x102d   :  { %v5336_v47 = vsel %vm721_vm4, %v5334_v34, 0.0 }
0x102e   :  { %5337 = vadd.xlane.f32.xlu0 %v5336_v47 }
0x1032   :  { %5340 = vadd.xlane.f32.xlu0 %v5339_v51 }
0x10bb   :  { %v5338_v32 = vpop.xlane.xlu0 %5337 }
0x10bc   :  { %v5342_v20 = vmul.f32 0.16666667, %v5338_v32 }
0x10be   :  { %v5344_v10 = vadd.f32 1e-05, %v5342_v20 }
0x10bf   :  { %v5341_v23 = vpop.xlane.xlu0 %5340 }
0x10c0   :  { %17141 = vrsqrt.f32 %v5344_v10  ;;  %v5343_v17 = vmul.f32 0.16666667, %v5341_v23 }
0x10c2   :  { %v5345_v13 = vadd.f32 1e-05, %v5343_v17 }
0x10c4   :  { %17143 = vrsqrt.f32 %v5345_v13 }
0x10ca   :  { %v17142_v4 = vpop.eup %17141 }
0x10cb   :  { %v5348_v63 = vmul.f32 %v17142_v4, %v5332_v25 }
0x10cd   :  { %15625 = vmatprep.mubr.msk.f32.mxu0 %vm721_vm4, %v5348_v63 }
0x10ce   :  { %v17144_v59 = vpop.eup %17143 }
0x10cf   :  { %v5349_v8 = vmul.f32 %v17144_v59, %v5333_v19 }
0x10d1   :  { %15626 = vmatmul.mubr.msk.f32.vlgmr.msra.gmra.mrb[204].mxu0 %vm721_vm4, %v5349_v8 }
0x10d2   :  { %15635 = vmatprep.mubr.msk.f32.mxu0 %vm18144_vm0, %v20747_v46 }
0x11a4   :  { %v15627_v6 = vpop.f32.mrb[204].mxu0 }
0x11a5   :  { %v5426_v9 = vpop.f32.mrb[205].mxu0 }
0x11a6   :  { %v5437_v54 = vrot.slane %v5426_v9, 4 }
0x11a8   :  { %15629 = vmatpush3.msk.msra.mxu1 %vm1104_vm7, %v5437_v54  ;;  %15634 = vmatpush3.msk.msra.mxu0 %vm1104_vm7, %v5437_v54 }
0x11a9   :  { %15631 = vmatmul.mubr.msk.f32.vlgmr.msra.gmra.mrb[202].mxu1 %vm5438_vm12, %v19772_v30  ;;  %15636 = vmatmul.mubr.msk.f32.vlgmr.msra.gmra.mrb[206].mxu0 %vm5438_vm12, %v19774_v0 }
0x11aa   :  { %15638 = vmatprep.subr.mxu1 %v20747_v46  ;;  %15643 = vmatprep.subr.mxu0 %v20747_v46 }
0x11ab   :  { %15639 = vmatpush3.msk.msra.mxu1 %vm1104_vm7, %v15627_v6  ;;  %15644 = vmatpush3.msk.msra.mxu0 %vm1104_vm7, %v15627_v6 }
0x11ac   :  { %15640 = vmatprep.mubr.msk.f32.mxu1 %vm18144_vm0, %v20747_v46  ;;  %15645 = vmatprep.mubr.msk.f32.mxu0 %vm18144_vm0, %v20747_v46 }
0x11ad   :  { %16470 = vmatprep.subr.bf16.mxu1 %v20746_v38  ;;  %16473 = vmatprep.subr.bf16.mxu0 %v20746_v38 }
0x11ae   :  { %15641 = vmatmul.mubr.msk.f32.vlgmr.msra.gmra.mrb[204].mxu1 %vm5438_vm12, %v19772_v30  ;;  %15646 = vmatmul.mubr.msk.f32.vlgmr.msra.gmra.mrb[208].mxu0 %vm5438_vm12, %v19774_v0 }
0x11af   :  { %16472 = vmatpush3.bf16.msra.mxu1 %v19786_v33  ;;  %16475 = vmatpush3.bf16.msra.mxu0 %v19786_v33 }
0x11b0   :  { %15652 = vmatprep.subr.mxu1 %v20747_v46  ;;  %15661 = vmatprep.subr.mxu0 %v20747_v46 }
0x11b1   :  { %15654 = vmatprep.mubr.msk.f32.mxu1 %vm18144_vm0, %v20747_v46  ;;  %15663 = vmatprep.mubr.msk.f32.mxu0 %vm18144_vm0, %v20747_v46 }
0x11b3   :  { %15653 = vmatpush3.msk.msra.mxu1 %vm5739_vm13, %v19806_v35  ;;  %15662 = vmatpush3.msk.msra.mxu0 %vm5739_vm13, %v19806_v35 }
0x11b4   :  { %15666 = vmatprep.subr.mxu1 %v20747_v46  ;;  %15671 = vmatprep.subr.mxu0 %v20747_v46 }
0x127c   :  { %v5510_v45 = vpop.f32.mrb[202].mxu1  ;;  %v5584_v40 = vpop.f32.mrb[206].mxu0 }
0x127d   :  { %v5731_v27 = vmul.f32 %v5510_v45, %v5426_v9  ;;  %v5814_v12 = vmul.f32 %v5584_v40, %v5426_v9  ;;  %v15632_v22 = vpop.f32.mrb[203].mxu1  ;;  %v15637_v21 = vpop.f32.mrb[207].mxu0 }
0x127f   :  { %15655 = vmatmul.mubr.msk.f32.vlgmr.msra.gmra.mrb[206].mxu1 %vm5735_vm14, %v5731_v27  ;;  %15664 = vmatmul.mubr.msk.f32.vlgmr.msra.gmra.mrb[210].mxu0 %vm5735_vm14, %v5814_v12 }
0x1280   :  { %15668 = vmatprep.mubr.msk.f32.mxu1 %vm18144_vm0, %v20747_v46  ;;  %15673 = vmatprep.mubr.msk.f32.mxu0 %vm18144_vm0, %v20747_v46 }
0x1281   :  { %v5657_v26 = vpop.f32.mrb[204].mxu1  ;;  %v5727_v29 = vpop.f32.mrb[208].mxu0  ;;  %15667 = vmatpush3.msk.msra.mxu1 %vm737_vm3, %v19820_v31  ;;  %15672 = vmatpush3.msk.msra.mxu0 %vm737_vm3, %v19820_v31 }
0x1282   :  { %v15642_v5 = vpop.f32.mrb[205].mxu1  ;;  %v15647_v24 = vpop.f32.mrb[209].mxu0  ;;  %15676 = vmatprep.subr.mxu1 %v20747_v46  ;;  %15686 = vmatprep.subr.mxu0 %v20747_v46 }
0x1352   :  { %v5809_v43 = vpop.f32.mrb[206].mxu1  ;;  %v5884_v52 = vpop.f32.mrb[210].mxu0 }
0x1353   :  { %v5813_v55 = vmul.f32 0.4082483, %v5809_v43  ;;  %v5888_v2 = vmul.f32 0.4082483, %v5884_v52  ;;  %v15656_v15 = vpop.f32.mrb[207].mxu1  ;;  %v15665_v36 = vpop.f32.mrb[211].mxu0 }
0x1354   :  { %v19891_v52 = vld [vmem:[#allocation41 + $0x4] sm:$0xf]  ;;  %v19903_v36 = vld [vmem:[#allocation41] sm:$0xf] }
0x1355   :  { %v5889_v39 = vmax.f32 %v5813_v55, %v5888_v2 }
0x1357   :  { %v5890_v16 = vsub.f32 %v5813_v55, %v5889_v39  ;;  %v5893_v42 = vsub.f32 %v5888_v2, %v5889_v39  ;;  %v6756_v39 = vrot.slane %v19755_v3, 4 }
0x1359   :  { %v5891_v44 = vmul.f32 1.442695, %v5890_v16  ;;  %v5894_v28 = vmul.f32 1.442695, %v5893_v42 }
0x135b   :  { %17145 = vpow2.f32 %v5891_v44 }
0x135c   :  { %17147 = vpow2.f32 %v5894_v28  ;;  %v19925_v28 = vld [vmem:[#allocation28] sm:$0x3f] }
0x1365   :  { %v17146_v48 = vpop.eup %17145 }
0x1366   :  { %v17148_v49 = vpop.eup %17147 }
0x1367   :  { %v5896_v53 = vadd.f32 %v17148_v49, %v17146_v48 }
0x1369   :  { %17149 = vrcp.f32 %v5896_v53 }
0x1373   :  { %v17150_v56 = vpop.eup %17149 }
0x1374   :  { %v5899_v57 = vmul.f32 %v17150_v56, %v17146_v48  ;;  %v5900_v62 = vmul.f32 %v17150_v56, %v17148_v49 }
0x1376   :  { %15669 = vmatmul.mubr.msk.f32.vlgmr.msra.gmra.mrb[208].mxu1 %vm721_vm4, %v5899_v57  ;;  %15674 = vmatmul.mubr.msk.f32.vlgmr.msra.gmra.mrb[212].mxu0 %vm721_vm4, %v5900_v62  ;;  %v6057_v62 = vld [vmem:[#allocation31] sm:$0xff] }
0x1377   :  { %15677 = vmatpush3.msk.msra.mxu1 %vm1104_vm7, %v19755_v3  ;;  %15687 = vmatpush3.msk.msra.mxu0 %vm1104_vm7, %v19755_v3 }
0x1378   :  { %15688 = vmatprep.mubr.msk.f32.mxu0 %vm18144_vm0, %v20747_v46  ;;  %15678 = vmatprep.mubr.msk.f32.mxu1 %vm18144_vm0, %v20747_v46 }
0x1379   :  { %15691 = vmatprep.subr.mxu0 %v20747_v46  ;;  %15681 = vmatprep.subr.mxu1 %v20747_v46 }
0x137a   :  { %15689 = vmatmul.mubr.msk.f32.vlgmr.msra.gmra.mrb[214].mxu0 %vm5438_vm12, %v19840_v7  ;;  %15679 = vmatmul.mubr.msk.f32.vlgmr.msra.gmra.mrb[210].mxu1 %vm5438_vm12, %v19842_v61 }
0x137b   :  { %15693 = vmatprep.mubr.msk.f32.mxu0 %vm18144_vm0, %v20747_v46  ;;  %15683 = vmatprep.mubr.msk.f32.mxu1 %vm18144_vm0, %v20747_v46 }
0x137c   :  { %15692 = vmatpush3.msk.msra.mxu0 %vm737_vm3, %v19852_v58  ;;  %15682 = vmatpush3.msk.msra.mxu1 %vm737_vm3, %v19852_v58 }
0x137d   :  { %15696 = vmatprep.subr.mxu1 %v20747_v46  ;;  %15706 = vmatprep.subr.mxu0 %v20747_v46 }
0x1449   :  { %v5974_v37 = vpop.f32.mrb[208].mxu1  ;;  %v6048_v18 = vpop.f32.mrb[212].mxu0 }
0x144a   :  { %v5978_v14 = vmul.f32 %v5974_v37, %v5657_v26  ;;  %v6052_v19 = vmul.f32 %v6048_v18, %v5727_v29  ;;  %v15670_v25 = vpop.f32.mrb[209].mxu1  ;;  %v15675_v34 = vpop.f32.mrb[213].mxu0  ;;  %v6058_v37 = vld [vmem:[#allocation31 + $0x8] sm:$0xff] }
0x144b   :  { %v19946_v18 = vpack.c.bf16 %v6058_v37, %v6057_v62 }
0x144c   :  { %v19860_v47 = vadd.f32 %v6052_v19, %v5978_v14  ;;  %v19950_v14 = vld [vmem:[#allocation31 + $0x10] sm:$0xff]  ;;  %v19954_v19 = vld [vmem:[#allocation29] ss:$0 sm:$0xff] }
0x144e   :  { %6235 = vrot.lane.b32.xlu1 %v19860_v47, %s18150_s15  ;;  %v19865_v60 = vrot.slane %v19860_v47, 2 }
0x1450   :  { %6063 = vrot.lane.b32.xlu0 %v19865_v60, %s18151_s12 }
0x14c0   :  { %v6236_v51 = vpop.permute.xlu1 %6235 }
0x14c1   :  { %v6239_v50 = vsel %vm601_vm2, %v6236_v51, %v19865_v60 }
0x14c2   :  { %v6064_v32 = vpop.permute.xlu0 %6063  ;;  %15694 = vmatmul.mubr.msk.f32.vlgmr.msra.gmra.mrb[214].mxu0 %vm721_vm4, %v6239_v50 }
0x14c3   :  { %v6066_v20 = vsel %vm601_vm2, %v19860_v47, %v6064_v32  ;;  %15708 = vmatprep.mubr.msk.f32.mxu0 %vm18144_vm0, %v20747_v46  ;;  %15707 = vmatpush3.msk.msra.mxu0 %vm737_vm3, %v19925_v28 }
0x14c4   :  { %15684 = vmatmul.mubr.msk.f32.vlgmr.msra.gmra.mrb[210].mxu1 %vm721_vm4, %v6066_v20  ;;  %16476 = vmatprep.subr.bf16.mxu0 %v20746_v38 }
0x14c5   :  { %15698 = vmatprep.mubr.msk.f32.mxu1 %vm18144_vm0, %v20747_v46 }
0x1595   :  { %v6384_v10 = vpop.f32.mrb[214].mxu0 }
0x1596   :  { %v15695_v23 = vpop.f32.mrb[215].mxu0  ;;  %v6388_v17 = vsel %vm6220_vm15, %v6384_v10, 0.0 }
0x1597   :  { %6389 = vadd.xlane.f32.xlu1 %v6388_v17  ;;  %v6216_v13 = vpop.f32.mrb[210].mxu1 }
0x1598   :  { %v15685_v4 = vpop.f32.mrb[211].mxu1  ;;  %v6221_v63 = vsel %vm6220_vm15, %v6216_v13, 0.0 }
0x1599   :  { %6222 = vadd.xlane.f32.xlu0 %v6221_v63 }
0x1624   :  { %v6390_v59 = vpop.xlane.xlu1 %6389 }
0x1625   :  { %v6391_v8 = vmul.f32 0.16666667, %v6390_v59 }
0x1626   :  { %v6223_v6 = vpop.xlane.xlu0 %6222 }
0x1627   :  { %v6392_v9 = vsub.f32 %v6384_v10, %v6391_v8  ;;  %v6224_v54 = vmul.f32 0.16666667, %v6223_v6 }
0x1629   :  { %v6225_v11 = vsub.f32 %v6216_v13, %v6224_v54  ;;  %v6393_v41 = vmul.f32 %v6392_v9, %v6392_v9 }
0x162b   :  { %v6394_v45 = vsel %vm6220_vm15, %v6393_v41, 0.0  ;;  %v6226_v40 = vmul.f32 %v6225_v11, %v6225_v11 }
0x162c   :  { %6395 = vadd.xlane.f32.xlu1 %v6394_v45 }
0x162d   :  { %v6227_v27 = vsel %vm6220_vm15, %v6226_v40, 0.0 }
0x162e   :  { %6228 = vadd.xlane.f32.xlu0 %v6227_v27 }
0x163d   :  { %6915 = vrot.lane.b32.xlu1 %v19860_v47, %s18152_s8 }
0x1641   :  { %6749 = vrot.lane.b32.xlu1 %v19860_v47, %s18153_s28 }
0x1644   :  { %6918 = vrot.lane.b32.xlu0 %v19865_v60, %s18153_s28 }
0x1645   :  { %6752 = vrot.lane.b32.xlu1 %v19865_v60, %s18150_s15 }
0x16b9   :  { %v6396_v12 = vpop.xlane.xlu1 %6395 }
0x16ba   :  { %v6397_v22 = vmul.f32 0.16666667, %v6396_v12  ;;  %v18156_v12 = vmov -1.0  }
0x16bb   :  { %v6229_v21 = vpop.xlane.xlu0 %6228 }
0x16bc   :  { %v6398_v26 = vadd.f32 1e-05, %v6397_v22  ;;  %v6230_v29 = vmul.f32 0.16666667, %v6229_v21 }
0x16bd   :  { %v19901_v15 = vpop.permute.xlu1 %6915 }
0x16be   :  { %17151 = vrsqrt.f32 %v6398_v26  ;;  %v6231_v5 = vadd.f32 1e-05, %v6230_v29 }
0x16c0   :  { %17153 = vrsqrt.f32 %v6231_v5 }
0x16c1   :  { %v6750_v16 = vpop.permute.xlu1 %6749 }
0x16c5   :  { %v6753_v42 = vpop.permute.xlu1 %6752 }
0x16c6   :  { %v6755_v44 = vsel %vm601_vm2, %v6750_v16, %v6753_v42 }
0x16c8   :  { %v17152_v24 = vpop.eup %17151 }
0x16c9   :  { %v6400_v43 = vmul.f32 %v17152_v24, %v6392_v9  ;;  %v6919_v24 = vpop.permute.xlu0 %6918 }
0x16ca   :  { %v17154_v55 = vpop.eup %17153  ;;  %v6921_v3 = vsel %vm601_vm2, %v19901_v15, %v6919_v24 }
0x16cb   :  { %15697 = vmatpush3.msk.msra.mxu1 %vm5739_vm13, %v6400_v43  ;;  %v6233_v2 = vmul.f32 %v17154_v55, %v6225_v11 }
0x16cc   :  { %15699 = vmatmul.mubr.msk.f32.vlgmr.msra.gmra.mrb[212].mxu1 %vm6403_vm1, %v19891_v52  ;;  %15701 = vmatprep.subr.mxu1 %v20747_v46 }
0x16cd   :  { %15702 = vmatpush3.msk.msra.mxu1 %vm5739_vm13, %v6233_v2  ;;  %15703 = vmatprep.mubr.msk.f32.mxu1 %vm18144_vm0, %v20747_v46 }
0x16ce   :  { %15720 = vmatprep.subr.mxu1 %v20747_v46 }
0x16d4   :  { %15704 = vmatmul.mubr.msk.f32.vlgmr.msra.gmra.mrb[212].mxu1 %vm6403_vm1, %v19903_v36 }
0x16d5   :  { %15721 = vmatpush3.msk.msra.mxu1 %vm1104_vm7, %v6756_v39  ;;  %15722 = vmatprep.mubr.msk.f32.mxu1 %vm18144_vm0, %v20747_v46 }
0x16d6   :  { %15725 = vmatprep.subr.mxu1 %v20747_v46 }
0x16d8   :  { %15723 = vmatmul.mubr.msk.f32.vlgmr.msra.gmra.mrb[214].mxu1 %vm5438_vm12, %v19842_v61 }
0x16d9   :  { %15726 = vmatpush3.msk.msra.mxu1 %vm737_vm3, %v19852_v58  ;;  %15727 = vmatprep.mubr.msk.f32.mxu1 %vm18144_vm0, %v20747_v46 }
0x16da   :  { %15740 = vmatprep.subr.mxu1 %v20747_v46 }
0x16e0   :  { %15728 = vmatmul.mubr.msk.f32.vlgmr.msra.gmra.mrb[214].mxu1 %vm721_vm4, %v6755_v44 }
0x16e1   :  { %15742 = vmatprep.mubr.msk.f32.mxu1 %vm18144_vm0, %v20747_v46 }
0x17a7   :  { %v19930_v48 = vpop.f32.mrb[212].mxu1 }
0x17a8   :  { %15709 = vmatmul.mubr.msk.f32.vlgmr.msra.gmra.mrb[216].mxu0 %vm721_vm4, %v19930_v48  ;;  %v15705_v49 = vpop.f32.mrb[213].mxu1 }
0x17a9   :  { %15717 = vmatprep.mubr.msk.f32.mxu0 %vm18144_vm0, %v20747_v46  ;;  %16478 = vmatpush3.bf16.msra.mxu0 %v19946_v18 }
0x17aa   :  { %15715 = vmatprep.subr.mxu0 %v20747_v46 }
0x17ad   :  { %15716 = vmatpush3.msra.mxu0 %v19950_v14 }
0x17ae   :  { %15730 = vmatprep.subr.mxu0 %v20747_v46 }
0x17b3   :  { %v19936_v53 = vpop.f32.mrb[214].mxu1 }
0x17b4   :  { %v15729_v56 = vpop.f32.mrb[215].mxu1  ;;  %v6902_v57 = vsel %vm6220_vm15, %v19936_v53, 0.0 }
0x17b5   :  { %6903 = vadd.xlane.f32.xlu1 %v6902_v57 }
0x17c6   :  { %7736 = vrot.lane.b32.xlu1 %v19860_v47, %s18154_s25 }
0x17ca   :  { %7570 = vrot.lane.b32.xlu1 %v19860_v47, %s18155_s21 }
0x17ce   :  { %7573 = vrot.lane.b32.xlu1 %v19865_v60, %s18152_s8 }
0x1842   :  { %v6904_v15 = vpop.xlane.xlu1 %6903 }
0x1843   :  { %v6905_v44 = vmul.f32 0.16666667, %v6904_v15 }
0x1845   :  { %v6906_v57 = vsub.f32 %v19936_v53, %v6905_v44 }
0x187b   :  { %v6634_v25 = vpop.f32.mrb[216].mxu0 }
0x187c   :  { %v6635_v34 = vadd.f32 %v19954_v19, %v6634_v25  ;;  %v15710_v47 = vpop.f32.mrb[217].mxu0 }
0x187e   :  { %v6639_v51 = vmul.f32 0.70710677, %v6635_v34  ;;  %v6638_v26 = vmul.f32 0.5, %v6635_v34  ;;  %v6907_v34 = vmul.f32 %v6906_v57, %v6906_v57 }
0x1880   :  { %v6642_v50 = vand.u32 2147483647, %v6639_v51  ;;  %vm6640_vm5 = vcmp.ge.f32.partialorder %v6639_v51, 0.0 }
0x1881   :  { %v6641_v22 = vsel %vm6640_vm5, 1.0, %v18156_v12 }
0x1882   :  { %v6643_v32 = vmul.f32 0.3275911, %v6642_v50  ;;  %v6656_v10 = vsub.f32 0.0, %v6642_v50 }
0x1884   :  { %v6644_v20 = vadd.f32 1.0, %v6643_v32  ;;  %v6657_v17 = vmul.f32 %v6656_v10, %v6642_v50 }
0x1886   :  { %17155 = vrcp.f32 %v6644_v20  ;;  %v6658_v63 = vmul.f32 1.442695, %v6657_v17 }
0x1888   :  { %17157 = vpow2.f32 %v6658_v63 }
0x1890   :  { %v17156_v23 = vpop.eup %17155 }
0x1891   :  { %v6647_v13 = vmul.f32 1.0614054, %v17156_v23 }
0x1892   :  { %v17158_v45 = vpop.eup %17157 }
0x1893   :  { %v6648_v4 = vadd.f32 -1.4531521, %v6647_v13 }
0x1895   :  { %v6649_v59 = vmul.f32 %v17156_v23, %v6648_v4 }
0x1897   :  { %v6650_v8 = vadd.f32 1.4214138, %v6649_v59 }
0x1899   :  { %v6651_v6 = vmul.f32 %v17156_v23, %v6650_v8 }
0x189b   :  { %v6652_v9 = vadd.f32 -0.28449672, %v6651_v6 }
0x189d   :  { %v6653_v54 = vmul.f32 %v17156_v23, %v6652_v9 }
0x189f   :  { %v6654_v11 = vadd.f32 0.2548296, %v6653_v54 }
0x18a1   :  { %v6655_v41 = vmul.f32 %v17156_v23, %v6654_v11 }
0x18a3   :  { %v6660_v40 = vmul.f32 %v17158_v45, %v6655_v41 }
0x18a5   :  { %v6661_v27 = vsub.f32 1.0, %v6660_v40 }
0x18a7   :  { %v6662_v21 = vmul.f32 %v6661_v27, %v6641_v22 }
0x18a9   :  { %v6663_v29 = vadd.f32 1.0, %v6662_v21 }
0x18ab   :  { %v6664_v5 = vmul.f32 %v6663_v29, %v6638_v26 }
0x18ad   :  { %15718 = vmatmul.mubr.msk.f32.vlgmr.msra.gmra.mrb[218].mxu0 %vm6665_vm6, %v6664_v5 }
0x18ae   :  { %15731 = vmatpush3.msk.msra.mxu0 %vm1104_vm7, %v6756_v39  ;;  %15732 = vmatprep.mubr.msk.f32.mxu0 %vm18144_vm0, %v20747_v46 }
0x18af   :  { %15735 = vmatprep.subr.mxu0 %v20747_v46 }
0x18b1   :  { %15733 = vmatmul.mubr.msk.f32.vlgmr.msra.gmra.mrb[220].mxu0 %vm5438_vm12, %v19840_v7 }
0x18b2   :  { %15736 = vmatpush3.msk.msra.mxu0 %vm737_vm3, %v19852_v58  ;;  %15737 = vmatprep.mubr.msk.f32.mxu0 %vm18144_vm0, %v20747_v46 }
0x18b3   :  { %15750 = vmatprep.subr.mxu0 %v20747_v46 }
0x18b9   :  { %15738 = vmatmul.mubr.msk.f32.vlgmr.msra.gmra.mrb[220].mxu0 %vm721_vm4, %v6921_v3 }
0x18ba   :  { %15751 = vmatpush3.msk.msra.mxu0 %vm737_vm3, %v19925_v28  ;;  %15752 = vmatprep.mubr.msk.f32.mxu0 %vm18144_vm0, %v20747_v46 }
0x18bb   :  { %16479 = vmatprep.subr.bf16.mxu0 %v20746_v38 }
0x1980   :  { %v6735_v43 = vpop.f32.mrb[218].mxu0 }
0x1981   :  { %v19981_v55 = vadd.f32 %v6735_v43, %v19930_v48  ;;  %v15719_v2 = vpop.f32.mrb[219].mxu0  ;;  %v6908_v48 = vsel %vm6220_vm15, %v6907_v34, 0.0 }
0x198c   :  { %v7061_v39 = vpop.f32.mrb[220].mxu0 }
0x198d   :  { %v15739_v16 = vpop.f32.mrb[221].mxu0  ;;  %v7065_v42 = vsel %vm6220_vm15, %v7061_v39, 0.0 }
0x198e   :  { %7066 = vadd.xlane.f32.xlu0 %v7065_v42 }
0x1a1b   :  { %v7067_v49 = vpop.xlane.xlu0 %7066 }
0x1a1c   :  { %v7068_v56 = vmul.f32 0.16666667, %v7067_v49  ;;  %v7737_v49 = vpop.permute.xlu1 %7736 }
0x1a1e   :  { %v7069_v62 = vsub.f32 %v7061_v39, %v7068_v56 }
0x1a20   :  { %v7070_v37 = vmul.f32 %v7069_v62, %v7069_v62 }
0x1a22   :  { %v7071_v25 = vsel %vm6220_vm15, %v7070_v37, 0.0  ;;  %v7571_v37 = vpop.permute.xlu1 %7570 }
0x1a23   :  { %7072 = vadd.xlane.f32.xlu0 %v7071_v25 }
0x1a26   :  { %v7574_v25 = vpop.permute.xlu1 %7573 }
0x1a27   :  { %6909 = vadd.xlane.f32.xlu0 %v6908_v48  ;;  %v7576_v34 = vsel %vm601_vm2, %v7571_v37, %v7574_v25  ;;  %v20024_v48 = vld [vmem:[#allocation43 + $0x10] sm:$0xff] }
0x1a3d   :  { %7739 = vrot.lane.b32.xlu0 %v19865_v60, %s18155_s21 }
0x1ab0   :  { %v7073_v47 = vpop.xlane.xlu0 %7072 }
0x1ab1   :  { %v7074_v51 = vmul.f32 0.16666667, %v7073_v47 }
0x1ab3   :  { %v7075_v50 = vadd.f32 1e-05, %v7074_v51 }
0x1ab4   :  { %v6910_v32 = vpop.xlane.xlu0 %6909 }
0x1ab5   :  { %17159 = vrsqrt.f32 %v7075_v50  ;;  %v6911_v20 = vmul.f32 0.16666667, %v6910_v32  ;;  %v20028_v32 = vld [vmem:[#allocation32] ss:$0 sm:$0xff] }
0x1ab7   :  { %v6912_v10 = vadd.f32 1e-05, %v6911_v20 }
0x1ab9   :  { %17161 = vrsqrt.f32 %v6912_v10  ;;  %v20031_v10 = vld [vmem:[#allocation43 + $0x18] sm:$0xf] }
0x1abf   :  { %v17160_v53 = vpop.eup %17159 }
0x1ac0   :  { %v7077_v23 = vmul.f32 %v17160_v53, %v7069_v62  ;;  %v6746_v53 = vadd.f32 %v20028_v32, %v19981_v55  ;;  %v20046_v55 = vld [vmem:[#allocation43 + $0x8] sm:$0xf] }
0x1ac2   :  { %15741 = vmatpush3.msk.msra.mxu1 %vm5739_vm13, %v7077_v23  ;;  %v20036_v23 = vld [vmem:[#allocation43] sm:$0xff] }
0x1ac3   :  { %v17162_v17 = vpop.eup %17161  ;;  %15743 = vmatmul.mubr.msk.f32.vlgmr.msra.gmra.mrb[216].mxu1 %vm6403_vm1, %v19891_v52  ;;  %15745 = vmatprep.subr.mxu1 %v20747_v46 }
0x1ac4   :  { %v6914_v13 = vmul.f32 %v17162_v17, %v6906_v57  ;;  %15747 = vmatprep.mubr.msk.f32.mxu1 %vm18144_vm0, %v20747_v46 }
0x1ac6   :  { %15746 = vmatpush3.msk.msra.mxu1 %vm5739_vm13, %v6914_v13 }
0x1acb   :  { %15748 = vmatmul.mubr.msk.f32.vlgmr.msra.gmra.mrb[216].mxu1 %vm6403_vm1, %v19903_v36 }
0x1acc   :  { %15766 = vmatprep.mubr.msk.f32.mxu1 %vm5438_vm12, %v20024_v48 }
0x1b9e   :  { %v7220_v60 = vpop.f32.mrb[216].mxu1 }
0x1b9f   :  { %15753 = vmatmul.mubr.msk.f32.vlgmr.msra.gmra.mrb[222].mxu0 %vm721_vm4, %v7220_v60  ;;  %v15749_v4 = vpop.f32.mrb[217].mxu1 }
0x1ba0   :  { %16481 = vmatpush3.bf16.msra.mxu0 %v19946_v18  ;;  %15761 = vmatprep.mubr.msk.f32.mxu0 %vm18144_vm0, %v20747_v46  ;;  %v7740_v4 = vpop.permute.xlu0 %7739 }
0x1ba1   :  { %15759 = vmatprep.subr.mxu0 %v20747_v46 }
0x1ba4   :  { %15760 = vmatpush3.msra.mxu0 %v19950_v14 }
0x1ba5   :  { %15774 = vmatprep.subr.mxu0 %v20747_v46 }
0x1c72   :  { %v7293_v63 = vpop.f32.mrb[222].mxu0 }
0x1c73   :  { %v7294_v59 = vadd.f32 %v19954_v19, %v7293_v63  ;;  %v15754_v8 = vpop.f32.mrb[223].mxu0  ;;  %v7742_v63 = vsel %vm601_vm2, %v7737_v49, %v7740_v4 }
0x1c75   :  { %v7298_v6 = vmul.f32 0.70710677, %v7294_v59  ;;  %v7297_v56 = vmul.f32 0.5, %v7294_v59 }
0x1c77   :  { %v7301_v9 = vand.u32 2147483647, %v7298_v6  ;;  %vm7299_vm8 = vcmp.ge.f32.partialorder %v7298_v6, 0.0 }
0x1c78   :  { %v7300_v15 = vsel %vm7299_vm8, 1.0, %v18156_v12 }
0x1c79   :  { %v7302_v54 = vmul.f32 0.3275911, %v7301_v9  ;;  %v7315_v41 = vsub.f32 0.0, %v7301_v9 }
0x1c7b   :  { %v7303_v11 = vadd.f32 1.0, %v7302_v54  ;;  %v7316_v40 = vmul.f32 %v7315_v41, %v7301_v9 }
0x1c7d   :  { %17163 = vrcp.f32 %v7303_v11  ;;  %v7317_v21 = vmul.f32 1.442695, %v7316_v40 }
0x1c7f   :  { %17165 = vpow2.f32 %v7317_v21 }
0x1c87   :  { %v17164_v45 = vpop.eup %17163 }
0x1c88   :  { %v7306_v27 = vmul.f32 1.0614054, %v17164_v45 }
0x1c89   :  { %v17166_v39 = vpop.eup %17165 }
0x1c8a   :  { %v7307_v22 = vadd.f32 -1.4531521, %v7306_v27 }
0x1c8c   :  { %v7308_v26 = vmul.f32 %v17164_v45, %v7307_v22 }
0x1c8e   :  { %v7309_v29 = vadd.f32 1.4214138, %v7308_v26 }
0x1c90   :  { %v7310_v5 = vmul.f32 %v17164_v45, %v7309_v29 }
0x1c92   :  { %v7311_v24 = vadd.f32 -0.28449672, %v7310_v5 }
0x1c94   :  { %v7312_v3 = vmul.f32 %v17164_v45, %v7311_v24 }
0x1c96   :  { %v7313_v43 = vadd.f32 0.2548296, %v7312_v3 }
0x1c98   :  { %v7314_v2 = vmul.f32 %v17164_v45, %v7313_v43 }
0x1c9a   :  { %v7319_v16 = vmul.f32 %v17166_v39, %v7314_v2 }
0x1c9c   :  { %v7320_v42 = vsub.f32 1.0, %v7319_v16 }
0x1c9e   :  { %v7321_v44 = vmul.f32 %v7320_v42, %v7300_v15 }
0x1ca0   :  { %v7322_v57 = vadd.f32 1.0, %v7321_v44 }
0x1ca2   :  { %v7323_v62 = vmul.f32 %v7322_v57, %v7297_v56 }
0x1ca4   :  { %15762 = vmatmul.mubr.msk.f32.vlgmr.msra.gmra.mrb[224].mxu0 %vm6665_vm6, %v7323_v62 }
0x1ca5   :  { %15775 = vmatpush3.msk.msra.mxu0 %vm1104_vm7, %v19753_v1  ;;  %15776 = vmatprep.mubr.msk.f32.mxu0 %vm18144_vm0, %v20747_v46 }
0x1ca6   :  { %15779 = vmatprep.subr.mxu0 %v20747_v46 }
0x1ca8   :  { %15777 = vmatmul.mubr.msk.f32.vlgmr.msra.gmra.mrb[226].mxu0 %vm5438_vm12, %v19842_v61 }
0x1ca9   :  { %15780 = vmatpush3.msk.msra.mxu0 %vm737_vm3, %v19852_v58  ;;  %15781 = vmatprep.mubr.msk.f32.mxu0 %vm18144_vm0, %v20747_v46 }
0x1caa   :  { %15794 = vmatprep.subr.mxu0 %v20747_v46 }
0x1cb0   :  { %15782 = vmatmul.mubr.msk.f32.vlgmr.msra.gmra.mrb[226].mxu0 %vm721_vm4, %v7576_v34 }
0x1cb1   :  { %15796 = vmatprep.mubr.msk.f32.mxu0 %vm18144_vm0, %v20747_v46 }
0x1d77   :  { %v7393_v47 = vpop.f32.mrb[224].mxu0 }
0x1d78   :  { %v7397_v51 = vadd.f32 %v7393_v47, %v7220_v60  ;;  %v15763_v50 = vpop.f32.mrb[225].mxu0 }
0x1d7a   :  { %v7398_v20 = vadd.f32 %v20028_v32, %v7397_v51 }
0x1d7c   :  { %15764 = vmatprep.subr.msk.mxu1 %vm1104_vm7, %v7398_v20 }
0x1d7d   :  { %15765 = vmatpush3.msk.msra.mxu1 %vm1104_vm7, %v7398_v20 }
0x1d7e   :  { %15767 = vmatmul.mubr.msk.f32.vlgmr.msra.gmra.mrb[218].mxu1 %vm5438_vm12, %v20031_v10  ;;  %15769 = vmatprep.subr.msk.mxu1 %vm1104_vm7, %v6746_v53 }
0x1d7f   :  { %15770 = vmatpush3.msk.msra.mxu1 %vm1104_vm7, %v6746_v53  ;;  %15771 = vmatprep.mubr.msk.f32.mxu1 %vm5438_vm12, %v20036_v23 }
0x1d80   :  { %15784 = vmatprep.subr.mxu1 %v20747_v46 }
0x1d83   :  { %v7719_v17 = vpop.f32.mrb[226].mxu0 }
0x1d84   :  { %v15783_v13 = vpop.f32.mrb[227].mxu0  ;;  %v7723_v60 = vsel %vm6220_vm15, %v7719_v17, 0.0 }
0x1d85   :  { %7724 = vadd.xlane.f32.xlu1 %v7723_v60 }
0x1d86   :  { %15772 = vmatmul.mubr.msk.f32.vlgmr.msra.gmra.mrb[218].mxu1 %vm5438_vm12, %v20046_v55 }
0x1d87   :  { %15785 = vmatpush3.msk.msra.mxu1 %vm1104_vm7, %v19753_v1  ;;  %15786 = vmatprep.mubr.msk.f32.mxu1 %vm18144_vm0, %v20747_v46 }
0x1d88   :  { %15789 = vmatprep.subr.mxu1 %v20747_v46 }
0x1d8a   :  { %15787 = vmatmul.mubr.msk.f32.vlgmr.msra.gmra.mrb[220].mxu1 %vm5438_vm12, %v19840_v7 }
0x1d8b   :  { %15790 = vmatpush3.msk.msra.mxu1 %vm737_vm3, %v19852_v58  ;;  %15791 = vmatprep.mubr.msk.f32.mxu1 %vm18144_vm0, %v20747_v46 }
0x1d8c   :  { %15804 = vmatprep.subr.mxu1 %v20747_v46 }
0x1d92   :  { %15792 = vmatmul.mubr.msk.f32.vlgmr.msra.gmra.mrb[220].mxu1 %vm721_vm4, %v7742_v63 }
0x1d93   :  { %15805 = vmatpush3.msk.msra.mxu1 %vm737_vm3, %v19925_v28  ;;  %15806 = vmatprep.mubr.msk.f32.mxu1 %vm18144_vm0, %v20747_v46 }
0x1d94   :  { %16482 = vmatprep.subr.bf16.mxu1 %v20746_v38 }
0x1e12   :  { %v7725_v8 = vpop.xlane.xlu1 %7724 }
0x1e13   :  { %v7726_v6 = vmul.f32 0.16666667, %v7725_v8 }
0x1e15   :  { %v7727_v11 = vsub.f32 %v7719_v17, %v7726_v6 }
0x1e17   :  { %v7728_v28 = vmul.f32 %v7727_v11, %v7727_v11 }
0x1e19   :  { %v7729_v27 = vsel %vm6220_vm15, %v7728_v28, 0.0  ;;  %v20096_v28 = vld [vmem:[#allocation43 + $0x28] sm:$0xf] }
0x1e65   :  { %v7882_v1 = vpop.f32.mrb[220].mxu1 }
0x1e66   :  { %v15793_v58 = vpop.f32.mrb[221].mxu1  ;;  %v7886_v59 = vsel %vm6220_vm15, %v7882_v1, 0.0 }
0x1e67   :  { %7887 = vadd.xlane.f32.xlu0 %v7886_v59 }
0x1ef4   :  { %v7888_v9 = vpop.xlane.xlu0 %7887 }
0x1ef5   :  { %v7889_v54 = vmul.f32 0.16666667, %v7888_v9 }
0x1ef7   :  { %v7890_v41 = vsub.f32 %v7882_v1, %v7889_v54  ;;  %v20091_v54 = vld [vmem:[#allocation43 + $0x20] sm:$0xff] }
0x1ef9   :  { %v7891_v45 = vmul.f32 %v7890_v41, %v7890_v41 }
0x1efb   :  { %v7892_v40 = vsel %vm6220_vm15, %v7891_v45, 0.0 }
0x1efc   :  { %7893 = vadd.xlane.f32.xlu0 %v7892_v40 }
0x1f00   :  { %7730 = vadd.xlane.f32.xlu0 %v7729_v27 }
0x1f89   :  { %v7894_v22 = vpop.xlane.xlu0 %7893 }
0x1f8a   :  { %v7895_v21 = vmul.f32 0.16666667, %v7894_v22 }
0x1f8c   :  { %v7896_v26 = vadd.f32 1e-05, %v7895_v21 }
0x1f8d   :  { %v7731_v29 = vpop.xlane.xlu0 %7730 }
0x1f8e   :  { %17167 = vrsqrt.f32 %v7896_v26  ;;  %v7732_v5 = vmul.f32 0.16666667, %v7731_v29 }
0x1f90   :  { %v7733_v24 = vadd.f32 1e-05, %v7732_v5 }
0x1f92   :  { %17169 = vrsqrt.f32 %v7733_v24 }
0x1f98   :  { %v17168_v3 = vpop.eup %17167 }
0x1f99   :  { %v7898_v43 = vmul.f32 %v17168_v3, %v7890_v41 }
0x1f9b   :  { %15795 = vmatpush3.msk.msra.mxu0 %vm5739_vm13, %v7898_v43 }
0x1f9c   :  { %v17170_v2 = vpop.eup %17169  ;;  %15797 = vmatmul.mubr.msk.f32.vlgmr.msra.gmra.mrb[228].mxu0 %vm6403_vm1, %v19891_v52  ;;  %15799 = vmatprep.subr.mxu0 %v20747_v46 }
0x1f9d   :  { %v7735_v39 = vmul.f32 %v17170_v2, %v7727_v11  ;;  %15801 = vmatprep.mubr.msk.f32.mxu0 %vm18144_vm0, %v20747_v46 }
0x1f9f   :  { %15800 = vmatpush3.msk.msra.mxu0 %vm5739_vm13, %v7735_v39 }
0x1fa4   :  { %15802 = vmatmul.mubr.msk.f32.vlgmr.msra.gmra.mrb[228].mxu0 %vm6403_vm1, %v19903_v36 }
0x2077   :  { %v8041_v16 = vpop.f32.mrb[228].mxu0 }
0x2078   :  { %15807 = vmatmul.mubr.msk.f32.vlgmr.msra.gmra.mrb[222].mxu1 %vm721_vm4, %v8041_v16  ;;  %v15803_v42 = vpop.f32.mrb[229].mxu0 }
0x2079   :  { %16484 = vmatpush3.bf16.msra.mxu1 %v19946_v18  ;;  %15815 = vmatprep.mubr.msk.f32.mxu1 %vm18144_vm0, %v20747_v46 }
0x207a   :  { %15813 = vmatprep.subr.mxu1 %v20747_v46 }
0x207d   :  { %15814 = vmatpush3.msra.mxu1 %v19950_v14 }
0x214b   :  { %v8114_v15 = vpop.f32.mrb[222].mxu1 }
0x214c   :  { %v8115_v44 = vadd.f32 %v19954_v19, %v8114_v15  ;;  %v15808_v49 = vpop.f32.mrb[223].mxu1  ;;  %v8336_v15 = vld [vmem:[#allocation25 + $0x8] sm:$0x3f] }
0x214d   :  { %15823 = vmatprep.subr.msk.mxu0 %vm737_vm3, %v8336_v15 }
0x214e   :  { %v8119_v56 = vmul.f32 0.70710677, %v8115_v44  ;;  %v8118_v8 = vmul.f32 0.5, %v8115_v44  ;;  %15824 = vmatpush3.msk.msra.mxu0 %vm737_vm3, %v8336_v15 }
0x214f   :  { %15828 = vmatprep.subr.mxu0 %v20747_v46 }
0x2150   :  { %v8122_v57 = vand.u32 2147483647, %v8119_v56  ;;  %vm8120_vm9 = vcmp.ge.f32.partialorder %v8119_v56, 0.0 }
0x2151   :  { %v8121_v58 = vsel %vm8120_vm9, 1.0, %v18156_v12 }
0x2152   :  { %v8123_v62 = vmul.f32 0.3275911, %v8122_v57  ;;  %v8136_v25 = vsub.f32 0.0, %v8122_v57 }
0x2154   :  { %v8124_v37 = vadd.f32 1.0, %v8123_v62  ;;  %v8137_v47 = vmul.f32 %v8136_v25, %v8122_v57 }
0x2156   :  { %17171 = vrcp.f32 %v8124_v37  ;;  %v8138_v50 = vmul.f32 1.442695, %v8137_v47 }
0x2158   :  { %17173 = vpow2.f32 %v8138_v50 }
0x2160   :  { %v17172_v34 = vpop.eup %17171 }
0x2161   :  { %v8127_v18 = vmul.f32 1.0614054, %v17172_v34 }
0x2162   :  { %v17174_v4 = vpop.eup %17173 }
0x2163   :  { %v8128_v51 = vadd.f32 -1.4531521, %v8127_v18 }
0x2165   :  { %v8129_v20 = vmul.f32 %v17172_v34, %v8128_v51 }
0x2167   :  { %v8130_v53 = vadd.f32 1.4214138, %v8129_v20 }
0x2169   :  { %v8131_v17 = vmul.f32 %v17172_v34, %v8130_v53 }
0x216b   :  { %v8132_v14 = vadd.f32 -0.28449672, %v8131_v17 }
0x216d   :  { %v8133_v13 = vmul.f32 %v17172_v34, %v8132_v14 }
0x216f   :  { %v8134_v60 = vadd.f32 0.2548296, %v8133_v13 }
0x2171   :  { %v8135_v19 = vmul.f32 %v17172_v34, %v8134_v60 }
0x2173   :  { %v8140_v63 = vmul.f32 %v17174_v4, %v8135_v19 }
0x2175   :  { %v8141_v1 = vsub.f32 1.0, %v8140_v63 }
0x2177   :  { %v8142_v59 = vmul.f32 %v8141_v1, %v8121_v58 }
0x2179   :  { %v8143_v6 = vadd.f32 1.0, %v8142_v59 }
0x217b   :  { %v8144_v9 = vmul.f32 %v8143_v6, %v8118_v8 }
0x217d   :  { %15816 = vmatmul.mubr.msk.f32.vlgmr.msra.gmra.mrb[224].mxu1 %vm6665_vm6, %v8144_v9 }
0x217e   :  { %15820 = vmatprep.mubr.msk.f32.mxu1 %vm5438_vm12, %v20091_v54 }
0x2250   :  { %v8214_v11 = vpop.f32.mrb[224].mxu1 }
0x2251   :  { %v8218_v41 = vadd.f32 %v8214_v11, %v8041_v16  ;;  %v15817_v45 = vpop.f32.mrb[225].mxu1 }
0x2253   :  { %v8219_v40 = vadd.f32 %v20028_v32, %v8218_v41 }
0x2255   :  { %15818 = vmatprep.subr.msk.mxu1 %vm1104_vm7, %v8219_v40 }
0x2256   :  { %15819 = vmatpush3.msk.msra.mxu1 %vm1104_vm7, %v8219_v40 }
0x2257   :  { %15821 = vmatmul.mubr.msk.f32.vlgmr.msra.gmra.mrb[218].mxu1 %vm5438_vm12, %v20096_v28  ;;  %15838 = vmatprep.subr.mxu1 %v20747_v46 }
0x2258   :  { %15840 = vmatprep.mubr.msk.f32.mxu1 %vm18144_vm0, %v20747_v46 }
0x232a   :  { %v20105_v27 = vpop.f32.mrb[218].mxu1 }
0x232b   :  { %v20107_v22 = vpop.f32.mrb[219].mxu1  ;;  %v8312_v32 = vsel %vm5325_vm11, %v20105_v27, 0.0 }
0x232c   :  { %8313 = vadd.xlane.f32.xlu0 %v8312_v32  ;;  %v8309_v21 = vsel %vm721_vm4, %v20107_v22, 0.0 }
0x232d   :  { %8310 = vadd.xlane.f32.xlu1 %v8309_v21 }
0x23b9   :  { %v8314_v26 = vpop.xlane.xlu0 %8313 }
0x23ba   :  { %v8316_v29 = vmul.f32 0.16666667, %v8314_v26  ;;  %v8311_v5 = vpop.xlane.xlu1 %8310 }
0x23bb   :  { %v8315_v24 = vmul.f32 0.16666667, %v8311_v5 }
0x23bc   :  { %v8318_v3 = vsub.f32 %v20105_v27, %v8316_v29 }
0x23bd   :  { %v8317_v43 = vsub.f32 %v20107_v22, %v8315_v24  ;;  %v20189_v24 = vld [vmem:[#allocation26 + $0x8] sm:$0x3f] }
0x23be   :  { %v8320_v2 = vmul.f32 %v8318_v3, %v8318_v3 }
0x23bf   :  { %v8319_v39 = vmul.f32 %v8317_v43, %v8317_v43 }
0x23c0   :  { %v8324_v16 = vsel %vm5325_vm11, %v8320_v2, 0.0 }
0x23c1   :  { %8325 = vadd.xlane.f32.xlu0 %v8324_v16  ;;  %v8321_v42 = vsel %vm721_vm4, %v8319_v39, 0.0 }
0x23c2   :  { %8322 = vadd.xlane.f32.xlu1 %v8321_v42 }
0x244e   :  { %v8326_v44 = vpop.xlane.xlu0 %8325 }
0x244f   :  { %v8328_v49 = vmul.f32 0.16666667, %v8326_v44  ;;  %v8323_v56 = vpop.xlane.xlu1 %8322 }
0x2450   :  { %v8327_v57 = vmul.f32 0.16666667, %v8323_v56 }
0x2451   :  { %v8330_v62 = vadd.f32 1e-05, %v8328_v49 }
0x2452   :  { %v8329_v37 = vadd.f32 1e-05, %v8327_v57 }
0x2453   :  { %17175 = vrsqrt.f32 %v8330_v62 }
0x2454   :  { %17177 = vrsqrt.f32 %v8329_v37 }
0x245d   :  { %v17176_v25 = vpop.eup %17175 }
0x245e   :  { %v17178_v34 = vpop.eup %17177  ;;  %v8334_v18 = vmul.f32 %v17176_v25, %v8318_v3 }
0x245f   :  { %v8333_v47 = vmul.f32 %v17178_v34, %v8317_v43 }
0x2461   :  { %15825 = vmatprep.mubr.msk.f32.mxu0 %vm721_vm4, %v8333_v47 }
0x2462   :  { %15826 = vmatmul.mubr.msk.f32.vlgmr.msra.gmra.mrb[230].mxu0 %vm721_vm4, %v8334_v18 }
0x2463   :  { %15830 = vmatprep.mubr.msk.f32.mxu0 %vm18144_vm0, %v20747_v46 }
0x2535   :  { %v15827_v51 = vpop.f32.mrb[230].mxu0 }
0x2536   :  { %v8412_v50 = vpop.f32.mrb[231].mxu0  ;;  %15839 = vmatpush3.msk.msra.mxu1 %vm1104_vm7, %v15827_v51 }
0x2537   :  { %v8422_v20 = vrot.slane %v8412_v50, 4  ;;  %16485 = vmatprep.subr.bf16.mxu1 %v20746_v38  ;;  %15841 = vmatmul.mubr.msk.f32.vlgmr.msra.gmra.mrb[226].mxu1 %vm5438_vm12, %v19772_v30 }
0x2538   :  { %16487 = vmatpush3.bf16.msra.mxu1 %v19786_v33  ;;  %15854 = vmatprep.mubr.msk.f32.mxu1 %vm18144_vm0, %v20747_v46 }
0x2539   :  { %15829 = vmatpush3.msk.msra.mxu0 %vm1104_vm7, %v8422_v20  ;;  %15852 = vmatprep.subr.mxu1 %v20747_v46 }
0x253a   :  { %15831 = vmatmul.mubr.msk.f32.vlgmr.msra.gmra.mrb[232].mxu0 %vm5438_vm12, %v19772_v30  ;;  %15833 = vmatprep.subr.mxu0 %v20747_v46  ;;  %v17267_v30 = vld [vmem:[#allocation35] sm:$0xf] }
0x253b   :  { %15834 = vmatpush3.msk.msra.mxu0 %vm1104_vm7, %v8422_v20  ;;  %15835 = vmatprep.mubr.msk.f32.mxu0 %vm18144_vm0, %v20747_v46 }
0x253c   :  { %15843 = vmatprep.subr.mxu0 %v20747_v46  ;;  %15853 = vmatpush3.msk.msra.mxu1 %vm5739_vm13, %v19806_v35 }
0x253d   :  { %15866 = vmatprep.subr.mxu1 %v20747_v46 }
0x253e   :  { %15836 = vmatmul.mubr.msk.f32.vlgmr.msra.gmra.mrb[234].mxu0 %vm5438_vm12, %v19774_v0 }
0x253f   :  { %15844 = vmatpush3.msk.msra.mxu0 %vm1104_vm7, %v15827_v51  ;;  %15845 = vmatprep.mubr.msk.f32.mxu0 %vm18144_vm0, %v20747_v46 }
0x2540   :  { %16488 = vmatprep.subr.bf16.mxu0 %v20746_v38 }
0x2542   :  { %15846 = vmatmul.mubr.msk.f32.vlgmr.msra.gmra.mrb[236].mxu0 %vm5438_vm12, %v17267_v30 }
0x2543   :  { %16490 = vmatpush3.bf16.msra.mxu0 %v19786_v33  ;;  %15863 = vmatprep.mubr.msk.f32.mxu0 %vm18144_vm0, %v20747_v46 }
0x2544   :  { %15861 = vmatprep.subr.mxu0 %v20747_v46 }
0x2547   :  { %15862 = vmatpush3.msk.msra.mxu0 %vm5739_vm13, %v19806_v35 }
0x2548   :  { %15871 = vmatprep.subr.mxu0 %v20747_v46 }
0x260a   :  { %v8634_v0 = vpop.f32.mrb[226].mxu1 }
0x260b   :  { %v15842_v53 = vpop.f32.mrb[227].mxu1 }
0x260d   :  { %v8491_v17 = vpop.f32.mrb[232].mxu0 }
0x260e   :  { %v8708_v14 = vmul.f32 %v8491_v17, %v8412_v50  ;;  %v15832_v13 = vpop.f32.mrb[233].mxu0 }
0x2610   :  { %15855 = vmatmul.mubr.msk.f32.vlgmr.msra.gmra.mrb[228].mxu1 %vm5735_vm14, %v8708_v14 }
0x2611   :  { %v8561_v60 = vpop.f32.mrb[234].mxu0  ;;  %15867 = vmatpush3.msk.msra.mxu1 %vm737_vm3, %v19820_v31  ;;  %15868 = vmatprep.mubr.msk.f32.mxu1 %vm18144_vm0, %v20747_v46 }
0x2612   :  { %v8783_v33 = vmul.f32 %v8561_v60, %v8412_v50  ;;  %v15837_v19 = vpop.f32.mrb[235].mxu0  ;;  %15876 = vmatprep.subr.mxu1 %v20747_v46 }
0x2614   :  { %15864 = vmatmul.mubr.msk.f32.vlgmr.msra.gmra.mrb[238].mxu0 %vm5735_vm14, %v8783_v33 }
0x2615   :  { %15872 = vmatpush3.msk.msra.mxu0 %vm737_vm3, %v19820_v31  ;;  %15873 = vmatprep.mubr.msk.f32.mxu0 %vm18144_vm0, %v20747_v46  ;;  %v8704_v35 = vpop.f32.mrb[236].mxu0 }
0x2616   :  { %15886 = vmatprep.subr.mxu0 %v20747_v46  ;;  %v15847_v4 = vpop.f32.mrb[237].mxu0 }
0x26e3   :  { %v8778_v63 = vpop.f32.mrb[228].mxu1 }
0x26e4   :  { %v15856_v1 = vpop.f32.mrb[229].mxu1  ;;  %v8782_v59 = vmul.f32 0.4082483, %v8778_v63 }
0x26e7   :  { %v8853_v58 = vpop.f32.mrb[238].mxu0 }
0x26e8   :  { %v8857_v8 = vmul.f32 0.4082483, %v8853_v58  ;;  %v15865_v6 = vpop.f32.mrb[239].mxu0 }
0x26ea   :  { %v8858_v9 = vmax.f32 %v8782_v59, %v8857_v8 }
0x26ec   :  { %v8859_v11 = vsub.f32 %v8782_v59, %v8858_v9  ;;  %v8862_v41 = vsub.f32 %v8857_v8, %v8858_v9  ;;  %v9703_v9 = vrot.slane %v20107_v22, 4 }
0x26ee   :  { %v8860_v45 = vmul.f32 1.442695, %v8859_v11  ;;  %v8863_v40 = vmul.f32 1.442695, %v8862_v41  ;;  %v20247_v11 = vld [vmem:[#allocation40] sm:$0x3] }
0x26f0   :  { %17179 = vpow2.f32 %v8860_v45  ;;  %v20260_v45 = vld [vmem:[#allocation28 + $0x8] sm:$0x3f] }
0x26f1   :  { %17181 = vpow2.f32 %v8863_v40 }
0x26fa   :  { %v17180_v31 = vpop.eup %17179 }
0x26fb   :  { %v17182_v32 = vpop.eup %17181 }
0x26fc   :  { %v8865_v21 = vadd.f32 %v17182_v32, %v17180_v31 }
0x26fe   :  { %17183 = vrcp.f32 %v8865_v21 }
0x2708   :  { %v17184_v26 = vpop.eup %17183 }
0x2709   :  { %v8868_v29 = vmul.f32 %v17184_v26, %v17180_v31  ;;  %v8869_v5 = vmul.f32 %v17184_v26, %v17182_v32 }
0x270b   :  { %15869 = vmatmul.mubr.msk.f32.vlgmr.msra.gmra.mrb[230].mxu1 %vm721_vm4, %v8868_v29  ;;  %15874 = vmatmul.mubr.msk.f32.vlgmr.msra.gmra.mrb[240].mxu0 %vm721_vm4, %v8869_v5  ;;  %v9026_v29 = vld [vmem:[#allocation31 + $0x18] sm:$0xff]  ;;  %v9027_v5 = vld [vmem:[#allocation31 + $0x20] sm:$0xff] }
0x270c   :  { %15877 = vmatpush3.msk.msra.mxu1 %vm1104_vm7, %v20107_v22  ;;  %15887 = vmatpush3.msk.msra.mxu0 %vm1104_vm7, %v20107_v22 }
0x270d   :  { %15888 = vmatprep.mubr.msk.f32.mxu0 %vm18144_vm0, %v20747_v46  ;;  %15878 = vmatprep.mubr.msk.f32.mxu1 %vm18144_vm0, %v20747_v46 }
0x270e   :  { %15891 = vmatprep.subr.mxu0 %v20747_v46  ;;  %15881 = vmatprep.subr.mxu1 %v20747_v46 }
0x270f   :  { %15889 = vmatmul.mubr.msk.f32.vlgmr.msra.gmra.mrb[242].mxu0 %vm5438_vm12, %v19840_v7  ;;  %15879 = vmatmul.mubr.msk.f32.vlgmr.msra.gmra.mrb[232].mxu1 %vm5438_vm12, %v19842_v61 }
0x2710   :  { %15893 = vmatprep.mubr.msk.f32.mxu0 %vm18144_vm0, %v20747_v46  ;;  %15883 = vmatprep.mubr.msk.f32.mxu1 %vm18144_vm0, %v20747_v46 }
0x2711   :  { %15892 = vmatpush3.msk.msra.mxu0 %vm737_vm3, %v20189_v24  ;;  %15882 = vmatpush3.msk.msra.mxu1 %vm737_vm3, %v20189_v24 }
0x2712   :  { %15896 = vmatprep.subr.mxu1 %v20747_v46  ;;  %15906 = vmatprep.subr.mxu0 %v20747_v46 }
0x27de   :  { %v8939_v7 = vpop.f32.mrb[230].mxu1  ;;  %v9013_v61 = vpop.f32.mrb[240].mxu0 }
0x27df   :  { %v8943_v3 = vmul.f32 %v8939_v7, %v8634_v0  ;;  %v9017_v43 = vmul.f32 %v9013_v61, %v8704_v35  ;;  %v15870_v2 = vpop.f32.mrb[231].mxu1  ;;  %v15875_v39 = vpop.f32.mrb[241].mxu0  ;;  %v20281_v7 = vpack.c.bf16 %v9027_v5, %v9026_v29  ;;  %v20285_v61 = vld [vmem:[#allocation31 + $0x28] sm:$0xff] }
0x27e1   :  { %v20197_v16 = vadd.f32 %v9017_v43, %v8943_v3  ;;  %v20289_v3 = vld [vmem:[#allocation29 + $0x1] ss:$0 sm:$0xff] }
0x27e3   :  { %9199 = vrot.lane.b32.xlu1 %v20197_v16, %s18150_s15  ;;  %v20202_v42 = vrot.slane %v20197_v16, 2 }
0x27e5   :  { %9033 = vrot.lane.b32.xlu0 %v20202_v42, %s18151_s12 }
0x2855   :  { %v9200_v15 = vpop.permute.xlu1 %9199 }
0x2856   :  { %v9203_v44 = vsel %vm601_vm2, %v9200_v15, %v20202_v42 }
0x2857   :  { %v9034_v49 = vpop.permute.xlu0 %9033  ;;  %15894 = vmatmul.mubr.msk.f32.vlgmr.msra.gmra.mrb[242].mxu0 %vm721_vm4, %v9203_v44 }
0x2858   :  { %v9036_v56 = vsel %vm601_vm2, %v20197_v16, %v9034_v49  ;;  %15908 = vmatprep.mubr.msk.f32.mxu0 %vm18144_vm0, %v20747_v46  ;;  %15907 = vmatpush3.msk.msra.mxu0 %vm737_vm3, %v20260_v45 }
0x2859   :  { %15884 = vmatmul.mubr.msk.f32.vlgmr.msra.gmra.mrb[232].mxu1 %vm721_vm4, %v9036_v56  ;;  %16491 = vmatprep.subr.bf16.mxu0 %v20746_v38 }
0x285a   :  { %15898 = vmatprep.mubr.msk.f32.mxu1 %vm18144_vm0, %v20747_v46 }
0x292a   :  { %v9343_v57 = vpop.f32.mrb[242].mxu0 }
0x292b   :  { %v15895_v62 = vpop.f32.mrb[243].mxu0  ;;  %v9347_v37 = vsel %vm6220_vm15, %v9343_v57, 0.0 }
0x292c   :  { %v9182_v25 = vpop.f32.mrb[232].mxu1  ;;  %9348 = vadd.xlane.f32.xlu1 %v9347_v37 }
0x292d   :  { %v15885_v34 = vpop.f32.mrb[233].mxu1  ;;  %v9186_v47 = vsel %vm6220_vm15, %v9182_v25, 0.0 }
0x292e   :  { %9187 = vadd.xlane.f32.xlu0 %v9186_v47 }
0x29b9   :  { %v9349_v18 = vpop.xlane.xlu1 %9348 }
0x29ba   :  { %v9350_v51 = vmul.f32 0.16666667, %v9349_v18 }
0x29bb   :  { %v9188_v50 = vpop.xlane.xlu0 %9187 }
0x29bc   :  { %v9351_v20 = vsub.f32 %v9343_v57, %v9350_v51  ;;  %v9189_v30 = vmul.f32 0.16666667, %v9188_v50 }
0x29be   :  { %v9190_v0 = vsub.f32 %v9182_v25, %v9189_v30  ;;  %v9352_v53 = vmul.f32 %v9351_v20, %v9351_v20 }
0x29c0   :  { %v9353_v17 = vsel %vm6220_vm15, %v9352_v53, 0.0  ;;  %v9191_v14 = vmul.f32 %v9190_v0, %v9190_v0 }
0x29c1   :  { %9354 = vadd.xlane.f32.xlu1 %v9353_v17 }
0x29c2   :  { %v9192_v13 = vsel %vm6220_vm15, %v9191_v14, 0.0 }
0x29c3   :  { %9193 = vadd.xlane.f32.xlu0 %v9192_v13 }
0x29d2   :  { %9862 = vrot.lane.b32.xlu1 %v20197_v16, %s18152_s8 }
0x29d6   :  { %9696 = vrot.lane.b32.xlu1 %v20197_v16, %s18153_s28 }
0x29d9   :  { %9865 = vrot.lane.b32.xlu0 %v20202_v42, %s18153_s28 }
0x29da   :  { %9699 = vrot.lane.b32.xlu1 %v20202_v42, %s18150_s15 }
0x2a4e   :  { %v9355_v60 = vpop.xlane.xlu1 %9354 }
0x2a4f   :  { %v9356_v33 = vmul.f32 0.16666667, %v9355_v60 }
0x2a50   :  { %v9194_v19 = vpop.xlane.xlu0 %9193 }
0x2a51   :  { %v9357_v35 = vadd.f32 1e-05, %v9356_v33  ;;  %v9195_v4 = vmul.f32 0.16666667, %v9194_v19 }
0x2a52   :  { %v20236_v6 = vpop.permute.xlu1 %9862 }
0x2a53   :  { %17185 = vrsqrt.f32 %v9357_v35  ;;  %v9196_v63 = vadd.f32 1e-05, %v9195_v4  ;;  %v20300_v4 = vld [vmem:[#allocation40 + $0x2] sm:$0x3] }
0x2a54   :  { %v9866_v22 = vpop.permute.xlu0 %9865 }
0x2a55   :  { %17187 = vrsqrt.f32 %v9196_v63  ;;  %v9868_v63 = vsel %vm601_vm2, %v20236_v6, %v9866_v22 }
0x2a5d   :  { %v17186_v1 = vpop.eup %17185 }
0x2a5e   :  { %v9359_v58 = vmul.f32 %v17186_v1, %v9351_v20 }
0x2a5f   :  { %v17188_v59 = vpop.eup %17187 }
0x2a60   :  { %15897 = vmatpush3.msk.msra.mxu1 %vm5739_vm13, %v9359_v58  ;;  %v9198_v8 = vmul.f32 %v17188_v59, %v9190_v0 }
0x2a61   :  { %15899 = vmatmul.mubr.msk.f32.vlgmr.msra.gmra.mrb[234].mxu1 %vm6403_vm1, %v19891_v52  ;;  %15901 = vmatprep.subr.mxu1 %v20747_v46  ;;  %v9697_v52 = vpop.permute.xlu1 %9696 }
0x2a62   :  { %15902 = vmatpush3.msk.msra.mxu1 %vm5739_vm13, %v9198_v8  ;;  %15903 = vmatprep.mubr.msk.f32.mxu1 %vm18144_vm0, %v20747_v46 }
0x2a63   :  { %15920 = vmatprep.subr.mxu1 %v20747_v46 }
0x2a69   :  { %15904 = vmatmul.mubr.msk.f32.vlgmr.msra.gmra.mrb[234].mxu1 %vm6403_vm1, %v19903_v36  ;;  %v9700_v36 = vpop.permute.xlu1 %9699 }
0x2a6a   :  { %15921 = vmatpush3.msk.msra.mxu1 %vm1104_vm7, %v9703_v9  ;;  %15922 = vmatprep.mubr.msk.f32.mxu1 %vm18144_vm0, %v20747_v46  ;;  %v9702_v41 = vsel %vm601_vm2, %v9697_v52, %v9700_v36 }
0x2a6b   :  { %15925 = vmatprep.subr.mxu1 %v20747_v46 }
0x2a6d   :  { %15923 = vmatmul.mubr.msk.f32.vlgmr.msra.gmra.mrb[236].mxu1 %vm5438_vm12, %v20247_v11 }
0x2a6e   :  { %15926 = vmatpush3.msk.msra.mxu1 %vm737_vm3, %v20189_v24  ;;  %15927 = vmatprep.mubr.msk.f32.mxu1 %vm18144_vm0, %v20747_v46 }
0x2a6f   :  { %15940 = vmatprep.subr.mxu1 %v20747_v46 }
0x2a75   :  { %15928 = vmatmul.mubr.msk.f32.vlgmr.msra.gmra.mrb[236].mxu1 %vm721_vm4, %v9702_v41 }
0x2a76   :  { %15942 = vmatprep.mubr.msk.f32.mxu1 %vm18144_vm0, %v20747_v46 }
0x2b3c   :  { %v20265_v40 = vpop.f32.mrb[234].mxu1 }
0x2b3d   :  { %15909 = vmatmul.mubr.msk.f32.vlgmr.msra.gmra.mrb[244].mxu0 %vm721_vm4, %v20265_v40  ;;  %v15905_v31 = vpop.f32.mrb[235].mxu1 }
0x2b3e   :  { %15917 = vmatprep.mubr.msk.f32.mxu0 %vm18144_vm0, %v20747_v46  ;;  %16493 = vmatpush3.bf16.msra.mxu0 %v20281_v7 }
0x2b3f   :  { %15915 = vmatprep.subr.mxu0 %v20747_v46 }
0x2b42   :  { %15916 = vmatpush3.msra.mxu0 %v20285_v61 }
0x2b43   :  { %15930 = vmatprep.subr.mxu0 %v20747_v46 }
0x2b48   :  { %v20271_v32 = vpop.f32.mrb[236].mxu1 }
0x2b49   :  { %v15929_v21 = vpop.f32.mrb[237].mxu1  ;;  %v9849_v26 = vsel %vm6220_vm15, %v20271_v32, 0.0 }
0x2b4a   :  { %9850 = vadd.xlane.f32.xlu1 %v9849_v26 }
0x2b5b   :  { %10668 = vrot.lane.b32.xlu1 %v20197_v16, %s18154_s25 }
0x2b5f   :  { %10502 = vrot.lane.b32.xlu1 %v20197_v16, %s18155_s21 }
0x2b63   :  { %10505 = vrot.lane.b32.xlu1 %v20202_v42, %s18152_s8 }
0x2bd7   :  { %v9851_v36 = vpop.xlane.xlu1 %9850 }
0x2bd8   :  { %v9852_v6 = vmul.f32 0.16666667, %v9851_v36 }
0x2bda   :  { %v9853_v21 = vsub.f32 %v20271_v32, %v9852_v6 }
0x2c10   :  { %v9584_v43 = vpop.f32.mrb[244].mxu0 }
0x2c11   :  { %v9585_v2 = vadd.f32 %v20289_v3, %v9584_v43  ;;  %v15910_v39 = vpop.f32.mrb[245].mxu0  ;;  %v9854_v43 = vmul.f32 %v9853_v21, %v9853_v21 }
0x2c13   :  { %v9589_v16 = vmul.f32 0.70710677, %v9585_v2  ;;  %v9588_v33 = vmul.f32 0.5, %v9585_v2 }
0x2c15   :  { %v9592_v15 = vand.u32 2147483647, %v9589_v16  ;;  %vm9590_vm11 = vcmp.ge.f32.partialorder %v9589_v16, 0.0 }
0x2c16   :  { %v9591_v13 = vsel %vm9590_vm11, 1.0, %v18156_v12 }
0x2c17   :  { %v9593_v44 = vmul.f32 0.3275911, %v9592_v15  ;;  %v9606_v56 = vsub.f32 0.0, %v9592_v15 }
0x2c19   :  { %v9594_v49 = vadd.f32 1.0, %v9593_v44  ;;  %v9607_v62 = vmul.f32 %v9606_v56, %v9592_v15 }
0x2c1b   :  { %17189 = vrcp.f32 %v9594_v49  ;;  %v9608_v34 = vmul.f32 1.442695, %v9607_v62  ;;  %v20326_v62 = vld [vmem:[#allocation41 + $0x4] sm:$0xf] }
0x2c1d   :  { %17191 = vpow2.f32 %v9608_v34 }
0x2c25   :  { %v17190_v57 = vpop.eup %17189 }
0x2c26   :  { %v9597_v37 = vmul.f32 1.0614054, %v17190_v57 }
0x2c27   :  { %v17192_v53 = vpop.eup %17191 }
0x2c28   :  { %v9598_v25 = vadd.f32 -1.4531521, %v9597_v37  ;;  %v20335_v37 = vld [vmem:[#allocation41] sm:$0xf] }
0x2c2a   :  { %v9599_v47 = vmul.f32 %v17190_v57, %v9598_v25 }
0x2c2c   :  { %v9600_v18 = vadd.f32 1.4214138, %v9599_v47 }
0x2c2e   :  { %v9601_v51 = vmul.f32 %v17190_v57, %v9600_v18 }
0x2c30   :  { %v9602_v50 = vadd.f32 -0.28449672, %v9601_v51 }
0x2c32   :  { %v9603_v20 = vmul.f32 %v17190_v57, %v9602_v50 }
0x2c34   :  { %v9604_v30 = vadd.f32 0.2548296, %v9603_v20 }
0x2c36   :  { %v9605_v0 = vmul.f32 %v17190_v57, %v9604_v30 }
0x2c38   :  { %v9610_v17 = vmul.f32 %v17192_v53, %v9605_v0 }
0x2c3a   :  { %v9611_v14 = vsub.f32 1.0, %v9610_v17 }
0x2c3c   :  { %v9612_v60 = vmul.f32 %v9611_v14, %v9591_v13 }
0x2c3e   :  { %v9613_v19 = vadd.f32 1.0, %v9612_v60 }
0x2c40   :  { %v9614_v35 = vmul.f32 %v9613_v19, %v9588_v33 }
0x2c42   :  { %15918 = vmatmul.mubr.msk.f32.vlgmr.msra.gmra.mrb[246].mxu0 %vm6665_vm6, %v9614_v35 }
0x2c43   :  { %15931 = vmatpush3.msk.msra.mxu0 %vm1104_vm7, %v9703_v9  ;;  %15932 = vmatprep.mubr.msk.f32.mxu0 %vm18144_vm0, %v20747_v46 }
0x2c44   :  { %15935 = vmatprep.subr.mxu0 %v20747_v46 }
0x2c46   :  { %15933 = vmatmul.mubr.msk.f32.vlgmr.msra.gmra.mrb[248].mxu0 %vm5438_vm12, %v20300_v4 }
0x2c47   :  { %15936 = vmatpush3.msk.msra.mxu0 %vm737_vm3, %v20189_v24  ;;  %15937 = vmatprep.mubr.msk.f32.mxu0 %vm18144_vm0, %v20747_v46 }
0x2c48   :  { %15950 = vmatprep.subr.mxu0 %v20747_v46 }
0x2c4e   :  { %15938 = vmatmul.mubr.msk.f32.vlgmr.msra.gmra.mrb[248].mxu0 %vm721_vm4, %v9868_v63 }
0x2c4f   :  { %15951 = vmatpush3.msk.msra.mxu0 %vm737_vm3, %v20260_v45  ;;  %15952 = vmatprep.mubr.msk.f32.mxu0 %vm18144_vm0, %v20747_v46 }
0x2d15   :  { %v9684_v1 = vpop.f32.mrb[246].mxu0 }
0x2d16   :  { %v20317_v58 = vadd.f32 %v9684_v1, %v20265_v40  ;;  %v15919_v59 = vpop.f32.mrb[247].mxu0  ;;  %v9855_v40 = vsel %vm6220_vm15, %v9854_v43, 0.0 }
0x2d21   :  { %v10008_v8 = vpop.f32.mrb[248].mxu0 }
0x2d22   :  { %v15939_v9 = vpop.f32.mrb[249].mxu0  ;;  %v10012_v52 = vsel %vm6220_vm15, %v10008_v8, 0.0 }
0x2d23   :  { %10013 = vadd.xlane.f32.xlu0 %v10012_v52 }
0x2db0   :  { %v10014_v41 = vpop.xlane.xlu0 %10013 }
0x2db1   :  { %v10015_v31 = vmul.f32 0.16666667, %v10014_v41  ;;  %v10669_v41 = vpop.permute.xlu1 %10668 }
0x2db3   :  { %v10016_v26 = vsub.f32 %v10008_v8, %v10015_v31 }
0x2db5   :  { %v10017_v29 = vmul.f32 %v10016_v26, %v10016_v26 }
0x2db7   :  { %v10018_v5 = vsel %vm6220_vm15, %v10017_v29, 0.0  ;;  %v10503_v29 = vpop.permute.xlu1 %10502 }
0x2db8   :  { %10019 = vadd.xlane.f32.xlu0 %v10018_v5 }
0x2dbb   :  { %v10506_v5 = vpop.permute.xlu1 %10505 }
0x2dbc   :  { %9856 = vadd.xlane.f32.xlu0 %v9855_v40  ;;  %v10508_v43 = vsel %vm601_vm2, %v10503_v29, %v10506_v5 }
0x2dd2   :  { %10671 = vrot.lane.b32.xlu0 %v20202_v42, %s18155_s21 }
0x2e45   :  { %v10020_v2 = vpop.xlane.xlu0 %10019 }
0x2e46   :  { %v10021_v39 = vmul.f32 0.16666667, %v10020_v2 }
0x2e48   :  { %v10022_v16 = vadd.f32 1e-05, %v10021_v39 }
0x2e49   :  { %v9857_v15 = vpop.xlane.xlu0 %9856 }
0x2e4a   :  { %17193 = vrsqrt.f32 %v10022_v16  ;;  %v9858_v44 = vmul.f32 0.16666667, %v9857_v15 }
0x2e4c   :  { %v9859_v49 = vadd.f32 1e-05, %v9858_v44 }
0x2e4e   :  { %17195 = vrsqrt.f32 %v9859_v49 }
0x2e54   :  { %v17194_v32 = vpop.eup %17193 }
0x2e55   :  { %v10024_v56 = vmul.f32 %v17194_v32, %v10016_v26 }
0x2e57   :  { %15941 = vmatpush3.msk.msra.mxu1 %vm5739_vm13, %v10024_v56 }
0x2e58   :  { %v17196_v57 = vpop.eup %17195  ;;  %15943 = vmatmul.mubr.msk.f32.vlgmr.msra.gmra.mrb[238].mxu1 %vm6403_vm1, %v20326_v62  ;;  %15945 = vmatprep.subr.mxu1 %v20747_v46 }
0x2e59   :  { %v9861_v42 = vmul.f32 %v17196_v57, %v9853_v21  ;;  %15947 = vmatprep.mubr.msk.f32.mxu1 %vm18144_vm0, %v20747_v46 }
0x2e5b   :  { %15946 = vmatpush3.msk.msra.mxu1 %vm5739_vm13, %v9861_v42 }
0x2e5c   :  { %16494 = vmatprep.subr.bf16.mxu1 %v20746_v38 }
0x2e60   :  { %15948 = vmatmul.mubr.msk.f32.vlgmr.msra.gmra.mrb[238].mxu1 %vm6403_vm1, %v20335_v37 }
0x2e61   :  { %16496 = vmatpush3.bf16.msra.mxu1 %v20281_v7  ;;  %15961 = vmatprep.mubr.msk.f32.mxu1 %vm18144_vm0, %v20747_v46 }
0x2e62   :  { %15959 = vmatprep.subr.mxu1 %v20747_v46 }
0x2e65   :  { %15960 = vmatpush3.msra.mxu1 %v20285_v61 }
0x2e66   :  { %15974 = vmatprep.subr.mxu1 %v20747_v46 }
0x2f33   :  { %v10167_v25 = vpop.f32.mrb[238].mxu1 }
0x2f34   :  { %15953 = vmatmul.mubr.msk.f32.vlgmr.msra.gmra.mrb[250].mxu0 %vm721_vm4, %v10167_v25  ;;  %v15949_v34 = vpop.f32.mrb[239].mxu1 }
0x2f35   :  { %15966 = vmatprep.mubr.msk.f32.mxu0 %vm5438_vm12, %v20024_v48 }
0x3007   :  { %v10240_v47 = vpop.f32.mrb[250].mxu0 }
0x3008   :  { %v10241_v18 = vadd.f32 %v20289_v3, %v10240_v47  ;;  %v15954_v51 = vpop.f32.mrb[251].mxu0 }
0x300a   :  { %v10245_v50 = vmul.f32 0.70710677, %v10241_v18  ;;  %v10244_v31 = vmul.f32 0.5, %v10241_v18 }
0x300c   :  { %v10248_v20 = vand.u32 2147483647, %v10245_v50  ;;  %vm10246_vm14 = vcmp.ge.f32.partialorder %v10245_v50, 0.0 }
0x300d   :  { %v10247_v36 = vsel %vm10246_vm14, 1.0, %v18156_v12 }
0x300e   :  { %v10249_v30 = vmul.f32 0.3275911, %v10248_v20  ;;  %v10262_v53 = vsub.f32 0.0, %v10248_v20 }
0x3010   :  { %v10250_v0 = vadd.f32 1.0, %v10249_v30  ;;  %v10263_v14 = vmul.f32 %v10262_v53, %v10248_v20 }
0x3012   :  { %17197 = vrcp.f32 %v10250_v0  ;;  %v10264_v33 = vmul.f32 1.442695, %v10263_v14 }
0x3014   :  { %17199 = vpow2.f32 %v10264_v33 }
0x301c   :  { %v17198_v17 = vpop.eup %17197 }
0x301d   :  { %v10253_v13 = vmul.f32 1.0614054, %v17198_v17 }
0x301e   :  { %v17200_v8 = vpop.eup %17199 }
0x301f   :  { %v10254_v60 = vadd.f32 -1.4531521, %v10253_v13 }
0x3021   :  { %v10255_v19 = vmul.f32 %v17198_v17, %v10254_v60 }
0x3023   :  { %v10256_v35 = vadd.f32 1.4214138, %v10255_v19 }
0x3025   :  { %v10257_v22 = vmul.f32 %v17198_v17, %v10256_v35 }
0x3027   :  { %v10258_v48 = vadd.f32 -0.28449672, %v10257_v22 }
0x3029   :  { %v10259_v63 = vmul.f32 %v17198_v17, %v10258_v48 }
0x302b   :  { %v10260_v1 = vadd.f32 0.2548296, %v10259_v63 }
0x302d   :  { %v10261_v59 = vmul.f32 %v17198_v17, %v10260_v1 }
0x302f   :  { %v10266_v9 = vmul.f32 %v17200_v8, %v10261_v59 }
0x3031   :  { %v10267_v52 = vsub.f32 1.0, %v10266_v9 }
0x3033   :  { %v10268_v6 = vmul.f32 %v10267_v52, %v10247_v36 }
0x3035   :  { %v10269_v21 = vadd.f32 1.0, %v10268_v6 }
0x3037   :  { %v10270_v26 = vmul.f32 %v10269_v21, %v10244_v31 }
0x3039   :  { %15962 = vmatmul.mubr.msk.f32.vlgmr.msra.gmra.mrb[240].mxu1 %vm6665_vm6, %v10270_v26 }
0x303a   :  { %15975 = vmatpush3.msk.msra.mxu1 %vm1104_vm7, %v20105_v27  ;;  %15976 = vmatprep.mubr.msk.f32.mxu1 %vm18144_vm0, %v20747_v46 }
0x303b   :  { %15979 = vmatprep.subr.mxu1 %v20747_v46 }
0x303d   :  { %15977 = vmatmul.mubr.msk.f32.vlgmr.msra.gmra.mrb[242].mxu1 %vm5438_vm12, %v20247_v11  ;;  %v20367_v11 = vld [vmem:[#allocation32 + $0x1] ss:$0 sm:$0xff] }
0x303e   :  { %15980 = vmatpush3.msk.msra.mxu1 %vm737_vm3, %v20189_v24  ;;  %15981 = vmatprep.mubr.msk.f32.mxu1 %vm18144_vm0, %v20747_v46  ;;  %v9695_v15 = vadd.f32 %v20367_v11, %v20317_v58 }
0x303f   :  { %15994 = vmatprep.subr.mxu1 %v20747_v46 }
0x3045   :  { %15982 = vmatmul.mubr.msk.f32.vlgmr.msra.gmra.mrb[242].mxu1 %vm721_vm4, %v10508_v43 }
0x3046   :  { %15996 = vmatprep.mubr.msk.f32.mxu1 %vm18144_vm0, %v20747_v46 }
0x310c   :  { %v10340_v40 = vpop.f32.mrb[240].mxu1 }
0x310d   :  { %v10344_v2 = vadd.f32 %v10340_v40, %v10167_v25  ;;  %v15963_v39 = vpop.f32.mrb[241].mxu1 }
0x310f   :  { %v10345_v16 = vadd.f32 %v20367_v11, %v10344_v2 }
0x3111   :  { %15964 = vmatprep.subr.msk.mxu0 %vm1104_vm7, %v10345_v16 }
0x3112   :  { %15965 = vmatpush3.msk.msra.mxu0 %vm1104_vm7, %v10345_v16 }
0x3113   :  { %15967 = vmatmul.mubr.msk.f32.vlgmr.msra.gmra.mrb[252].mxu0 %vm5438_vm12, %v20031_v10  ;;  %15969 = vmatprep.subr.msk.mxu0 %vm1104_vm7, %v9695_v15  ;;  %v10672_v10 = vpop.permute.xlu0 %10671 }
0x3114   :  { %15970 = vmatpush3.msk.msra.mxu0 %vm1104_vm7, %v9695_v15  ;;  %15971 = vmatprep.mubr.msk.f32.mxu0 %vm5438_vm12, %v20036_v23  ;;  %v10674_v23 = vsel %vm601_vm2, %v10669_v41, %v10672_v10 }
0x3115   :  { %15984 = vmatprep.subr.mxu0 %v20747_v46 }
0x3118   :  { %v10651_v44 = vpop.f32.mrb[242].mxu1 }
0x3119   :  { %v15983_v49 = vpop.f32.mrb[243].mxu1  ;;  %v10655_v58 = vsel %vm6220_vm15, %v10651_v44, 0.0 }
0x311a   :  { %10656 = vadd.xlane.f32.xlu1 %v10655_v58 }
0x311b   :  { %15972 = vmatmul.mubr.msk.f32.vlgmr.msra.gmra.mrb[252].mxu0 %vm5438_vm12, %v20046_v55 }
0x311c   :  { %15985 = vmatpush3.msk.msra.mxu0 %vm1104_vm7, %v20105_v27  ;;  %15986 = vmatprep.mubr.msk.f32.mxu0 %vm18144_vm0, %v20747_v46 }
0x311d   :  { %15989 = vmatprep.subr.mxu0 %v20747_v46 }
0x311f   :  { %15987 = vmatmul.mubr.msk.f32.vlgmr.msra.gmra.mrb[254].mxu0 %vm5438_vm12, %v20300_v4 }
0x3120   :  { %15990 = vmatpush3.msk.msra.mxu0 %vm737_vm3, %v20189_v24  ;;  %15991 = vmatprep.mubr.msk.f32.mxu0 %vm18144_vm0, %v20747_v46 }
0x3121   :  { %16004 = vmatprep.subr.mxu0 %v20747_v46 }
0x3127   :  { %15992 = vmatmul.mubr.msk.f32.vlgmr.msra.gmra.mrb[254].mxu0 %vm721_vm4, %v10674_v23 }
0x3128   :  { %16005 = vmatpush3.msk.msra.mxu0 %vm737_vm3, %v20260_v45  ;;  %16006 = vmatprep.mubr.msk.f32.mxu0 %vm18144_vm0, %v20747_v46 }
0x3129   :  { %16497 = vmatprep.subr.bf16.mxu0 %v20746_v38 }
0x31a7   :  { %v10657_v4 = vpop.xlane.xlu1 %10656 }
0x31a8   :  { %v10658_v32 = vmul.f32 0.16666667, %v10657_v4 }
0x31aa   :  { %v10659_v42 = vsub.f32 %v10651_v44, %v10658_v32  ;;  %v11310_v32 = vld [vmem:[#allocation46] sm:$0x3f] }
0x31ac   :  { %v10660_v45 = vmul.f32 %v10659_v42, %v10659_v42 }
0x31ae   :  { %v10661_v18 = vsel %vm6220_vm15, %v10660_v45, 0.0 }
0x31fa   :  { %v10814_v55 = vpop.f32.mrb[254].mxu0 }
0x31fb   :  { %v15993_v27 = vpop.f32.mrb[255].mxu0  ;;  %v10818_v24 = vsel %vm6220_vm15, %v10814_v55, 0.0 }
0x31fc   :  { %10819 = vadd.xlane.f32.xlu0 %v10818_v24  ;;  %v11387_v27 = vld [vmem:[#allocation46 + $0x8] sm:$0x3f] }
0x3289   :  { %v10820_v56 = vpop.xlane.xlu0 %10819 }
0x328a   :  { %v10821_v57 = vmul.f32 0.16666667, %v10820_v56 }
0x328c   :  { %v10822_v25 = vsub.f32 %v10814_v55, %v10821_v57  ;;  %v11232_v55 = vld [vmem:[#allocation44] sm:$0x3f] }
0x328e   :  { %v10823_v34 = vmul.f32 %v10822_v25, %v10822_v25 }
0x3290   :  { %v10824_v47 = vsel %vm6220_vm15, %v10823_v34, 0.0 }
0x3291   :  { %10825 = vadd.xlane.f32.xlu0 %v10824_v47  ;;  %v20467_v47 = vld [vmem:[%s20771_s1] sm:$0x3f] }
0x3295   :  { %10662 = vadd.xlane.f32.xlu0 %v10661_v18 }
0x331e   :  { %v10826_v51 = vpop.xlane.xlu0 %10825 }
0x331f   :  { %v10827_v50 = vmul.f32 0.16666667, %v10826_v51  ;;  %v20477_v51 = vld [vmem:[%s20771_s1 + $0x8] sm:$0x3f] }
0x3321   :  { %v10828_v20 = vadd.f32 1e-05, %v10827_v50  ;;  %v20486_v50 = vld [vmem:[%s20771_s1 + $0x10] sm:$0x3f] }
0x3322   :  { %v10663_v30 = vpop.xlane.xlu0 %10662 }
0x3323   :  { %17201 = vrsqrt.f32 %v10828_v20  ;;  %v10664_v0 = vmul.f32 0.16666667, %v10663_v30  ;;  %v14093_v20 = vld [vmem:[%s20770_s5 + $0x20] sm:$0xff]  ;;  %v14095_v30 = vld [vmem:[%s20770_s5 + $0x30] sm:$0xf] }
0x3325   :  { %v10665_v53 = vadd.f32 1e-05, %v10664_v0  ;;  %v16511_v0 = vpack.c.bf16 %v14095_v30, %v14093_v20  ;;  %v12296_v30 = vld [vmem:[#allocation49 + $0x360] sm:$0xff] }
0x3327   :  { %17203 = vrsqrt.f32 %v10665_v53  ;;  %v11618_v53 = vld [vmem:[%s20770_s5 + $0x8] sm:$0xff] }
0x332d   :  { %v17202_v17 = vpop.eup %17201 }
0x332e   :  { %v10830_v14 = vmul.f32 %v17202_v17, %v10822_v25  ;;  %v14096_v25 = vld [vmem:[%s20770_s5 + $0x38] sm:$0xf] }
0x332f   :  { %v11620_v17 = vld [vmem:[%s20770_s5 + $0x18] sm:$0xf] }
0x3330   :  { %15995 = vmatpush3.msk.msra.mxu1 %vm5739_vm13, %v10830_v14  ;;  %v16514_v14 = vpack.c.bf16 %v11620_v17, %v11618_v53  ;;  %v12303_v17 = vld [vmem:[#allocation49 + $0x398] sm:$0xff] }
0x3331   :  { %v17204_v13 = vpop.eup %17203  ;;  %15997 = vmatmul.mubr.msk.f32.vlgmr.msra.gmra.mrb[244].mxu1 %vm6403_vm1, %v20326_v62  ;;  %15999 = vmatprep.subr.mxu1 %v20747_v46 }
0x3332   :  { %v10667_v60 = vmul.f32 %v17204_v13, %v10659_v42  ;;  %16001 = vmatprep.mubr.msk.f32.mxu1 %vm18144_vm0, %v20747_v46  ;;  %v14094_v42 = vld [vmem:[%s20770_s5 + $0x28] sm:$0xff]  ;;  %v11617_v13 = vld [vmem:[%s20770_s5] sm:$0xff] }
0x3333   :  { %v16508_v34 = vpack.c.bf16 %v14096_v25, %v14094_v42  ;;  %v12290_v42 = vld [vmem:[#allocation49 + $0x330] sm:$0xff]  ;;  %v12293_v25 = vld [vmem:[#allocation49 + $0x348] sm:$0xff] }
0x3334   :  { %16000 = vmatpush3.msk.msra.mxu1 %vm5739_vm13, %v10667_v60  ;;  %vm18157_vm13 = vmmov 1   ;;  %v11619_v60 = vld [vmem:[%s20770_s5 + $0x10] sm:$0xf] }
0x3335   :  { %16500 = vmatprep.subr.bf16.mxu1 %v20746_v38  ;;  %vm20438_vm15 = vmpackc.low %vm1104_vm7, %vm18157_vm13 }
0x3339   :  { %16002 = vmatmul.mubr.msk.f32.vlgmr.msra.gmra.mrb[244].mxu1 %vm6403_vm1, %v20335_v37  ;;  %vm11233_vm1 = vcmask 97280  }
0x333a   :  { %16027 = vmatprep.mubr.msk.f32.mxu1 %vm18144_vm0, %v20747_v46 }
0x340c   :  { %v10973_v33 = vpop.f32.mrb[244].mxu1 }
0x340d   :  { %16007 = vmatmul.mubr.msk.f32.vlgmr.msra.gmra.mrb[0].mxu0 %vm721_vm4, %v10973_v33  ;;  %v16003_v62 = vpop.f32.mrb[245].mxu1 }
0x340e   :  { %16499 = vmatpush3.bf16.msra.mxu0 %v20281_v7  ;;  %16015 = vmatprep.mubr.msk.f32.mxu0 %vm18144_vm0, %v20747_v46  ;;  %v14107_v62 = vld [vmem:[%s20770_s5 + $0x48] sm:$0xff] }
0x340f   :  { %16013 = vmatprep.subr.mxu0 %v20747_v46 }
0x3412   :  { %16014 = vmatpush3.msra.mxu0 %v20285_v61 }
0x34e0   :  { %v11046_v19 = vpop.f32.mrb[0].mxu0 }
0x34e1   :  { %v11047_v35 = vadd.f32 %v20289_v3, %v11046_v19  ;;  %v16008_v37 = vpop.f32.mrb[1].mxu0  ;;  %v14109_v19 = vld [vmem:[%s20770_s5 + $0x58] sm:$0xf] }
0x34e2   :  { %v16517_v37 = vpack.c.bf16 %v11619_v60, %v11617_v13  ;;  %v12302_v60 = vld [vmem:[#allocation49 + $0x390] sm:$0xff] }
0x34e3   :  { %v11051_v22 = vmul.f32 0.70710677, %v11047_v35  ;;  %v11050_v39 = vmul.f32 0.5, %v11047_v35 }
0x34e5   :  { %v11054_v48 = vand.u32 2147483647, %v11051_v22  ;;  %vm11052_vm2 = vcmp.ge.f32.partialorder %v11051_v22, 0.0  ;;  %v16520_v22 = vpack.c.bf16 %v14109_v19, %v14107_v62  ;;  %v12309_v19 = vld [vmem:[#allocation49 + $0x3c8] sm:$0xff] }
0x34e6   :  { %v11053_v40 = vsel %vm11052_vm2, 1.0, %v18156_v12 }
0x34e7   :  { %v11055_v63 = vmul.f32 0.3275911, %v11054_v48  ;;  %v11068_v59 = vsub.f32 0.0, %v11054_v48 }
0x34e9   :  { %v11056_v1 = vadd.f32 1.0, %v11055_v63  ;;  %v11069_v9 = vmul.f32 %v11068_v59, %v11054_v48  ;;  %v14108_v59 = vld [vmem:[%s20770_s5 + $0x50] sm:$0xf] }
0x34eb   :  { %17205 = vrcp.f32 %v11056_v1  ;;  %v11070_v36 = vmul.f32 1.442695, %v11069_v9  ;;  %v14106_v1 = vld [vmem:[%s20770_s5 + $0x40] sm:$0xff] }
0x34ed   :  { %17207 = vpow2.f32 %v11070_v36  ;;  %v12264_v36 = vld [vmem:[#allocation49 + $0x260] sm:$0xff] }
0x34f5   :  { %v17206_v8 = vpop.eup %17205 }
0x34f6   :  { %v11059_v7 = vmul.f32 1.0614054, %v17206_v8 }
0x34f7   :  { %v17208_v29 = vpop.eup %17207 }
0x34f8   :  { %v11060_v52 = vadd.f32 -1.4531521, %v11059_v7  ;;  %v16523_v7 = vpack.c.bf16 %v14108_v59, %v14106_v1  ;;  %v12315_v1 = vld [vmem:[#allocation49 + $0x3f8] sm:$0xff]  ;;  %v12318_v59 = vld [vmem:[#allocation49 + $0x410] sm:$0xff] }
0x34fa   :  { %v11061_v6 = vmul.f32 %v17206_v8, %v11060_v52  ;;  %v12261_v52 = vld [vmem:[#allocation49 + $0x248] sm:$0xff] }
0x34fc   :  { %v11062_v41 = vadd.f32 1.4214138, %v11061_v6  ;;  %v12260_v6 = vld [vmem:[#allocation49 + $0x240] sm:$0xff] }
0x34fe   :  { %v11063_v31 = vmul.f32 %v17206_v8, %v11062_v41  ;;  %v16526_v41 = vpack.c.bf16 %v12264_v36, %v12261_v52  ;;  %v12321_v36 = vld [vmem:[#allocation49 + $0x428] sm:$0xff] }
0x3500   :  { %v11064_v61 = vadd.f32 -0.28449672, %v11063_v31  ;;  %v12263_v31 = vld [vmem:[#allocation49 + $0x258] sm:$0xff] }
0x3502   :  { %v11065_v21 = vmul.f32 %v17206_v8, %v11064_v61  ;;  %v16528_v61 = vpack.c.bf16 %v12263_v31, %v12260_v6  ;;  %v12324_v6 = vld [vmem:[#allocation49 + $0x440] sm:$0xff] }
0x3503   :  { %v12320_v31 = vld [vmem:[#allocation49 + $0x420] sm:$0xff] }
0x3504   :  { %v11066_v26 = vadd.f32 0.2548296, %v11065_v21  ;;  %v12267_v21 = vld [vmem:[#allocation49 + $0x278] sm:$0xff] }
0x3506   :  { %v11067_v3 = vmul.f32 %v17206_v8, %v11066_v26  ;;  %v12270_v26 = vld [vmem:[#allocation49 + $0x290] sm:$0xff] }
0x3508   :  { %v11072_v5 = vmul.f32 %v17208_v29, %v11067_v3  ;;  %v12266_v3 = vld [vmem:[#allocation49 + $0x270] sm:$0xff]  ;;  %v16530_v29 = vpack.c.bf16 %v12270_v26, %v12267_v21  ;;  %v12023_v26 = vld [vmem:[#allocation47] sm:$0x3] }
0x350a   :  { %v11073_v43 = vsub.f32 1.0, %v11072_v5  ;;  %v12269_v5 = vld [vmem:[#allocation49 + $0x288] sm:$0xff] }
0x350c   :  { %v11074_v2 = vmul.f32 %v11073_v43, %v11053_v40  ;;  %v16532_v43 = vpack.c.bf16 %v12269_v5, %v12266_v3  ;;  %v12273_v40 = vld [vmem:[#allocation49 + $0x2a8] sm:$0xff]  ;;  %v20772_v3 = vld [vmem:[#allocation97_spill] sm:$0xff] }
0x350d   :  { %v20773_v5 = vld [vmem:[#allocation96_spill] sm:$0xff] }
0x350e   :  { %v11075_v16 = vadd.f32 1.0, %v11074_v2  ;;  %v12276_v2 = vld [vmem:[#allocation49 + $0x2c0] sm:$0xff] }
0x3510   :  { %v11076_v15 = vmul.f32 %v11075_v16, %v11050_v39  ;;  %v16534_v39 = vpack.c.bf16 %v12276_v2, %v12273_v40  ;;  %v12272_v16 = vld [vmem:[#allocation49 + $0x2a0] sm:$0xff] }
0x3512   :  { %16016 = vmatmul.mubr.msk.f32.vlgmr.msra.gmra.mrb[2].mxu0 %vm6665_vm6, %v11076_v15  ;;  %v12275_v15 = vld [vmem:[#allocation49 + $0x2b8] sm:$0xff] }
0x3513   :  { %16020 = vmatprep.mubr.msk.f32.mxu0 %vm5438_vm12, %v20091_v54 }
0x35e5   :  { %v11146_v44 = vpop.f32.mrb[2].mxu0 }
0x35e6   :  { %v11150_v49 = vadd.f32 %v11146_v44, %v10973_v33  ;;  %v16017_v58 = vpop.f32.mrb[3].mxu0  ;;  %v16536_v44 = vpack.c.bf16 %v12275_v15, %v12272_v16 }
0x35e7   :  { %v12282_v58 = vld [vmem:[#allocation49 + $0x2f0] sm:$0xff] }
0x35e8   :  { %v11151_v10 = vadd.f32 %v20367_v11, %v11150_v49  ;;  %v12279_v49 = vld [vmem:[#allocation49 + $0x2d8] sm:$0xff] }
0x35ea   :  { %16018 = vmatprep.subr.msk.mxu0 %vm1104_vm7, %v11151_v10 }
0x35eb   :  { %16019 = vmatpush3.msk.msra.mxu0 %vm1104_vm7, %v11151_v10  ;;  %v16538_v10 = vpack.c.bf16 %v12282_v58, %v12279_v49  ;;  %v12262_v49 = vld [vmem:[#allocation49 + $0x250] sm:$0xff]  ;;  %v12265_v58 = vld [vmem:[#allocation49 + $0x268] sm:$0xff] }
0x35ec   :  { %16021 = vmatmul.mubr.msk.f32.vlgmr.msra.gmra.mrb[252].mxu0 %vm5438_vm12, %v20096_v28  ;;  %16047 = vmatprep.subr.mxu0 %v20747_v46  ;;  %v11312_v28 = vld [vmem:[#allocation44 + $0x8] sm:$0x3f] }
0x35ed   :  { %16049 = vmatprep.mubr.msk.f32.mxu0 %vm18144_vm0, %v20747_v46 }
0x36bf   :  { %v16022_v12 = vpop.f32.mrb[252].mxu0 }
0x36c0   :  { %v11221_v23 = vpop.f32.mrb[253].mxu0 }
0x36c1   :  { %v16501_v11 = vpack.c.bf16 %v16022_v12, %v11221_v23  ;;  %v12278_v12 = vld [vmem:[#allocation49 + $0x2d0] sm:$0xff]  ;;  %v12281_v23 = vld [vmem:[#allocation49 + $0x2e8] sm:$0xff] }
0x36c2   :  { %v16540_v54 = vpack.c.bf16 %v12281_v23, %v12278_v12  ;;  %v12268_v12 = vld [vmem:[#allocation49 + $0x280] sm:$0xff]  ;;  %v12271_v23 = vld [vmem:[#allocation49 + $0x298] sm:$0xff] }
0x36c3   :  { %16503 = vmatpush3.bf16.msk.msra.mxu1 %vm20438_vm15, %v16501_v11 }
0x36c4   :  { %16504 = vmatprep.subr.bf16.mxu1 %v20746_v38 }
0x36c6   :  { %16028 = vmatmul.mubr.msk.f32.vlgmr.msra.gmra.mrb[246].mxu1 %vm11233_vm1, %v11232_v55  ;;  %v12288_v55 = vld [vmem:[#allocation49 + $0x320] sm:$0xff] }
0x36c7   :  { %16507 = vmatpush3.bf16.msk.msra.mxu1 %vm20438_vm15, %v16501_v11  ;;  %16034 = vmatprep.mubr.msk.f32.mxu1 %vm18144_vm0, %v20747_v46  ;;  %v12285_v11 = vld [vmem:[#allocation49 + $0x308] sm:$0xff] }
0x36c8   :  { %16037 = vmatprep.subr.mxu1 %v20747_v46 }
0x36ca   :  { %16035 = vmatmul.mubr.msk.f32.vlgmr.msra.gmra.mrb[248].mxu1 %vm11233_vm1, %v11312_v28  ;;  %v16542_v28 = vpack.c.bf16 %v12288_v55, %v12285_v11  ;;  %v12277_v11 = vld [vmem:[#allocation49 + $0x2c8] sm:$0xff] }
0x36cb   :  { %16039 = vmatprep.mubr.msk.f32.mxu1 %vm18144_vm0, %v20747_v46  ;;  %16038 = vmatpush3.msk.msra.mxu1 %vm737_vm3, %v11387_v27  ;;  %v12284_v27 = vld [vmem:[#allocation49 + $0x300] sm:$0xff] }
0x36cc   :  { %16042 = vmatprep.subr.mxu1 %v20747_v46 }
0x3799   :  { %v11306_v24 = vpop.f32.mrb[246].mxu1 }
0x379a   :  { %v16029_v4 = vpop.f32.mrb[247].mxu1 }
0x379d   :  { %v11382_v56 = vpop.f32.mrb[248].mxu1 }
0x379e   :  { %16040 = vmatmul.mubr.msk.f32.vlgmr.msra.gmra.mrb[250].mxu1 %vm721_vm4, %v11382_v56  ;;  %v16036_v57 = vpop.f32.mrb[249].mxu1  ;;  %v12294_v56 = vld [vmem:[#allocation49 + $0x350] sm:$0xff] }
0x379f   :  { %16043 = vmatpush3.msk.msra.mxu1 %vm737_vm3, %v11310_v32  ;;  %16044 = vmatprep.mubr.msk.f32.mxu1 %vm18144_vm0, %v20747_v46  ;;  %v12291_v32 = vld [vmem:[#allocation49 + $0x338] sm:$0xff] }
0x37a0   :  { %16510 = vmatprep.subr.msk.bf16.mxu1 %vm20438_vm15, %v16508_v34  ;;  %v16546_v57 = vpack.c.bf16 %v12294_v56, %v12291_v32  ;;  %v16548_v34 = vpack.c.bf16 %v12293_v25, %v12290_v42  ;;  %v12289_v32 = vld [vmem:[#allocation49 + $0x328] sm:$0xff]  ;;  %v12292_v56 = vld [vmem:[#allocation49 + $0x340] sm:$0xff]  ;;  %v12298_v25 = vld [vmem:[#allocation49 + $0x370] sm:$0xff] }
0x37a6   :  { %16045 = vmatmul.mubr.msk.f32.vlgmr.msra.gmra.mrb[250].mxu1 %vm721_vm4, %v11306_v24  ;;  %v12287_v24 = vld [vmem:[#allocation49 + $0x318] sm:$0xff] }
0x37a7   :  { %11774 = vmatprep.mubr.f32.mxu1 %v20747_v46  ;;  %16513 = vmatpush1.bf16.msk.msra.mxu1 %vm20438_vm15, %v16511_v0  ;;  %v16544_v4 = vpack.c.bf16 %v12287_v24, %v12284_v27  ;;  %v12299_v0 = vld [vmem:[#allocation49 + $0x378] sm:$0xff] }
0x37a8   :  { %16516 = vmatprep.subr.msk.bf16.mxu1 %vm20438_vm15, %v16514_v14  ;;  %v16552_v53 = vpack.c.bf16 %v12299_v0, %v12296_v30  ;;  %v12306_v14 = vld [vmem:[#allocation49 + $0x3b0] sm:$0xff]  ;;  %v12283_v27 = vld [vmem:[#allocation49 + $0x2f8] sm:$0xff] }
0x37a9   :  { %v16554_v13 = vpack.c.bf16 %v12306_v14, %v12303_v17  ;;  %v12310_v0 = vld [vmem:[#allocation49 + $0x3d0] sm:$0xff]  ;;  %v12316_v14 = vld [vmem:[#allocation49 + $0x400] sm:$0xff] }
0x3879   :  { %v11536_v45 = vpop.f32.mrb[250].mxu1 }
0x387a   :  { %16048 = vmatpush3.msk.msra.mxu0 %vm737_vm3, %v11536_v45  ;;  %v16046_v18 = vpop.f32.mrb[251].mxu1 }
0x387b   :  { %16050 = vmatmul.mubr.msk.f32.vlgmr.msra.gmra.mrb[4].mxu0 %vm721_vm4, %v20467_v47  ;;  %16052 = vmatprep.subr.mxu0 %v20747_v46  ;;  %v12300_v18 = vld [vmem:[#allocation49 + $0x380] sm:$0xff] }
0x387c   :  { %16053 = vmatpush3.msk.msra.mxu0 %vm737_vm3, %v11536_v45  ;;  %16054 = vmatprep.mubr.msk.f32.mxu0 %vm18144_vm0, %v20747_v46 }
0x387d   :  { %16057 = vmatprep.subr.mxu0 %v20747_v46 }
0x387f   :  { %16055 = vmatmul.mubr.msk.f32.vlgmr.msra.gmra.mrb[6].mxu0 %vm721_vm4, %v20477_v51 }
0x3880   :  { %16058 = vmatpush3.msk.msra.mxu0 %vm737_vm3, %v11536_v45  ;;  %16059 = vmatprep.mubr.msk.f32.mxu0 %vm18144_vm0, %v20747_v46  ;;  %v12297_v45 = vld [vmem:[#allocation49 + $0x368] sm:$0xff] }
0x3881   :  { %v16550_v20 = vpack.c.bf16 %v12300_v18, %v12297_v45  ;;  %v12304_v18 = vld [vmem:[#allocation49 + $0x3a0] sm:$0xff] }
0x3883   :  { %16060 = vmatmul.mubr.msk.f32.vlgmr.msra.gmra.mrb[8].mxu0 %vm721_vm4, %v20486_v50 }
0x3884   :  { %12109 = vmatprep.mubr.f32.mxu0 %v20747_v46 }
0x394e   :  { %v11613_v33 = vpop.f32.mrb[4].mxu0 }
0x394f   :  { %v16051_v35 = vpop.f32.mrb[5].mxu0 }
0x3950   :  { %v12312_v35 = vld [vmem:[#allocation49 + $0x3e0] sm:$0xff] }
0x3952   :  { %v11692_v48 = vpop.f32.mrb[6].mxu0 }
0x3953   :  { %14099 = vmatmul.mubr.msk.f32.vlgmr.msra.gmra.mrb[252].mxu1 %vm11233_vm1, %v11692_v48  ;;  %v16056_v63 = vpop.f32.mrb[7].mxu0  ;;  %v12311_v48 = vld [vmem:[#allocation49 + $0x3d8] sm:$0xff] }
0x3954   :  { %16519 = vmatpush1.bf16.msk.msra.mxu1 %vm20438_vm15, %v16517_v37  ;;  %11854 = vmatprep.mubr.f32.mxu1 %v20747_v46  ;;  %v16558_v37 = vpack.c.bf16 %v12312_v35, %v12309_v19  ;;  %v12327_v35 = vld [vmem:[#allocation49 + $0x458] sm:$0xff] }
0x3955   :  { %16522 = vmatprep.subr.msk.bf16.mxu1 %vm20438_vm15, %v16520_v22  ;;  %v12308_v22 = vld [vmem:[#allocation49 + $0x3c0] sm:$0xff] }
0x3956   :  { %v11932_v8 = vpop.f32.mrb[8].mxu0  ;;  %v16560_v63 = vpack.c.bf16 %v12311_v48, %v12308_v22  ;;  %v12326_v48 = vld [vmem:[#allocation49 + $0x450] sm:$0xff] }
0x3957   :  { %v16061_v9 = vpop.f32.mrb[9].mxu0 }
0x3958   :  { %v12314_v9 = vld [vmem:[#allocation49 + $0x3f0] sm:$0xff] }
0x395b   :  { %14102 = vmatmul.mubr.msk.f32.vlgmr.msra.gmra.mrb[252].mxu1 %vm11233_vm1, %v11613_v33  ;;  %v12305_v33 = vld [vmem:[#allocation49 + $0x3a8] sm:$0xff] }
0x395c   :  { %16525 = vmatpush1.bf16.msk.msra.mxu1 %vm20438_vm15, %v16523_v7  ;;  %12014 = vmatprep.mubr.f32.mxu1 %v20747_v46  ;;  %v16556_v62 = vpack.c.bf16 %v12305_v33, %v12302_v60  ;;  %v12317_v7 = vld [vmem:[#allocation49 + $0x408] sm:$0xff]  ;;  %v12322_v33 = vld [vmem:[#allocation49 + $0x430] sm:$0xff] }
0x395d   :  { %16527 = vmatprep.subr.bf16.mxu1 %v16526_v41  ;;  %v16564_v52 = vpack.c.bf16 %v12317_v7, %v12314_v9  ;;  %v16566_v41 = vpack.c.bf16 %v12324_v6, %v12321_v36  ;;  %v12117_v7 = vld [vmem:[#allocation49 + $0x8] sm:$0xff] }
0x3963   :  { %14112 = vmatmul.mubr.msk.f32.vlgmr.msra.gmra.mrb[252].mxu1 %vm11233_vm1, %v11932_v8  ;;  %v16562_v8 = vpack.c.bf16 %v12318_v59, %v12315_v1  ;;  %v12328_v1 = vld [vmem:[#allocation49 + $0x460] sm:$0xff] }
0x3964   :  { %16529 = vmatpush1.bf16.msra.mxu1 %v16528_v61  ;;  %v12323_v61 = vld [vmem:[#allocation49 + $0x438] sm:$0xff] }
0x3965   :  { %16531 = vmatprep.subr.bf16.mxu1 %v16530_v29  ;;  %v16568_v21 = vpack.c.bf16 %v12323_v61, %v12320_v31  ;;  %v12028_v29 = vrot.slane %v12023_v26, %v20772_v3  ;;  %v12119_v61 = vld [vmem:[#allocation49 + $0x18] sm:$0xff] }
0x3968   :  { %16533 = vmatpush1.bf16.msra.mxu1 %v16532_v43  ;;  %v12032_v43 = vrot.slane %v12023_v26, %v20773_v5  ;;  %v12121_v26 = vld [vmem:[#allocation49 + $0x28] sm:$0xff] }
0x3969   :  { %16535 = vmatprep.subr.bf16.mxu1 %v16534_v39 }
0x396c   :  { %16537 = vmatpush1.bf16.msra.mxu1 %v16536_v44 }
0x396d   :  { %16539 = vmatprep.subr.bf16.mxu1 %v16538_v10  ;;  %v16575_v10 = vpack.c.bf16 %v12265_v58, %v12262_v49 }
0x3970   :  { %16541 = vmatpush1.bf16.msra.mxu1 %v16540_v54  ;;  %v16578_v54 = vpack.c.bf16 %v12271_v23, %v12268_v12  ;;  %v12124_v12 = vld [vmem:[#allocation49 + $0x40] sm:$0xff]  ;;  %v12127_v23 = vld [vmem:[#allocation49 + $0x58] sm:$0xff] }
0x3971   :  { %16543 = vmatprep.subr.bf16.mxu1 %v16542_v28  ;;  %v12280_v28 = vld [vmem:[#allocation49 + $0x2e0] sm:$0xff] }
0x3972   :  { %v16584_v24 = vpack.c.bf16 %v12283_v27, %v12280_v28  ;;  %v12128_v28 = vld [vmem:[#allocation49 + $0x60] sm:$0xff] }
0x3974   :  { %16545 = vmatpush1.bf16.msra.mxu1 %v16544_v4  ;;  %v12286_v4 = vld [vmem:[#allocation49 + $0x310] sm:$0xff] }
0x3975   :  { %16547 = vmatprep.subr.bf16.mxu1 %v16546_v57  ;;  %v12295_v57 = vld [vmem:[#allocation49 + $0x358] sm:$0xff] }
0x3976   :  { %v16590_v42 = vpack.c.bf16 %v12295_v57, %v12292_v56  ;;  %v12138_v56 = vld [vmem:[#allocation49 + $0xb0] sm:$0xff] }
0x3978   :  { %16549 = vmatpush1.bf16.msra.mxu1 %v16548_v34  ;;  %v12301_v34 = vld [vmem:[#allocation49 + $0x388] sm:$0xff] }
0x3979   :  { %16551 = vmatprep.subr.bf16.mxu1 %v16550_v20  ;;  %v16593_v45 = vpack.c.bf16 %v12301_v34, %v12298_v25  ;;  %v12307_v20 = vld [vmem:[#allocation49 + $0x3b8] sm:$0xff]  ;;  %v12134_v25 = vld [vmem:[#allocation49 + $0x90] sm:$0xff] }
0x397a   :  { %v16596_v30 = vpack.c.bf16 %v12307_v20, %v12304_v18  ;;  %v12136_v18 = vld [vmem:[#allocation49 + $0xa0] sm:$0xff]  ;;  %v12139_v20 = vld [vmem:[#allocation49 + $0xb8] sm:$0xff] }
0x397c   :  { %16553 = vmatpush1.bf16.msra.mxu1 %v16552_v53  ;;  %v12313_v53 = vld [vmem:[#allocation49 + $0x3e8] sm:$0xff] }
0x397d   :  { %16555 = vmatprep.subr.bf16.mxu1 %v16554_v13  ;;  %v16599_v17 = vpack.c.bf16 %v12313_v53, %v12310_v0  ;;  %v12319_v13 = vld [vmem:[#allocation49 + $0x418] sm:$0xff]  ;;  %v12144_v0 = vld [vmem:[#allocation49 + $0xe0] sm:$0xff] }
0x397e   :  { %v16602_v60 = vpack.c.bf16 %v12319_v13, %v12316_v14  ;;  %v12140_v14 = vld [vmem:[#allocation49 + $0xc0] sm:$0xff] }
0x3980   :  { %16557 = vmatpush1.bf16.msra.mxu1 %v16556_v62  ;;  %v12325_v62 = vld [vmem:[#allocation49 + $0x448] sm:$0xff] }
0x3981   :  { %16559 = vmatprep.subr.bf16.mxu1 %v16558_v37  ;;  %v16605_v19 = vpack.c.bf16 %v12325_v62, %v12322_v33  ;;  %v12330_v37 = vld [vmem:[#allocation49 + $0x470] sm:$0xff]  ;;  %v12145_v62 = vld [vmem:[#allocation49 + $0xe8] sm:$0xff] }
0x3982   :  { %v16570_v22 = vpack.c.bf16 %v12330_v37, %v12327_v35  ;;  %v12142_v33 = vld [vmem:[#allocation49 + $0xd0] sm:$0xff] }
0x3983   :  { %v12150_v35 = vld [vmem:[#allocation49 + $0x110] sm:$0xff] }
0x3984   :  { %16561 = vmatpush1.bf16.msra.mxu1 %v16560_v63  ;;  %v12329_v63 = vld [vmem:[#allocation49 + $0x468] sm:$0xff] }
0x3985   :  { %16563 = vmatprep.subr.bf16.mxu1 %v16562_v8  ;;  %v16572_v59 = vpack.c.bf16 %v12329_v63, %v12326_v48  ;;  %v12331_v8 = vld [vmem:[#allocation49 + $0x478] sm:$0xff]  ;;  %v12146_v48 = vld [vmem:[#allocation49 + $0xf0] sm:$0xff] }
0x3986   :  { %v16608_v9 = vpack.c.bf16 %v12331_v8, %v12328_v1  ;;  %v12149_v1 = vld [vmem:[#allocation49 + $0x108] sm:$0xff]  ;;  %v12151_v8 = vld [vmem:[#allocation49 + $0x118] sm:$0xff] }
0x3988   :  { %16565 = vmatpush1.bf16.msra.mxu1 %v16564_v52  ;;  %v12120_v52 = vld [vmem:[#allocation49 + $0x20] sm:$0xff] }
0x3989   :  { %16567 = vmatprep.subr.bf16.mxu1 %v16566_v41  ;;  %v16610_v36 = vpack.c.bf16 %v12120_v52, %v12117_v7  ;;  %v12116_v41 = vld [vmem:[#allocation49] sm:$0xff]  ;;  %v16632_v52 = vpack.c.bf16 %v12149_v1, %v12146_v48  ;;  %v12185_v48 = vld [vmem:[#allocation49 + $0x228] sm:$0xff]  ;;  %v12187_v1 = vld [vmem:[#allocation49 + $0x238] sm:$0xff] }
0x398a   :  { %v12156_v7 = vld [vmem:[#allocation49 + $0x140] sm:$0xff] }
0x398c   :  { %16569 = vmatpush1.bf16.msra.mxu1 %v16568_v21  ;;  %v12118_v21 = vld [vmem:[#allocation49 + $0x10] sm:$0xff] }
0x398d   :  { %16571 = vmatprep.subr.bf16.mxu1 %v16570_v22  ;;  %v16671_v22 = vpack.c.bf16 %v12145_v62, %v12142_v33  ;;  %v12183_v33 = vld [vmem:[#allocation49 + $0x218] sm:$0xff]  ;;  %v12186_v62 = vld [vmem:[#allocation49 + $0x230] sm:$0xff] }
0x3990   :  { %16573 = vmatpush1.bf16.msra.mxu1 %v16572_v59  ;;  %v12148_v59 = vld [vmem:[#allocation49 + $0x100] sm:$0xff] }
0x3991   :  { %16611 = vmatprep.subr.bf16.mxu1 %v16610_v36  ;;  %v16674_v36 = vpack.c.bf16 %v12151_v8, %v12148_v59 }
0x3a36   :  { %v12016_v40 = vpop.f32.mrb[252].mxu1 }
0x3a37   :  { %v12035_v2 = vadd.f32 %v12028_v29, %v12016_v40  ;;  %v12018_v39 = vpop.f32.mrb[253].mxu1  ;;  %v12123_v29 = vld [vmem:[#allocation49 + $0x38] sm:$0xff] }
0x3a38   :  { %v12036_v16 = vadd.f32 %v12032_v43, %v12018_v39  ;;  %v12126_v43 = vld [vmem:[#allocation49 + $0x50] sm:$0xff]  ;;  %v16659_v39 = vpack.c.bf16 %v12121_v26, %v12118_v21  ;;  %v12157_v26 = vld [vmem:[#allocation49 + $0x148] sm:$0xff] }
0x3a39   :  { %v20520_v44 = vmax.f32 %v12035_v2, 0.0  ;;  %v16612_v2 = vpack.c.bf16 %v12119_v61, %v12116_v41  ;;  %v16614_v58 = vpack.c.bf16 %v12126_v43, %v12123_v29  ;;  %v12152_v41 = vld [vmem:[#allocation49 + $0x120] sm:$0xff]  ;;  %v12155_v61 = vld [vmem:[#allocation49 + $0x138] sm:$0xff]  ;;  %v12154_v21 = vld [vmem:[#allocation49 + $0x130] sm:$0xff] }
0x3a3a   :  { %v20518_v15 = vmax.f32 %v12036_v16, 0.0  ;;  %v12122_v16 = vld [vmem:[#allocation49 + $0x30] sm:$0xff]  ;;  %v12159_v29 = vld [vmem:[#allocation49 + $0x158] sm:$0xff] }
0x3a3b   :  { %v12162_v43 = vld [vmem:[#allocation49 + $0x170] sm:$0xff] }
0x3a3c   :  { %14113 = vmatprep.subr.msk.mxu0 %vm737_vm3, %v20518_v15 }
0x3a3d   :  { %14114 = vmatpush1.msk.msra.mxu0 %vm737_vm3, %v20520_v44 }
0x3a3e   :  { %14115 = vmatmul.mubr.msk.f32.vlgmr.msra.gmra.mrb[10].mxu0 %vm721_vm4, %v20467_v47  ;;  %14116 = vmatprep.subr.msk.mxu0 %vm737_vm3, %v20518_v15  ;;  %v12274_v47 = vld [vmem:[#allocation49 + $0x2b0] sm:$0xff] }
0x3a3f   :  { %14117 = vmatpush1.msk.msra.mxu0 %vm737_vm3, %v20520_v44  ;;  %12252 = vmatprep.mubr.f32.mxu0 %v20747_v46  ;;  %v16581_v55 = vpack.c.bf16 %v12277_v11, %v12274_v47  ;;  %v12132_v47 = vld [vmem:[#allocation49 + $0x80] sm:$0xff] }
0x3a40   :  { %16574 = vmatprep.subr.bf16.mxu0 %v20746_v38 }
0x3a42   :  { %14118 = vmatmul.mubr.msk.f32.vlgmr.msra.gmra.mrb[12].mxu0 %vm721_vm4, %v20477_v51  ;;  %v16587_v51 = vpack.c.bf16 %v12289_v32, %v12286_v4  ;;  %v12130_v4 = vld [vmem:[#allocation49 + $0x70] sm:$0xff]  ;;  %v12133_v32 = vld [vmem:[#allocation49 + $0x88] sm:$0xff] }
0x3a43   :  { %16576 = vmatpush1.bf16.msra.mxu0 %v16575_v10  ;;  %v12125_v10 = vld [vmem:[#allocation49 + $0x48] sm:$0xff] }
0x3a44   :  { %16577 = vmatprep.subr.bf16.mxu0 %v20746_v38  ;;  %v16616_v11 = vpack.c.bf16 %v12125_v10, %v12122_v16  ;;  %v16638_v16 = vpack.c.bf16 %v12162_v43, %v12159_v29  ;;  %v12163_v10 = vld [vmem:[#allocation49 + $0x178] sm:$0xff]  ;;  %v12702_v29 = vld [vmem:[#allocation49 + $0x4d0] sm:$0xff]  ;;  %v12700_v43 = vld [vmem:[#allocation49 + $0x4c0] sm:$0xff] }
0x3a47   :  { %16579 = vmatpush1.bf16.msra.mxu0 %v16578_v54  ;;  %v12129_v54 = vld [vmem:[#allocation49 + $0x68] sm:$0xff] }
0x3a48   :  { %16580 = vmatprep.subr.bf16.mxu0 %v20746_v38  ;;  %v16618_v27 = vpack.c.bf16 %v12132_v47, %v12129_v54 }
0x3a4b   :  { %16582 = vmatpush1.bf16.msra.mxu0 %v16581_v55  ;;  %v16662_v55 = vpack.c.bf16 %v12127_v23, %v12124_v12  ;;  %v12165_v12 = vld [vmem:[#allocation49 + $0x188] sm:$0xff]  ;;  %v12168_v23 = vld [vmem:[#allocation49 + $0x1a0] sm:$0xff] }
0x3a4c   :  { %16583 = vmatprep.subr.bf16.mxu0 %v20746_v38 }
0x3a4f   :  { %16585 = vmatpush1.bf16.msra.mxu0 %v16584_v24  ;;  %v12131_v24 = vld [vmem:[#allocation49 + $0x78] sm:$0xff] }
0x3a50   :  { %16586 = vmatprep.subr.bf16.mxu0 %v20746_v38  ;;  %v16620_v57 = vpack.c.bf16 %v12131_v24, %v12128_v28  ;;  %v12167_v28 = vld [vmem:[#allocation49 + $0x198] sm:$0xff]  ;;  %v12169_v24 = vld [vmem:[#allocation49 + $0x1a8] sm:$0xff] }
0x3a53   :  { %16588 = vmatpush1.bf16.msra.mxu0 %v16587_v51  ;;  %v12135_v51 = vld [vmem:[#allocation49 + $0x98] sm:$0xff] }
0x3a54   :  { %16589 = vmatprep.subr.bf16.mxu0 %v20746_v38  ;;  %v16622_v34 = vpack.c.bf16 %v12138_v56, %v12135_v51 }
0x3a57   :  { %16591 = vmatpush1.bf16.msra.mxu0 %v16590_v42  ;;  %v16665_v42 = vpack.c.bf16 %v12133_v32, %v12130_v4  ;;  %v12171_v4 = vld [vmem:[#allocation49 + $0x1b8] sm:$0xff]  ;;  %v12174_v32 = vld [vmem:[#allocation49 + $0x1d0] sm:$0xff] }
0x3a58   :  { %16592 = vmatprep.subr.bf16.mxu0 %v20746_v38 }
0x3a5b   :  { %16594 = vmatpush1.bf16.msra.mxu0 %v16593_v45  ;;  %v12137_v45 = vld [vmem:[#allocation49 + $0xa8] sm:$0xff] }
0x3a5c   :  { %16595 = vmatprep.subr.bf16.mxu0 %v20746_v38  ;;  %v16624_v53 = vpack.c.bf16 %v12137_v45, %v12134_v25  ;;  %v12173_v25 = vld [vmem:[#allocation49 + $0x1c8] sm:$0xff]  ;;  %v12175_v45 = vld [vmem:[#allocation49 + $0x1d8] sm:$0xff] }
0x3a5f   :  { %16597 = vmatpush1.bf16.msra.mxu0 %v16596_v30  ;;  %v12141_v30 = vld [vmem:[#allocation49 + $0xc8] sm:$0xff] }
0x3a60   :  { %16598 = vmatprep.subr.bf16.mxu0 %v20746_v38  ;;  %v16626_v13 = vpack.c.bf16 %v12144_v0, %v12141_v30 }
0x3a63   :  { %16600 = vmatpush1.bf16.msra.mxu0 %v16599_v17  ;;  %v16668_v17 = vpack.c.bf16 %v12139_v20, %v12136_v18  ;;  %v12177_v18 = vld [vmem:[#allocation49 + $0x1e8] sm:$0xff]  ;;  %v12180_v20 = vld [vmem:[#allocation49 + $0x200] sm:$0xff] }
0x3a64   :  { %16601 = vmatprep.subr.bf16.mxu0 %v20746_v38 }
0x3a67   :  { %16603 = vmatpush1.bf16.msra.mxu0 %v16602_v60  ;;  %v12143_v60 = vld [vmem:[#allocation49 + $0xd8] sm:$0xff] }
0x3a68   :  { %16604 = vmatprep.subr.bf16.mxu0 %v20746_v38  ;;  %v16628_v37 = vpack.c.bf16 %v12143_v60, %v12140_v14  ;;  %v12179_v14 = vld [vmem:[#allocation49 + $0x1f8] sm:$0xff]  ;;  %v12181_v60 = vld [vmem:[#allocation49 + $0x208] sm:$0xff] }
0x3a6b   :  { %16606 = vmatpush1.bf16.msra.mxu0 %v16605_v19  ;;  %v12147_v19 = vld [vmem:[#allocation49 + $0xf8] sm:$0xff] }
0x3a6c   :  { %16607 = vmatprep.subr.bf16.mxu0 %v20746_v38  ;;  %v16630_v63 = vpack.c.bf16 %v12150_v35, %v12147_v19 }
0x3a6f   :  { %16609 = vmatpush1.bf16.msra.mxu0 %v16608_v9  ;;  %v12153_v9 = vld [vmem:[#allocation49 + $0x128] sm:$0xff] }
0x3a70   :  { %16658 = vmatprep.subr.bf16.mxu0 %v20746_v38 }
0x3b11   :  { %v20548_v6 = vpop.f32.mrb[10].mxu0 }
0x3b12   :  { %v12113_v31 = vpop.f32.mrb[11].mxu0 }
0x3b15   :  { %v12254_v40 = vpop.f32.mrb[12].mxu0 }
0x3b16   :  { %v12256_v49 = vpop.f32.mrb[13].mxu0 }
0x3b17   :  { %14119 = vmatprep.mubr.msk.f32.mxu1 %vm3568_vm10, %v12256_v49  ;;  %14120 = vmatprep.mubr.msk.f32.mxu0 %vm3568_vm10, %v12256_v49  ;;  %v12161_v49 = vld [vmem:[#allocation49 + $0x168] sm:$0xff] }
0x3b18   :  { %12400 = vmatmul.mubr.f32.vlgmr.msra.gmra.mrb[254].mxu1 %v12254_v40  ;;  %12471 = vmatmul.mubr.f32.vlgmr.msra.gmra.mrb[14].mxu0 %v12254_v40  ;;  %v16636_v40 = vpack.c.bf16 %v12155_v61, %v12152_v41  ;;  %v12695_v61 = vld [vmem:[#allocation49 + $0x498] sm:$0xff] }
0x3b19   :  { %16613 = vmatpush1.bf16.msra.mxu1 %v16612_v2  ;;  %16660 = vmatpush1.bf16.msra.mxu0 %v16659_v39  ;;  %v16677_v2 = vpack.c.bf16 %v12157_v26, %v12154_v21  ;;  %v12158_v39 = vld [vmem:[#allocation49 + $0x150] sm:$0xff]  ;;  %v12699_v26 = vld [vmem:[#allocation49 + $0x4b8] sm:$0xff] }
0x3b1a   :  { %16615 = vmatprep.subr.bf16.mxu1 %v16614_v58  ;;  %16661 = vmatprep.subr.bf16.mxu0 %v20746_v38  ;;  %v12160_v58 = vld [vmem:[#allocation49 + $0x160] sm:$0xff]  ;;  %v16640_v54 = vpack.c.bf16 %v12161_v49, %v12158_v39  ;;  %v12698_v39 = vld [vmem:[#allocation49 + $0x4b0] sm:$0xff] }
0x3b1b   :  { %14121 = vmatprep.mubr.msk.f32.mxu1 %vm3568_vm10, %v12113_v31  ;;  %14122 = vmatprep.mubr.msk.f32.mxu0 %vm3568_vm10, %v12113_v31  ;;  %v16634_v31 = vpack.c.bf16 %v12156_v7, %v12153_v9  ;;  %v16680_v47 = vpack.c.bf16 %v12163_v10, %v12160_v58  ;;  %v12693_v9 = vld [vmem:[#allocation49 + $0x488] sm:$0xff]  ;;  %v12696_v7 = vld [vmem:[#allocation49 + $0x4a0] sm:$0xff] }
0x3b1c   :  { %v16694_v41 = vpack.c.bf16 %v12696_v7, %v12693_v9  ;;  %v12704_v10 = vld [vmem:[#allocation49 + $0x4e0] sm:$0xff]  ;;  %v12733_v9 = vld [vmem:[#allocation49 + $0x5c8] sm:$0xff]  ;;  %v12735_v7 = vld [vmem:[#allocation49 + $0x5d8] sm:$0xff] }
0x3b1d   :  { %16617 = vmatpush1.bf16.msra.mxu1 %v16616_v11  ;;  %16663 = vmatpush1.bf16.msra.mxu0 %v16662_v55  ;;  %v12164_v11 = vld [vmem:[#allocation49 + $0x180] sm:$0xff]  ;;  %v16642_v55 = vpack.c.bf16 %v12168_v23, %v12165_v12  ;;  %v12707_v23 = vld [vmem:[#allocation49 + $0x4f8] sm:$0xff] }
0x3b1e   :  { %16619 = vmatprep.subr.bf16.mxu1 %v16618_v27  ;;  %16664 = vmatprep.subr.bf16.mxu0 %v20746_v38  ;;  %v12166_v27 = vld [vmem:[#allocation49 + $0x190] sm:$0xff]  ;;  %v16644_v51 = vpack.c.bf16 %v12167_v28, %v12164_v11  ;;  %v16704_v11 = vpack.c.bf16 %v12707_v23, %v12704_v10  ;;  %v12711_v28 = vld [vmem:[#allocation49 + $0x518] sm:$0xff] }
0x3b1f   :  { %v16683_v56 = vpack.c.bf16 %v12169_v24, %v12166_v27  ;;  %v12714_v27 = vld [vmem:[#allocation49 + $0x530] sm:$0xff] }
0x3b20   :  { %v12710_v24 = vld [vmem:[#allocation49 + $0x510] sm:$0xff] }
0x3b21   :  { %16621 = vmatpush1.bf16.msra.mxu1 %v16620_v57  ;;  %16666 = vmatpush1.bf16.msra.mxu0 %v16665_v42  ;;  %v12170_v57 = vld [vmem:[#allocation49 + $0x1b0] sm:$0xff]  ;;  %v16646_v42 = vpack.c.bf16 %v12174_v32, %v12171_v4  ;;  %v12713_v4 = vld [vmem:[#allocation49 + $0x528] sm:$0xff]  ;;  %v12712_v32 = vld [vmem:[#allocation49 + $0x520] sm:$0xff] }
0x3b22   :  { %16623 = vmatprep.subr.bf16.mxu1 %v16622_v34  ;;  %16667 = vmatprep.subr.bf16.mxu0 %v20746_v38  ;;  %v12172_v34 = vld [vmem:[#allocation49 + $0x1c0] sm:$0xff]  ;;  %v16648_v30 = vpack.c.bf16 %v12173_v25, %v12170_v57  ;;  %v12750_v10 = vld [vmem:[#allocation49 + $0x650] sm:$0xff] }
0x3b23   :  { %v16686_v0 = vpack.c.bf16 %v12175_v45, %v12172_v34  ;;  %v12720_v25 = vld [vmem:[#allocation49 + $0x560] sm:$0xff] }
0x3b24   :  { %v12716_v34 = vld [vmem:[#allocation49 + $0x540] sm:$0xff] }
0x3b25   :  { %16625 = vmatpush1.bf16.msra.mxu1 %v16624_v53  ;;  %16669 = vmatpush1.bf16.msra.mxu0 %v16668_v17  ;;  %v12176_v53 = vld [vmem:[#allocation49 + $0x1e0] sm:$0xff]  ;;  %v16650_v17 = vpack.c.bf16 %v12180_v20, %v12177_v18  ;;  %v12719_v18 = vld [vmem:[#allocation49 + $0x558] sm:$0xff]  ;;  %v12718_v20 = vld [vmem:[#allocation49 + $0x550] sm:$0xff] }
0x3b26   :  { %16627 = vmatprep.subr.bf16.mxu1 %v16626_v13  ;;  %16670 = vmatprep.subr.bf16.mxu0 %v20746_v38  ;;  %v12178_v13 = vld [vmem:[#allocation49 + $0x1f0] sm:$0xff]  ;;  %v16652_v19 = vpack.c.bf16 %v12179_v14, %v12176_v53 }
0x3b27   :  { %v16689_v35 = vpack.c.bf16 %v12181_v60, %v12178_v13  ;;  %v12726_v53 = vld [vmem:[#allocation49 + $0x590] sm:$0xff] }
0x3b28   :  { %v12722_v13 = vld [vmem:[#allocation49 + $0x570] sm:$0xff] }
0x3b29   :  { %16629 = vmatpush1.bf16.msra.mxu1 %v16628_v37  ;;  %16672 = vmatpush1.bf16.msra.mxu0 %v16671_v22  ;;  %v12182_v37 = vld [vmem:[#allocation49 + $0x210] sm:$0xff]  ;;  %v16654_v22 = vpack.c.bf16 %v12186_v62, %v12183_v33  ;;  %v12725_v33 = vld [vmem:[#allocation49 + $0x588] sm:$0xff]  ;;  %v12724_v62 = vld [vmem:[#allocation49 + $0x580] sm:$0xff] }
0x3b2a   :  { %16631 = vmatprep.subr.bf16.mxu1 %v16630_v63  ;;  %16673 = vmatprep.subr.bf16.mxu0 %v20746_v38  ;;  %v12184_v63 = vld [vmem:[#allocation49 + $0x220] sm:$0xff]  ;;  %v16656_v59 = vpack.c.bf16 %v12185_v48, %v12182_v37 }
0x3b2b   :  { %v16692_v8 = vpack.c.bf16 %v12187_v1, %v12184_v63  ;;  %v12732_v37 = vld [vmem:[#allocation49 + $0x5c0] sm:$0xff] }
0x3b2c   :  { %v12728_v63 = vld [vmem:[#allocation49 + $0x5a0] sm:$0xff] }
0x3b2d   :  { %16633 = vmatpush1.bf16.msra.mxu1 %v16632_v52  ;;  %16675 = vmatpush1.bf16.msra.mxu0 %v16674_v36  ;;  %v12694_v52 = vld [vmem:[#allocation49 + $0x490] sm:$0xff]  ;;  %v12697_v36 = vld [vmem:[#allocation49 + $0x4a8] sm:$0xff] }
0x3b2e   :  { %16635 = vmatprep.subr.bf16.mxu1 %v16634_v31  ;;  %16676 = vmatprep.subr.bf16.mxu0 %v20746_v38  ;;  %v12692_v31 = vld [vmem:[#allocation49 + $0x480] sm:$0xff]  ;;  %v16743_v21 = vpack.c.bf16 %v12697_v36, %v12694_v52  ;;  %v12738_v52 = vld [vmem:[#allocation49 + $0x5f0] sm:$0xff] }
0x3b31   :  { %16637 = vmatpush1.bf16.msra.mxu1 %v16636_v40  ;;  %16678 = vmatpush1.bf16.msra.mxu0 %v16677_v2  ;;  %v12703_v40 = vld [vmem:[#allocation49 + $0x4d8] sm:$0xff]  ;;  %v16698_v2 = vpack.c.bf16 %v12702_v29, %v12699_v26  ;;  %v12736_v26 = vld [vmem:[#allocation49 + $0x5e0] sm:$0xff] }
0x3b32   :  { %16639 = vmatprep.subr.bf16.mxu1 %v16638_v16  ;;  %16679 = vmatprep.subr.bf16.mxu0 %v20746_v38  ;;  %v12701_v16 = vld [vmem:[#allocation49 + $0x4c8] sm:$0xff]  ;;  %v16746_v49 = vpack.c.bf16 %v12703_v40, %v12700_v43  ;;  %v12739_v29 = vld [vmem:[#allocation49 + $0x5f8] sm:$0xff]  ;;  %v12744_v40 = vld [vmem:[#allocation49 + $0x620] sm:$0xff] }
0x3b33   :  { %v16700_v58 = vpack.c.bf16 %v12701_v16, %v12698_v39  ;;  %v12741_v43 = vld [vmem:[#allocation49 + $0x608] sm:$0xff]  ;;  %v12740_v39 = vld [vmem:[#allocation49 + $0x600] sm:$0xff] }
0x3b34   :  { %v16726_v16 = vpack.c.bf16 %v12744_v40, %v12741_v43  ;;  %v13088_v43 = vld [vmem:[#allocation50] sm:$0xff] }
0x3b35   :  { %16641 = vmatpush1.bf16.msra.mxu1 %v16640_v54  ;;  %16681 = vmatpush1.bf16.msra.mxu0 %v16680_v47  ;;  %v12706_v54 = vld [vmem:[#allocation49 + $0x4f0] sm:$0xff]  ;;  %v12709_v47 = vld [vmem:[#allocation49 + $0x508] sm:$0xff] }
0x3b36   :  { %16643 = vmatprep.subr.bf16.mxu1 %v16642_v55  ;;  %16682 = vmatprep.subr.bf16.mxu0 %v20746_v38  ;;  %v16749_v55 = vpack.c.bf16 %v12709_v47, %v12706_v54  ;;  %v12746_v54 = vld [vmem:[#allocation49 + $0x630] sm:$0xff] }
0x3b39   :  { %16645 = vmatpush1.bf16.msra.mxu1 %v16644_v51  ;;  %16684 = vmatpush1.bf16.msra.mxu0 %v16683_v56  ;;  %v12715_v51 = vld [vmem:[#allocation49 + $0x538] sm:$0xff]  ;;  %v16708_v56 = vpack.c.bf16 %v12713_v4, %v12710_v24  ;;  %v12756_v24 = vld [vmem:[#allocation49 + $0x680] sm:$0xff] }
0x3b3a   :  { %16647 = vmatprep.subr.bf16.mxu1 %v16646_v42  ;;  %16685 = vmatprep.subr.bf16.mxu0 %v20746_v38  ;;  %v16752_v57 = vpack.c.bf16 %v12715_v51, %v12712_v32  ;;  %v12717_v42 = vld [vmem:[#allocation49 + $0x548] sm:$0xff]  ;;  %v12752_v51 = vld [vmem:[#allocation49 + $0x660] sm:$0xff] }
0x3b3b   :  { %v16710_v45 = vpack.c.bf16 %v12720_v25, %v12717_v42  ;;  %v12757_v25 = vld [vmem:[#allocation49 + $0x688] sm:$0xff] }
0x3b3d   :  { %16649 = vmatpush1.bf16.msra.mxu1 %v16648_v30  ;;  %16687 = vmatpush1.bf16.msra.mxu0 %v16686_v0  ;;  %v12721_v30 = vld [vmem:[#allocation49 + $0x568] sm:$0xff]  ;;  %v12723_v0 = vld [vmem:[#allocation49 + $0x578] sm:$0xff] }
0x3b3e   :  { %16651 = vmatprep.subr.bf16.mxu1 %v16650_v17  ;;  %16688 = vmatprep.subr.bf16.mxu0 %v20746_v38  ;;  %v16712_v17 = vpack.c.bf16 %v12719_v18, %v12716_v34  ;;  %v16755_v14 = vpack.c.bf16 %v12721_v30, %v12718_v20  ;;  %v16714_v60 = vpack.c.bf16 %v12726_v53, %v12723_v0  ;;  %v12762_v18 = vld [vmem:[#allocation49 + $0x6b0] sm:$0xff]  ;;  %v12761_v0 = vld [vmem:[#allocation49 + $0x6a8] sm:$0xff]  ;;  %v12760_v53 = vld [vmem:[#allocation49 + $0x6a0] sm:$0xff] }
0x3b3f   :  { %v12758_v30 = vld [vmem:[#allocation49 + $0x690] sm:$0xff] }
0x3b41   :  { %16653 = vmatpush1.bf16.msra.mxu1 %v16652_v19  ;;  %16690 = vmatpush1.bf16.msra.mxu0 %v16689_v35  ;;  %v12727_v19 = vld [vmem:[#allocation49 + $0x598] sm:$0xff]  ;;  %v12729_v35 = vld [vmem:[#allocation49 + $0x5a8] sm:$0xff] }
0x3b42   :  { %16655 = vmatprep.subr.bf16.mxu1 %v16654_v22  ;;  %16691 = vmatprep.subr.bf16.mxu0 %v20746_v38  ;;  %v16716_v22 = vpack.c.bf16 %v12725_v33, %v12722_v13  ;;  %v16758_v48 = vpack.c.bf16 %v12727_v19, %v12724_v62  ;;  %v16718_v1 = vpack.c.bf16 %v12732_v37, %v12729_v35 }
0x3b45   :  { %16657 = vmatpush1.bf16.msra.mxu1 %v16656_v59  ;;  %16693 = vmatpush1.bf16.msra.mxu0 %v16692_v8  ;;  %v12731_v59 = vld [vmem:[#allocation49 + $0x5b8] sm:$0xff]  ;;  %v12730_v8 = vld [vmem:[#allocation49 + $0x5b0] sm:$0xff] }
0x3b46   :  { %14123 = vmatprep.subr.msk.mxu1 %vm737_vm3, %v20518_v15  ;;  %16742 = vmatprep.subr.bf16.mxu0 %v20746_v38  ;;  %v16696_v15 = vpack.c.bf16 %v12695_v61, %v12692_v31  ;;  %v16720_v36 = vpack.c.bf16 %v12731_v59, %v12728_v63  ;;  %v12734_v31 = vld [vmem:[#allocation49 + $0x5d0] sm:$0xff]  ;;  %v16722_v61 = vpack.c.bf16 %v12738_v52, %v12735_v7  ;;  %v20775_v59 = vld [vmem:[#allocation95_spill] sm:$0xff] }
0x3b48   :  { %12544 = vmatmul.mubr.f32.vlgmr.msra.gmra.mrb[254].mxu1 %v20548_v6  ;;  %12615 = vmatmul.mubr.f32.vlgmr.msra.gmra.mrb[16].mxu0 %v20548_v6  ;;  %v12708_v6 = vld [vmem:[#allocation49 + $0x500] sm:$0xff] }
0x3b49   :  { %14124 = vmatpush1.msk.msra.mxu1 %vm737_vm3, %v20520_v44  ;;  %12684 = vmatprep.mubr.f32.mxu1 %v20747_v46  ;;  %v12705_v44 = vld [vmem:[#allocation49 + $0x4e8] sm:$0xff] }
0x3b4a   :  { %16695 = vmatprep.subr.bf16.mxu1 %v16694_v41  ;;  %16744 = vmatpush1.bf16.msra.mxu0 %v16743_v21  ;;  %v16702_v12 = vpack.c.bf16 %v12708_v6, %v12705_v44  ;;  %v16761_v41 = vpack.c.bf16 %v12733_v9, %v12730_v8  ;;  %v12737_v21 = vld [vmem:[#allocation49 + $0x5e8] sm:$0xff]  ;;  %v12747_v6 = vld [vmem:[#allocation49 + $0x638] sm:$0xff]  ;;  %v20776_v8 = vsub.s32 2, %v20775_v59  ;;  %v13098_v59 = vld [vmem:[#allocation50 + $0x50] sm:$0xff] }
0x3b4b   :  { %16745 = vmatprep.subr.bf16.mxu0 %v20746_v38  ;;  %v12745_v44 = vld [vmem:[#allocation49 + $0x628] sm:$0xff]  ;;  %v16730_v47 = vpack.c.bf16 %v12750_v10, %v12747_v6 }
0x3b4c   :  { %14125 = vmatmul.mubr.msk.f32.vlgmr.msra.gmra.mrb[0].mxu1 %vm721_vm4, %v20486_v50  ;;  %v16706_v50 = vpack.c.bf16 %v12714_v27, %v12711_v28  ;;  %v12751_v28 = vld [vmem:[#allocation49 + $0x658] sm:$0xff]  ;;  %v12753_v27 = vld [vmem:[#allocation49 + $0x668] sm:$0xff] }
0x3b4d   :  { %16697 = vmatpush1.bf16.msra.mxu1 %v16696_v15  ;;  %v16724_v15 = vpack.c.bf16 %v12737_v21, %v12734_v31  ;;  %v16734_v32 = vpack.c.bf16 %v12756_v24, %v12753_v27  ;;  %v13109_v27 = vld [vmem:[#allocation50 + $0xa8] sm:$0xff] }
0x3b4e   :  { %16699 = vmatprep.subr.bf16.mxu1 %v16698_v2  ;;  %16747 = vmatpush1.bf16.msra.mxu0 %v16746_v49  ;;  %v16764_v2 = vpack.c.bf16 %v12739_v29, %v12736_v26  ;;  %v12743_v49 = vld [vmem:[#allocation49 + $0x618] sm:$0xff]  ;;  %v13104_v26 = vld [vmem:[#allocation50 + $0x80] sm:$0xff]  ;;  %v13105_v29 = vld [vmem:[#allocation50 + $0x88] sm:$0xff] }
0x3b4f   :  { %16748 = vmatprep.subr.bf16.mxu0 %v20746_v38  ;;  %v16778_v6 = vpack.c.bf16 %v13105_v29, %v13104_v26  ;;  %v13101_v29 = vld [vmem:[#allocation50 + $0x68] sm:$0xff] }
0x3b51   :  { %16701 = vmatpush1.bf16.msra.mxu1 %v16700_v58  ;;  %v12742_v58 = vld [vmem:[#allocation49 + $0x610] sm:$0xff] }
0x3b52   :  { %16703 = vmatprep.subr.bf16.mxu1 %v16702_v12  ;;  %16750 = vmatpush1.bf16.msra.mxu0 %v16749_v55  ;;  %v16728_v12 = vpack.c.bf16 %v12743_v49, %v12740_v39  ;;  %v16767_v23 = vpack.c.bf16 %v12745_v44, %v12742_v58  ;;  %v12748_v55 = vld [vmem:[#allocation49 + $0x640] sm:$0xff]  ;;  %v12934_v44 = vld [vmem:[%s20777_s6] sm:$0x3f] }
0x3b53   :  { %16751 = vmatprep.subr.bf16.mxu0 %v20746_v38  ;;  %v16770_v4 = vpack.c.bf16 %v12751_v28, %v12748_v55  ;;  %v13123_v55 = vld [vmem:[#allocation50 + $0x118] sm:$0xff]  ;;  %v13108_v28 = vld [vmem:[#allocation50 + $0xa0] sm:$0xff] }
0x3b55   :  { %16705 = vmatpush1.bf16.msra.mxu1 %v16704_v11  ;;  %v12749_v11 = vld [vmem:[#allocation49 + $0x648] sm:$0xff] }
0x3b56   :  { %16707 = vmatprep.subr.bf16.mxu1 %v16706_v50  ;;  %16753 = vmatpush1.bf16.msra.mxu0 %v16752_v57  ;;  %v16732_v50 = vpack.c.bf16 %v12749_v11, %v12746_v54  ;;  %v12754_v57 = vld [vmem:[#allocation49 + $0x670] sm:$0xff] }
0x3b57   :  { %16754 = vmatprep.subr.bf16.mxu0 %v20746_v38  ;;  %v16773_v34 = vpack.c.bf16 %v12757_v25, %v12754_v57  ;;  %v13122_v11 = vld [vmem:[#allocation50 + $0x110] sm:$0xff]  ;;  %v13125_v57 = vld [vmem:[#allocation50 + $0x128] sm:$0xff]  ;;  %v13111_v25 = vld [vmem:[#allocation50 + $0xb8] sm:$0xff] }
0x3b59   :  { %16709 = vmatpush1.bf16.msra.mxu1 %v16708_v56  ;;  %v12755_v56 = vld [vmem:[#allocation49 + $0x678] sm:$0xff] }
0x3b5a   :  { %16711 = vmatprep.subr.bf16.mxu1 %v16710_v45  ;;  %16756 = vmatpush1.bf16.msra.mxu0 %v16755_v14  ;;  %v16736_v42 = vpack.c.bf16 %v12755_v56, %v12752_v51  ;;  %v12759_v45 = vld [vmem:[#allocation49 + $0x698] sm:$0xff]  ;;  %v13093_v51 = vld [vmem:[#allocation50 + $0x28] sm:$0xff]  ;;  %v13124_v56 = vld [vmem:[#allocation50 + $0x120] sm:$0xff] }
0x3b5b   :  { %16757 = vmatprep.subr.bf16.mxu0 %v20746_v38  ;;  %v16738_v20 = vpack.c.bf16 %v12762_v18, %v12759_v45  ;;  %v12763_v14 = vld [vmem:[#allocation49 + $0x6b8] sm:$0xff]  ;;  %v16817_v45 = vpack.c.bf16 %v13125_v57, %v13124_v56  ;;  %v13094_v18 = vld [vmem:[#allocation50 + $0x30] sm:$0xff] }
0x3b5c   :  { %v16776_v13 = vpack.c.bf16 %v12763_v14, %v12760_v53  ;;  %v13127_v53 = vld [vmem:[#allocation50 + $0x138] sm:$0xff]  ;;  %v13113_v14 = vld [vmem:[#allocation50 + $0xc8] sm:$0xff]  ;;  %v13276_v57 = vld [vmem:[%s18352_s4] sm:$0x7] }
0x3b5d   :  { %16713 = vmatpush1.bf16.msra.mxu1 %v16712_v17  ;;  %v16740_v17 = vpack.c.bf16 %v12761_v0, %v12758_v30  ;;  %v13095_v30 = vld [vmem:[#allocation50 + $0x38] sm:$0xff]  ;;  %v13126_v0 = vld [vmem:[#allocation50 + $0x130] sm:$0xff] }
0x3b5e   :  { %16715 = vmatprep.subr.bf16.mxu1 %v16714_v60  ;;  %16759 = vmatpush1.bf16.msra.mxu0 %v16758_v48  ;;  %v12911_v48 = vld [vmem:[%s20774_s19] sm:$0x7] }
0x3b5f   :  { %16760 = vmatprep.subr.bf16.mxu0 %v20746_v38  ;;  %v12916_v63 = vrot.slane %v12911_v48, %v20772_v3  ;;  %v12924_v9 = vrot.slane %v12911_v48, %v20776_v8  ;;  %v13121_v3 = vld [vmem:[#allocation50 + $0x108] sm:$0xff] }
0x3b61   :  { %16717 = vmatpush1.bf16.msra.mxu1 %v16716_v22 }
0x3b62   :  { %16719 = vmatprep.subr.bf16.mxu1 %v16718_v1  ;;  %16762 = vmatpush1.bf16.msra.mxu0 %v16761_v41  ;;  %v12920_v1 = vrot.slane %v12911_v48, %v20773_v5  ;;  %v13106_v5 = vld [vmem:[#allocation50 + $0x90] sm:$0xff]  ;;  %v13115_v48 = vld [vmem:[#allocation50 + $0xd8] sm:$0xff] }
0x3b63   :  { %16763 = vmatprep.subr.bf16.mxu0 %v20746_v38 }
0x3b65   :  { %16721 = vmatpush1.bf16.msra.mxu1 %v16720_v36 }
0x3b66   :  { %16723 = vmatprep.subr.bf16.mxu1 %v16722_v61  ;;  %16765 = vmatpush1.bf16.msra.mxu0 %v16764_v2  ;;  %v13120_v2 = vld [vmem:[#allocation50 + $0x100] sm:$0xff] }
0x3b67   :  { %16766 = vmatprep.subr.bf16.mxu0 %v20746_v38 }
0x3b69   :  { %16725 = vmatpush1.bf16.msra.mxu1 %v16724_v15  ;;  %v13089_v15 = vld [vmem:[#allocation50 + $0x8] sm:$0xff] }
0x3b6a   :  { %16727 = vmatprep.subr.bf16.mxu1 %v16726_v16  ;;  %16768 = vmatpush1.bf16.msra.mxu0 %v16767_v23  ;;  %v13107_v16 = vld [vmem:[#allocation50 + $0x98] sm:$0xff]  ;;  %v16780_v10 = vpack.c.bf16 %v13089_v15, %v13088_v43  ;;  %v13090_v23 = vld [vmem:[#allocation50 + $0x10] sm:$0xff]  ;;  %v13132_v43 = vld [vmem:[#allocation50 + $0x160] sm:$0xff] }
0x3b6b   :  { %16769 = vmatprep.subr.bf16.mxu0 %v20746_v38  ;;  %v16782_v54 = vpack.c.bf16 %v13107_v16, %v13106_v5  ;;  %v13118_v15 = vld [vmem:[#allocation50 + $0xf0] sm:$0xff] }
0x3b6c   :  { %v13102_v16 = vld [vmem:[#allocation50 + $0x70] sm:$0xff] }
0x3b6d   :  { %16729 = vmatpush1.bf16.msra.mxu1 %v16728_v12  ;;  %v16811_v12 = vpack.c.bf16 %v13121_v3, %v13120_v2  ;;  %v13119_v2 = vld [vmem:[#allocation50 + $0xf8] sm:$0xff] }
0x3b6e   :  { %16731 = vmatprep.subr.bf16.mxu1 %v16730_v47  ;;  %16771 = vmatpush1.bf16.msra.mxu0 %v16770_v4  ;;  %v13091_v47 = vld [vmem:[#allocation50 + $0x18] sm:$0xff]  ;;  %v13092_v4 = vld [vmem:[#allocation50 + $0x20] sm:$0xff]  ;;  %v16806_v5 = vpack.c.bf16 %v13119_v2, %v13118_v15 }
0x3b6f   :  { %16772 = vmatprep.subr.bf16.mxu0 %v20746_v38  ;;  %v16784_v24 = vpack.c.bf16 %v13091_v47, %v13090_v23 }
0x3b71   :  { %16733 = vmatpush1.bf16.msra.mxu1 %v16732_v50  ;;  %v16814_v50 = vpack.c.bf16 %v13123_v55, %v13122_v11 }
0x3b72   :  { %16735 = vmatprep.subr.bf16.mxu1 %v16734_v32  ;;  %16774 = vmatpush1.bf16.msra.mxu0 %v16773_v34  ;;  %v16786_v32 = vpack.c.bf16 %v13109_v27, %v13108_v28  ;;  %v16788_v34 = vpack.c.bf16 %v13093_v51, %v13092_v4  ;;  %v13446_v4 = vld [vmem:[#allocation52 + $0x88] sm:$0xff] }
0x3b73   :  { %16775 = vmatprep.subr.bf16.mxu0 %v20746_v38  ;;  %v13354_v51 = vld [vmem:[#allocation52 + $0x8] sm:$0xff] }
0x3b75   :  { %16737 = vmatpush1.bf16.msra.mxu1 %v16736_v42  ;;  %v13110_v42 = vld [vmem:[#allocation50 + $0xb0] sm:$0xff] }
0x3b76   :  { %16739 = vmatprep.subr.bf16.mxu1 %v16738_v20  ;;  %16777 = vmatpush1.bf16.msra.mxu0 %v16776_v13  ;;  %v16790_v20 = vpack.c.bf16 %v13111_v25, %v13110_v42  ;;  %v16792_v13 = vpack.c.bf16 %v13095_v30, %v13094_v18  ;;  %v14135_v42 = vld [vmem:[%s18352_s4 + $0x4] sm:$0x7]  ;;  %s18158_s4 = smov [#allocation53]  }
0x3b77   :  { %v13448_v18 = vld [vmem:[#allocation52 + $0x98] sm:$0xff] }
0x3b78   :  { %v13356_v30 = vld [vmem:[#allocation52 + $0x18] sm:$0xff] }
0x3b79   :  { %16741 = vmatpush1.bf16.msra.mxu1 %v16740_v17  ;;  %v13112_v17 = vld [vmem:[#allocation50 + $0xc0] sm:$0xff] }
0x3b7a   :  { %16062 = vmatprep.subr.mxu1 %v20747_v46 }
0x3beb   :  { %v12472_v60 = vpop.f32.mrb[14].mxu0 }
0x3bec   :  { %v12474_v33 = vpop.f32.mrb[15].mxu0 }
0x3bed   :  { %v13096_v33 = vld [vmem:[#allocation50 + $0x40] sm:$0xff] }
0x3c1b   :  { %v12616_v62 = vpop.f32.mrb[16].mxu0 }
0x3c1c   :  { %v12617_v19 = vadd.f32 %v12616_v62, %v12472_v60  ;;  %v12618_v35 = vpop.f32.mrb[17].mxu0  ;;  %v16820_v60 = vpack.c.bf16 %v13127_v53, %v13126_v0  ;;  %v16794_v62 = vpack.c.bf16 %v13113_v14, %v13112_v17  ;;  %v13449_v17 = vld [vmem:[#allocation52 + $0xa0] sm:$0xff]  ;;  %v13450_v14 = vld [vmem:[#allocation52 + $0xa8] sm:$0xff] }
0x3c1d   :  { %v13128_v35 = vld [vmem:[#allocation50 + $0x140] sm:$0xff] }
0x3c1f   :  { %v12686_v37 = vpop.f32.mrb[0].mxu1 }
0x3c20   :  { %v12688_v22 = vpop.f32.mrb[1].mxu1 }
0x3c21   :  { %14126 = vmatprep.mubr.msk.f32.mxu1 %vm3568_vm10, %v12688_v22  ;;  %14127 = vmatprep.mubr.msk.f32.mxu0 %vm3568_vm10, %v12688_v22  ;;  %v13114_v22 = vld [vmem:[#allocation50 + $0xd0] sm:$0xff] }
0x3c22   :  { %12832 = vmatmul.mubr.f32.vlgmr.msra.gmra.mrb[254].mxu1 %v12686_v37  ;;  %12903 = vmatmul.mubr.f32.vlgmr.msra.gmra.mrb[18].mxu0 %v12686_v37  ;;  %v13129_v37 = vld [vmem:[#allocation50 + $0x148] sm:$0xff]  ;;  %v16798_v8 = vpack.c.bf16 %v13115_v48, %v13114_v22  ;;  %v13360_v22 = vld [vmem:[#allocation52 + $0x38] sm:$0xff] }
0x3c23   :  { %13011 = vmatprep.mubr.f32.mxu0 %v20747_v46  ;;  %16064 = vmatprep.mubr.msk.f32.mxu1 %vm18144_vm0, %v20747_v46 }
0x3cf5   :  { %v12833_v7 = vpop.f32.mrb[254].mxu1  ;;  %v12904_v52 = vpop.f32.mrb[18].mxu0 }
0x3cf6   :  { %v12928_v36 = vadd.f32 %v12916_v63, %v12833_v7  ;;  %v12910_v41 = vadd.f32 %v12904_v52, %v12617_v19  ;;  %v12835_v31 = vpop.f32.mrb[255].mxu1  ;;  %v12906_v61 = vpop.f32.mrb[19].mxu0  ;;  %v13097_v19 = vld [vmem:[#allocation50 + $0x48] sm:$0xff]  ;;  %v13130_v7 = vld [vmem:[#allocation50 + $0x150] sm:$0xff]  ;;  %v13131_v52 = vld [vmem:[#allocation50 + $0x158] sm:$0xff] }
0x3cf7   :  { %v12929_v21 = vadd.f32 %v12920_v1, %v12835_v31  ;;  %v16796_v63 = vpack.c.bf16 %v13097_v19, %v13096_v33  ;;  %v16823_v1 = vpack.c.bf16 %v13129_v37, %v13128_v35  ;;  %v16826_v61 = vpack.c.bf16 %v13131_v52, %v13130_v7  ;;  %v13451_v19 = vld [vmem:[#allocation52 + $0xb0] sm:$0xff]  ;;  %v13452_v35 = vld [vmem:[#allocation52 + $0xb8] sm:$0xff] }
0x3cf8   :  { %v12930_v40 = vadd.f32 %v12924_v9, %v12910_v41  ;;  %v12931_v49 = vmax.f32 %v12928_v36, 0.0  ;;  %v13099_v9 = vld [vmem:[#allocation50 + $0x58] sm:$0xff]  ;;  %v13116_v36 = vld [vmem:[#allocation50 + $0xe0] sm:$0xff]  ;;  %v13117_v41 = vld [vmem:[#allocation50 + $0xe8] sm:$0xff]  ;;  %v16841_v33 = vpack.c.bf16 %v13450_v14, %v13449_v17  ;;  %v16844_v48 = vpack.c.bf16 %v13452_v35, %v13451_v19 }
0x3cf9   :  { %v12932_v39 = vmax.f32 %v12929_v21, 0.0  ;;  %v16800_v31 = vpack.c.bf16 %v13099_v9, %v13098_v59  ;;  %v13100_v21 = vld [vmem:[#allocation50 + $0x60] sm:$0xff]  ;;  %v16802_v26 = vpack.c.bf16 %v13117_v41, %v13116_v36  ;;  %v13359_v37 = vld [vmem:[#allocation52 + $0x30] sm:$0xff]  ;;  %v13456_v36 = vld [vmem:[#allocation52 + $0xd8] sm:$0xff] }
0x3cfa   :  { %v12933_v58 = vmax.f32 %v12930_v40, 0.0  ;;  %v13133_v40 = vld [vmem:[#allocation50 + $0x168] sm:$0xff]  ;;  %v16804_v3 = vpack.c.bf16 %v13101_v29, %v13100_v21  ;;  %v13361_v59 = vld [vmem:[#allocation52 + $0x40] sm:$0xff]  ;;  %v13455_v52 = vld [vmem:[#allocation52 + $0xd0] sm:$0xff] }
0x3cfb   :  { %14128 = vmatprep.subr.msk.mxu0 %vm737_vm3, %v12932_v39  ;;  %v16829_v39 = vpack.c.bf16 %v13133_v40, %v13132_v43  ;;  %v13363_v41 = vld [vmem:[#allocation52 + $0x50] sm:$0xff]  ;;  %v13458_v29 = vld [vmem:[#allocation52 + $0xe8] sm:$0xff]  ;;  %v13365_v43 = vld [vmem:[#allocation52 + $0x60] sm:$0xff] }
0x3cfc   :  { %14129 = vmatpush1.msk.msra.mxu0 %vm737_vm3, %v12931_v49  ;;  %16063 = vmatpush3.msk.msra.mxu1 %vm737_vm3, %v12933_v58  ;;  %v13103_v49 = vld [vmem:[#allocation50 + $0x78] sm:$0xff]  ;;  %v13366_v40 = vld [vmem:[#allocation52 + $0x68] sm:$0xff] }
0x3cfd   :  { %14130 = vmatmul.mubr.msk.f32.vlgmr.msra.gmra.mrb[20].mxu0 %vm721_vm4, %v12934_v44  ;;  %16065 = vmatmul.mubr.msk.f32.vlgmr.msra.gmra.mrb[2].mxu1 %vm721_vm4, %v12934_v44  ;;  %v16808_v58 = vpack.c.bf16 %v13103_v49, %v13102_v16  ;;  %v13134_v44 = vld [vmem:[#allocation50 + $0x170] sm:$0xff]  ;;  %v16877_v2 = vpack.c.bf16 %v13366_v40, %v13365_v43  ;;  %v13368_v16 = vld [vmem:[#allocation52 + $0x78] sm:$0xff] }
0x3cfe   :  { %16779 = vmatprep.subr.bf16.mxu0 %v16778_v6  ;;  %16810 = vmatprep.subr.bf16.mxu1 %v20746_v38  ;;  %v13135_v6 = vld [vmem:[#allocation50 + $0x178] sm:$0xff] }
0x3cff   :  { %16781 = vmatpush3.bf16.msra.mxu0 %v16780_v10  ;;  %16812 = vmatpush3.bf16.msra.mxu1 %v16811_v12  ;;  %v16832_v10 = vpack.c.bf16 %v13135_v6, %v13134_v44 }
0x3d00   :  { %16783 = vmatprep.subr.bf16.mxu0 %v16782_v54  ;;  %16813 = vmatprep.subr.bf16.mxu1 %v20746_v38 }
0x3d01   :  { %16099 = vmatprep.mubr.msk.f32.mxu1 %vm18144_vm0, %v20747_v46 }
0x3d03   :  { %16785 = vmatpush3.bf16.msra.mxu0 %v16784_v24  ;;  %16815 = vmatpush3.bf16.msra.mxu1 %v16814_v50  ;;  %v13445_v24 = vld [vmem:[#allocation52 + $0x80] sm:$0xff] }
0x3d04   :  { %16787 = vmatprep.subr.bf16.mxu0 %v16786_v32  ;;  %16816 = vmatprep.subr.bf16.mxu1 %v20746_v38  ;;  %v13353_v32 = vld [vmem:[#allocation52] sm:$0xff]  ;;  %v16835_v25 = vpack.c.bf16 %v13446_v4, %v13445_v24 }
0x3d07   :  { %16789 = vmatpush3.bf16.msra.mxu0 %v16788_v34  ;;  %16818 = vmatpush3.bf16.msra.mxu1 %v16817_v45  ;;  %v16859_v34 = vpack.c.bf16 %v13354_v51, %v13353_v32  ;;  %v13447_v45 = vld [vmem:[#allocation52 + $0x90] sm:$0xff] }
0x3d08   :  { %16791 = vmatprep.subr.bf16.mxu0 %v16790_v20  ;;  %16819 = vmatprep.subr.bf16.mxu1 %v20746_v38  ;;  %v13355_v20 = vld [vmem:[#allocation52 + $0x10] sm:$0xff]  ;;  %v16838_v0 = vpack.c.bf16 %v13448_v18, %v13447_v45 }
0x3d09   :  { %v16862_v53 = vpack.c.bf16 %v13356_v30, %v13355_v20 }
0x3d0b   :  { %16793 = vmatpush3.bf16.msra.mxu0 %v16792_v13  ;;  %16821 = vmatpush3.bf16.msra.mxu1 %v16820_v60  ;;  %v13357_v13 = vld [vmem:[#allocation52 + $0x20] sm:$0xff]  ;;  %v13358_v60 = vld [vmem:[#allocation52 + $0x28] sm:$0xff] }
0x3d0c   :  { %16795 = vmatprep.subr.bf16.mxu0 %v16794_v62  ;;  %16822 = vmatprep.subr.bf16.mxu1 %v20746_v38  ;;  %v16865_v62 = vpack.c.bf16 %v13358_v60, %v13357_v13 }
0x3d0f   :  { %16797 = vmatpush3.bf16.msra.mxu0 %v16796_v63  ;;  %16824 = vmatpush3.bf16.msra.mxu1 %v16823_v1  ;;  %v16868_v63 = vpack.c.bf16 %v13360_v22, %v13359_v37  ;;  %v13453_v1 = vld [vmem:[#allocation52 + $0xc0] sm:$0xff] }
0x3d10   :  { %16799 = vmatprep.subr.bf16.mxu0 %v16798_v8  ;;  %16825 = vmatprep.subr.bf16.mxu1 %v20746_v38  ;;  %v13362_v8 = vld [vmem:[#allocation52 + $0x48] sm:$0xff] }
0x3d11   :  { %v16871_v7 = vpack.c.bf16 %v13362_v8, %v13361_v59 }
0x3d13   :  { %16801 = vmatpush3.bf16.msra.mxu0 %v16800_v31  ;;  %16827 = vmatpush3.bf16.msra.mxu1 %v16826_v61  ;;  %v13364_v31 = vld [vmem:[#allocation52 + $0x58] sm:$0xff]  ;;  %v16850_v61 = vpack.c.bf16 %v13456_v36, %v13455_v52 }
0x3d14   :  { %16803 = vmatprep.subr.bf16.mxu0 %v16802_v26  ;;  %16828 = vmatprep.subr.bf16.mxu1 %v20746_v38  ;;  %v16874_v21 = vpack.c.bf16 %v13364_v31, %v13363_v41  ;;  %v13457_v26 = vld [vmem:[#allocation52 + $0xe0] sm:$0xff] }
0x3d15   :  { %v16853_v15 = vpack.c.bf16 %v13458_v29, %v13457_v26 }
0x3d17   :  { %16805 = vmatpush3.bf16.msra.mxu0 %v16804_v3  ;;  %16830 = vmatpush3.bf16.msra.mxu1 %v16829_v39  ;;  %v13459_v3 = vld [vmem:[#allocation52 + $0xf0] sm:$0xff]  ;;  %v13460_v39 = vld [vmem:[#allocation52 + $0xf8] sm:$0xff] }
0x3d18   :  { %16807 = vmatprep.subr.bf16.mxu0 %v16806_v5  ;;  %16831 = vmatprep.subr.bf16.mxu1 %v20746_v38  ;;  %v13367_v5 = vld [vmem:[#allocation52 + $0x70] sm:$0xff]  ;;  %v16856_v49 = vpack.c.bf16 %v13460_v39, %v13459_v3 }
0x3d1b   :  { %16809 = vmatpush3.bf16.msra.mxu0 %v16808_v58  ;;  %16833 = vmatpush3.bf16.msra.mxu1 %v16832_v10  ;;  %v16880_v58 = vpack.c.bf16 %v13368_v16, %v13367_v5 }
0x3d1c   :  { %16102 = vmatprep.subr.mxu0 %v20747_v46  ;;  %16107 = vmatprep.subr.mxu1 %v20747_v46 }
0x3dd0   :  { %v13013_v12 = vpop.f32.mrb[20].mxu0  ;;  %v13084_v23 = vpop.f32.mrb[2].mxu1 }
0x3dd1   :  { %v13015_v54 = vpop.f32.mrb[21].mxu0  ;;  %16100 = vmatmul.mubr.f32.vlgmr.msra.gmra.mrb[4].mxu1 %v13084_v23  ;;  %v16066_v47 = vpop.f32.mrb[3].mxu1 }
0x3dd2   :  { %13200 = vmatprep.mubr.f32.mxu0 %v13015_v54  ;;  %16109 = vmatprep.mubr.msk.f32.mxu1 %vm18144_vm0, %v20747_v46  ;;  %v14138_v47 = vld [vmem:[%s18362_s20] ss:$0 sm:$0xff]  ;;  %s13628_s20 = sshll.u32 %s18158_s4, 4  ;;  %s13629_s20 = int_to_ptr.vmem [resolvable:$true] %s13628_s20 }
0x3dd3   :  { %13201 = vmatmul.mubr.f32.vlgmr.msra.gmra.mrb[22].mxu0 %v13013_v12  ;;  %s17998_s2 = scalar_lea.vmem %s13629_s20, 64  ;;  %p18003_p13 = scmp.lt.s32.totalorder %s13629_s20, %s13629_s20 }
0x3dd4   :  { %16104 = vmatprep.mubr.msk.f32.mxu0 %vm18144_vm0, %v20747_v46  ;;  %p17999_p12 = scmp.ne.s32.totalorder %s13629_s20, %s17998_s2  ;;  %p18004_p0 = scmp.lt.s32.totalorder %s17998_s2, %s17998_s2 }
0x3dd6   :  { %p18005_p1 = por %p18004_p0, %p18003_p13 }
0x3dd8   :  { %p18006_p2 = pnand %p18005_p1, %p17999_p12 }
0x3ea4   :  { %v13272_v11 = vpop.f32.mrb[4].mxu1 }
0x3ea5   :  { %v16101_v55 = vpop.f32.mrb[5].mxu1 }
0x3ea6   :  { %v14707_v28 = vpop.f32.mrb[22].mxu0 }
0x3ea7   :  { %v14708_v27 = vpop.f32.mrb[23].mxu0 }
0x3ea8   :  { %v14709_v50 = vadd.f32 %v14708_v27, %v14707_v28 }
0x3eaa   :  { %v13273_v56 = vadd.f32 %v14709_v50, %v13272_v11 }
0x3eac   :  { %16103 = vmatpush3.msk.msra.mxu0 %vm737_vm3, %v13273_v56  ;;  %16108 = vmatpush3.msk.msra.mxu1 %vm737_vm3, %v13273_v56 }
0x3ead   :  { %16105 = vmatmul.mubr.msk.f32.vlgmr.msra.gmra.mrb[24].mxu0 %vm721_vm4, %v13276_v57  ;;  %16110 = vmatmul.mubr.msk.f32.vlgmr.msra.gmra.mrb[6].mxu1 %vm721_vm4, %v14135_v42 }
0x3eae   :  { %16834 = vmatprep.subr.bf16.mxu0 %v20746_v38  ;;  %16858 = vmatprep.subr.bf16.mxu1 %v20746_v38 }
0x3eaf   :  { %16836 = vmatpush3.bf16.msra.mxu0 %v16835_v25  ;;  %16860 = vmatpush3.bf16.msra.mxu1 %v16859_v34 }
0x3eb0   :  { %16837 = vmatprep.subr.bf16.mxu0 %v20746_v38  ;;  %16861 = vmatprep.subr.bf16.mxu1 %v20746_v38 }
0x3eb1   :  { %16144 = vmatprep.mubr.msk.f32.mxu0 %vm18144_vm0, %v20747_v46  ;;  %16179 = vmatprep.mubr.msk.f32.mxu1 %vm18144_vm0, %v20747_v46  ;;  %v13454_v46 = vld [vmem:[#allocation52 + $0xc8] sm:$0xff]  ;;  %vm13609_vm0 = vcmask 26624  }
0x3eb2   :  { %v16847_v9 = vpack.c.bf16 %v13454_v46, %v13453_v1 }
0x3eb3   :  { %16839 = vmatpush3.bf16.msra.mxu0 %v16838_v0  ;;  %16863 = vmatpush3.bf16.msra.mxu1 %v16862_v53 }
0x3eb4   :  { %16840 = vmatprep.subr.bf16.mxu0 %v20746_v38  ;;  %16864 = vmatprep.subr.bf16.mxu1 %v20746_v38 }
0x3eb7   :  { %16842 = vmatpush3.bf16.msra.mxu0 %v16841_v33  ;;  %16866 = vmatpush3.bf16.msra.mxu1 %v16865_v62 }
0x3eb8   :  { %16843 = vmatprep.subr.bf16.mxu0 %v20746_v38  ;;  %16867 = vmatprep.subr.bf16.mxu1 %v20746_v38 }
0x3ebb   :  { %16845 = vmatpush3.bf16.msra.mxu0 %v16844_v48  ;;  %16869 = vmatpush3.bf16.msra.mxu1 %v16868_v63 }
0x3ebc   :  { %16846 = vmatprep.subr.bf16.mxu0 %v20746_v38  ;;  %16870 = vmatprep.subr.bf16.mxu1 %v20746_v38 }
0x3ebf   :  { %16848 = vmatpush3.bf16.msra.mxu0 %v16847_v9  ;;  %16872 = vmatpush3.bf16.msra.mxu1 %v16871_v7 }
0x3ec0   :  { %16849 = vmatprep.subr.bf16.mxu0 %v20746_v38  ;;  %16873 = vmatprep.subr.bf16.mxu1 %v20746_v38 }
0x3ec3   :  { %16851 = vmatpush3.bf16.msra.mxu0 %v16850_v61  ;;  %16875 = vmatpush3.bf16.msra.mxu1 %v16874_v21 }
0x3ec4   :  { %16852 = vmatprep.subr.bf16.mxu0 %v20746_v38  ;;  %16876 = vmatprep.subr.bf16.mxu1 %v20746_v38 }
0x3ec7   :  { %16854 = vmatpush3.bf16.msra.mxu0 %v16853_v15  ;;  %16878 = vmatpush3.bf16.msra.mxu1 %v16877_v2 }
0x3ec8   :  { %16855 = vmatprep.subr.bf16.mxu0 %v20746_v38  ;;  %16879 = vmatprep.subr.bf16.mxu1 %v20746_v38 }
0x3ecb   :  { %16857 = vmatpush3.bf16.msra.mxu0 %v16856_v49  ;;  %16881 = vmatpush3.bf16.msra.mxu1 %v16880_v58 }
0x3f80   :  { %v13349_v44 = vpop.f32.mrb[24].mxu0  ;;  %v13440_v6 = vpop.f32.mrb[6].mxu1 }
0x3f81   :  { %16145 = vmatmul.mubr.f32.vlgmr.msra.gmra.mrb[26].mxu0 %v13440_v6  ;;  %16180 = vmatmul.mubr.f32.vlgmr.msra.gmra.mrb[8].mxu1 %v13349_v44  ;;  %v16106_v10 = vpop.f32.mrb[25].mxu0  ;;  %v16111_v12 = vpop.f32.mrb[7].mxu1 }
0x4054   :  { %v13527_v23 = vpop.f32.mrb[26].mxu0  ;;  %v13597_v54 = vpop.f32.mrb[8].mxu1 }
0x4055   :  { %v13598_v11 = vadd.f32 %v13597_v54, %v13527_v23  ;;  %v16146_v55 = vpop.f32.mrb[27].mxu0  ;;  %v16181_v28 = vpop.f32.mrb[9].mxu1 }
0x4057   :  { %v13608_v27 = vadd.f32 %v14138_v47, %v13598_v11 }
0x4059   :  { %v13610_v24 = vsel %vm13609_vm0, %v13608_v27, -inf }
0x405a   :  { %13611 = vmax.xlane.f32.xlu1 %v13610_v24 }
0x40e7   :  { %v13612_v38 = vpop.xlane.xlu1 %13611 }
0x40e8   :  { %v13613_v50 = vsub.f32 %v13608_v27, %v13612_v38 }
0x40ea   :  { %v13614_v4 = vmul.f32 1.442695, %v13613_v50 }
0x40ec   :  { %17209 = vpow2.f32 %v13614_v4 }
0x40f6   :  { %v17210_v32 = vpop.eup %17209 }
0x40f7   :  { %v13616_v51 = vsel %vm13609_vm0, %v17210_v32, 0.0 }
0x40f8   :  { %13617 = vadd.xlane.f32.xlu0 %v13616_v51 }
0x4185   :  { %v13618_v56 = vpop.xlane.xlu0 %13617 }
0x4186   :  { %17211 = vrcp.f32 %v13618_v56 }
0x4190   :  { %v17212_v57 = vpop.eup %17211 }
0x4191   :  { %v13620_v42 = vmul.f32 %v17212_v57, %v17210_v32 }
0x4193   :  { %13621 = vst.msk [vmem:[#allocation53] sm:$0x7] %vm13609_vm0, %v13620_v42 }
0x4194   :  { %18009 = shalt.err (!%p18006_p2)
}
0x4195   :  { %s18010_s7 = scalar_lea.hbm %s18367_s9, 64 }
0x4196   :  { %p18011_p3 = scmp.ne.s32.totalorder %s18367_s9, %s18010_s7  ;;  %p18014_p4 = scmp.lt.u32.totalorder %s18010_s7, %s18367_s9 }
0x4198   :  { %p18016_p5 = pnand %p18014_p4, %p18011_p3 }
0x419a   :  { %18019 = shalt.err (!%p18016_p5)
}
0x419b   :  { %13631 = dma.vmem_to_hbm [thread:$0]  %s13629_s20, 64, %s18367_s9, [#allocation4]  }
0x419c   :  { %18054 = dma.done.wait [#allocation4], 64  }
0x419d   :  { %18055 = vsyncadd [#allocation4], 4294967232 }
0x419e   :  { %13635 = vsyncpa [#allocation3], 1 }
0x419f   :  { %13636 = vsyncpa [#allocation6], 1 }
0x41a0   :  { %13637 = vsyncpa [#allocation9], 1 }
0x41a1   :  { %13638 = vsyncpa [#allocation12], 1 }
0x41a2   :  { %13639 = vsyncpa [#allocation15], 1 }
0x41a3   :  { %13640 = vsyncpa [#allocation18], 1 }
0x41a4   :  { %13641 = vsyncpa [#allocation21], 1 }
0x41a5   :  { %13642 = vsyncpa [#allocation24], 1 }
0x41a6   :  { %13643 = vsyncpa [#allocation27], 1 }
0x41a7   :  { %13644 = vsyncpa [#allocation30], 1 }
0x41a8   :  { %13645 = vsyncpa [#allocation33], 1 }
0x41a9   :  { %13646 = vsyncpa [#allocation36], 1 }
0x41aa   :  { %13647 = vsyncpa [#allocation39], 1 }
0x41ab   :  { %13648 = vsyncpa [#allocation42], 1 }
0x41ac   :  { %13649 = vsyncpa [#allocation45], 1 }
0x41ad   :  { %13650 = vsyncpa [#allocation48], 1 }
0x41ae   :  { %13651 = vsyncpa [#allocation51], 1 }
0x41af   :  { %13652 = vsyncpa [#allocation4], 1 }

</bundles_post_ra>
